<compile_context>
chip_gen: v7x
topology: tpu7x:2x2x1
jax: 0.10.0
libtpu: 0.0.40
codegen_flags: <defaults>
</compile_context>

<pallas_src>
import functools

import jax
import jax.numpy as jnp
import numpy as np
from jax.experimental import pallas as pl
from jax.experimental.pallas import tpu as pltpu

LANE = 128     # hidden / head widths padded to the TPU lane count
SUBLANE = 8    # batch padded to the f32 sublane count -> full (8,128) tiles


# ----------------------------------------------------------------------------
# Fused Seq2seq kernel
# ----------------------------------------------------------------------------
def seq2seq_kernel(x_ref, wi_ref, wh_ref, b_ref, wout_ref, bout_ref,
                   out_ref, hn_ref, *, S, Bp, L, Hp):
    """Fused encoder GRU stack -> decoder GRU stack -> Linear head.

    Inputs (pre-padded / pre-packed by the wrapper):
      x_ref    (S*Bp, 1)      time-major scalar input, batch padded to Bp
      wi_ref   (2L, Hp, 3Hp)  input->gate weights  [enc layers..., dec layers...]
                              (layer 0: its single input row pre-broadcast over
                               the first Bp sublanes, remaining rows zero)
      wh_ref   (2L, Hp, 3Hp)  hidden->gate weights
      b_ref    (2L, Bp, 4Hp)  [:, :, :3Hp] = b_ih (+ b_hh folded for r,z gates)
                              [:, :, 3Hp:] = b_hh of the n gate (scaled by r),
                              pre-broadcast over the Bp sublanes
      wout_ref (Hp, Op), bout_ref (1, Op)  Linear head
    Outputs:
      out_ref  (S*Bp, Op)  head output over the decoder sequence (lane dense)
      hn_ref   (L*Bp, Hp)  encoder final hidden states (lane dense)
    """
    x_flat = x_ref[...]                                   # (S*Bp, 1)

    def gru_cell(gi, gh, h, b_hn):
        # fused r/z gates: one sigmoid over 2*Hp lanes, lane-aligned slices
        rz = jax.nn.sigmoid(gi[:, :2 * Hp] + gh[:, :2 * Hp])
        r = rz[:, :Hp]
        z = rz[:, Hp:]
        n = jnp.tanh(gi[:, 2 * Hp:] + r * (gh[:, 2 * Hp:] + b_hn))
        return (1.0 - z) * n + z * h

    def gru_stack(stack, h0s):
        # hoist weight loads and bias slices out of the recurrence
        w_i, w_h, gi_b, b_hn = [], [], [], []
        for l in range(L):
            idx = stack * L + l
            wi_full = wi_ref[idx]                         # (Hp, 3Hp)
            # layer 0 input is scalar -> only the pre-broadcast Bp rows used
            w_i.append(wi_full[:Bp, :] if l == 0 else wi_full)
            w_h.append(wh_ref[idx])                       # (Hp, 3Hp)
            b = b_ref[idx]                                # (Bp, 4Hp)
            gi_b.append(b[:, :3 * Hp])
            b_hn.append(b[:, 3 * Hp:])

        hs = list(h0s)                                    # (Bp, Hp) per layer
        outs = [[None] * S for _ in range(L)]
        # Wavefront over (layer, time): at wave w, layer l runs step t = w - l.
        # Layer l step t depends only on layer l-1 step t (ready one wave
        # earlier, via a per-step ih matmul that sits off this layer's
        # recurrence chain) and on layer l step t-1 -> the L recurrence chains
        # overlap and hide each other's MXU/EUP latency.  All per-step values
        # stay in registers; no VMEM round trip, no sub-tile stores.
        for w in range(S + L - 1):
            for l in range(L):
                t = w - l
                if t < 0 or t >= S:
                    continue
                if l == 0:
                    # scalar input: pure VPU broadcast-multiply, off the chain
                    x_t = x_flat[t * Bp:(t + 1) * Bp, :]  # (Bp, 1)
                    gi = x_t * w_i[0] + gi_b[0]
                else:
                    gi = jnp.dot(outs[l - 1][t], w_i[l],
                                 preferred_element_type=jnp.float32) + gi_b[l]
                gh = jnp.dot(hs[l], w_h[l],
                             preferred_element_type=jnp.float32)
                hs[l] = gru_cell(gi, gh, hs[l], b_hn[l])
                outs[l][t] = hs[l]
        return outs[L - 1], hs

    # Encoder: h0 = 0 (torch.nn.GRU default); only h_n is consumed downstream.
    h0 = jnp.zeros((Bp, Hp), jnp.float32)
    _, h_enc = gru_stack(0, [h0] * L)

    # Decoder: seeded with the encoder's h_n, layer by layer; consumes x.
    dec_last, _ = gru_stack(1, h_enc)

    # Linear head over the full decoder sequence: one (S*Bp, Hp)@(Hp, Op)
    # matmul and a single lane-dense full-tile store.
    dec_seq = jnp.concatenate(dec_last, axis=0)           # (S*Bp, Hp)
    out_ref[...] = jnp.dot(dec_seq, wout_ref[...],
                           preferred_element_type=jnp.float32) + bout_ref[...]

    # Encoder final hidden states: single full-tile store (no per-layer
    # masked sub-tile stores).
    hn_ref[...] = jnp.concatenate(h_enc, axis=0)          # (L*Bp, Hp)


# ----------------------------------------------------------------------------
# Weight packing: PyTorch GRU layout -> 3 lane-aligned, padded DMA slabs
# ----------------------------------------------------------------------------
def _pad_gate_cols(a, H, Hp):
    """(..., 3*H) -> (..., 3*Hp): pad each r/z/n gate block to Hp lanes."""
    lead = a.shape[:-1]
    a3 = a.reshape(lead + (3, H))
    a3 = jnp.pad(a3, [(0, 0)] * len(lead) + [(0, 0), (0, Hp - H)])
    return a3.reshape(lead + (3 * Hp,))


def _pack_gru_layer(w_i, w_h, b_i, b_h, Hp, Bp):
    H = w_h.shape[0]
    in_size = w_i.shape[0]
    w_i_g = _pad_gate_cols(w_i, H, Hp)                    # (in_size, 3Hp)
    if in_size == 1:
        # scalar-input layer: pre-broadcast the single row over the Bp
        # sublanes the kernel multiplies against; remaining rows are zero.
        w_i_p = jnp.pad(jnp.broadcast_to(w_i_g, (Bp, 3 * Hp)),
                        ((0, Hp - Bp), (0, 0)))
    else:
        w_i_p = jnp.pad(w_i_g, ((0, Hp - in_size), (0, 0)))
    w_h_p = jnp.pad(_pad_gate_cols(w_h, H, Hp), ((0, Hp - H), (0, 0)))
    b_i3 = b_i.reshape(3, H)
    b_h3 = b_h.reshape(3, H)
    # fold b_hh into the r/z gate biases; keep the n gate's b_hh separate
    # (it is scaled by r inside the cell)
    gi_bias = jnp.concatenate(
        [b_i3[0] + b_h3[0], b_i3[1] + b_h3[1], b_i3[2]]).reshape(1, 3 * H)
    gi_bias_p = _pad_gate_cols(gi_bias, H, Hp)            # (1, 3Hp)
    b_hn_p = jnp.pad(b_h3[2].reshape(1, H), ((0, 0), (0, Hp - H)))
    bias = jnp.broadcast_to(jnp.concatenate([gi_bias_p, b_hn_p], axis=1),
                            (Bp, 4 * Hp))                 # pre-broadcast rows
    return w_i_p, w_h_p, bias


def pack_params(enc_params, dec_params, Hp=LANE, Bp=SUBLANE):
    """18 small PyTorch-layout arrays -> 3 contiguous slabs (3 DMAs)."""
    wi, wh, bb = [], [], []
    for layer in list(enc_params) + list(dec_params):
        a, b, c = _pack_gru_layer(*layer, Hp=Hp, Bp=Bp)
        wi.append(a)
        wh.append(b)
        bb.append(c)
    return jnp.stack(wi), jnp.stack(wh), jnp.stack(bb)


def pack_linear(w, b, Hp=LANE, Op=LANE):
    H, O = w.shape
    return (jnp.pad(w, ((0, Hp - H), (0, Op - O))),
            jnp.pad(b, ((0, 0), (0, Op - O))))


# ----------------------------------------------------------------------------
# Jitted forward (single fused pallas_call)
# ----------------------------------------------------------------------------
@functools.partial(jax.jit, static_argnames=("hidden_size", "output_size"))
def seq2seq_forward(x, target, wi_slab, wh_slab, b_slab, w_out_p, b_out_p, *,
                    hidden_size, output_size):
    del target  # only sizes a torch buffer that is immediately overwritten
    S, B, _ = x.shape
    L = wi_slab.shape[0] // 2
    Hp = wh_slab.shape[1]
    Bp = b_slab.shape[1]
    Op = w_out_p.shape[1]

    # pad batch to a full sublane group so every per-step tensor in the kernel
    # is a whole (8, 128k) tile (layout plumbing, not compute hoisting)
    x_p = jnp.pad(x, ((0, 0), (0, Bp - B), (0, 0))).reshape(S * Bp, 1)

    kernel = functools.partial(seq2seq_kernel, S=S, Bp=Bp, L=L, Hp=Hp)
    out_full, hn_full = pl.pallas_call(
        kernel,
        out_shape=(
            jax.ShapeDtypeStruct((S * Bp, Op), jnp.float32),  # lane-dense head out
            jax.ShapeDtypeStruct((L * Bp, Hp), jnp.float32),  # lane-dense h_n
        ),
        # ~1.8 MiB of weights + activations; 16 MiB leaves headroom for
        # compiler scratch and fits every generation's scoped VMEM (v7x incl.).
        # TODO(synk): if S grows, switch to a time-chunked grid ("arbitrary"
        # reduction axis, h carried in scratch) instead of full unroll.
        compiler_params=pltpu.CompilerParams(vmem_limit_bytes=16 * 1024 * 1024),
    )(x_p, wi_slab, wh_slab, b_slab, w_out_p, b_out_p)

    out = out_full.reshape(S, Bp, Op)[:, :B, :output_size]
    h_n = hn_full.reshape(L, Bp, Hp)[:, :B, :hidden_size]
    return out, h_n


# ----------------------------------------------------------------------------
# Pure-JAX reference (mirrors torch.nn.GRU / nn.Linear semantics)
# ----------------------------------------------------------------------------
def gru_stack_ref(x, h0, params):
    inp = x
    finals = []
    for l, (w_i, w_h, b_i, b_h) in enumerate(params):
        h = h0[l]
        H = h.shape[-1]
        outs = []
        for t in range(inp.shape[0]):
            gi = jnp.dot(inp[t], w_i, precision=jax.lax.Precision.HIGHEST) + b_i
            gh = jnp.dot(h, w_h, precision=jax.lax.Precision.HIGHEST) + b_h
            r = jax.nn.sigmoid(gi[:, :H] + gh[:, :H])
            z = jax.nn.sigmoid(gi[:, H:2 * H] + gh[:, H:2 * H])
            n = jnp.tanh(gi[:, 2 * H:] + r * gh[:, 2 * H:])
            h = (1.0 - z) * n + z * h
            outs.append(h)
        inp = jnp.stack(outs, axis=0)
        finals.append(h)
    return inp, jnp.stack(finals, axis=0)


def seq2seq_ref(x, enc_params, dec_params, w_out, b_out):
    L = len(enc_params)
    B = x.shape[1]
    H = enc_params[0][1].shape[0]
    h0 = jnp.zeros((L, B, H), jnp.float32)
    _, h_n = gru_stack_ref(x, h0, enc_params)
    dec_seq, _ = gru_stack_ref(x, h_n, dec_params)
    out = jnp.dot(dec_seq, w_out, precision=jax.lax.Precision.HIGHEST) + b_out
    return out, h_n


# ----------------------------------------------------------------------------
# Parameter init (deterministic, PyTorch-like uniform(-1/sqrt(H), 1/sqrt(H)))
# ----------------------------------------------------------------------------
def init_gru_params(key, hidden_size, num_layers, input_size=1):
    bound = 1.0 / np.sqrt(hidden_size)
    params = []
    for l in range(num_layers):
        in_size = input_size if l == 0 else hidden_size
        key, k1, k2, k3, k4 = jax.random.split(key, 5)
        w_i = jax.random.uniform(k1, (in_size, 3 * hidden_size), jnp.float32, -bound, bound)
        w_h = jax.random.uniform(k2, (hidden_size, 3 * hidden_size), jnp.float32, -bound, bound)
        b_i = jax.random.uniform(k3, (1, 3 * hidden_size), jnp.float32, -bound, bound)
        b_h = jax.random.uniform(k4, (1, 3 * hidden_size), jnp.float32, -bound, bound)
        params.append((w_i, w_h, b_i, b_h))
    return params


def init_linear_params(key, hidden_size, output_size):
    bound = 1.0 / np.sqrt(hidden_size)
    k1, k2 = jax.random.split(key)
    w = jax.random.uniform(k1, (hidden_size, output_size), jnp.float32, -bound, bound)
    b = jax.random.uniform(k2, (1, output_size), jnp.float32, -bound, bound)
    return w, b


if __name__ == "__main__":
    hidden_size = 32
    output_size = 1
    num_layers = 2
    seq_len = 8
    batch = 2

    key = jax.random.PRNGKey(0)
    key, kx, kt, ke, kd, kl = jax.random.split(key, 6)

    # x, target: (seq, batch, 1) -- PyTorch GRU time-major layout
    x = jax.random.normal(kx, (seq_len, batch, 1), jnp.float32)
    target = jax.random.normal(kt, (seq_len, batch, 1), jnp.float32)

    enc_params = init_gru_params(ke, hidden_size, num_layers, input_size=1)
    dec_params = init_gru_params(kd, hidden_size, num_layers, input_size=1)
    w_out, b_out = init_linear_params(kl, hidden_size, output_size)

    # one-time repack of the weights into 3 lane-aligned, bias-folded slabs
    wi_slab, wh_slab, b_slab = pack_params(enc_params, dec_params)
    w_out_p, b_out_p = pack_linear(w_out, b_out)

    out, h_n = seq2seq_forward(x, target, wi_slab, wh_slab, b_slab, w_out_p,
                               b_out_p, hidden_size=hidden_size,
                               output_size=output_size)
    out = jax.block_until_ready(out)
    h_n = jax.block_until_ready(h_n)

    out_expect, hn_expect = seq2seq_ref(x, enc_params, dec_params, w_out, b_out)
    # reference uses Precision.HIGHEST; kernel uses Mosaic's default f32
    # handling -> 1e-4 tolerance per review (observed error is far smaller)
    np.testing.assert_allclose(np.asarray(out), np.asarray(out_expect),
                               rtol=1e-4, atol=1e-4)
    np.testing.assert_allclose(np.asarray(h_n), np.asarray(hn_expect),
                               rtol=1e-4, atol=1e-4)
    assert out.shape == (seq_len, batch, output_size)
    assert h_n.shape == (num_layers, batch, hidden_size)

    print("KERNEL_OK")
</pallas_src>

<mosaic_0001>
module attributes {stable_mosaic.version = 11 : i64} {
  func.func @seq2seq_kernel(%arg0: memref<64x1xf32, #tpu.memory_space<vmem>>, %arg1: memref<4x128x384xf32, #tpu.memory_space<vmem>>, %arg2: memref<4x128x384xf32, #tpu.memory_space<vmem>>, %arg3: memref<4x8x512xf32, #tpu.memory_space<vmem>>, %arg4: memref<128x128xf32, #tpu.memory_space<vmem>>, %arg5: memref<1x128xf32, #tpu.memory_space<vmem>>, %arg6: memref<64x128xf32, #tpu.memory_space<vmem>>, %arg7: memref<16x128xf32, #tpu.memory_space<vmem>>) attributes {dimension_semantics = [], scalar_prefetch = 0 : i64, scratch_operands = 0 : i64, tpu.core_type = #tpu.core_type<tc>} {
    %c0 = arith.constant 0 : index
    %c0_0 = arith.constant 0 : index
    %0 = vector.load %arg0[%c0, %c0_0] : memref<64x1xf32, #tpu.memory_space<vmem>>, vector<64x1xf32>
    %cst = arith.constant 0.000000e+00 : f32
    %1 = vector.broadcast %cst : f32 to vector<8x128xf32>
    %c0_1 = arith.constant 0 : index
    %c0_2 = arith.constant 0 : index
    %c0_3 = arith.constant 0 : index
    %2 = vector.load %arg1[%c0_1, %c0_2, %c0_3] : memref<4x128x384xf32, #tpu.memory_space<vmem>>, vector<1x128x384xf32>
    %3 = vector.shape_cast %2 : vector<1x128x384xf32> to vector<128x384xf32>
    %4 = vector.extract_strided_slice %3 {offsets = [0, 0], sizes = [8, 384], strides = [1, 1]} : vector<128x384xf32> to vector<8x384xf32>
    %c0_4 = arith.constant 0 : index
    %c0_5 = arith.constant 0 : index
    %c0_6 = arith.constant 0 : index
    %5 = vector.load %arg2[%c0_4, %c0_5, %c0_6] : memref<4x128x384xf32, #tpu.memory_space<vmem>>, vector<1x128x384xf32>
    %6 = vector.shape_cast %5 : vector<1x128x384xf32> to vector<128x384xf32>
    %c0_7 = arith.constant 0 : index
    %c0_8 = arith.constant 0 : index
    %c0_9 = arith.constant 0 : index
    %7 = vector.load %arg3[%c0_7, %c0_8, %c0_9] : memref<4x8x512xf32, #tpu.memory_space<vmem>>, vector<1x8x512xf32>
    %8 = vector.shape_cast %7 : vector<1x8x512xf32> to vector<8x512xf32>
    %9 = vector.extract_strided_slice %8 {offsets = [0, 0], sizes = [8, 384], strides = [1, 1]} : vector<8x512xf32> to vector<8x384xf32>
    %10 = vector.extract_strided_slice %8 {offsets = [0, 384], sizes = [8, 128], strides = [1, 1]} : vector<8x512xf32> to vector<8x128xf32>
    %c1 = arith.constant 1 : index
    %c0_10 = arith.constant 0 : index
    %c0_11 = arith.constant 0 : index
    %11 = vector.load %arg1[%c1, %c0_10, %c0_11] : memref<4x128x384xf32, #tpu.memory_space<vmem>>, vector<1x128x384xf32>
    %12 = vector.shape_cast %11 : vector<1x128x384xf32> to vector<128x384xf32>
    %c1_12 = arith.constant 1 : index
    %c0_13 = arith.constant 0 : index
    %c0_14 = arith.constant 0 : index
    %13 = vector.load %arg2[%c1_12, %c0_13, %c0_14] : memref<4x128x384xf32, #tpu.memory_space<vmem>>, vector<1x128x384xf32>
    %14 = vector.shape_cast %13 : vector<1x128x384xf32> to vector<128x384xf32>
    %c1_15 = arith.constant 1 : index
    %c0_16 = arith.constant 0 : index
    %c0_17 = arith.constant 0 : index
    %15 = vector.load %arg3[%c1_15, %c0_16, %c0_17] : memref<4x8x512xf32, #tpu.memory_space<vmem>>, vector<1x8x512xf32>
    %16 = vector.shape_cast %15 : vector<1x8x512xf32> to vector<8x512xf32>
    %17 = vector.extract_strided_slice %16 {offsets = [0, 0], sizes = [8, 384], strides = [1, 1]} : vector<8x512xf32> to vector<8x384xf32>
    %18 = vector.extract_strided_slice %16 {offsets = [0, 384], sizes = [8, 128], strides = [1, 1]} : vector<8x512xf32> to vector<8x128xf32>
    %19 = vector.extract_strided_slice %0 {offsets = [0, 0], sizes = [8, 1], strides = [1, 1]} : vector<64x1xf32> to vector<8x1xf32>
    %20 = vector.broadcast %19 : vector<8x1xf32> to vector<8x384xf32>
    %21 = arith.mulf %20, %4 : vector<8x384xf32>
    %22 = arith.addf %21, %9 : vector<8x384xf32>
    %cst_18 = arith.constant dense<0.000000e+00> : vector<8x384xf32>
    %23 = tpu.matmul %1, %6, %cst_18 {dimension_numbers = #tpu.dot_dimension_numbers<[1], [0], [0], [1], [0, 0, 1, 1], [], []>} : vector<8x128xf32>, vector<128x384xf32>, vector<8x384xf32> -> vector<8x384xf32>
    %24 = vector.extract_strided_slice %22 {offsets = [0, 0], sizes = [8, 256], strides = [1, 1]} : vector<8x384xf32> to vector<8x256xf32>
    %25 = vector.extract_strided_slice %23 {offsets = [0, 0], sizes = [8, 256], strides = [1, 1]} : vector<8x384xf32> to vector<8x256xf32>
    %26 = arith.addf %24, %25 : vector<8x256xf32>
    %27 = arith.negf %26 : vector<8x256xf32>
    %28 = math.exp %27 : vector<8x256xf32>
    %cst_19 = arith.constant 1.000000e+00 : f32
    %29 = vector.broadcast %cst_19 : f32 to vector<8x256xf32>
    %30 = arith.addf %29, %28 : vector<8x256xf32>
    %31 = arith.divf %29, %30 : vector<8x256xf32>
    %32 = vector.extract_strided_slice %31 {offsets = [0, 0], sizes = [8, 128], strides = [1, 1]} : vector<8x256xf32> to vector<8x128xf32>
    %33 = vector.extract_strided_slice %31 {offsets = [0, 128], sizes = [8, 128], strides = [1, 1]} : vector<8x256xf32> to vector<8x128xf32>
    %34 = vector.extract_strided_slice %22 {offsets = [0, 256], sizes = [8, 128], strides = [1, 1]} : vector<8x384xf32> to vector<8x128xf32>
    %35 = vector.extract_strided_slice %23 {offsets = [0, 256], sizes = [8, 128], strides = [1, 1]} : vector<8x384xf32> to vector<8x128xf32>
    %36 = arith.addf %35, %10 : vector<8x128xf32>
    %37 = arith.mulf %32, %36 : vector<8x128xf32>
    %38 = arith.addf %34, %37 : vector<8x128xf32>
    %39 = math.tanh %38 : vector<8x128xf32>
    %cst_20 = arith.constant 1.000000e+00 : f32
    %40 = vector.broadcast %cst_20 : f32 to vector<8x128xf32>
    %41 = arith.subf %40, %33 : vector<8x128xf32>
    %42 = arith.mulf %41, %39 : vector<8x128xf32>
    %43 = arith.mulf %33, %1 : vector<8x128xf32>
    %44 = arith.addf %42, %43 : vector<8x128xf32>
    %45 = vector.extract_strided_slice %0 {offsets = [8, 0], sizes = [8, 1], strides = [1, 1]} : vector<64x1xf32> to vector<8x1xf32>
    %46 = vector.broadcast %45 : vector<8x1xf32> to vector<8x384xf32>
    %47 = arith.mulf %46, %4 : vector<8x384xf32>
    %48 = arith.addf %47, %9 : vector<8x384xf32>
    %cst_21 = arith.constant dense<0.000000e+00> : vector<8x384xf32>
    %49 = tpu.matmul %44, %6, %cst_21 {dimension_numbers = #tpu.dot_dimension_numbers<[1], [0], [0], [1], [0, 0, 1, 1], [], []>} : vector<8x128xf32>, vector<128x384xf32>, vector<8x384xf32> -> vector<8x384xf32>
    %50 = vector.extract_strided_slice %48 {offsets = [0, 0], sizes = [8, 256], strides = [1, 1]} : vector<8x384xf32> to vector<8x256xf32>
    %51 = vector.extract_strided_slice %49 {offsets = [0, 0], sizes = [8, 256], strides = [1, 1]} : vector<8x384xf32> to vector<8x256xf32>
    %52 = arith.addf %50, %51 : vector<8x256xf32>
    %53 = arith.negf %52 : vector<8x256xf32>
    %54 = math.exp %53 : vector<8x256xf32>
    %cst_22 = arith.constant 1.000000e+00 : f32
    %55 = vector.broadcast %cst_22 : f32 to vector<8x256xf32>
    %56 = arith.addf %55, %54 : vector<8x256xf32>
    %57 = arith.divf %55, %56 : vector<8x256xf32>
    %58 = vector.extract_strided_slice %57 {offsets = [0, 0], sizes = [8, 128], strides = [1, 1]} : vector<8x256xf32> to vector<8x128xf32>
    %59 = vector.extract_strided_slice %57 {offsets = [0, 128], sizes = [8, 128], strides = [1, 1]} : vector<8x256xf32> to vector<8x128xf32>
    %60 = vector.extract_strided_slice %48 {offsets = [0, 256], sizes = [8, 128], strides = [1, 1]} : vector<8x384xf32> to vector<8x128xf32>
    %61 = vector.extract_strided_slice %49 {offsets = [0, 256], sizes = [8, 128], strides = [1, 1]} : vector<8x384xf32> to vector<8x128xf32>
    %62 = arith.addf %61, %10 : vector<8x128xf32>
    %63 = arith.mulf %58, %62 : vector<8x128xf32>
    %64 = arith.addf %60, %63 : vector<8x128xf32>
    %65 = math.tanh %64 : vector<8x128xf32>
    %cst_23 = arith.constant 1.000000e+00 : f32
    %66 = vector.broadcast %cst_23 : f32 to vector<8x128xf32>
    %67 = arith.subf %66, %59 : vector<8x128xf32>
    %68 = arith.mulf %67, %65 : vector<8x128xf32>
    %69 = arith.mulf %59, %44 : vector<8x128xf32>
    %70 = arith.addf %68, %69 : vector<8x128xf32>
    %cst_24 = arith.constant dense<0.000000e+00> : vector<8x384xf32>
    %71 = tpu.matmul %44, %12, %cst_24 {dimension_numbers = #tpu.dot_dimension_numbers<[1], [0], [0], [1], [0, 0, 1, 1], [], []>} : vector<8x128xf32>, vector<128x384xf32>, vector<8x384xf32> -> vector<8x384xf32>
    %72 = arith.addf %71, %17 : vector<8x384xf32>
    %cst_25 = arith.constant dense<0.000000e+00> : vector<8x384xf32>
    %73 = tpu.matmul %1, %14, %cst_25 {dimension_numbers = #tpu.dot_dimension_numbers<[1], [0], [0], [1], [0, 0, 1, 1], [], []>} : vector<8x128xf32>, vector<128x384xf32>, vector<8x384xf32> -> vector<8x384xf32>
    %74 = vector.extract_strided_slice %72 {offsets = [0, 0], sizes = [8, 256], strides = [1, 1]} : vector<8x384xf32> to vector<8x256xf32>
    %75 = vector.extract_strided_slice %73 {offsets = [0, 0], sizes = [8, 256], strides = [1, 1]} : vector<8x384xf32> to vector<8x256xf32>
    %76 = arith.addf %74, %75 : vector<8x256xf32>
    %77 = arith.negf %76 : vector<8x256xf32>
    %78 = math.exp %77 : vector<8x256xf32>
    %cst_26 = arith.constant 1.000000e+00 : f32
    %79 = vector.broadcast %cst_26 : f32 to vector<8x256xf32>
    %80 = arith.addf %79, %78 : vector<8x256xf32>
    %81 = arith.divf %79, %80 : vector<8x256xf32>
    %82 = vector.extract_strided_slice %81 {offsets = [0, 0], sizes = [8, 128], strides = [1, 1]} : vector<8x256xf32> to vector<8x128xf32>
    %83 = vector.extract_strided_slice %81 {offsets = [0, 128], sizes = [8, 128], strides = [1, 1]} : vector<8x256xf32> to vector<8x128xf32>
    %84 = vector.extract_strided_slice %72 {offsets = [0, 256], sizes = [8, 128], strides = [1, 1]} : vector<8x384xf32> to vector<8x128xf32>
    %85 = vector.extract_strided_slice %73 {offsets = [0, 256], sizes = [8, 128], strides = [1, 1]} : vector<8x384xf32> to vector<8x128xf32>
    %86 = arith.addf %85, %18 : vector<8x128xf32>
    %87 = arith.mulf %82, %86 : vector<8x128xf32>
    %88 = arith.addf %84, %87 : vector<8x128xf32>
    %89 = math.tanh %88 : vector<8x128xf32>
    %cst_27 = arith.constant 1.000000e+00 : f32
    %90 = vector.broadcast %cst_27 : f32 to vector<8x128xf32>
    %91 = arith.subf %90, %83 : vector<8x128xf32>
    %92 = arith.mulf %91, %89 : vector<8x128xf32>
    %93 = arith.mulf %83, %1 : vector<8x128xf32>
    %94 = arith.addf %92, %93 : vector<8x128xf32>
    %95 = vector.extract_strided_slice %0 {offsets = [16, 0], sizes = [8, 1], strides = [1, 1]} : vector<64x1xf32> to vector<8x1xf32>
    %96 = vector.broadcast %95 : vector<8x1xf32> to vector<8x384xf32>
    %97 = arith.mulf %96, %4 : vector<8x384xf32>
    %98 = arith.addf %97, %9 : vector<8x384xf32>
    %cst_28 = arith.constant dense<0.000000e+00> : vector<8x384xf32>
    %99 = tpu.matmul %70, %6, %cst_28 {dimension_numbers = #tpu.dot_dimension_numbers<[1], [0], [0], [1], [0, 0, 1, 1], [], []>} : vector<8x128xf32>, vector<128x384xf32>, vector<8x384xf32> -> vector<8x384xf32>
    %100 = vector.extract_strided_slice %98 {offsets = [0, 0], sizes = [8, 256], strides = [1, 1]} : vector<8x384xf32> to vector<8x256xf32>
    %101 = vector.extract_strided_slice %99 {offsets = [0, 0], sizes = [8, 256], strides = [1, 1]} : vector<8x384xf32> to vector<8x256xf32>
    %102 = arith.addf %100, %101 : vector<8x256xf32>
    %103 = arith.negf %102 : vector<8x256xf32>
    %104 = math.exp %103 : vector<8x256xf32>
    %cst_29 = arith.constant 1.000000e+00 : f32
    %105 = vector.broadcast %cst_29 : f32 to vector<8x256xf32>
    %106 = arith.addf %105, %104 : vector<8x256xf32>
    %107 = arith.divf %105, %106 : vector<8x256xf32>
    %108 = vector.extract_strided_slice %107 {offsets = [0, 0], sizes = [8, 128], strides = [1, 1]} : vector<8x256xf32> to vector<8x128xf32>
    %109 = vector.extract_strided_slice %107 {offsets = [0, 128], sizes = [8, 128], strides = [1, 1]} : vector<8x256xf32> to vector<8x128xf32>
    %110 = vector.extract_strided_slice %98 {offsets = [0, 256], sizes = [8, 128], strides = [1, 1]} : vector<8x384xf32> to vector<8x128xf32>
    %111 = vector.extract_strided_slice %99 {offsets = [0, 256], sizes = [8, 128], strides = [1, 1]} : vector<8x384xf32> to vector<8x128xf32>
    %112 = arith.addf %111, %10 : vector<8x128xf32>
    %113 = arith.mulf %108, %112 : vector<8x128xf32>
    %114 = arith.addf %110, %113 : vector<8x128xf32>
    %115 = math.tanh %114 : vector<8x128xf32>
    %cst_30 = arith.constant 1.000000e+00 : f32
    %116 = vector.broadcast %cst_30 : f32 to vector<8x128xf32>
    %117 = arith.subf %116, %109 : vector<8x128xf32>
    %118 = arith.mulf %117, %115 : vector<8x128xf32>
    %119 = arith.mulf %109, %70 : vector<8x128xf32>
    %120 = arith.addf %118, %119 : vector<8x128xf32>
    %cst_31 = arith.constant dense<0.000000e+00> : vector<8x384xf32>
    %121 = tpu.matmul %70, %12, %cst_31 {dimension_numbers = #tpu.dot_dimension_numbers<[1], [0], [0], [1], [0, 0, 1, 1], [], []>} : vector<8x128xf32>, vector<128x384xf32>, vector<8x384xf32> -> vector<8x384xf32>
    %122 = arith.addf %121, %17 : vector<8x384xf32>
    %cst_32 = arith.constant dense<0.000000e+00> : vector<8x384xf32>
    %123 = tpu.matmul %94, %14, %cst_32 {dimension_numbers = #tpu.dot_dimension_numbers<[1], [0], [0], [1], [0, 0, 1, 1], [], []>} : vector<8x128xf32>, vector<128x384xf32>, vector<8x384xf32> -> vector<8x384xf32>
    %124 = vector.extract_strided_slice %122 {offsets = [0, 0], sizes = [8, 256], strides = [1, 1]} : vector<8x384xf32> to vector<8x256xf32>
    %125 = vector.extract_strided_slice %123 {offsets = [0, 0], sizes = [8, 256], strides = [1, 1]} : vector<8x384xf32> to vector<8x256xf32>
    %126 = arith.addf %124, %125 : vector<8x256xf32>
    %127 = arith.negf %126 : vector<8x256xf32>
    %128 = math.exp %127 : vector<8x256xf32>
    %cst_33 = arith.constant 1.000000e+00 : f32
    %129 = vector.broadcast %cst_33 : f32 to vector<8x256xf32>
    %130 = arith.addf %129, %128 : vector<8x256xf32>
    %131 = arith.divf %129, %130 : vector<8x256xf32>
    %132 = vector.extract_strided_slice %131 {offsets = [0, 0], sizes = [8, 128], strides = [1, 1]} : vector<8x256xf32> to vector<8x128xf32>
    %133 = vector.extract_strided_slice %131 {offsets = [0, 128], sizes = [8, 128], strides = [1, 1]} : vector<8x256xf32> to vector<8x128xf32>
    %134 = vector.extract_strided_slice %122 {offsets = [0, 256], sizes = [8, 128], strides = [1, 1]} : vector<8x384xf32> to vector<8x128xf32>
    %135 = vector.extract_strided_slice %123 {offsets = [0, 256], sizes = [8, 128], strides = [1, 1]} : vector<8x384xf32> to vector<8x128xf32>
    %136 = arith.addf %135, %18 : vector<8x128xf32>
    %137 = arith.mulf %132, %136 : vector<8x128xf32>
    %138 = arith.addf %134, %137 : vector<8x128xf32>
    %139 = math.tanh %138 : vector<8x128xf32>
    %cst_34 = arith.constant 1.000000e+00 : f32
    %140 = vector.broadcast %cst_34 : f32 to vector<8x128xf32>
    %141 = arith.subf %140, %133 : vector<8x128xf32>
    %142 = arith.mulf %141, %139 : vector<8x128xf32>
    %143 = arith.mulf %133, %94 : vector<8x128xf32>
    %144 = arith.addf %142, %143 : vector<8x128xf32>
    %145 = vector.extract_strided_slice %0 {offsets = [24, 0], sizes = [8, 1], strides = [1, 1]} : vector<64x1xf32> to vector<8x1xf32>
    %146 = vector.broadcast %145 : vector<8x1xf32> to vector<8x384xf32>
    %147 = arith.mulf %146, %4 : vector<8x384xf32>
    %148 = arith.addf %147, %9 : vector<8x384xf32>
    %cst_35 = arith.constant dense<0.000000e+00> : vector<8x384xf32>
    %149 = tpu.matmul %120, %6, %cst_35 {dimension_numbers = #tpu.dot_dimension_numbers<[1], [0], [0], [1], [0, 0, 1, 1], [], []>} : vector<8x128xf32>, vector<128x384xf32>, vector<8x384xf32> -> vector<8x384xf32>
    %150 = vector.extract_strided_slice %148 {offsets = [0, 0], sizes = [8, 256], strides = [1, 1]} : vector<8x384xf32> to vector<8x256xf32>
    %151 = vector.extract_strided_slice %149 {offsets = [0, 0], sizes = [8, 256], strides = [1, 1]} : vector<8x384xf32> to vector<8x256xf32>
    %152 = arith.addf %150, %151 : vector<8x256xf32>
    %153 = arith.negf %152 : vector<8x256xf32>
    %154 = math.exp %153 : vector<8x256xf32>
    %cst_36 = arith.constant 1.000000e+00 : f32
    %155 = vector.broadcast %cst_36 : f32 to vector<8x256xf32>
    %156 = arith.addf %155, %154 : vector<8x256xf32>
    %157 = arith.divf %155, %156 : vector<8x256xf32>
    %158 = vector.extract_strided_slice %157 {offsets = [0, 0], sizes = [8, 128], strides = [1, 1]} : vector<8x256xf32> to vector<8x128xf32>
    %159 = vector.extract_strided_slice %157 {offsets = [0, 128], sizes = [8, 128], strides = [1, 1]} : vector<8x256xf32> to vector<8x128xf32>
    %160 = vector.extract_strided_slice %148 {offsets = [0, 256], sizes = [8, 128], strides = [1, 1]} : vector<8x384xf32> to vector<8x128xf32>
    %161 = vector.extract_strided_slice %149 {offsets = [0, 256], sizes = [8, 128], strides = [1, 1]} : vector<8x384xf32> to vector<8x128xf32>
    %162 = arith.addf %161, %10 : vector<8x128xf32>
    %163 = arith.mulf %158, %162 : vector<8x128xf32>
    %164 = arith.addf %160, %163 : vector<8x128xf32>
    %165 = math.tanh %164 : vector<8x128xf32>
    %cst_37 = arith.constant 1.000000e+00 : f32
    %166 = vector.broadcast %cst_37 : f32 to vector<8x128xf32>
    %167 = arith.subf %166, %159 : vector<8x128xf32>
    %168 = arith.mulf %167, %165 : vector<8x128xf32>
    %169 = arith.mulf %159, %120 : vector<8x128xf32>
    %170 = arith.addf %168, %169 : vector<8x128xf32>
    %cst_38 = arith.constant dense<0.000000e+00> : vector<8x384xf32>
    %171 = tpu.matmul %120, %12, %cst_38 {dimension_numbers = #tpu.dot_dimension_numbers<[1], [0], [0], [1], [0, 0, 1, 1], [], []>} : vector<8x128xf32>, vector<128x384xf32>, vector<8x384xf32> -> vector<8x384xf32>
    %172 = arith.addf %171, %17 : vector<8x384xf32>
    %cst_39 = arith.constant dense<0.000000e+00> : vector<8x384xf32>
    %173 = tpu.matmul %144, %14, %cst_39 {dimension_numbers = #tpu.dot_dimension_numbers<[1], [0], [0], [1], [0, 0, 1, 1], [], []>} : vector<8x128xf32>, vector<128x384xf32>, vector<8x384xf32> -> vector<8x384xf32>
    %174 = vector.extract_strided_slice %172 {offsets = [0, 0], sizes = [8, 256], strides = [1, 1]} : vector<8x384xf32> to vector<8x256xf32>
    %175 = vector.extract_strided_slice %173 {offsets = [0, 0], sizes = [8, 256], strides = [1, 1]} : vector<8x384xf32> to vector<8x256xf32>
    %176 = arith.addf %174, %175 : vector<8x256xf32>
    %177 = arith.negf %176 : vector<8x256xf32>
    %178 = math.exp %177 : vector<8x256xf32>
    %cst_40 = arith.constant 1.000000e+00 : f32
    %179 = vector.broadcast %cst_40 : f32 to vector<8x256xf32>
    %180 = arith.addf %179, %178 : vector<8x256xf32>
    %181 = arith.divf %179, %180 : vector<8x256xf32>
    %182 = vector.extract_strided_slice %181 {offsets = [0, 0], sizes = [8, 128], strides = [1, 1]} : vector<8x256xf32> to vector<8x128xf32>
    %183 = vector.extract_strided_slice %181 {offsets = [0, 128], sizes = [8, 128], strides = [1, 1]} : vector<8x256xf32> to vector<8x128xf32>
    %184 = vector.extract_strided_slice %172 {offsets = [0, 256], sizes = [8, 128], strides = [1, 1]} : vector<8x384xf32> to vector<8x128xf32>
    %185 = vector.extract_strided_slice %173 {offsets = [0, 256], sizes = [8, 128], strides = [1, 1]} : vector<8x384xf32> to vector<8x128xf32>
    %186 = arith.addf %185, %18 : vector<8x128xf32>
    %187 = arith.mulf %182, %186 : vector<8x128xf32>
    %188 = arith.addf %184, %187 : vector<8x128xf32>
    %189 = math.tanh %188 : vector<8x128xf32>
    %cst_41 = arith.constant 1.000000e+00 : f32
    %190 = vector.broadcast %cst_41 : f32 to vector<8x128xf32>
    %191 = arith.subf %190, %183 : vector<8x128xf32>
    %192 = arith.mulf %191, %189 : vector<8x128xf32>
    %193 = arith.mulf %183, %144 : vector<8x128xf32>
    %194 = arith.addf %192, %193 : vector<8x128xf32>
    %195 = vector.extract_strided_slice %0 {offsets = [32, 0], sizes = [8, 1], strides = [1, 1]} : vector<64x1xf32> to vector<8x1xf32>
    %196 = vector.broadcast %195 : vector<8x1xf32> to vector<8x384xf32>
    %197 = arith.mulf %196, %4 : vector<8x384xf32>
    %198 = arith.addf %197, %9 : vector<8x384xf32>
    %cst_42 = arith.constant dense<0.000000e+00> : vector<8x384xf32>
    %199 = tpu.matmul %170, %6, %cst_42 {dimension_numbers = #tpu.dot_dimension_numbers<[1], [0], [0], [1], [0, 0, 1, 1], [], []>} : vector<8x128xf32>, vector<128x384xf32>, vector<8x384xf32> -> vector<8x384xf32>
    %200 = vector.extract_strided_slice %198 {offsets = [0, 0], sizes = [8, 256], strides = [1, 1]} : vector<8x384xf32> to vector<8x256xf32>
    %201 = vector.extract_strided_slice %199 {offsets = [0, 0], sizes = [8, 256], strides = [1, 1]} : vector<8x384xf32> to vector<8x256xf32>
    %202 = arith.addf %200, %201 : vector<8x256xf32>
    %203 = arith.negf %202 : vector<8x256xf32>
    %204 = math.exp %203 : vector<8x256xf32>
    %cst_43 = arith.constant 1.000000e+00 : f32
    %205 = vector.broadcast %cst_43 : f32 to vector<8x256xf32>
    %206 = arith.addf %205, %204 : vector<8x256xf32>
    %207 = arith.divf %205, %206 : vector<8x256xf32>
    %208 = vector.extract_strided_slice %207 {offsets = [0, 0], sizes = [8, 128], strides = [1, 1]} : vector<8x256xf32> to vector<8x128xf32>
    %209 = vector.extract_strided_slice %207 {offsets = [0, 128], sizes = [8, 128], strides = [1, 1]} : vector<8x256xf32> to vector<8x128xf32>
    %210 = vector.extract_strided_slice %198 {offsets = [0, 256], sizes = [8, 128], strides = [1, 1]} : vector<8x384xf32> to vector<8x128xf32>
    %211 = vector.extract_strided_slice %199 {offsets = [0, 256], sizes = [8, 128], strides = [1, 1]} : vector<8x384xf32> to vector<8x128xf32>
    %212 = arith.addf %211, %10 : vector<8x128xf32>
    %213 = arith.mulf %208, %212 : vector<8x128xf32>
    %214 = arith.addf %210, %213 : vector<8x128xf32>
    %215 = math.tanh %214 : vector<8x128xf32>
    %cst_44 = arith.constant 1.000000e+00 : f32
    %216 = vector.broadcast %cst_44 : f32 to vector<8x128xf32>
    %217 = arith.subf %216, %209 : vector<8x128xf32>
    %218 = arith.mulf %217, %215 : vector<8x128xf32>
    %219 = arith.mulf %209, %170 : vector<8x128xf32>
    %220 = arith.addf %218, %219 : vector<8x128xf32>
    %cst_45 = arith.constant dense<0.000000e+00> : vector<8x384xf32>
    %221 = tpu.matmul %170, %12, %cst_45 {dimension_numbers = #tpu.dot_dimension_numbers<[1], [0], [0], [1], [0, 0, 1, 1], [], []>} : vector<8x128xf32>, vector<128x384xf32>, vector<8x384xf32> -> vector<8x384xf32>
    %222 = arith.addf %221, %17 : vector<8x384xf32>
    %cst_46 = arith.constant dense<0.000000e+00> : vector<8x384xf32>
    %223 = tpu.matmul %194, %14, %cst_46 {dimension_numbers = #tpu.dot_dimension_numbers<[1], [0], [0], [1], [0, 0, 1, 1], [], []>} : vector<8x128xf32>, vector<128x384xf32>, vector<8x384xf32> -> vector<8x384xf32>
    %224 = vector.extract_strided_slice %222 {offsets = [0, 0], sizes = [8, 256], strides = [1, 1]} : vector<8x384xf32> to vector<8x256xf32>
    %225 = vector.extract_strided_slice %223 {offsets = [0, 0], sizes = [8, 256], strides = [1, 1]} : vector<8x384xf32> to vector<8x256xf32>
    %226 = arith.addf %224, %225 : vector<8x256xf32>
    %227 = arith.negf %226 : vector<8x256xf32>
    %228 = math.exp %227 : vector<8x256xf32>
    %cst_47 = arith.constant 1.000000e+00 : f32
    %229 = vector.broadcast %cst_47 : f32 to vector<8x256xf32>
    %230 = arith.addf %229, %228 : vector<8x256xf32>
    %231 = arith.divf %229, %230 : vector<8x256xf32>
    %232 = vector.extract_strided_slice %231 {offsets = [0, 0], sizes = [8, 128], strides = [1, 1]} : vector<8x256xf32> to vector<8x128xf32>
    %233 = vector.extract_strided_slice %231 {offsets = [0, 128], sizes = [8, 128], strides = [1, 1]} : vector<8x256xf32> to vector<8x128xf32>
    %234 = vector.extract_strided_slice %222 {offsets = [0, 256], sizes = [8, 128], strides = [1, 1]} : vector<8x384xf32> to vector<8x128xf32>
    %235 = vector.extract_strided_slice %223 {offsets = [0, 256], sizes = [8, 128], strides = [1, 1]} : vector<8x384xf32> to vector<8x128xf32>
    %236 = arith.addf %235, %18 : vector<8x128xf32>
    %237 = arith.mulf %232, %236 : vector<8x128xf32>
    %238 = arith.addf %234, %237 : vector<8x128xf32>
    %239 = math.tanh %238 : vector<8x128xf32>
    %cst_48 = arith.constant 1.000000e+00 : f32
    %240 = vector.broadcast %cst_48 : f32 to vector<8x128xf32>
    %241 = arith.subf %240, %233 : vector<8x128xf32>
    %242 = arith.mulf %241, %239 : vector<8x128xf32>
    %243 = arith.mulf %233, %194 : vector<8x128xf32>
    %244 = arith.addf %242, %243 : vector<8x128xf32>
    %245 = vector.extract_strided_slice %0 {offsets = [40, 0], sizes = [8, 1], strides = [1, 1]} : vector<64x1xf32> to vector<8x1xf32>
    %246 = vector.broadcast %245 : vector<8x1xf32> to vector<8x384xf32>
    %247 = arith.mulf %246, %4 : vector<8x384xf32>
    %248 = arith.addf %247, %9 : vector<8x384xf32>
    %cst_49 = arith.constant dense<0.000000e+00> : vector<8x384xf32>
    %249 = tpu.matmul %220, %6, %cst_49 {dimension_numbers = #tpu.dot_dimension_numbers<[1], [0], [0], [1], [0, 0, 1, 1], [], []>} : vector<8x128xf32>, vector<128x384xf32>, vector<8x384xf32> -> vector<8x384xf32>
    %250 = vector.extract_strided_slice %248 {offsets = [0, 0], sizes = [8, 256], strides = [1, 1]} : vector<8x384xf32> to vector<8x256xf32>
    %251 = vector.extract_strided_slice %249 {offsets = [0, 0], sizes = [8, 256], strides = [1, 1]} : vector<8x384xf32> to vector<8x256xf32>
    %252 = arith.addf %250, %251 : vector<8x256xf32>
    %253 = arith.negf %252 : vector<8x256xf32>
    %254 = math.exp %253 : vector<8x256xf32>
    %cst_50 = arith.constant 1.000000e+00 : f32
    %255 = vector.broadcast %cst_50 : f32 to vector<8x256xf32>
    %256 = arith.addf %255, %254 : vector<8x256xf32>
    %257 = arith.divf %255, %256 : vector<8x256xf32>
    %258 = vector.extract_strided_slice %257 {offsets = [0, 0], sizes = [8, 128], strides = [1, 1]} : vector<8x256xf32> to vector<8x128xf32>
    %259 = vector.extract_strided_slice %257 {offsets = [0, 128], sizes = [8, 128], strides = [1, 1]} : vector<8x256xf32> to vector<8x128xf32>
    %260 = vector.extract_strided_slice %248 {offsets = [0, 256], sizes = [8, 128], strides = [1, 1]} : vector<8x384xf32> to vector<8x128xf32>
    %261 = vector.extract_strided_slice %249 {offsets = [0, 256], sizes = [8, 128], strides = [1, 1]} : vector<8x384xf32> to vector<8x128xf32>
    %262 = arith.addf %261, %10 : vector<8x128xf32>
    %263 = arith.mulf %258, %262 : vector<8x128xf32>
    %264 = arith.addf %260, %263 : vector<8x128xf32>
    %265 = math.tanh %264 : vector<8x128xf32>
    %cst_51 = arith.constant 1.000000e+00 : f32
    %266 = vector.broadcast %cst_51 : f32 to vector<8x128xf32>
    %267 = arith.subf %266, %259 : vector<8x128xf32>
    %268 = arith.mulf %267, %265 : vector<8x128xf32>
    %269 = arith.mulf %259, %220 : vector<8x128xf32>
    %270 = arith.addf %268, %269 : vector<8x128xf32>
    %cst_52 = arith.constant dense<0.000000e+00> : vector<8x384xf32>
    %271 = tpu.matmul %220, %12, %cst_52 {dimension_numbers = #tpu.dot_dimension_numbers<[1], [0], [0], [1], [0, 0, 1, 1], [], []>} : vector<8x128xf32>, vector<128x384xf32>, vector<8x384xf32> -> vector<8x384xf32>
    %272 = arith.addf %271, %17 : vector<8x384xf32>
    %cst_53 = arith.constant dense<0.000000e+00> : vector<8x384xf32>
    %273 = tpu.matmul %244, %14, %cst_53 {dimension_numbers = #tpu.dot_dimension_numbers<[1], [0], [0], [1], [0, 0, 1, 1], [], []>} : vector<8x128xf32>, vector<128x384xf32>, vector<8x384xf32> -> vector<8x384xf32>
    %274 = vector.extract_strided_slice %272 {offsets = [0, 0], sizes = [8, 256], strides = [1, 1]} : vector<8x384xf32> to vector<8x256xf32>
    %275 = vector.extract_strided_slice %273 {offsets = [0, 0], sizes = [8, 256], strides = [1, 1]} : vector<8x384xf32> to vector<8x256xf32>
    %276 = arith.addf %274, %275 : vector<8x256xf32>
    %277 = arith.negf %276 : vector<8x256xf32>
    %278 = math.exp %277 : vector<8x256xf32>
    %cst_54 = arith.constant 1.000000e+00 : f32
    %279 = vector.broadcast %cst_54 : f32 to vector<8x256xf32>
    %280 = arith.addf %279, %278 : vector<8x256xf32>
    %281 = arith.divf %279, %280 : vector<8x256xf32>
    %282 = vector.extract_strided_slice %281 {offsets = [0, 0], sizes = [8, 128], strides = [1, 1]} : vector<8x256xf32> to vector<8x128xf32>
    %283 = vector.extract_strided_slice %281 {offsets = [0, 128], sizes = [8, 128], strides = [1, 1]} : vector<8x256xf32> to vector<8x128xf32>
    %284 = vector.extract_strided_slice %272 {offsets = [0, 256], sizes = [8, 128], strides = [1, 1]} : vector<8x384xf32> to vector<8x128xf32>
    %285 = vector.extract_strided_slice %273 {offsets = [0, 256], sizes = [8, 128], strides = [1, 1]} : vector<8x384xf32> to vector<8x128xf32>
    %286 = arith.addf %285, %18 : vector<8x128xf32>
    %287 = arith.mulf %282, %286 : vector<8x128xf32>
    %288 = arith.addf %284, %287 : vector<8x128xf32>
    %289 = math.tanh %288 : vector<8x128xf32>
    %cst_55 = arith.constant 1.000000e+00 : f32
    %290 = vector.broadcast %cst_55 : f32 to vector<8x128xf32>
    %291 = arith.subf %290, %283 : vector<8x128xf32>
    %292 = arith.mulf %291, %289 : vector<8x128xf32>
    %293 = arith.mulf %283, %244 : vector<8x128xf32>
    %294 = arith.addf %292, %293 : vector<8x128xf32>
    %295 = vector.extract_strided_slice %0 {offsets = [48, 0], sizes = [8, 1], strides = [1, 1]} : vector<64x1xf32> to vector<8x1xf32>
    %296 = vector.broadcast %295 : vector<8x1xf32> to vector<8x384xf32>
    %297 = arith.mulf %296, %4 : vector<8x384xf32>
    %298 = arith.addf %297, %9 : vector<8x384xf32>
    %cst_56 = arith.constant dense<0.000000e+00> : vector<8x384xf32>
    %299 = tpu.matmul %270, %6, %cst_56 {dimension_numbers = #tpu.dot_dimension_numbers<[1], [0], [0], [1], [0, 0, 1, 1], [], []>} : vector<8x128xf32>, vector<128x384xf32>, vector<8x384xf32> -> vector<8x384xf32>
    %300 = vector.extract_strided_slice %298 {offsets = [0, 0], sizes = [8, 256], strides = [1, 1]} : vector<8x384xf32> to vector<8x256xf32>
    %301 = vector.extract_strided_slice %299 {offsets = [0, 0], sizes = [8, 256], strides = [1, 1]} : vector<8x384xf32> to vector<8x256xf32>
    %302 = arith.addf %300, %301 : vector<8x256xf32>
    %303 = arith.negf %302 : vector<8x256xf32>
    %304 = math.exp %303 : vector<8x256xf32>
    %cst_57 = arith.constant 1.000000e+00 : f32
    %305 = vector.broadcast %cst_57 : f32 to vector<8x256xf32>
    %306 = arith.addf %305, %304 : vector<8x256xf32>
    %307 = arith.divf %305, %306 : vector<8x256xf32>
    %308 = vector.extract_strided_slice %307 {offsets = [0, 0], sizes = [8, 128], strides = [1, 1]} : vector<8x256xf32> to vector<8x128xf32>
    %309 = vector.extract_strided_slice %307 {offsets = [0, 128], sizes = [8, 128], strides = [1, 1]} : vector<8x256xf32> to vector<8x128xf32>
    %310 = vector.extract_strided_slice %298 {offsets = [0, 256], sizes = [8, 128], strides = [1, 1]} : vector<8x384xf32> to vector<8x128xf32>
    %311 = vector.extract_strided_slice %299 {offsets = [0, 256], sizes = [8, 128], strides = [1, 1]} : vector<8x384xf32> to vector<8x128xf32>
    %312 = arith.addf %311, %10 : vector<8x128xf32>
    %313 = arith.mulf %308, %312 : vector<8x128xf32>
    %314 = arith.addf %310, %313 : vector<8x128xf32>
    %315 = math.tanh %314 : vector<8x128xf32>
    %cst_58 = arith.constant 1.000000e+00 : f32
    %316 = vector.broadcast %cst_58 : f32 to vector<8x128xf32>
    %317 = arith.subf %316, %309 : vector<8x128xf32>
    %318 = arith.mulf %317, %315 : vector<8x128xf32>
    %319 = arith.mulf %309, %270 : vector<8x128xf32>
    %320 = arith.addf %318, %319 : vector<8x128xf32>
    %cst_59 = arith.constant dense<0.000000e+00> : vector<8x384xf32>
    %321 = tpu.matmul %270, %12, %cst_59 {dimension_numbers = #tpu.dot_dimension_numbers<[1], [0], [0], [1], [0, 0, 1, 1], [], []>} : vector<8x128xf32>, vector<128x384xf32>, vector<8x384xf32> -> vector<8x384xf32>
    %322 = arith.addf %321, %17 : vector<8x384xf32>
    %cst_60 = arith.constant dense<0.000000e+00> : vector<8x384xf32>
    %323 = tpu.matmul %294, %14, %cst_60 {dimension_numbers = #tpu.dot_dimension_numbers<[1], [0], [0], [1], [0, 0, 1, 1], [], []>} : vector<8x128xf32>, vector<128x384xf32>, vector<8x384xf32> -> vector<8x384xf32>
    %324 = vector.extract_strided_slice %322 {offsets = [0, 0], sizes = [8, 256], strides = [1, 1]} : vector<8x384xf32> to vector<8x256xf32>
    %325 = vector.extract_strided_slice %323 {offsets = [0, 0], sizes = [8, 256], strides = [1, 1]} : vector<8x384xf32> to vector<8x256xf32>
    %326 = arith.addf %324, %325 : vector<8x256xf32>
    %327 = arith.negf %326 : vector<8x256xf32>
    %328 = math.exp %327 : vector<8x256xf32>
    %cst_61 = arith.constant 1.000000e+00 : f32
    %329 = vector.broadcast %cst_61 : f32 to vector<8x256xf32>
    %330 = arith.addf %329, %328 : vector<8x256xf32>
    %331 = arith.divf %329, %330 : vector<8x256xf32>
    %332 = vector.extract_strided_slice %331 {offsets = [0, 0], sizes = [8, 128], strides = [1, 1]} : vector<8x256xf32> to vector<8x128xf32>
    %333 = vector.extract_strided_slice %331 {offsets = [0, 128], sizes = [8, 128], strides = [1, 1]} : vector<8x256xf32> to vector<8x128xf32>
    %334 = vector.extract_strided_slice %322 {offsets = [0, 256], sizes = [8, 128], strides = [1, 1]} : vector<8x384xf32> to vector<8x128xf32>
    %335 = vector.extract_strided_slice %323 {offsets = [0, 256], sizes = [8, 128], strides = [1, 1]} : vector<8x384xf32> to vector<8x128xf32>
    %336 = arith.addf %335, %18 : vector<8x128xf32>
    %337 = arith.mulf %332, %336 : vector<8x128xf32>
    %338 = arith.addf %334, %337 : vector<8x128xf32>
    %339 = math.tanh %338 : vector<8x128xf32>
    %cst_62 = arith.constant 1.000000e+00 : f32
    %340 = vector.broadcast %cst_62 : f32 to vector<8x128xf32>
    %341 = arith.subf %340, %333 : vector<8x128xf32>
    %342 = arith.mulf %341, %339 : vector<8x128xf32>
    %343 = arith.mulf %333, %294 : vector<8x128xf32>
    %344 = arith.addf %342, %343 : vector<8x128xf32>
    %345 = vector.extract_strided_slice %0 {offsets = [56, 0], sizes = [8, 1], strides = [1, 1]} : vector<64x1xf32> to vector<8x1xf32>
    %346 = vector.broadcast %345 : vector<8x1xf32> to vector<8x384xf32>
    %347 = arith.mulf %346, %4 : vector<8x384xf32>
    %348 = arith.addf %347, %9 : vector<8x384xf32>
    %cst_63 = arith.constant dense<0.000000e+00> : vector<8x384xf32>
    %349 = tpu.matmul %320, %6, %cst_63 {dimension_numbers = #tpu.dot_dimension_numbers<[1], [0], [0], [1], [0, 0, 1, 1], [], []>} : vector<8x128xf32>, vector<128x384xf32>, vector<8x384xf32> -> vector<8x384xf32>
    %350 = vector.extract_strided_slice %348 {offsets = [0, 0], sizes = [8, 256], strides = [1, 1]} : vector<8x384xf32> to vector<8x256xf32>
    %351 = vector.extract_strided_slice %349 {offsets = [0, 0], sizes = [8, 256], strides = [1, 1]} : vector<8x384xf32> to vector<8x256xf32>
    %352 = arith.addf %350, %351 : vector<8x256xf32>
    %353 = arith.negf %352 : vector<8x256xf32>
    %354 = math.exp %353 : vector<8x256xf32>
    %cst_64 = arith.constant 1.000000e+00 : f32
    %355 = vector.broadcast %cst_64 : f32 to vector<8x256xf32>
    %356 = arith.addf %355, %354 : vector<8x256xf32>
    %357 = arith.divf %355, %356 : vector<8x256xf32>
    %358 = vector.extract_strided_slice %357 {offsets = [0, 0], sizes = [8, 128], strides = [1, 1]} : vector<8x256xf32> to vector<8x128xf32>
    %359 = vector.extract_strided_slice %357 {offsets = [0, 128], sizes = [8, 128], strides = [1, 1]} : vector<8x256xf32> to vector<8x128xf32>
    %360 = vector.extract_strided_slice %348 {offsets = [0, 256], sizes = [8, 128], strides = [1, 1]} : vector<8x384xf32> to vector<8x128xf32>
    %361 = vector.extract_strided_slice %349 {offsets = [0, 256], sizes = [8, 128], strides = [1, 1]} : vector<8x384xf32> to vector<8x128xf32>
    %362 = arith.addf %361, %10 : vector<8x128xf32>
    %363 = arith.mulf %358, %362 : vector<8x128xf32>
    %364 = arith.addf %360, %363 : vector<8x128xf32>
    %365 = math.tanh %364 : vector<8x128xf32>
    %cst_65 = arith.constant 1.000000e+00 : f32
    %366 = vector.broadcast %cst_65 : f32 to vector<8x128xf32>
    %367 = arith.subf %366, %359 : vector<8x128xf32>
    %368 = arith.mulf %367, %365 : vector<8x128xf32>
    %369 = arith.mulf %359, %320 : vector<8x128xf32>
    %370 = arith.addf %368, %369 : vector<8x128xf32>
    %cst_66 = arith.constant dense<0.000000e+00> : vector<8x384xf32>
    %371 = tpu.matmul %320, %12, %cst_66 {dimension_numbers = #tpu.dot_dimension_numbers<[1], [0], [0], [1], [0, 0, 1, 1], [], []>} : vector<8x128xf32>, vector<128x384xf32>, vector<8x384xf32> -> vector<8x384xf32>
    %372 = arith.addf %371, %17 : vector<8x384xf32>
    %cst_67 = arith.constant dense<0.000000e+00> : vector<8x384xf32>
    %373 = tpu.matmul %344, %14, %cst_67 {dimension_numbers = #tpu.dot_dimension_numbers<[1], [0], [0], [1], [0, 0, 1, 1], [], []>} : vector<8x128xf32>, vector<128x384xf32>, vector<8x384xf32> -> vector<8x384xf32>
    %374 = vector.extract_strided_slice %372 {offsets = [0, 0], sizes = [8, 256], strides = [1, 1]} : vector<8x384xf32> to vector<8x256xf32>
    %375 = vector.extract_strided_slice %373 {offsets = [0, 0], sizes = [8, 256], strides = [1, 1]} : vector<8x384xf32> to vector<8x256xf32>
    %376 = arith.addf %374, %375 : vector<8x256xf32>
    %377 = arith.negf %376 : vector<8x256xf32>
    %378 = math.exp %377 : vector<8x256xf32>
    %cst_68 = arith.constant 1.000000e+00 : f32
    %379 = vector.broadcast %cst_68 : f32 to vector<8x256xf32>
    %380 = arith.addf %379, %378 : vector<8x256xf32>
    %381 = arith.divf %379, %380 : vector<8x256xf32>
    %382 = vector.extract_strided_slice %381 {offsets = [0, 0], sizes = [8, 128], strides = [1, 1]} : vector<8x256xf32> to vector<8x128xf32>
    %383 = vector.extract_strided_slice %381 {offsets = [0, 128], sizes = [8, 128], strides = [1, 1]} : vector<8x256xf32> to vector<8x128xf32>
    %384 = vector.extract_strided_slice %372 {offsets = [0, 256], sizes = [8, 128], strides = [1, 1]} : vector<8x384xf32> to vector<8x128xf32>
    %385 = vector.extract_strided_slice %373 {offsets = [0, 256], sizes = [8, 128], strides = [1, 1]} : vector<8x384xf32> to vector<8x128xf32>
    %386 = arith.addf %385, %18 : vector<8x128xf32>
    %387 = arith.mulf %382, %386 : vector<8x128xf32>
    %388 = arith.addf %384, %387 : vector<8x128xf32>
    %389 = math.tanh %388 : vector<8x128xf32>
    %cst_69 = arith.constant 1.000000e+00 : f32
    %390 = vector.broadcast %cst_69 : f32 to vector<8x128xf32>
    %391 = arith.subf %390, %383 : vector<8x128xf32>
    %392 = arith.mulf %391, %389 : vector<8x128xf32>
    %393 = arith.mulf %383, %344 : vector<8x128xf32>
    %394 = arith.addf %392, %393 : vector<8x128xf32>
    %cst_70 = arith.constant dense<0.000000e+00> : vector<8x384xf32>
    %395 = tpu.matmul %370, %12, %cst_70 {dimension_numbers = #tpu.dot_dimension_numbers<[1], [0], [0], [1], [0, 0, 1, 1], [], []>} : vector<8x128xf32>, vector<128x384xf32>, vector<8x384xf32> -> vector<8x384xf32>
    %396 = arith.addf %395, %17 : vector<8x384xf32>
    %cst_71 = arith.constant dense<0.000000e+00> : vector<8x384xf32>
    %397 = tpu.matmul %394, %14, %cst_71 {dimension_numbers = #tpu.dot_dimension_numbers<[1], [0], [0], [1], [0, 0, 1, 1], [], []>} : vector<8x128xf32>, vector<128x384xf32>, vector<8x384xf32> -> vector<8x384xf32>
    %398 = vector.extract_strided_slice %396 {offsets = [0, 0], sizes = [8, 256], strides = [1, 1]} : vector<8x384xf32> to vector<8x256xf32>
    %399 = vector.extract_strided_slice %397 {offsets = [0, 0], sizes = [8, 256], strides = [1, 1]} : vector<8x384xf32> to vector<8x256xf32>
    %400 = arith.addf %398, %399 : vector<8x256xf32>
    %401 = arith.negf %400 : vector<8x256xf32>
    %402 = math.exp %401 : vector<8x256xf32>
    %cst_72 = arith.constant 1.000000e+00 : f32
    %403 = vector.broadcast %cst_72 : f32 to vector<8x256xf32>
    %404 = arith.addf %403, %402 : vector<8x256xf32>
    %405 = arith.divf %403, %404 : vector<8x256xf32>
    %406 = vector.extract_strided_slice %405 {offsets = [0, 0], sizes = [8, 128], strides = [1, 1]} : vector<8x256xf32> to vector<8x128xf32>
    %407 = vector.extract_strided_slice %405 {offsets = [0, 128], sizes = [8, 128], strides = [1, 1]} : vector<8x256xf32> to vector<8x128xf32>
    %408 = vector.extract_strided_slice %396 {offsets = [0, 256], sizes = [8, 128], strides = [1, 1]} : vector<8x384xf32> to vector<8x128xf32>
    %409 = vector.extract_strided_slice %397 {offsets = [0, 256], sizes = [8, 128], strides = [1, 1]} : vector<8x384xf32> to vector<8x128xf32>
    %410 = arith.addf %409, %18 : vector<8x128xf32>
    %411 = arith.mulf %406, %410 : vector<8x128xf32>
    %412 = arith.addf %408, %411 : vector<8x128xf32>
    %413 = math.tanh %412 : vector<8x128xf32>
    %cst_73 = arith.constant 1.000000e+00 : f32
    %414 = vector.broadcast %cst_73 : f32 to vector<8x128xf32>
    %415 = arith.subf %414, %407 : vector<8x128xf32>
    %416 = arith.mulf %415, %413 : vector<8x128xf32>
    %417 = arith.mulf %407, %394 : vector<8x128xf32>
    %418 = arith.addf %416, %417 : vector<8x128xf32>
    %c2 = arith.constant 2 : index
    %c0_74 = arith.constant 0 : index
    %c0_75 = arith.constant 0 : index
    %419 = vector.load %arg1[%c2, %c0_74, %c0_75] : memref<4x128x384xf32, #tpu.memory_space<vmem>>, vector<1x128x384xf32>
    %420 = vector.shape_cast %419 : vector<1x128x384xf32> to vector<128x384xf32>
    %421 = vector.extract_strided_slice %420 {offsets = [0, 0], sizes = [8, 384], strides = [1, 1]} : vector<128x384xf32> to vector<8x384xf32>
    %c2_76 = arith.constant 2 : index
    %c0_77 = arith.constant 0 : index
    %c0_78 = arith.constant 0 : index
    %422 = vector.load %arg2[%c2_76, %c0_77, %c0_78] : memref<4x128x384xf32, #tpu.memory_space<vmem>>, vector<1x128x384xf32>
    %423 = vector.shape_cast %422 : vector<1x128x384xf32> to vector<128x384xf32>
    %c2_79 = arith.constant 2 : index
    %c0_80 = arith.constant 0 : index
    %c0_81 = arith.constant 0 : index
    %424 = vector.load %arg3[%c2_79, %c0_80, %c0_81] : memref<4x8x512xf32, #tpu.memory_space<vmem>>, vector<1x8x512xf32>
    %425 = vector.shape_cast %424 : vector<1x8x512xf32> to vector<8x512xf32>
    %426 = vector.extract_strided_slice %425 {offsets = [0, 0], sizes = [8, 384], strides = [1, 1]} : vector<8x512xf32> to vector<8x384xf32>
    %427 = vector.extract_strided_slice %425 {offsets = [0, 384], sizes = [8, 128], strides = [1, 1]} : vector<8x512xf32> to vector<8x128xf32>
    %c3 = arith.constant 3 : index
    %c0_82 = arith.constant 0 : index
    %c0_83 = arith.constant 0 : index
    %428 = vector.load %arg1[%c3, %c0_82, %c0_83] : memref<4x128x384xf32, #tpu.memory_space<vmem>>, vector<1x128x384xf32>
    %429 = vector.shape_cast %428 : vector<1x128x384xf32> to vector<128x384xf32>
    %c3_84 = arith.constant 3 : index
    %c0_85 = arith.constant 0 : index
    %c0_86 = arith.constant 0 : index
    %430 = vector.load %arg2[%c3_84, %c0_85, %c0_86] : memref<4x128x384xf32, #tpu.memory_space<vmem>>, vector<1x128x384xf32>
    %431 = vector.shape_cast %430 : vector<1x128x384xf32> to vector<128x384xf32>
    %c3_87 = arith.constant 3 : index
    %c0_88 = arith.constant 0 : index
    %c0_89 = arith.constant 0 : index
    %432 = vector.load %arg3[%c3_87, %c0_88, %c0_89] : memref<4x8x512xf32, #tpu.memory_space<vmem>>, vector<1x8x512xf32>
    %433 = vector.shape_cast %432 : vector<1x8x512xf32> to vector<8x512xf32>
    %434 = vector.extract_strided_slice %433 {offsets = [0, 0], sizes = [8, 384], strides = [1, 1]} : vector<8x512xf32> to vector<8x384xf32>
    %435 = vector.extract_strided_slice %433 {offsets = [0, 384], sizes = [8, 128], strides = [1, 1]} : vector<8x512xf32> to vector<8x128xf32>
    %436 = vector.extract_strided_slice %0 {offsets = [0, 0], sizes = [8, 1], strides = [1, 1]} : vector<64x1xf32> to vector<8x1xf32>
    %437 = vector.broadcast %436 : vector<8x1xf32> to vector<8x384xf32>
    %438 = arith.mulf %437, %421 : vector<8x384xf32>
    %439 = arith.addf %438, %426 : vector<8x384xf32>
    %cst_90 = arith.constant dense<0.000000e+00> : vector<8x384xf32>
    %440 = tpu.matmul %370, %423, %cst_90 {dimension_numbers = #tpu.dot_dimension_numbers<[1], [0], [0], [1], [0, 0, 1, 1], [], []>} : vector<8x128xf32>, vector<128x384xf32>, vector<8x384xf32> -> vector<8x384xf32>
    %441 = vector.extract_strided_slice %439 {offsets = [0, 0], sizes = [8, 256], strides = [1, 1]} : vector<8x384xf32> to vector<8x256xf32>
    %442 = vector.extract_strided_slice %440 {offsets = [0, 0], sizes = [8, 256], strides = [1, 1]} : vector<8x384xf32> to vector<8x256xf32>
    %443 = arith.addf %441, %442 : vector<8x256xf32>
    %444 = arith.negf %443 : vector<8x256xf32>
    %445 = math.exp %444 : vector<8x256xf32>
    %cst_91 = arith.constant 1.000000e+00 : f32
    %446 = vector.broadcast %cst_91 : f32 to vector<8x256xf32>
    %447 = arith.addf %446, %445 : vector<8x256xf32>
    %448 = arith.divf %446, %447 : vector<8x256xf32>
    %449 = vector.extract_strided_slice %448 {offsets = [0, 0], sizes = [8, 128], strides = [1, 1]} : vector<8x256xf32> to vector<8x128xf32>
    %450 = vector.extract_strided_slice %448 {offsets = [0, 128], sizes = [8, 128], strides = [1, 1]} : vector<8x256xf32> to vector<8x128xf32>
    %451 = vector.extract_strided_slice %439 {offsets = [0, 256], sizes = [8, 128], strides = [1, 1]} : vector<8x384xf32> to vector<8x128xf32>
    %452 = vector.extract_strided_slice %440 {offsets = [0, 256], sizes = [8, 128], strides = [1, 1]} : vector<8x384xf32> to vector<8x128xf32>
    %453 = arith.addf %452, %427 : vector<8x128xf32>
    %454 = arith.mulf %449, %453 : vector<8x128xf32>
    %455 = arith.addf %451, %454 : vector<8x128xf32>
    %456 = math.tanh %455 : vector<8x128xf32>
    %cst_92 = arith.constant 1.000000e+00 : f32
    %457 = vector.broadcast %cst_92 : f32 to vector<8x128xf32>
    %458 = arith.subf %457, %450 : vector<8x128xf32>
    %459 = arith.mulf %458, %456 : vector<8x128xf32>
    %460 = arith.mulf %450, %370 : vector<8x128xf32>
    %461 = arith.addf %459, %460 : vector<8x128xf32>
    %462 = vector.extract_strided_slice %0 {offsets = [8, 0], sizes = [8, 1], strides = [1, 1]} : vector<64x1xf32> to vector<8x1xf32>
    %463 = vector.broadcast %462 : vector<8x1xf32> to vector<8x384xf32>
    %464 = arith.mulf %463, %421 : vector<8x384xf32>
    %465 = arith.addf %464, %426 : vector<8x384xf32>
    %cst_93 = arith.constant dense<0.000000e+00> : vector<8x384xf32>
    %466 = tpu.matmul %461, %423, %cst_93 {dimension_numbers = #tpu.dot_dimension_numbers<[1], [0], [0], [1], [0, 0, 1, 1], [], []>} : vector<8x128xf32>, vector<128x384xf32>, vector<8x384xf32> -> vector<8x384xf32>
    %467 = vector.extract_strided_slice %465 {offsets = [0, 0], sizes = [8, 256], strides = [1, 1]} : vector<8x384xf32> to vector<8x256xf32>
    %468 = vector.extract_strided_slice %466 {offsets = [0, 0], sizes = [8, 256], strides = [1, 1]} : vector<8x384xf32> to vector<8x256xf32>
    %469 = arith.addf %467, %468 : vector<8x256xf32>
    %470 = arith.negf %469 : vector<8x256xf32>
    %471 = math.exp %470 : vector<8x256xf32>
    %cst_94 = arith.constant 1.000000e+00 : f32
    %472 = vector.broadcast %cst_94 : f32 to vector<8x256xf32>
    %473 = arith.addf %472, %471 : vector<8x256xf32>
    %474 = arith.divf %472, %473 : vector<8x256xf32>
    %475 = vector.extract_strided_slice %474 {offsets = [0, 0], sizes = [8, 128], strides = [1, 1]} : vector<8x256xf32> to vector<8x128xf32>
    %476 = vector.extract_strided_slice %474 {offsets = [0, 128], sizes = [8, 128], strides = [1, 1]} : vector<8x256xf32> to vector<8x128xf32>
    %477 = vector.extract_strided_slice %465 {offsets = [0, 256], sizes = [8, 128], strides = [1, 1]} : vector<8x384xf32> to vector<8x128xf32>
    %478 = vector.extract_strided_slice %466 {offsets = [0, 256], sizes = [8, 128], strides = [1, 1]} : vector<8x384xf32> to vector<8x128xf32>
    %479 = arith.addf %478, %427 : vector<8x128xf32>
    %480 = arith.mulf %475, %479 : vector<8x128xf32>
    %481 = arith.addf %477, %480 : vector<8x128xf32>
    %482 = math.tanh %481 : vector<8x128xf32>
    %cst_95 = arith.constant 1.000000e+00 : f32
    %483 = vector.broadcast %cst_95 : f32 to vector<8x128xf32>
    %484 = arith.subf %483, %476 : vector<8x128xf32>
    %485 = arith.mulf %484, %482 : vector<8x128xf32>
    %486 = arith.mulf %476, %461 : vector<8x128xf32>
    %487 = arith.addf %485, %486 : vector<8x128xf32>
    %cst_96 = arith.constant dense<0.000000e+00> : vector<8x384xf32>
    %488 = tpu.matmul %461, %429, %cst_96 {dimension_numbers = #tpu.dot_dimension_numbers<[1], [0], [0], [1], [0, 0, 1, 1], [], []>} : vector<8x128xf32>, vector<128x384xf32>, vector<8x384xf32> -> vector<8x384xf32>
    %489 = arith.addf %488, %434 : vector<8x384xf32>
    %cst_97 = arith.constant dense<0.000000e+00> : vector<8x384xf32>
    %490 = tpu.matmul %418, %431, %cst_97 {dimension_numbers = #tpu.dot_dimension_numbers<[1], [0], [0], [1], [0, 0, 1, 1], [], []>} : vector<8x128xf32>, vector<128x384xf32>, vector<8x384xf32> -> vector<8x384xf32>
    %491 = vector.extract_strided_slice %489 {offsets = [0, 0], sizes = [8, 256], strides = [1, 1]} : vector<8x384xf32> to vector<8x256xf32>
    %492 = vector.extract_strided_slice %490 {offsets = [0, 0], sizes = [8, 256], strides = [1, 1]} : vector<8x384xf32> to vector<8x256xf32>
    %493 = arith.addf %491, %492 : vector<8x256xf32>
    %494 = arith.negf %493 : vector<8x256xf32>
    %495 = math.exp %494 : vector<8x256xf32>
    %cst_98 = arith.constant 1.000000e+00 : f32
    %496 = vector.broadcast %cst_98 : f32 to vector<8x256xf32>
    %497 = arith.addf %496, %495 : vector<8x256xf32>
    %498 = arith.divf %496, %497 : vector<8x256xf32>
    %499 = vector.extract_strided_slice %498 {offsets = [0, 0], sizes = [8, 128], strides = [1, 1]} : vector<8x256xf32> to vector<8x128xf32>
    %500 = vector.extract_strided_slice %498 {offsets = [0, 128], sizes = [8, 128], strides = [1, 1]} : vector<8x256xf32> to vector<8x128xf32>
    %501 = vector.extract_strided_slice %489 {offsets = [0, 256], sizes = [8, 128], strides = [1, 1]} : vector<8x384xf32> to vector<8x128xf32>
    %502 = vector.extract_strided_slice %490 {offsets = [0, 256], sizes = [8, 128], strides = [1, 1]} : vector<8x384xf32> to vector<8x128xf32>
    %503 = arith.addf %502, %435 : vector<8x128xf32>
    %504 = arith.mulf %499, %503 : vector<8x128xf32>
    %505 = arith.addf %501, %504 : vector<8x128xf32>
    %506 = math.tanh %505 : vector<8x128xf32>
    %cst_99 = arith.constant 1.000000e+00 : f32
    %507 = vector.broadcast %cst_99 : f32 to vector<8x128xf32>
    %508 = arith.subf %507, %500 : vector<8x128xf32>
    %509 = arith.mulf %508, %506 : vector<8x128xf32>
    %510 = arith.mulf %500, %418 : vector<8x128xf32>
    %511 = arith.addf %509, %510 : vector<8x128xf32>
    %512 = vector.extract_strided_slice %0 {offsets = [16, 0], sizes = [8, 1], strides = [1, 1]} : vector<64x1xf32> to vector<8x1xf32>
    %513 = vector.broadcast %512 : vector<8x1xf32> to vector<8x384xf32>
    %514 = arith.mulf %513, %421 : vector<8x384xf32>
    %515 = arith.addf %514, %426 : vector<8x384xf32>
    %cst_100 = arith.constant dense<0.000000e+00> : vector<8x384xf32>
    %516 = tpu.matmul %487, %423, %cst_100 {dimension_numbers = #tpu.dot_dimension_numbers<[1], [0], [0], [1], [0, 0, 1, 1], [], []>} : vector<8x128xf32>, vector<128x384xf32>, vector<8x384xf32> -> vector<8x384xf32>
    %517 = vector.extract_strided_slice %515 {offsets = [0, 0], sizes = [8, 256], strides = [1, 1]} : vector<8x384xf32> to vector<8x256xf32>
    %518 = vector.extract_strided_slice %516 {offsets = [0, 0], sizes = [8, 256], strides = [1, 1]} : vector<8x384xf32> to vector<8x256xf32>
    %519 = arith.addf %517, %518 : vector<8x256xf32>
    %520 = arith.negf %519 : vector<8x256xf32>
    %521 = math.exp %520 : vector<8x256xf32>
    %cst_101 = arith.constant 1.000000e+00 : f32
    %522 = vector.broadcast %cst_101 : f32 to vector<8x256xf32>
    %523 = arith.addf %522, %521 : vector<8x256xf32>
    %524 = arith.divf %522, %523 : vector<8x256xf32>
    %525 = vector.extract_strided_slice %524 {offsets = [0, 0], sizes = [8, 128], strides = [1, 1]} : vector<8x256xf32> to vector<8x128xf32>
    %526 = vector.extract_strided_slice %524 {offsets = [0, 128], sizes = [8, 128], strides = [1, 1]} : vector<8x256xf32> to vector<8x128xf32>
    %527 = vector.extract_strided_slice %515 {offsets = [0, 256], sizes = [8, 128], strides = [1, 1]} : vector<8x384xf32> to vector<8x128xf32>
    %528 = vector.extract_strided_slice %516 {offsets = [0, 256], sizes = [8, 128], strides = [1, 1]} : vector<8x384xf32> to vector<8x128xf32>
    %529 = arith.addf %528, %427 : vector<8x128xf32>
    %530 = arith.mulf %525, %529 : vector<8x128xf32>
    %531 = arith.addf %527, %530 : vector<8x128xf32>
    %532 = math.tanh %531 : vector<8x128xf32>
    %cst_102 = arith.constant 1.000000e+00 : f32
    %533 = vector.broadcast %cst_102 : f32 to vector<8x128xf32>
    %534 = arith.subf %533, %526 : vector<8x128xf32>
    %535 = arith.mulf %534, %532 : vector<8x128xf32>
    %536 = arith.mulf %526, %487 : vector<8x128xf32>
    %537 = arith.addf %535, %536 : vector<8x128xf32>
    %cst_103 = arith.constant dense<0.000000e+00> : vector<8x384xf32>
    %538 = tpu.matmul %487, %429, %cst_103 {dimension_numbers = #tpu.dot_dimension_numbers<[1], [0], [0], [1], [0, 0, 1, 1], [], []>} : vector<8x128xf32>, vector<128x384xf32>, vector<8x384xf32> -> vector<8x384xf32>
    %539 = arith.addf %538, %434 : vector<8x384xf32>
    %cst_104 = arith.constant dense<0.000000e+00> : vector<8x384xf32>
    %540 = tpu.matmul %511, %431, %cst_104 {dimension_numbers = #tpu.dot_dimension_numbers<[1], [0], [0], [1], [0, 0, 1, 1], [], []>} : vector<8x128xf32>, vector<128x384xf32>, vector<8x384xf32> -> vector<8x384xf32>
    %541 = vector.extract_strided_slice %539 {offsets = [0, 0], sizes = [8, 256], strides = [1, 1]} : vector<8x384xf32> to vector<8x256xf32>
    %542 = vector.extract_strided_slice %540 {offsets = [0, 0], sizes = [8, 256], strides = [1, 1]} : vector<8x384xf32> to vector<8x256xf32>
    %543 = arith.addf %541, %542 : vector<8x256xf32>
    %544 = arith.negf %543 : vector<8x256xf32>
    %545 = math.exp %544 : vector<8x256xf32>
    %cst_105 = arith.constant 1.000000e+00 : f32
    %546 = vector.broadcast %cst_105 : f32 to vector<8x256xf32>
    %547 = arith.addf %546, %545 : vector<8x256xf32>
    %548 = arith.divf %546, %547 : vector<8x256xf32>
    %549 = vector.extract_strided_slice %548 {offsets = [0, 0], sizes = [8, 128], strides = [1, 1]} : vector<8x256xf32> to vector<8x128xf32>
    %550 = vector.extract_strided_slice %548 {offsets = [0, 128], sizes = [8, 128], strides = [1, 1]} : vector<8x256xf32> to vector<8x128xf32>
    %551 = vector.extract_strided_slice %539 {offsets = [0, 256], sizes = [8, 128], strides = [1, 1]} : vector<8x384xf32> to vector<8x128xf32>
    %552 = vector.extract_strided_slice %540 {offsets = [0, 256], sizes = [8, 128], strides = [1, 1]} : vector<8x384xf32> to vector<8x128xf32>
    %553 = arith.addf %552, %435 : vector<8x128xf32>
    %554 = arith.mulf %549, %553 : vector<8x128xf32>
    %555 = arith.addf %551, %554 : vector<8x128xf32>
    %556 = math.tanh %555 : vector<8x128xf32>
    %cst_106 = arith.constant 1.000000e+00 : f32
    %557 = vector.broadcast %cst_106 : f32 to vector<8x128xf32>
    %558 = arith.subf %557, %550 : vector<8x128xf32>
    %559 = arith.mulf %558, %556 : vector<8x128xf32>
    %560 = arith.mulf %550, %511 : vector<8x128xf32>
    %561 = arith.addf %559, %560 : vector<8x128xf32>
    %562 = vector.extract_strided_slice %0 {offsets = [24, 0], sizes = [8, 1], strides = [1, 1]} : vector<64x1xf32> to vector<8x1xf32>
    %563 = vector.broadcast %562 : vector<8x1xf32> to vector<8x384xf32>
    %564 = arith.mulf %563, %421 : vector<8x384xf32>
    %565 = arith.addf %564, %426 : vector<8x384xf32>
    %cst_107 = arith.constant dense<0.000000e+00> : vector<8x384xf32>
    %566 = tpu.matmul %537, %423, %cst_107 {dimension_numbers = #tpu.dot_dimension_numbers<[1], [0], [0], [1], [0, 0, 1, 1], [], []>} : vector<8x128xf32>, vector<128x384xf32>, vector<8x384xf32> -> vector<8x384xf32>
    %567 = vector.extract_strided_slice %565 {offsets = [0, 0], sizes = [8, 256], strides = [1, 1]} : vector<8x384xf32> to vector<8x256xf32>
    %568 = vector.extract_strided_slice %566 {offsets = [0, 0], sizes = [8, 256], strides = [1, 1]} : vector<8x384xf32> to vector<8x256xf32>
    %569 = arith.addf %567, %568 : vector<8x256xf32>
    %570 = arith.negf %569 : vector<8x256xf32>
    %571 = math.exp %570 : vector<8x256xf32>
    %cst_108 = arith.constant 1.000000e+00 : f32
    %572 = vector.broadcast %cst_108 : f32 to vector<8x256xf32>
    %573 = arith.addf %572, %571 : vector<8x256xf32>
    %574 = arith.divf %572, %573 : vector<8x256xf32>
    %575 = vector.extract_strided_slice %574 {offsets = [0, 0], sizes = [8, 128], strides = [1, 1]} : vector<8x256xf32> to vector<8x128xf32>
    %576 = vector.extract_strided_slice %574 {offsets = [0, 128], sizes = [8, 128], strides = [1, 1]} : vector<8x256xf32> to vector<8x128xf32>
    %577 = vector.extract_strided_slice %565 {offsets = [0, 256], sizes = [8, 128], strides = [1, 1]} : vector<8x384xf32> to vector<8x128xf32>
    %578 = vector.extract_strided_slice %566 {offsets = [0, 256], sizes = [8, 128], strides = [1, 1]} : vector<8x384xf32> to vector<8x128xf32>
    %579 = arith.addf %578, %427 : vector<8x128xf32>
    %580 = arith.mulf %575, %579 : vector<8x128xf32>
    %581 = arith.addf %577, %580 : vector<8x128xf32>
    %582 = math.tanh %581 : vector<8x128xf32>
    %cst_109 = arith.constant 1.000000e+00 : f32
    %583 = vector.broadcast %cst_109 : f32 to vector<8x128xf32>
    %584 = arith.subf %583, %576 : vector<8x128xf32>
    %585 = arith.mulf %584, %582 : vector<8x128xf32>
    %586 = arith.mulf %576, %537 : vector<8x128xf32>
    %587 = arith.addf %585, %586 : vector<8x128xf32>
    %cst_110 = arith.constant dense<0.000000e+00> : vector<8x384xf32>
    %588 = tpu.matmul %537, %429, %cst_110 {dimension_numbers = #tpu.dot_dimension_numbers<[1], [0], [0], [1], [0, 0, 1, 1], [], []>} : vector<8x128xf32>, vector<128x384xf32>, vector<8x384xf32> -> vector<8x384xf32>
    %589 = arith.addf %588, %434 : vector<8x384xf32>
    %cst_111 = arith.constant dense<0.000000e+00> : vector<8x384xf32>
    %590 = tpu.matmul %561, %431, %cst_111 {dimension_numbers = #tpu.dot_dimension_numbers<[1], [0], [0], [1], [0, 0, 1, 1], [], []>} : vector<8x128xf32>, vector<128x384xf32>, vector<8x384xf32> -> vector<8x384xf32>
    %591 = vector.extract_strided_slice %589 {offsets = [0, 0], sizes = [8, 256], strides = [1, 1]} : vector<8x384xf32> to vector<8x256xf32>
    %592 = vector.extract_strided_slice %590 {offsets = [0, 0], sizes = [8, 256], strides = [1, 1]} : vector<8x384xf32> to vector<8x256xf32>
    %593 = arith.addf %591, %592 : vector<8x256xf32>
    %594 = arith.negf %593 : vector<8x256xf32>
    %595 = math.exp %594 : vector<8x256xf32>
    %cst_112 = arith.constant 1.000000e+00 : f32
    %596 = vector.broadcast %cst_112 : f32 to vector<8x256xf32>
    %597 = arith.addf %596, %595 : vector<8x256xf32>
    %598 = arith.divf %596, %597 : vector<8x256xf32>
    %599 = vector.extract_strided_slice %598 {offsets = [0, 0], sizes = [8, 128], strides = [1, 1]} : vector<8x256xf32> to vector<8x128xf32>
    %600 = vector.extract_strided_slice %598 {offsets = [0, 128], sizes = [8, 128], strides = [1, 1]} : vector<8x256xf32> to vector<8x128xf32>
    %601 = vector.extract_strided_slice %589 {offsets = [0, 256], sizes = [8, 128], strides = [1, 1]} : vector<8x384xf32> to vector<8x128xf32>
    %602 = vector.extract_strided_slice %590 {offsets = [0, 256], sizes = [8, 128], strides = [1, 1]} : vector<8x384xf32> to vector<8x128xf32>
    %603 = arith.addf %602, %435 : vector<8x128xf32>
    %604 = arith.mulf %599, %603 : vector<8x128xf32>
    %605 = arith.addf %601, %604 : vector<8x128xf32>
    %606 = math.tanh %605 : vector<8x128xf32>
    %cst_113 = arith.constant 1.000000e+00 : f32
    %607 = vector.broadcast %cst_113 : f32 to vector<8x128xf32>
    %608 = arith.subf %607, %600 : vector<8x128xf32>
    %609 = arith.mulf %608, %606 : vector<8x128xf32>
    %610 = arith.mulf %600, %561 : vector<8x128xf32>
    %611 = arith.addf %609, %610 : vector<8x128xf32>
    %612 = vector.extract_strided_slice %0 {offsets = [32, 0], sizes = [8, 1], strides = [1, 1]} : vector<64x1xf32> to vector<8x1xf32>
    %613 = vector.broadcast %612 : vector<8x1xf32> to vector<8x384xf32>
    %614 = arith.mulf %613, %421 : vector<8x384xf32>
    %615 = arith.addf %614, %426 : vector<8x384xf32>
    %cst_114 = arith.constant dense<0.000000e+00> : vector<8x384xf32>
    %616 = tpu.matmul %587, %423, %cst_114 {dimension_numbers = #tpu.dot_dimension_numbers<[1], [0], [0], [1], [0, 0, 1, 1], [], []>} : vector<8x128xf32>, vector<128x384xf32>, vector<8x384xf32> -> vector<8x384xf32>
    %617 = vector.extract_strided_slice %615 {offsets = [0, 0], sizes = [8, 256], strides = [1, 1]} : vector<8x384xf32> to vector<8x256xf32>
    %618 = vector.extract_strided_slice %616 {offsets = [0, 0], sizes = [8, 256], strides = [1, 1]} : vector<8x384xf32> to vector<8x256xf32>
    %619 = arith.addf %617, %618 : vector<8x256xf32>
    %620 = arith.negf %619 : vector<8x256xf32>
    %621 = math.exp %620 : vector<8x256xf32>
    %cst_115 = arith.constant 1.000000e+00 : f32
    %622 = vector.broadcast %cst_115 : f32 to vector<8x256xf32>
    %623 = arith.addf %622, %621 : vector<8x256xf32>
    %624 = arith.divf %622, %623 : vector<8x256xf32>
    %625 = vector.extract_strided_slice %624 {offsets = [0, 0], sizes = [8, 128], strides = [1, 1]} : vector<8x256xf32> to vector<8x128xf32>
    %626 = vector.extract_strided_slice %624 {offsets = [0, 128], sizes = [8, 128], strides = [1, 1]} : vector<8x256xf32> to vector<8x128xf32>
    %627 = vector.extract_strided_slice %615 {offsets = [0, 256], sizes = [8, 128], strides = [1, 1]} : vector<8x384xf32> to vector<8x128xf32>
    %628 = vector.extract_strided_slice %616 {offsets = [0, 256], sizes = [8, 128], strides = [1, 1]} : vector<8x384xf32> to vector<8x128xf32>
    %629 = arith.addf %628, %427 : vector<8x128xf32>
    %630 = arith.mulf %625, %629 : vector<8x128xf32>
    %631 = arith.addf %627, %630 : vector<8x128xf32>
    %632 = math.tanh %631 : vector<8x128xf32>
    %cst_116 = arith.constant 1.000000e+00 : f32
    %633 = vector.broadcast %cst_116 : f32 to vector<8x128xf32>
    %634 = arith.subf %633, %626 : vector<8x128xf32>
    %635 = arith.mulf %634, %632 : vector<8x128xf32>
    %636 = arith.mulf %626, %587 : vector<8x128xf32>
    %637 = arith.addf %635, %636 : vector<8x128xf32>
    %cst_117 = arith.constant dense<0.000000e+00> : vector<8x384xf32>
    %638 = tpu.matmul %587, %429, %cst_117 {dimension_numbers = #tpu.dot_dimension_numbers<[1], [0], [0], [1], [0, 0, 1, 1], [], []>} : vector<8x128xf32>, vector<128x384xf32>, vector<8x384xf32> -> vector<8x384xf32>
    %639 = arith.addf %638, %434 : vector<8x384xf32>
    %cst_118 = arith.constant dense<0.000000e+00> : vector<8x384xf32>
    %640 = tpu.matmul %611, %431, %cst_118 {dimension_numbers = #tpu.dot_dimension_numbers<[1], [0], [0], [1], [0, 0, 1, 1], [], []>} : vector<8x128xf32>, vector<128x384xf32>, vector<8x384xf32> -> vector<8x384xf32>
    %641 = vector.extract_strided_slice %639 {offsets = [0, 0], sizes = [8, 256], strides = [1, 1]} : vector<8x384xf32> to vector<8x256xf32>
    %642 = vector.extract_strided_slice %640 {offsets = [0, 0], sizes = [8, 256], strides = [1, 1]} : vector<8x384xf32> to vector<8x256xf32>
    %643 = arith.addf %641, %642 : vector<8x256xf32>
    %644 = arith.negf %643 : vector<8x256xf32>
    %645 = math.exp %644 : vector<8x256xf32>
    %cst_119 = arith.constant 1.000000e+00 : f32
    %646 = vector.broadcast %cst_119 : f32 to vector<8x256xf32>
    %647 = arith.addf %646, %645 : vector<8x256xf32>
    %648 = arith.divf %646, %647 : vector<8x256xf32>
    %649 = vector.extract_strided_slice %648 {offsets = [0, 0], sizes = [8, 128], strides = [1, 1]} : vector<8x256xf32> to vector<8x128xf32>
    %650 = vector.extract_strided_slice %648 {offsets = [0, 128], sizes = [8, 128], strides = [1, 1]} : vector<8x256xf32> to vector<8x128xf32>
    %651 = vector.extract_strided_slice %639 {offsets = [0, 256], sizes = [8, 128], strides = [1, 1]} : vector<8x384xf32> to vector<8x128xf32>
    %652 = vector.extract_strided_slice %640 {offsets = [0, 256], sizes = [8, 128], strides = [1, 1]} : vector<8x384xf32> to vector<8x128xf32>
    %653 = arith.addf %652, %435 : vector<8x128xf32>
    %654 = arith.mulf %649, %653 : vector<8x128xf32>
    %655 = arith.addf %651, %654 : vector<8x128xf32>
    %656 = math.tanh %655 : vector<8x128xf32>
    %cst_120 = arith.constant 1.000000e+00 : f32
    %657 = vector.broadcast %cst_120 : f32 to vector<8x128xf32>
    %658 = arith.subf %657, %650 : vector<8x128xf32>
    %659 = arith.mulf %658, %656 : vector<8x128xf32>
    %660 = arith.mulf %650, %611 : vector<8x128xf32>
    %661 = arith.addf %659, %660 : vector<8x128xf32>
    %662 = vector.extract_strided_slice %0 {offsets = [40, 0], sizes = [8, 1], strides = [1, 1]} : vector<64x1xf32> to vector<8x1xf32>
    %663 = vector.broadcast %662 : vector<8x1xf32> to vector<8x384xf32>
    %664 = arith.mulf %663, %421 : vector<8x384xf32>
    %665 = arith.addf %664, %426 : vector<8x384xf32>
    %cst_121 = arith.constant dense<0.000000e+00> : vector<8x384xf32>
    %666 = tpu.matmul %637, %423, %cst_121 {dimension_numbers = #tpu.dot_dimension_numbers<[1], [0], [0], [1], [0, 0, 1, 1], [], []>} : vector<8x128xf32>, vector<128x384xf32>, vector<8x384xf32> -> vector<8x384xf32>
    %667 = vector.extract_strided_slice %665 {offsets = [0, 0], sizes = [8, 256], strides = [1, 1]} : vector<8x384xf32> to vector<8x256xf32>
    %668 = vector.extract_strided_slice %666 {offsets = [0, 0], sizes = [8, 256], strides = [1, 1]} : vector<8x384xf32> to vector<8x256xf32>
    %669 = arith.addf %667, %668 : vector<8x256xf32>
    %670 = arith.negf %669 : vector<8x256xf32>
    %671 = math.exp %670 : vector<8x256xf32>
    %cst_122 = arith.constant 1.000000e+00 : f32
    %672 = vector.broadcast %cst_122 : f32 to vector<8x256xf32>
    %673 = arith.addf %672, %671 : vector<8x256xf32>
    %674 = arith.divf %672, %673 : vector<8x256xf32>
    %675 = vector.extract_strided_slice %674 {offsets = [0, 0], sizes = [8, 128], strides = [1, 1]} : vector<8x256xf32> to vector<8x128xf32>
    %676 = vector.extract_strided_slice %674 {offsets = [0, 128], sizes = [8, 128], strides = [1, 1]} : vector<8x256xf32> to vector<8x128xf32>
    %677 = vector.extract_strided_slice %665 {offsets = [0, 256], sizes = [8, 128], strides = [1, 1]} : vector<8x384xf32> to vector<8x128xf32>
    %678 = vector.extract_strided_slice %666 {offsets = [0, 256], sizes = [8, 128], strides = [1, 1]} : vector<8x384xf32> to vector<8x128xf32>
    %679 = arith.addf %678, %427 : vector<8x128xf32>
    %680 = arith.mulf %675, %679 : vector<8x128xf32>
    %681 = arith.addf %677, %680 : vector<8x128xf32>
    %682 = math.tanh %681 : vector<8x128xf32>
    %cst_123 = arith.constant 1.000000e+00 : f32
    %683 = vector.broadcast %cst_123 : f32 to vector<8x128xf32>
    %684 = arith.subf %683, %676 : vector<8x128xf32>
    %685 = arith.mulf %684, %682 : vector<8x128xf32>
    %686 = arith.mulf %676, %637 : vector<8x128xf32>
    %687 = arith.addf %685, %686 : vector<8x128xf32>
    %cst_124 = arith.constant dense<0.000000e+00> : vector<8x384xf32>
    %688 = tpu.matmul %637, %429, %cst_124 {dimension_numbers = #tpu.dot_dimension_numbers<[1], [0], [0], [1], [0, 0, 1, 1], [], []>} : vector<8x128xf32>, vector<128x384xf32>, vector<8x384xf32> -> vector<8x384xf32>
    %689 = arith.addf %688, %434 : vector<8x384xf32>
    %cst_125 = arith.constant dense<0.000000e+00> : vector<8x384xf32>
    %690 = tpu.matmul %661, %431, %cst_125 {dimension_numbers = #tpu.dot_dimension_numbers<[1], [0], [0], [1], [0, 0, 1, 1], [], []>} : vector<8x128xf32>, vector<128x384xf32>, vector<8x384xf32> -> vector<8x384xf32>
    %691 = vector.extract_strided_slice %689 {offsets = [0, 0], sizes = [8, 256], strides = [1, 1]} : vector<8x384xf32> to vector<8x256xf32>
    %692 = vector.extract_strided_slice %690 {offsets = [0, 0], sizes = [8, 256], strides = [1, 1]} : vector<8x384xf32> to vector<8x256xf32>
    %693 = arith.addf %691, %692 : vector<8x256xf32>
    %694 = arith.negf %693 : vector<8x256xf32>
    %695 = math.exp %694 : vector<8x256xf32>
    %cst_126 = arith.constant 1.000000e+00 : f32
    %696 = vector.broadcast %cst_126 : f32 to vector<8x256xf32>
    %697 = arith.addf %696, %695 : vector<8x256xf32>
    %698 = arith.divf %696, %697 : vector<8x256xf32>
    %699 = vector.extract_strided_slice %698 {offsets = [0, 0], sizes = [8, 128], strides = [1, 1]} : vector<8x256xf32> to vector<8x128xf32>
    %700 = vector.extract_strided_slice %698 {offsets = [0, 128], sizes = [8, 128], strides = [1, 1]} : vector<8x256xf32> to vector<8x128xf32>
    %701 = vector.extract_strided_slice %689 {offsets = [0, 256], sizes = [8, 128], strides = [1, 1]} : vector<8x384xf32> to vector<8x128xf32>
    %702 = vector.extract_strided_slice %690 {offsets = [0, 256], sizes = [8, 128], strides = [1, 1]} : vector<8x384xf32> to vector<8x128xf32>
    %703 = arith.addf %702, %435 : vector<8x128xf32>
    %704 = arith.mulf %699, %703 : vector<8x128xf32>
    %705 = arith.addf %701, %704 : vector<8x128xf32>
    %706 = math.tanh %705 : vector<8x128xf32>
    %cst_127 = arith.constant 1.000000e+00 : f32
    %707 = vector.broadcast %cst_127 : f32 to vector<8x128xf32>
    %708 = arith.subf %707, %700 : vector<8x128xf32>
    %709 = arith.mulf %708, %706 : vector<8x128xf32>
    %710 = arith.mulf %700, %661 : vector<8x128xf32>
    %711 = arith.addf %709, %710 : vector<8x128xf32>
    %712 = vector.extract_strided_slice %0 {offsets = [48, 0], sizes = [8, 1], strides = [1, 1]} : vector<64x1xf32> to vector<8x1xf32>
    %713 = vector.broadcast %712 : vector<8x1xf32> to vector<8x384xf32>
    %714 = arith.mulf %713, %421 : vector<8x384xf32>
    %715 = arith.addf %714, %426 : vector<8x384xf32>
    %cst_128 = arith.constant dense<0.000000e+00> : vector<8x384xf32>
    %716 = tpu.matmul %687, %423, %cst_128 {dimension_numbers = #tpu.dot_dimension_numbers<[1], [0], [0], [1], [0, 0, 1, 1], [], []>} : vector<8x128xf32>, vector<128x384xf32>, vector<8x384xf32> -> vector<8x384xf32>
    %717 = vector.extract_strided_slice %715 {offsets = [0, 0], sizes = [8, 256], strides = [1, 1]} : vector<8x384xf32> to vector<8x256xf32>
    %718 = vector.extract_strided_slice %716 {offsets = [0, 0], sizes = [8, 256], strides = [1, 1]} : vector<8x384xf32> to vector<8x256xf32>
    %719 = arith.addf %717, %718 : vector<8x256xf32>
    %720 = arith.negf %719 : vector<8x256xf32>
    %721 = math.exp %720 : vector<8x256xf32>
    %cst_129 = arith.constant 1.000000e+00 : f32
    %722 = vector.broadcast %cst_129 : f32 to vector<8x256xf32>
    %723 = arith.addf %722, %721 : vector<8x256xf32>
    %724 = arith.divf %722, %723 : vector<8x256xf32>
    %725 = vector.extract_strided_slice %724 {offsets = [0, 0], sizes = [8, 128], strides = [1, 1]} : vector<8x256xf32> to vector<8x128xf32>
    %726 = vector.extract_strided_slice %724 {offsets = [0, 128], sizes = [8, 128], strides = [1, 1]} : vector<8x256xf32> to vector<8x128xf32>
    %727 = vector.extract_strided_slice %715 {offsets = [0, 256], sizes = [8, 128], strides = [1, 1]} : vector<8x384xf32> to vector<8x128xf32>
    %728 = vector.extract_strided_slice %716 {offsets = [0, 256], sizes = [8, 128], strides = [1, 1]} : vector<8x384xf32> to vector<8x128xf32>
    %729 = arith.addf %728, %427 : vector<8x128xf32>
    %730 = arith.mulf %725, %729 : vector<8x128xf32>
    %731 = arith.addf %727, %730 : vector<8x128xf32>
    %732 = math.tanh %731 : vector<8x128xf32>
    %cst_130 = arith.constant 1.000000e+00 : f32
    %733 = vector.broadcast %cst_130 : f32 to vector<8x128xf32>
    %734 = arith.subf %733, %726 : vector<8x128xf32>
    %735 = arith.mulf %734, %732 : vector<8x128xf32>
    %736 = arith.mulf %726, %687 : vector<8x128xf32>
    %737 = arith.addf %735, %736 : vector<8x128xf32>
    %cst_131 = arith.constant dense<0.000000e+00> : vector<8x384xf32>
    %738 = tpu.matmul %687, %429, %cst_131 {dimension_numbers = #tpu.dot_dimension_numbers<[1], [0], [0], [1], [0, 0, 1, 1], [], []>} : vector<8x128xf32>, vector<128x384xf32>, vector<8x384xf32> -> vector<8x384xf32>
    %739 = arith.addf %738, %434 : vector<8x384xf32>
    %cst_132 = arith.constant dense<0.000000e+00> : vector<8x384xf32>
    %740 = tpu.matmul %711, %431, %cst_132 {dimension_numbers = #tpu.dot_dimension_numbers<[1], [0], [0], [1], [0, 0, 1, 1], [], []>} : vector<8x128xf32>, vector<128x384xf32>, vector<8x384xf32> -> vector<8x384xf32>
    %741 = vector.extract_strided_slice %739 {offsets = [0, 0], sizes = [8, 256], strides = [1, 1]} : vector<8x384xf32> to vector<8x256xf32>
    %742 = vector.extract_strided_slice %740 {offsets = [0, 0], sizes = [8, 256], strides = [1, 1]} : vector<8x384xf32> to vector<8x256xf32>
    %743 = arith.addf %741, %742 : vector<8x256xf32>
    %744 = arith.negf %743 : vector<8x256xf32>
    %745 = math.exp %744 : vector<8x256xf32>
    %cst_133 = arith.constant 1.000000e+00 : f32
    %746 = vector.broadcast %cst_133 : f32 to vector<8x256xf32>
    %747 = arith.addf %746, %745 : vector<8x256xf32>
    %748 = arith.divf %746, %747 : vector<8x256xf32>
    %749 = vector.extract_strided_slice %748 {offsets = [0, 0], sizes = [8, 128], strides = [1, 1]} : vector<8x256xf32> to vector<8x128xf32>
    %750 = vector.extract_strided_slice %748 {offsets = [0, 128], sizes = [8, 128], strides = [1, 1]} : vector<8x256xf32> to vector<8x128xf32>
    %751 = vector.extract_strided_slice %739 {offsets = [0, 256], sizes = [8, 128], strides = [1, 1]} : vector<8x384xf32> to vector<8x128xf32>
    %752 = vector.extract_strided_slice %740 {offsets = [0, 256], sizes = [8, 128], strides = [1, 1]} : vector<8x384xf32> to vector<8x128xf32>
    %753 = arith.addf %752, %435 : vector<8x128xf32>
    %754 = arith.mulf %749, %753 : vector<8x128xf32>
    %755 = arith.addf %751, %754 : vector<8x128xf32>
    %756 = math.tanh %755 : vector<8x128xf32>
    %cst_134 = arith.constant 1.000000e+00 : f32
    %757 = vector.broadcast %cst_134 : f32 to vector<8x128xf32>
    %758 = arith.subf %757, %750 : vector<8x128xf32>
    %759 = arith.mulf %758, %756 : vector<8x128xf32>
    %760 = arith.mulf %750, %711 : vector<8x128xf32>
    %761 = arith.addf %759, %760 : vector<8x128xf32>
    %762 = vector.extract_strided_slice %0 {offsets = [56, 0], sizes = [8, 1], strides = [1, 1]} : vector<64x1xf32> to vector<8x1xf32>
    %763 = vector.broadcast %762 : vector<8x1xf32> to vector<8x384xf32>
    %764 = arith.mulf %763, %421 : vector<8x384xf32>
    %765 = arith.addf %764, %426 : vector<8x384xf32>
    %cst_135 = arith.constant dense<0.000000e+00> : vector<8x384xf32>
    %766 = tpu.matmul %737, %423, %cst_135 {dimension_numbers = #tpu.dot_dimension_numbers<[1], [0], [0], [1], [0, 0, 1, 1], [], []>} : vector<8x128xf32>, vector<128x384xf32>, vector<8x384xf32> -> vector<8x384xf32>
    %767 = vector.extract_strided_slice %765 {offsets = [0, 0], sizes = [8, 256], strides = [1, 1]} : vector<8x384xf32> to vector<8x256xf32>
    %768 = vector.extract_strided_slice %766 {offsets = [0, 0], sizes = [8, 256], strides = [1, 1]} : vector<8x384xf32> to vector<8x256xf32>
    %769 = arith.addf %767, %768 : vector<8x256xf32>
    %770 = arith.negf %769 : vector<8x256xf32>
    %771 = math.exp %770 : vector<8x256xf32>
    %cst_136 = arith.constant 1.000000e+00 : f32
    %772 = vector.broadcast %cst_136 : f32 to vector<8x256xf32>
    %773 = arith.addf %772, %771 : vector<8x256xf32>
    %774 = arith.divf %772, %773 : vector<8x256xf32>
    %775 = vector.extract_strided_slice %774 {offsets = [0, 0], sizes = [8, 128], strides = [1, 1]} : vector<8x256xf32> to vector<8x128xf32>
    %776 = vector.extract_strided_slice %774 {offsets = [0, 128], sizes = [8, 128], strides = [1, 1]} : vector<8x256xf32> to vector<8x128xf32>
    %777 = vector.extract_strided_slice %765 {offsets = [0, 256], sizes = [8, 128], strides = [1, 1]} : vector<8x384xf32> to vector<8x128xf32>
    %778 = vector.extract_strided_slice %766 {offsets = [0, 256], sizes = [8, 128], strides = [1, 1]} : vector<8x384xf32> to vector<8x128xf32>
    %779 = arith.addf %778, %427 : vector<8x128xf32>
    %780 = arith.mulf %775, %779 : vector<8x128xf32>
    %781 = arith.addf %777, %780 : vector<8x128xf32>
    %782 = math.tanh %781 : vector<8x128xf32>
    %cst_137 = arith.constant 1.000000e+00 : f32
    %783 = vector.broadcast %cst_137 : f32 to vector<8x128xf32>
    %784 = arith.subf %783, %776 : vector<8x128xf32>
    %785 = arith.mulf %784, %782 : vector<8x128xf32>
    %786 = arith.mulf %776, %737 : vector<8x128xf32>
    %787 = arith.addf %785, %786 : vector<8x128xf32>
    %cst_138 = arith.constant dense<0.000000e+00> : vector<8x384xf32>
    %788 = tpu.matmul %737, %429, %cst_138 {dimension_numbers = #tpu.dot_dimension_numbers<[1], [0], [0], [1], [0, 0, 1, 1], [], []>} : vector<8x128xf32>, vector<128x384xf32>, vector<8x384xf32> -> vector<8x384xf32>
    %789 = arith.addf %788, %434 : vector<8x384xf32>
    %cst_139 = arith.constant dense<0.000000e+00> : vector<8x384xf32>
    %790 = tpu.matmul %761, %431, %cst_139 {dimension_numbers = #tpu.dot_dimension_numbers<[1], [0], [0], [1], [0, 0, 1, 1], [], []>} : vector<8x128xf32>, vector<128x384xf32>, vector<8x384xf32> -> vector<8x384xf32>
    %791 = vector.extract_strided_slice %789 {offsets = [0, 0], sizes = [8, 256], strides = [1, 1]} : vector<8x384xf32> to vector<8x256xf32>
    %792 = vector.extract_strided_slice %790 {offsets = [0, 0], sizes = [8, 256], strides = [1, 1]} : vector<8x384xf32> to vector<8x256xf32>
    %793 = arith.addf %791, %792 : vector<8x256xf32>
    %794 = arith.negf %793 : vector<8x256xf32>
    %795 = math.exp %794 : vector<8x256xf32>
    %cst_140 = arith.constant 1.000000e+00 : f32
    %796 = vector.broadcast %cst_140 : f32 to vector<8x256xf32>
    %797 = arith.addf %796, %795 : vector<8x256xf32>
    %798 = arith.divf %796, %797 : vector<8x256xf32>
    %799 = vector.extract_strided_slice %798 {offsets = [0, 0], sizes = [8, 128], strides = [1, 1]} : vector<8x256xf32> to vector<8x128xf32>
    %800 = vector.extract_strided_slice %798 {offsets = [0, 128], sizes = [8, 128], strides = [1, 1]} : vector<8x256xf32> to vector<8x128xf32>
    %801 = vector.extract_strided_slice %789 {offsets = [0, 256], sizes = [8, 128], strides = [1, 1]} : vector<8x384xf32> to vector<8x128xf32>
    %802 = vector.extract_strided_slice %790 {offsets = [0, 256], sizes = [8, 128], strides = [1, 1]} : vector<8x384xf32> to vector<8x128xf32>
    %803 = arith.addf %802, %435 : vector<8x128xf32>
    %804 = arith.mulf %799, %803 : vector<8x128xf32>
    %805 = arith.addf %801, %804 : vector<8x128xf32>
    %806 = math.tanh %805 : vector<8x128xf32>
    %cst_141 = arith.constant 1.000000e+00 : f32
    %807 = vector.broadcast %cst_141 : f32 to vector<8x128xf32>
    %808 = arith.subf %807, %800 : vector<8x128xf32>
    %809 = arith.mulf %808, %806 : vector<8x128xf32>
    %810 = arith.mulf %800, %761 : vector<8x128xf32>
    %811 = arith.addf %809, %810 : vector<8x128xf32>
    %cst_142 = arith.constant dense<0.000000e+00> : vector<8x384xf32>
    %812 = tpu.matmul %787, %429, %cst_142 {dimension_numbers = #tpu.dot_dimension_numbers<[1], [0], [0], [1], [0, 0, 1, 1], [], []>} : vector<8x128xf32>, vector<128x384xf32>, vector<8x384xf32> -> vector<8x384xf32>
    %813 = arith.addf %812, %434 : vector<8x384xf32>
    %cst_143 = arith.constant dense<0.000000e+00> : vector<8x384xf32>
    %814 = tpu.matmul %811, %431, %cst_143 {dimension_numbers = #tpu.dot_dimension_numbers<[1], [0], [0], [1], [0, 0, 1, 1], [], []>} : vector<8x128xf32>, vector<128x384xf32>, vector<8x384xf32> -> vector<8x384xf32>
    %815 = vector.extract_strided_slice %813 {offsets = [0, 0], sizes = [8, 256], strides = [1, 1]} : vector<8x384xf32> to vector<8x256xf32>
    %816 = vector.extract_strided_slice %814 {offsets = [0, 0], sizes = [8, 256], strides = [1, 1]} : vector<8x384xf32> to vector<8x256xf32>
    %817 = arith.addf %815, %816 : vector<8x256xf32>
    %818 = arith.negf %817 : vector<8x256xf32>
    %819 = math.exp %818 : vector<8x256xf32>
    %cst_144 = arith.constant 1.000000e+00 : f32
    %820 = vector.broadcast %cst_144 : f32 to vector<8x256xf32>
    %821 = arith.addf %820, %819 : vector<8x256xf32>
    %822 = arith.divf %820, %821 : vector<8x256xf32>
    %823 = vector.extract_strided_slice %822 {offsets = [0, 0], sizes = [8, 128], strides = [1, 1]} : vector<8x256xf32> to vector<8x128xf32>
    %824 = vector.extract_strided_slice %822 {offsets = [0, 128], sizes = [8, 128], strides = [1, 1]} : vector<8x256xf32> to vector<8x128xf32>
    %825 = vector.extract_strided_slice %813 {offsets = [0, 256], sizes = [8, 128], strides = [1, 1]} : vector<8x384xf32> to vector<8x128xf32>
    %826 = vector.extract_strided_slice %814 {offsets = [0, 256], sizes = [8, 128], strides = [1, 1]} : vector<8x384xf32> to vector<8x128xf32>
    %827 = arith.addf %826, %435 : vector<8x128xf32>
    %828 = arith.mulf %823, %827 : vector<8x128xf32>
    %829 = arith.addf %825, %828 : vector<8x128xf32>
    %830 = math.tanh %829 : vector<8x128xf32>
    %cst_145 = arith.constant 1.000000e+00 : f32
    %831 = vector.broadcast %cst_145 : f32 to vector<8x128xf32>
    %832 = arith.subf %831, %824 : vector<8x128xf32>
    %833 = arith.mulf %832, %830 : vector<8x128xf32>
    %834 = arith.mulf %824, %811 : vector<8x128xf32>
    %835 = arith.addf %833, %834 : vector<8x128xf32>
    %836 = tpu.concatenate %511, %561, %611, %661, %711, %761, %811, %835 in 0 : vector<8x128xf32>, vector<8x128xf32>, vector<8x128xf32>, vector<8x128xf32>, vector<8x128xf32>, vector<8x128xf32>, vector<8x128xf32>, vector<8x128xf32> -> vector<64x128xf32>
    %c0_146 = arith.constant 0 : index
    %c0_147 = arith.constant 0 : index
    %837 = vector.load %arg4[%c0_146, %c0_147] : memref<128x128xf32, #tpu.memory_space<vmem>>, vector<128x128xf32>
    %cst_148 = arith.constant dense<0.000000e+00> : vector<64x128xf32>
    %838 = tpu.matmul %836, %837, %cst_148 {dimension_numbers = #tpu.dot_dimension_numbers<[1], [0], [0], [1], [0, 0, 1, 1], [], []>} : vector<64x128xf32>, vector<128x128xf32>, vector<64x128xf32> -> vector<64x128xf32>
    %c0_149 = arith.constant 0 : index
    %c0_150 = arith.constant 0 : index
    %839 = vector.load %arg5[%c0_149, %c0_150] : memref<1x128xf32, #tpu.memory_space<vmem>>, vector<1x128xf32>
    %840 = vector.broadcast %839 : vector<1x128xf32> to vector<64x128xf32>
    %841 = arith.addf %838, %840 : vector<64x128xf32>
    %c0_151 = arith.constant 0 : index
    %c0_152 = arith.constant 0 : index
    %842 = vector.load %arg6[%c0_151, %c0_152] : memref<64x128xf32, #tpu.memory_space<vmem>>, vector<64x128xf32>
    tpu.vector_store %arg6[%c0_151, %c0_152], %841 {strides = array<i32>} : memref<64x128xf32, #tpu.memory_space<vmem>>, vector<64x128xf32>,
    %843 = tpu.concatenate %370, %418 in 0 : vector<8x128xf32>, vector<8x128xf32> -> vector<16x128xf32>
    %c0_153 = arith.constant 0 : index
    %c0_154 = arith.constant 0 : index
    %844 = vector.load %arg7[%c0_153, %c0_154] : memref<16x128xf32, #tpu.memory_space<vmem>>, vector<16x128xf32>
    tpu.vector_store %arg7[%c0_153, %c0_154], %843 {strides = array<i32>} : memref<16x128xf32, #tpu.memory_space<vmem>>, vector<16x128xf32>,
    return
  }
}

</mosaic_0001>

<bundles_post_ra>
// kernel: seq2seq_forward.1
= control target key start
LH: loop header
LB: loop body
LE: loop exit
PB: predicated region body
PF: predicated region fallthrough
CT: control target
= control target key end

     0   :  { %13 = vsyncpa [#allocation3], 0  ;;  %s16780_s0 = inlined_call_operand.vmem [shape: f32[64,1], index: 0, kind: input, shape index: {}]   ;;  %s16781_s1 = inlined_call_operand.hbm [shape: f32[4,128,384], index: 1, kind: input, shape index: {}]   ;;  %s16782_s2 = inlined_call_operand.hbm [shape: f32[4,128,384], index: 2, kind: input, shape index: {}]   ;;  %s16783_s3 = inlined_call_operand.hbm [shape: f32[4,8,512], index: 3, kind: input, shape index: {}]   ;;  %s16784_s4 = inlined_call_operand.hbm [shape: f32[128,128], index: 4, kind: input, shape index: {}]   ;;  %s16785_s5 = inlined_call_operand.vmem [shape: f32[1,128], index: 5, kind: input, shape index: {}]   ;;  %s16786_s6 = inlined_call_operand.vmem [shape: f32[64,128], index: 6, kind: output, shape index: {0}]   ;;  %s16787_s7 = inlined_call_operand.vmem [shape: f32[16,128], index: 7, kind: output, shape index: {1}]  }
   0x1   :  { %14 = vsyncpa [#allocation5], 0 }
   0x2   :  { %15 = vsyncpa [#allocation8], 0  ;;  %s14051_s24 = smov [#allocation4]   ;;  %s14052_s26 = smov [#allocation2]  }
   0x3   :  { %s35_s25 = sshll.u32 %s14051_s24, 4  ;;  %s23_s27 = sshll.u32 %s14052_s26, 4  ;;  %s36_s25 = int_to_ptr.vmem [resolvable:$true] %s35_s25  ;;  %s14105_s27 = int_to_ptr.vmem [resolvable:$true] %s23_s27 }
   0x4   :  { %s13957_s30 = scalar_lea.hbm %s16782_s2, 24576 }
   0x5   :  { %p13958_p0 = scmp.ne.s32.totalorder %s16782_s2, %s13957_s30  ;;  %p13961_p1 = scmp.lt.u32.totalorder %s13957_s30, %s16782_s2 }
   0x7   :  { %p13963_p2 = pnand %p13961_p1, %p13958_p0 }
   0x9   :  { %13966 = shalt.err (!%p13963_p2)
}
   0xa   :  { %s13967_s12 = scalar_lea.vmem %s36_s25, 24576  ;;  %p13972_p4 = scmp.lt.s32.totalorder %s36_s25, %s36_s25 }
   0xb   :  { %p13968_p3 = scmp.ne.s32.totalorder %s36_s25, %s13967_s12  ;;  %p13973_p5 = scmp.lt.s32.totalorder %s13967_s12, %s13967_s12 }
   0xd   :  { %p13974_p6 = por %p13973_p5, %p13972_p4 }
   0xf   :  { %p13975_p7 = pnand %p13974_p6, %p13968_p3 }
  0x11   :  { %13978 = shalt.err (!%p13975_p7)
}
  0x12   :  { %s14053_s13 = smov 384   ;;  %s14054_s14 = smov 24  }
  0x13   :  { %41 = dma.hbm_to_vmem [thread:$0]  %s16782_s2, 24576, %s36_s25, [#allocation5], %s14053_s13, %s14053_s13, %s14054_s14  }
  0x14   :  { %s13979_s19 = scalar_lea.hbm %s16781_s1, 24576 }
  0x15   :  { %p13980_p8 = scmp.ne.s32.totalorder %s16781_s1, %s13979_s19  ;;  %p13983_p9 = scmp.lt.u32.totalorder %s13979_s19, %s16781_s1 }
  0x17   :  { %p13985_p10 = pnand %p13983_p9, %p13980_p8 }
  0x19   :  { %13988 = shalt.err (!%p13985_p10)
}
  0x1a   :  { %s13989_s24 = scalar_lea.vmem %s14105_s27, 24576  ;;  %p13994_p12 = scmp.lt.s32.totalorder %s14105_s27, %s14105_s27 }
  0x1b   :  { %p13990_p11 = scmp.ne.s32.totalorder %s14105_s27, %s13989_s24  ;;  %p13995_p13 = scmp.lt.s32.totalorder %s13989_s24, %s13989_s24 }
  0x1d   :  { %p13996_p0 = por %p13995_p13, %p13994_p12 }
  0x1f   :  { %p13997_p1 = pnand %p13996_p0, %p13990_p11 }
  0x21   :  { %14000 = shalt.err (!%p13997_p1)
}
  0x22   :  { %29 = dma.hbm_to_vmem [thread:$0]  %s16781_s1, 24576, %s14105_s27, [#allocation3], %s14053_s13, %s14053_s13, %s14054_s14  }
  0x23   :  { %s14055_s26 = smov [#allocation6]   ;;  %s14001_s8 = scalar_lea.hbm %s16783_s3, 2048 }
  0x24   :  { %s47_s28 = sshll.u32 %s14055_s26, 4  ;;  %p14002_p2 = scmp.ne.s32.totalorder %s16783_s3, %s14001_s8  ;;  %s48_s28 = int_to_ptr.vmem [resolvable:$true] %s47_s28 }
  0x25   :  { %p14005_p3 = scmp.lt.u32.totalorder %s14001_s8, %s16783_s3 }
  0x27   :  { %p14007_p4 = pnand %p14005_p3, %p14002_p2 }
  0x29   :  { %14010 = shalt.err (!%p14007_p4)
}
  0x2a   :  { %s14011_s15 = scalar_lea.vmem %s48_s28, 2048  ;;  %p14016_p6 = scmp.lt.s32.totalorder %s48_s28, %s48_s28 }
  0x2b   :  { %p14012_p5 = scmp.ne.s32.totalorder %s48_s28, %s14011_s15  ;;  %p14017_p7 = scmp.lt.s32.totalorder %s14011_s15, %s14011_s15 }
  0x2d   :  { %p14018_p8 = por %p14017_p7, %p14016_p6 }
  0x2f   :  { %p14019_p9 = pnand %p14018_p8, %p14012_p5 }
  0x31   :  { %14022 = shalt.err (!%p14019_p9)
}
  0x32   :  { %s14056_s1 = smov 512   ;;  %s14057_s27 = smov 32  }
  0x33   :  { %53 = dma.hbm_to_vmem [thread:$0]  %s16783_s3, 2048, %s48_s28, [#allocation5], %s14056_s1, %s14056_s1, %s14057_s27  }
  0x34   :  { %s14058_s16 = smov [#allocation7]   ;;  %s14023_s20 = scalar_lea.hbm %s16784_s4, 2048 }
  0x35   :  { %s59_s17 = sshll.u32 %s14058_s16, 4  ;;  %p14024_p10 = scmp.ne.s32.totalorder %s16784_s4, %s14023_s20  ;;  %s60_s17 = int_to_ptr.vmem [resolvable:$true] %s59_s17 }
  0x36   :  { %p14027_p11 = scmp.lt.u32.totalorder %s14023_s20, %s16784_s4 }
  0x38   :  { %p14029_p12 = pnand %p14027_p11, %p14024_p10 }
  0x3a   :  { %14032 = shalt.err (!%p14029_p12)
}
  0x3b   :  { %s14033_s2 = scalar_lea.vmem %s60_s17, 2048  ;;  %p14038_p0 = scmp.lt.s32.totalorder %s60_s17, %s60_s17 }
  0x3c   :  { %p14034_p13 = scmp.ne.s32.totalorder %s60_s17, %s14033_s2  ;;  %p14039_p1 = scmp.lt.s32.totalorder %s14033_s2, %s14033_s2 }
  0x3e   :  { %p14040_p2 = por %p14039_p1, %p14038_p0 }
  0x40   :  { %p14041_p3 = pnand %p14040_p2, %p14034_p13 }
  0x42   :  { %14044 = shalt.err (!%p14041_p3)
}
  0x43   :  { %s14059_s3 = smov 128   ;;  %s14060_s25 = smov 8  }
  0x44   :  { %65 = dma.hbm_to_vmem [thread:$0]  %s16784_s4, 2048, %s60_s17, [#allocation8], %s14059_s3, %s14059_s3, %s14060_s25  }
  0x45   :  { %14045 = dma.done.wait [#allocation3], 24576  }
  0x46   :  { %14046 = vsyncadd [#allocation3], 4294942720 }
  0x47   :  { %14047 = dma.done.wait [#allocation5], 26624  }
  0x48   :  { %14048 = vsyncadd [#allocation5], 4294940672 }
  0x49   :  { %14049 = dma.done.wait [#allocation8], 2048  }
  0x4a   :  { %14050 = vsyncadd [#allocation8], 4294965248  ;;  %v16788_v0 = vmov 0.0   ;;  %v14062_v1 = vmov 0   ;;  %v92_v2 = vld [vmem:[#allocation4 + $0x8] sm:$0xff]  ;;  %v95_v3 = vld [vmem:[#allocation4 + $0x20] sm:$0xff] }
  0x4b   :  { %321 = vmatprep.mubr.f32.mxu1 %v16788_v0  ;;  %13591 = vset.pattern.permute.xlu0 %v14062_v1  ;;  %v91_v4 = vld [vmem:[#allocation4] sm:$0xff]  ;;  %v14162_v5 = vpack.c.bf16 %v95_v3, %v92_v2  ;;  %v94_v6 = vld [vmem:[#allocation4 + $0x18] sm:$0xff]  ;;  %v101_v8 = vld [vmem:[#allocation4 + $0x50] sm:$0xff]  ;;  %v16846_v57 = vmov 0.0|0.0   ;;  %vm14064_vm0 = vmmov 0  }
  0x4c   :  { %495 = vmatprep.mubr.f32.mxu0 %v16788_v0  ;;  %13592 = vset.pattern.permute.xlu1 %v14062_v1  ;;  %v98_v7 = vld [vmem:[#allocation4 + $0x38] sm:$0xff]  ;;  %v14164_v9 = vpack.c.bf16 %v94_v6, %v91_v4  ;;  %v97_v11 = vld [vmem:[#allocation4 + $0x30] sm:$0xff]  ;;  %v100_v12 = vld [vmem:[#allocation4 + $0x48] sm:$0xff] }
  0x4d   :  { %17108 = vst [vmem:[#allocation12_spill] sm:$0xff] %v14162_v5  ;;  %v14166_v10 = vpack.c.bf16 %v101_v8, %v98_v7  ;;  %v104_v13 = vld [vmem:[#allocation4 + $0x68] sm:$0xff]  ;;  %10794 = vmatprep.subr.bf16.mxu1 %v14162_v5  ;;  %v107_v14 = vld [vmem:[#allocation4 + $0x80] sm:$0xff]  ;;  %10850 = vmatprep.subr.bf16.mxu0 %v14162_v5  ;;  %v14171_v15 = vpack.c.bf16 %v100_v12, %v97_v11  ;;  %v106_v18 = vld [vmem:[#allocation4 + $0x78] sm:$0xff] }
  0x4e   :  { %17109 = vst [vmem:[#allocation13_spill] sm:$0xff] %v14164_v9  ;;  %10796 = vmatpush1.bf16.msra.mxu1 %v14164_v9  ;;  %10852 = vmatpush1.bf16.msra.mxu0 %v14164_v9  ;;  %v14175_v16 = vpack.c.bf16 %v107_v14, %v104_v13  ;;  %v103_v17 = vld [vmem:[#allocation4 + $0x60] sm:$0xff]  ;;  %v110_v19 = vld [vmem:[#allocation4 + $0x98] sm:$0xff]  ;;  %v113_v20 = vld [vmem:[#allocation4 + $0xb0] sm:$0xff] }
  0x4f   :  { %17110 = vst [vmem:[#allocation14_spill] sm:$0xff] %v14166_v10  ;;  %17111 = vst [vmem:[#allocation15_spill] sm:$0xff] %v14171_v15  ;;  %10798 = vmatprep.subr.bf16.mxu1 %v14166_v10  ;;  %10854 = vmatprep.subr.bf16.mxu0 %v14166_v10  ;;  %v14179_v21 = vpack.c.bf16 %v106_v18, %v103_v17  ;;  %v14183_v22 = vpack.c.bf16 %v113_v20, %v110_v19  ;;  %v109_v23 = vld [vmem:[#allocation4 + $0x90] sm:$0xff]  ;;  %v112_v24 = vld [vmem:[#allocation4 + $0xa8] sm:$0xff] }
  0x50   :  { %17112 = vst [vmem:[#allocation16_spill] sm:$0xff] %v14175_v16  ;;  %v116_v25 = vld [vmem:[#allocation4 + $0xc8] sm:$0xff]  ;;  %v119_v26 = vld [vmem:[#allocation4 + $0xe0] sm:$0xff]  ;;  %v14187_v27 = vpack.c.bf16 %v112_v24, %v109_v23  ;;  %v118_v30 = vld [vmem:[#allocation4 + $0xd8] sm:$0xff] }
  0x51   :  { %17113 = vst [vmem:[#allocation17_spill] sm:$0xff] %v14179_v21  ;;  %17114 = vst [vmem:[#allocation18_spill] sm:$0xff] %v14183_v22  ;;  %v14191_v28 = vpack.c.bf16 %v119_v26, %v116_v25  ;;  %v115_v29 = vld [vmem:[#allocation4 + $0xc0] sm:$0xff]  ;;  %v122_v31 = vld [vmem:[#allocation4 + $0xf8] sm:$0xff] }
  0x52   :  { %10800 = vmatpush1.bf16.msra.mxu1 %v14171_v15  ;;  %10856 = vmatpush1.bf16.msra.mxu0 %v14171_v15  ;;  %17115 = vst [vmem:[#allocation19_spill] sm:$0xff] %v14187_v27  ;;  %v125_v32 = vld [vmem:[#allocation4 + $0x110] sm:$0xff]  ;;  %v14195_v33 = vpack.c.bf16 %v118_v30, %v115_v29  ;;  %v80_v34 = vld [vmem:[%s16780_s0] sm:$0xff]  ;;  %v124_v37 = vld [vmem:[#allocation4 + $0x108] sm:$0xff] }
  0x53   :  { %10802 = vmatprep.subr.bf16.mxu1 %v14175_v16  ;;  %10858 = vmatprep.subr.bf16.mxu0 %v14175_v16  ;;  %17116 = vst [vmem:[#allocation20_spill] sm:$0xff] %v14191_v28  ;;  %v14202_v35 = vpack.c.bf16 %v125_v32, %v122_v31  ;;  %v121_v36 = vld [vmem:[#allocation4 + $0xf0] sm:$0xff]  ;;  %v128_v38 = vld [vmem:[#allocation4 + $0x128] sm:$0xff]  ;;  %v131_v39 = vld [vmem:[#allocation4 + $0x140] sm:$0xff] }
  0x54   :  { %17117 = vst [vmem:[#allocation21_spill] sm:$0xff] %v14195_v33  ;;  %248 = vperm.xlu0 %13591, %v80_v34   ;;  %v81_v40 = vld [vmem:[%s16780_s0 + $0x8] sm:$0xff]  ;;  %v14209_v41 = vpack.c.bf16 %v124_v37, %v121_v36  ;;  %v14213_v42 = vpack.c.bf16 %v131_v39, %v128_v38  ;;  %v127_v43 = vld [vmem:[#allocation4 + $0x120] sm:$0xff]  ;;  %v130_v44 = vld [vmem:[#allocation4 + $0x138] sm:$0xff] }
  0x55   :  { %17118 = vst [vmem:[#allocation22_spill] sm:$0xff] %v14202_v35  ;;  %v134_v45 = vld [vmem:[#allocation4 + $0x158] sm:$0xff]  ;;  %v137_v46 = vld [vmem:[#allocation4 + $0x170] sm:$0xff]  ;;  %v84_v47 = vld [vmem:[%s16780_s0 + $0x20] sm:$0xff]  ;;  %v14220_v48 = vpack.c.bf16 %v130_v44, %v127_v43 }
  0x56   :  { %10804 = vmatpush1.bf16.msra.mxu1 %v14179_v21  ;;  %10860 = vmatpush1.bf16.msra.mxu0 %v14179_v21  ;;  %17119 = vst [vmem:[#allocation23_spill] sm:$0xff] %v14209_v41  ;;  %17120 = vst [vmem:[#allocation24_spill] sm:$0xff] %v14213_v42  ;;  %v14224_v49 = vpack.c.bf16 %v137_v46, %v134_v45  ;;  %v133_v50 = vld [vmem:[#allocation4 + $0x150] sm:$0xff]  ;;  %v136_v51 = vld [vmem:[#allocation4 + $0x168] sm:$0xff] }
  0x57   :  { %10806 = vmatprep.subr.bf16.mxu1 %v14183_v22  ;;  %10862 = vmatprep.subr.bf16.mxu0 %v14183_v22  ;;  %17121 = vst [vmem:[#allocation25_spill] sm:$0xff] %v14220_v48  ;;  %v86_v52 = vld [vmem:[%s16780_s0 + $0x30] sm:$0xff]  ;;  %v14231_v53 = vpack.c.bf16 %v136_v51, %v133_v50  ;;  %v96_v55 = vld [vmem:[#allocation4 + $0x28] sm:$0xff]  ;;  %v99_v58 = vld [vmem:[#allocation4 + $0x40] sm:$0xff] }
  0x58   :  { %422 = vperm.xlu0 %13591, %v81_v40   ;;  %17122 = vst [vmem:[#allocation26_spill] sm:$0xff] %v14224_v49  ;;  %v93_v54 = vld [vmem:[#allocation4 + $0x10] sm:$0xff]  ;;  %v102_v59 = vld [vmem:[#allocation4 + $0x58] sm:$0xff]  ;;  %v108_v62 = vld [vmem:[#allocation4 + $0x88] sm:$0xff] }
  0x59   :  { %17123 = vst [vmem:[#allocation27_spill] sm:$0xff] %v14231_v53  ;;  %v14237_v56 = vpack.c.bf16 %v96_v55, %v93_v54  ;;  %v14243_v60 = vpack.c.bf16 %v102_v59, %v99_v58  ;;  %v105_v61 = vld [vmem:[#allocation4 + $0x70] sm:$0xff]  ;;  %v111_v1 = vld [vmem:[#allocation4 + $0xa0] sm:$0xff]  ;;  %v114_v2 = vld [vmem:[#allocation4 + $0xb8] sm:$0xff] }
  0x5a   :  { %10808 = vmatpush1.bf16.msra.mxu1 %v14187_v27  ;;  %10864 = vmatpush1.bf16.msra.mxu0 %v14187_v27  ;;  %v14249_v63 = vpack.c.bf16 %v108_v62, %v105_v61  ;;  %v14253_v3 = vpack.c.bf16 %v114_v2, %v111_v1  ;;  %v117_v4 = vld [vmem:[#allocation4 + $0xd0] sm:$0xff]  ;;  %v120_v6 = vld [vmem:[#allocation4 + $0xe8] sm:$0xff]  ;;  %v123_v8 = vld [vmem:[#allocation4 + $0x100] sm:$0xff] }
  0x5b   :  { %10810 = vmatprep.subr.bf16.mxu1 %v14191_v28  ;;  %10866 = vmatprep.subr.bf16.mxu0 %v14191_v28  ;;  %17124 = vst [vmem:[#allocation28_spill] sm:$0xff] %v14237_v56  ;;  %17125 = vst [vmem:[#allocation29_spill] sm:$0xff] %v14243_v60  ;;  %v14257_v7 = vpack.c.bf16 %v120_v6, %v117_v4  ;;  %v126_v11 = vld [vmem:[#allocation4 + $0x118] sm:$0xff]  ;;  %v129_v13 = vld [vmem:[#allocation4 + $0x130] sm:$0xff] }
  0x5c   :  { %1856 = vperm.xlu0 %13591, %v84_v47   ;;  %17126 = vst [vmem:[#allocation30_spill] sm:$0xff] %v14249_v63  ;;  %17127 = vst [vmem:[#allocation31_spill] sm:$0xff] %v14253_v3  ;;  %v14261_v12 = vpack.c.bf16 %v126_v11, %v123_v8  ;;  %v132_v14 = vld [vmem:[#allocation4 + $0x148] sm:$0xff]  ;;  %v135_v18 = vld [vmem:[#allocation4 + $0x160] sm:$0xff] }
  0x5d   :  { %17128 = vst [vmem:[#allocation32_spill] sm:$0xff] %v14257_v7  ;;  %v14265_v17 = vpack.c.bf16 %v132_v14, %v129_v13  ;;  %v138_v19 = vld [vmem:[#allocation4 + $0x178] sm:$0xff]  ;;  %v145_v23 = vld [vmem:[#allocation2 + $0x188] sm:$0xff]  ;;  %v148_v24 = vld [vmem:[#allocation2 + $0x1a0] sm:$0xff] }
  0x5e   :  { %10812 = vmatpush1.bf16.msra.mxu1 %v14195_v33  ;;  %10868 = vmatpush1.bf16.msra.mxu0 %v14195_v33  ;;  %17129 = vst [vmem:[#allocation33_spill] sm:$0xff] %v14261_v12  ;;  %v14269_v20 = vpack.c.bf16 %v138_v19, %v135_v18  ;;  %v14293_v25 = vpack.c.bf16 %v148_v24, %v145_v23  ;;  %v14296_v26 = vld [vmem:[#allocation2] sm:$0xff]  ;;  %v14305_v34 = vld [vmem:[#allocation2 + $0x8] sm:$0xff]  ;;  %v14314_v54 = vld [vmem:[#allocation6 + $0x18] sm:$0xff] }
  0x5f   :  { %10814 = vmatprep.subr.bf16.mxu1 %v14202_v35  ;;  %10870 = vmatprep.subr.bf16.mxu0 %v14202_v35  ;;  %17130 = vst [vmem:[#allocation34_spill] sm:$0xff] %v14265_v17  ;;  %17133 = vst [vmem:[#allocation37_spill] sm:$0xff] %v14296_v26  ;;  %v14302_v31 = vld [vmem:[#allocation6] sm:$0xff]  ;;  %v14309_v43 = vld [vmem:[#allocation6 + $0x8] sm:$0xff] }
  0x60   :  { %2812 = vperm.xlu0 %13591, %v86_v52   ;;  %17131 = vst [vmem:[#allocation35_spill] sm:$0xff] %v14269_v20  ;;  %17132 = vst [vmem:[#allocation36_spill] sm:$0xff] %v14293_v25  ;;  %v14312_v52 = vld [vmem:[#allocation2 + $0x10] sm:$0xff]  ;;  %v144_v13 = vld [vmem:[#allocation2 + $0x180] sm:$0xff] }
  0x61   :  { %17135 = vst [vmem:[#allocation39_spill] sm:$0xff] %v14302_v31  ;;  %17136 = vst [vmem:[#allocation40_spill] sm:$0xff] %v14305_v34  ;;  %v14318_v59 = vld [vmem:[#allocation6 + $0x10] sm:$0xff]  ;;  %v147_v18 = vld [vmem:[#allocation2 + $0x198] sm:$0xff] }
  0x62   :  { %10816 = vmatpush1.bf16.msra.mxu1 %v14209_v41  ;;  %10872 = vmatpush1.bf16.msra.mxu0 %v14209_v41  ;;  %v146_v19 = vld [vmem:[#allocation2 + $0x190] sm:$0xff]  ;;  %v149_v23 = vld [vmem:[#allocation2 + $0x1a8] sm:$0xff] }
  0x63   :  { %10818 = vmatprep.subr.bf16.mxu1 %v14213_v42  ;;  %10874 = vmatprep.subr.bf16.mxu0 %v14213_v42 }
  0x66   :  { %10820 = vmatpush1.bf16.msra.mxu1 %v14220_v48  ;;  %10876 = vmatpush1.bf16.msra.mxu0 %v14220_v48 }
  0x67   :  { %10822 = vmatprep.subr.bf16.mxu1 %v14224_v49  ;;  %10878 = vmatprep.subr.bf16.mxu0 %v14224_v49 }
  0x6a   :  { %10824 = vmatpush1.bf16.msra.mxu1 %v14231_v53  ;;  %10880 = vmatpush1.bf16.msra.mxu0 %v14231_v53 }
  0x6b   :  { %10825 = vmatprep.subr.bf16.mxu1 %v16846_v57  ;;  %10906 = vmatprep.subr.bf16.mxu0 %v14293_v25 }
  0x6d   :  { %322 = vmatmul.mubr.f32.vlgmr.msra.gmra.mrb[0].mxu1 %v16788_v0 }
  0x6e   :  { %10827 = vmatpush3.bf16.msra.mxu1 %v14237_v56  ;;  %9101 = vmatprep.mubr.msk.f32.mxu1 %vm14064_vm0, %v16788_v0 }
  0x6f   :  { %10828 = vmatprep.subr.bf16.mxu1 %v16846_v57 }
  0x72   :  { %10830 = vmatpush3.bf16.msra.mxu1 %v14243_v60 }
  0x73   :  { %10831 = vmatprep.subr.bf16.mxu1 %v16846_v57 }
  0x76   :  { %10833 = vmatpush3.bf16.msra.mxu1 %v14249_v63 }
  0x77   :  { %10834 = vmatprep.subr.bf16.mxu1 %v16846_v57 }
  0x7a   :  { %10836 = vmatpush3.bf16.msra.mxu1 %v14253_v3 }
  0x7b   :  { %10837 = vmatprep.subr.bf16.mxu1 %v16846_v57 }
  0x7e   :  { %10839 = vmatpush3.bf16.msra.mxu1 %v14257_v7 }
  0x7f   :  { %10840 = vmatprep.subr.bf16.mxu1 %v16846_v57 }
  0x82   :  { %10842 = vmatpush3.bf16.msra.mxu1 %v14261_v12 }
  0x83   :  { %10843 = vmatprep.subr.bf16.mxu1 %v16846_v57 }
  0x86   :  { %10845 = vmatpush3.bf16.msra.mxu1 %v14265_v17 }
  0x87   :  { %10846 = vmatprep.subr.bf16.mxu1 %v16846_v57 }
  0x8a   :  { %10848 = vmatpush3.bf16.msra.mxu1 %v14269_v20 }
  0x8b   :  { %10881 = vmatprep.subr.bf16.mxu1 %v16846_v57 }
  0x8d   :  { %9102 = vmatmul.mubr.f32.vlgmr.msra.gmra.mrb[2].mxu1 %v16788_v0 }
  0x8e   :  { %10883 = vmatpush3.bf16.msra.mxu1 %v14237_v56  ;;  %9136 = vmatprep.mubr.msk.f32.mxu1 %vm14064_vm0, %v16788_v0 }
  0x8f   :  { %10884 = vmatprep.subr.bf16.mxu1 %v16846_v57 }
  0x92   :  { %10886 = vmatpush3.bf16.msra.mxu1 %v14243_v60 }
  0x93   :  { %10887 = vmatprep.subr.bf16.mxu1 %v16846_v57 }
  0x96   :  { %10889 = vmatpush3.bf16.msra.mxu1 %v14249_v63 }
  0x97   :  { %10890 = vmatprep.subr.bf16.mxu1 %v16846_v57 }
  0x9a   :  { %10892 = vmatpush3.bf16.msra.mxu1 %v14253_v3 }
  0x9b   :  { %10893 = vmatprep.subr.bf16.mxu1 %v16846_v57 }
  0x9e   :  { %10895 = vmatpush3.bf16.msra.mxu1 %v14257_v7 }
  0x9f   :  { %10896 = vmatprep.subr.bf16.mxu1 %v16846_v57 }
  0xa2   :  { %10898 = vmatpush3.bf16.msra.mxu1 %v14261_v12 }
  0xa3   :  { %10899 = vmatprep.subr.bf16.mxu1 %v16846_v57 }
  0xa6   :  { %10901 = vmatpush3.bf16.msra.mxu1 %v14265_v17 }
  0xa7   :  { %10902 = vmatprep.subr.bf16.mxu1 %v16846_v57 }
  0xaa   :  { %10904 = vmatpush3.bf16.msra.mxu1 %v14269_v20 }
  0xab   :  { %10937 = vmatprep.subr.bf16.mxu1 %v16846_v57 }
  0xd3   :  { %v14298_v29 = vpop.permute.xlu0 %248 }
  0xd4   :  { %17134 = vst [vmem:[#allocation38_spill] sm:$0xff] %v14298_v29  ;;  %v251_v30 = vmul.f32 %v14298_v29, %v14296_v26  ;;  %v252_v39 = vmul.f32 %v14298_v29, %v14305_v34  ;;  %v253_v58 = vmul.f32 %v14298_v29, %v14312_v52  ;;  %v190_v29 = vld [vmem:[#allocation2 + $0x2f0] sm:$0xff] }
  0xd6   :  { %v254_v32 = vadd.f32 %v251_v30, %v14302_v31  ;;  %v255_v44 = vadd.f32 %v252_v39, %v14309_v43  ;;  %v256_v4 = vadd.f32 %v253_v58, %v14318_v59  ;;  %v151_v30 = vld [vmem:[#allocation2 + $0x1b8] sm:$0xff]  ;;  %v14324_v39 = vpack.c.bf16 %v149_v23, %v146_v19  ;;  %v165_v23 = vld [vmem:[#allocation2 + $0x228] sm:$0xff] }
 0x140   :  { %v323_v36 = vpop.f32.mrb[0].mxu1 }
 0x141   :  { %v398_v37 = vadd.f32 %v323_v36, %v254_v32  ;;  %v325_v38 = vpop.f32.mrb[1].mxu1  ;;  %v154_v32 = vld [vmem:[#allocation2 + $0x1d0] sm:$0xff] }
 0x142   :  { %v399_v45 = vadd.f32 %v325_v38, %v255_v44  ;;  %v14322_v38 = vpack.c.bf16 %v147_v18, %v144_v13  ;;  %v162_v18 = vld [vmem:[#allocation2 + $0x210] sm:$0xff] }
 0x143   :  { %v8164_v40 = vmul.f32 -1.442695, %v398_v37 }
 0x144   :  { %v8165_v46 = vmul.f32 -1.442695, %v399_v45  ;;  %v14328_v45 = vpack.c.bf16 %v154_v32, %v151_v30  ;;  %v167_v30 = vld [vmem:[#allocation2 + $0x238] sm:$0xff]  ;;  %v169_v32 = vld [vmem:[#allocation2 + $0x248] sm:$0xff] }
 0x145   :  { %13593 = vpow2.f32 %v8164_v40  ;;  %v150_v40 = vld [vmem:[#allocation2 + $0x1b0] sm:$0xff] }
 0x146   :  { %13595 = vpow2.f32 %v8165_v46  ;;  %v153_v46 = vld [vmem:[#allocation2 + $0x1c8] sm:$0xff] }
 0x147   :  { %v14334_v58 = vpack.c.bf16 %v153_v46, %v150_v40  ;;  %v168_v46 = vld [vmem:[#allocation2 + $0x240] sm:$0xff] }
 0x14f   :  { %v13594_v47 = vpop.eup %13593 }
 0x150   :  { %v406_v50 = vadd.f32 1.0, %v13594_v47  ;;  %v13596_v51 = vpop.eup %13595  ;;  %v152_v47 = vld [vmem:[#allocation2 + $0x1c0] sm:$0xff] }
 0x151   :  { %v407_v55 = vadd.f32 1.0, %v13596_v51  ;;  %v157_v51 = vld [vmem:[#allocation2 + $0x1e8] sm:$0xff] }
 0x152   :  { %13597 = vrcp.f32 %v406_v50  ;;  %v155_v50 = vld [vmem:[#allocation2 + $0x1d8] sm:$0xff] }
 0x153   :  { %13599 = vrcp.f32 %v407_v55  ;;  %v160_v55 = vld [vmem:[#allocation2 + $0x200] sm:$0xff] }
 0x15c   :  { %v13598_v2 = vpop.eup %13597 }
 0x15d   :  { %v13600_v11 = vpop.eup %13599 }
 0x15e   :  { %v416_v14 = vsub.f32 1.0, %v13600_v11  ;;  %v418_v37 = vmul.f32 0.0, %v13600_v11  ;;  %v166_v11 = vld [vmem:[#allocation2 + $0x230] sm:$0xff] }
 0x160   :  { %v394_v61 = vpop.f32.mrb[2].mxu1 }
 0x161   :  { %v412_v62 = vadd.f32 %v394_v61, %v14314_v54  ;;  %v9103_v1 = vpop.f32.mrb[3].mxu1  ;;  %v14336_v61 = vpack.c.bf16 %v155_v50, %v152_v47  ;;  %v171_v50 = vld [vmem:[#allocation2 + $0x258] sm:$0xff] }
 0x162   :  { %v14340_v1 = vpack.c.bf16 %v160_v55, %v157_v51  ;;  %v170_v51 = vld [vmem:[#allocation2 + $0x250] sm:$0xff]  ;;  %v173_v55 = vld [vmem:[#allocation2 + $0x268] sm:$0xff] }
 0x163   :  { %v413_v6 = vmul.f32 %v13598_v2, %v412_v62  ;;  %v156_v62 = vld [vmem:[#allocation2 + $0x1e0] sm:$0xff]  ;;  %v159_v2 = vld [vmem:[#allocation2 + $0x1f8] sm:$0xff] }
 0x164   :  { %v14347_v13 = vpack.c.bf16 %v159_v2, %v156_v62  ;;  %v175_v62 = vld [vmem:[#allocation2 + $0x278] sm:$0xff]  ;;  %v178_v2 = vld [vmem:[#allocation2 + $0x290] sm:$0xff] }
 0x165   :  { %v414_v8 = vadd.f32 %v413_v6, %v256_v4  ;;  %v158_v4 = vld [vmem:[#allocation2 + $0x1f0] sm:$0xff]  ;;  %v161_v6 = vld [vmem:[#allocation2 + $0x208] sm:$0xff] }
 0x167   :  { %13601 = vtanh.f32 %v414_v8  ;;  %v163_v8 = vld [vmem:[#allocation2 + $0x218] sm:$0xff] }
 0x168   :  { %v14353_v19 = vpack.c.bf16 %v166_v11, %v163_v8  ;;  %v174_v8 = vld [vmem:[#allocation2 + $0x270] sm:$0xff]  ;;  %v14373_v11 = vpack.c.bf16 %v178_v2, %v175_v62  ;;  %v185_v2 = vld [vmem:[#allocation2 + $0x2c8] sm:$0xff] }
 0x169   :  { %v182_v62 = vld [vmem:[#allocation2 + $0x2b0] sm:$0xff] }
 0x16a   :  { %17140 = vst [vmem:[#allocation44_spill] sm:$0xff] %v14373_v11 }
 0x171   :  { %v13602_v24 = vpop.eup %13601 }
 0x172   :  { %v417_v36 = vmul.f32 %v13602_v24, %v416_v14  ;;  %v14349_v14 = vpack.c.bf16 %v161_v6, %v158_v4  ;;  %v164_v24 = vld [vmem:[#allocation2 + $0x220] sm:$0xff]  ;;  %v14367_v4 = vpack.c.bf16 %v171_v50, %v168_v46  ;;  %v14369_v6 = vpack.c.bf16 %v173_v55, %v170_v51  ;;  %v183_v55 = vld [vmem:[#allocation2 + $0x2b8] sm:$0xff] }
 0x173   :  { %v14359_v40 = vpack.c.bf16 %v167_v30, %v164_v24  ;;  %v179_v24 = vld [vmem:[#allocation2 + $0x298] sm:$0xff]  ;;  %v181_v30 = vld [vmem:[#allocation2 + $0x2a8] sm:$0xff]  ;;  %v180_v50 = vld [vmem:[#allocation2 + $0x2a0] sm:$0xff] }
 0x174   :  { %v14326_v44 = vadd.f32 %v418_v37, %v417_v36  ;;  %v172_v36 = vld [vmem:[#allocation2 + $0x260] sm:$0xff]  ;;  %v14357_v37 = vpack.c.bf16 %v165_v23, %v162_v18  ;;  %17138 = vst [vmem:[#allocation42_spill] sm:$0xff] %v14367_v4  ;;  %17139 = vst [vmem:[#allocation43_spill] sm:$0xff] %v14369_v6  ;;  %v177_v18 = vld [vmem:[#allocation2 + $0x288] sm:$0xff] }
 0x175   :  { %v14363_v47 = vpack.c.bf16 %v172_v36, %v169_v32  ;;  %v176_v23 = vld [vmem:[#allocation2 + $0x280] sm:$0xff]  ;;  %v14377_v36 = vpack.c.bf16 %v177_v18, %v174_v8  ;;  %v14387_v8 = vpack.c.bf16 %v183_v55, %v180_v50  ;;  %v14389_v18 = vpack.c.bf16 %v185_v2, %v182_v62  ;;  %v195_v2 = vld [vmem:[#allocation4 + $0x190] sm:$0xff] }
 0x176   :  { %496 = vmatmul.mubr.f32.vlgmr.msra.gmra.mrb[0].mxu0 %v14326_v44  ;;  %9137 = vmatmul.mubr.f32.vlgmr.msra.gmra.mrb[4].mxu1 %v14326_v44  ;;  %v184_v32 = vld [vmem:[#allocation2 + $0x2c0] sm:$0xff]  ;;  %v14379_v46 = vpack.c.bf16 %v179_v24, %v176_v23  ;;  %v186_v23 = vld [vmem:[#allocation2 + $0x2d0] sm:$0xff] }
 0x177   :  { %10908 = vmatpush1.bf16.msra.mxu0 %v14322_v38  ;;  %10939 = vmatpush3.bf16.msra.mxu1 %v14324_v39  ;;  %17137 = vst [vmem:[#allocation41_spill] sm:$0xff] %v14363_v47  ;;  %17141 = vst [vmem:[#allocation45_spill] sm:$0xff] %v14377_v36  ;;  %v14383_v51 = vpack.c.bf16 %v184_v32, %v181_v30  ;;  %v189_v30 = vld [vmem:[#allocation2 + $0x2e8] sm:$0xff]  ;;  %v188_v32 = vld [vmem:[#allocation2 + $0x2e0] sm:$0xff] }
 0x178   :  { %10910 = vmatprep.subr.bf16.mxu0 %v14328_v45  ;;  %10940 = vmatprep.subr.bf16.mxu1 %v16846_v57  ;;  %17142 = vst [vmem:[#allocation46_spill] sm:$0xff] %v14379_v46  ;;  %17144 = vst [vmem:[#allocation48_spill] sm:$0xff] %v14387_v8  ;;  %v14397_v50 = vpack.c.bf16 %v189_v30, %v186_v23  ;;  %v193_v62 = vld [vmem:[#allocation4 + $0x180] sm:$0xff] }
 0x179   :  { %658 = vmatprep.mubr.f32.mxu0 %v16788_v0  ;;  %9171 = vmatprep.mubr.msk.f32.mxu1 %vm14064_vm0, %v16788_v0  ;;  %17143 = vst [vmem:[#allocation47_spill] sm:$0xff] %v14383_v51  ;;  %v187_v0 = vld [vmem:[#allocation2 + $0x2d8] sm:$0xff]  ;;  %17145 = vst [vmem:[#allocation49_spill] sm:$0xff] %v14389_v18 }
 0x17a   :  { %v14393_v24 = vpack.c.bf16 %v190_v29, %v187_v0  ;;  %17147 = vst [vmem:[#allocation51_spill] sm:$0xff] %v14397_v50  ;;  %v196_v29 = vld [vmem:[#allocation4 + $0x198] sm:$0xff] }
 0x17b   :  { %10912 = vmatpush1.bf16.msra.mxu0 %v14334_v58  ;;  %10942 = vmatpush3.bf16.msra.mxu1 %v14336_v61  ;;  %v14407_v23 = vpack.c.bf16 %v196_v29, %v193_v62  ;;  %v208_v29 = vld [vmem:[#allocation4 + $0x1f8] sm:$0xff] }
 0x17c   :  { %10914 = vmatprep.subr.bf16.mxu0 %v14340_v1  ;;  %10943 = vmatprep.subr.bf16.mxu1 %v16846_v57  ;;  %17146 = vst [vmem:[#allocation50_spill] sm:$0xff] %v14393_v24 }
 0x17d   :  { %17150 = vst [vmem:[#allocation54_spill] sm:$0xff] %v14407_v23 }
 0x17f   :  { %10916 = vmatpush1.bf16.msra.mxu0 %v14347_v13  ;;  %10945 = vmatpush3.bf16.msra.mxu1 %v14349_v14 }
 0x180   :  { %10918 = vmatprep.subr.bf16.mxu0 %v14353_v19  ;;  %10946 = vmatprep.subr.bf16.mxu1 %v16846_v57 }
 0x183   :  { %10920 = vmatpush1.bf16.msra.mxu0 %v14357_v37  ;;  %10948 = vmatpush3.bf16.msra.mxu1 %v14359_v40 }
 0x184   :  { %10922 = vmatprep.subr.bf16.mxu0 %v14363_v47  ;;  %10949 = vmatprep.subr.bf16.mxu1 %v16846_v57  ;;  %v17156_v47 = vmov 0.0  }
 0x187   :  { %10924 = vmatpush1.bf16.msra.mxu0 %v14367_v4  ;;  %10951 = vmatpush3.bf16.msra.mxu1 %v14369_v6  ;;  %v194_v6 = vld [vmem:[#allocation4 + $0x188] sm:$0xff]  ;;  %v197_v4 = vld [vmem:[#allocation4 + $0x1a0] sm:$0xff] }
 0x188   :  { %10926 = vmatprep.subr.bf16.mxu0 %v14373_v11  ;;  %10952 = vmatprep.subr.bf16.mxu1 %v16846_v57  ;;  %v191_v11 = vld [vmem:[#allocation2 + $0x2f8] sm:$0xff]  ;;  %v14403_v0 = vpack.c.bf16 %v197_v4, %v194_v6  ;;  %v202_v4 = vld [vmem:[#allocation4 + $0x1c8] sm:$0xff]  ;;  %v201_v6 = vld [vmem:[#allocation4 + $0x1c0] sm:$0xff] }
 0x189   :  { %v14399_v55 = vpack.c.bf16 %v191_v11, %v188_v32  ;;  %v199_v11 = vld [vmem:[#allocation4 + $0x1b0] sm:$0xff] }
 0x18a   :  { %17149 = vst [vmem:[#allocation53_spill] sm:$0xff] %v14403_v0  ;;  %v14418_v62 = vpack.c.bf16 %v202_v4, %v199_v11  ;;  %v211_v11 = vld [vmem:[#allocation4 + $0x210] sm:$0xff]  ;;  %v214_v4 = vld [vmem:[#allocation4 + $0x228] sm:$0xff] }
 0x18b   :  { %10928 = vmatpush1.bf16.msra.mxu0 %v14377_v36  ;;  %10954 = vmatpush3.bf16.msra.mxu1 %v14379_v46  ;;  %17148 = vst [vmem:[#allocation52_spill] sm:$0xff] %v14399_v55  ;;  %v200_v46 = vld [vmem:[#allocation4 + $0x1b8] sm:$0xff]  ;;  %v203_v36 = vld [vmem:[#allocation4 + $0x1d0] sm:$0xff] }
 0x18c   :  { %10930 = vmatprep.subr.bf16.mxu0 %v14383_v51  ;;  %10955 = vmatprep.subr.bf16.mxu1 %v16846_v57  ;;  %v198_v51 = vld [vmem:[#allocation4 + $0x1a8] sm:$0xff]  ;;  %v14412_v32 = vpack.c.bf16 %v203_v36, %v200_v46  ;;  %17153 = vst [vmem:[#allocation57_spill] sm:$0xff] %v14418_v62 }
 0x18d   :  { %v14409_v30 = vpack.c.bf16 %v198_v51, %v195_v2  ;;  %v205_v51 = vld [vmem:[#allocation4 + $0x1e0] sm:$0xff]  ;;  %v207_v2 = vld [vmem:[#allocation4 + $0x1f0] sm:$0xff] }
 0x18e   :  { %17152 = vst [vmem:[#allocation56_spill] sm:$0xff] %v14412_v32 }
 0x18f   :  { %10932 = vmatpush1.bf16.msra.mxu0 %v14387_v8  ;;  %10957 = vmatpush3.bf16.msra.mxu1 %v14389_v18  ;;  %17151 = vst [vmem:[#allocation55_spill] sm:$0xff] %v14409_v30  ;;  %v206_v18 = vld [vmem:[#allocation4 + $0x1e8] sm:$0xff]  ;;  %v209_v8 = vld [vmem:[#allocation4 + $0x200] sm:$0xff] }
 0x190   :  { %10934 = vmatprep.subr.bf16.mxu0 %v14393_v24  ;;  %10958 = vmatprep.subr.bf16.mxu1 %v16846_v57  ;;  %v204_v24 = vld [vmem:[#allocation4 + $0x1d8] sm:$0xff]  ;;  %v14424_v46 = vpack.c.bf16 %v209_v8, %v206_v18 }
 0x191   :  { %v14421_v36 = vpack.c.bf16 %v204_v24, %v201_v6  ;;  %v14431_v24 = vpack.c.bf16 %v208_v29, %v205_v51  ;;  %v213_v6 = vld [vmem:[#allocation4 + $0x220] sm:$0xff]  ;;  %v14441_v51 = vpack.c.bf16 %v214_v4, %v211_v11  ;;  %v223_v4 = vld [vmem:[#allocation4 + $0x270] sm:$0xff] }
 0x192   :  { %17155 = vst [vmem:[#allocation59_spill] sm:$0xff] %v14424_v46  ;;  %v217_v29 = vld [vmem:[#allocation4 + $0x240] sm:$0xff] }
 0x193   :  { %10936 = vmatpush1.bf16.msra.mxu0 %v14397_v50  ;;  %10960 = vmatpush3.bf16.msra.mxu1 %v14399_v55  ;;  %17154 = vst [vmem:[#allocation58_spill] sm:$0xff] %v14421_v36  ;;  %v212_v55 = vld [vmem:[#allocation4 + $0x218] sm:$0xff]  ;;  %v215_v50 = vld [vmem:[#allocation4 + $0x230] sm:$0xff]  ;;  %17157 = vst [vmem:[#allocation60_spill] sm:$0xff] %v14431_v24 }
 0x194   :  { %10962 = vmatprep.subr.bf16.mxu0 %v14403_v0  ;;  %10993 = vmatprep.subr.bf16.mxu1 %v16846_v57  ;;  %v210_v0 = vld [vmem:[#allocation4 + $0x208] sm:$0xff]  ;;  %v14437_v18 = vpack.c.bf16 %v215_v50, %v212_v55  ;;  %17160 = vst [vmem:[#allocation63_spill] sm:$0xff] %v14441_v51  ;;  %v220_v55 = vld [vmem:[#allocation4 + $0x258] sm:$0xff] }
 0x195   :  { %v14434_v8 = vpack.c.bf16 %v210_v0, %v207_v2  ;;  %v219_v2 = vld [vmem:[#allocation4 + $0x250] sm:$0xff]  ;;  %v14451_v11 = vpack.c.bf16 %v220_v55, %v217_v29  ;;  %v229_v55 = vld [vmem:[#allocation4 + $0x2a0] sm:$0xff] }
 0x196   :  { %659 = vmatmul.mubr.f32.vlgmr.msra.gmra.mrb[2].mxu0 %v14326_v44  ;;  %9172 = vmatmul.mubr.f32.vlgmr.msra.gmra.mrb[6].mxu1 %v14326_v44  ;;  %17159 = vst [vmem:[#allocation62_spill] sm:$0xff] %v14437_v18 }
 0x197   :  { %10964 = vmatpush1.bf16.msra.mxu0 %v14407_v23  ;;  %10995 = vmatpush3.bf16.msra.mxu1 %v14409_v30  ;;  %17158 = vst [vmem:[#allocation61_spill] sm:$0xff] %v14434_v8  ;;  %v218_v30 = vld [vmem:[#allocation4 + $0x248] sm:$0xff]  ;;  %v221_v23 = vld [vmem:[#allocation4 + $0x260] sm:$0xff]  ;;  %17163 = vst [vmem:[#allocation66_spill] sm:$0xff] %v14451_v11 }
 0x198   :  { %10966 = vmatprep.subr.bf16.mxu0 %v14412_v32  ;;  %10996 = vmatprep.subr.bf16.mxu1 %v16846_v57  ;;  %v216_v32 = vld [vmem:[#allocation4 + $0x238] sm:$0xff]  ;;  %v14447_v50 = vpack.c.bf16 %v221_v23, %v218_v30  ;;  %v226_v30 = vld [vmem:[#allocation4 + $0x288] sm:$0xff] }
 0x199   :  { %799 = vmatprep.mubr.f32.mxu0 %v17156_v47  ;;  %9206 = vmatprep.mubr.msk.f32.mxu1 %vm14064_vm0, %v17156_v47  ;;  %v14444_v0 = vpack.c.bf16 %v216_v32, %v213_v6  ;;  %v225_v6 = vld [vmem:[#allocation4 + $0x280] sm:$0xff]  ;;  %v14461_v29 = vpack.c.bf16 %v226_v30, %v223_v4  ;;  %v235_v30 = vld [vmem:[#allocation4 + $0x2d0] sm:$0xff] }
 0x19a   :  { %17162 = vst [vmem:[#allocation65_spill] sm:$0xff] %v14447_v50 }
 0x19b   :  { %10968 = vmatpush1.bf16.msra.mxu0 %v14418_v62  ;;  %10998 = vmatpush3.bf16.msra.mxu1 %v14421_v36  ;;  %17161 = vst [vmem:[#allocation64_spill] sm:$0xff] %v14444_v0  ;;  %v224_v36 = vld [vmem:[#allocation4 + $0x278] sm:$0xff]  ;;  %v227_v62 = vld [vmem:[#allocation4 + $0x290] sm:$0xff]  ;;  %17166 = vst [vmem:[#allocation69_spill] sm:$0xff] %v14461_v29 }
 0x19c   :  { %10970 = vmatprep.subr.bf16.mxu0 %v14424_v46  ;;  %10999 = vmatprep.subr.bf16.mxu1 %v16846_v57  ;;  %v222_v46 = vld [vmem:[#allocation4 + $0x268] sm:$0xff]  ;;  %v14457_v23 = vpack.c.bf16 %v227_v62, %v224_v36  ;;  %v232_v36 = vld [vmem:[#allocation4 + $0x2b8] sm:$0xff] }
 0x19d   :  { %v14454_v32 = vpack.c.bf16 %v222_v46, %v219_v2  ;;  %v231_v2 = vld [vmem:[#allocation4 + $0x2b0] sm:$0xff]  ;;  %v14471_v4 = vpack.c.bf16 %v232_v36, %v229_v55  ;;  %v87_v36 = vld [vmem:[%s16780_s0 + $0x38] sm:$0xff] }
 0x19e   :  { %17165 = vst [vmem:[#allocation68_spill] sm:$0xff] %v14457_v23 }
 0x19f   :  { %10972 = vmatpush1.bf16.msra.mxu0 %v14431_v24  ;;  %11001 = vmatpush3.bf16.msra.mxu1 %v14434_v8  ;;  %17164 = vst [vmem:[#allocation67_spill] sm:$0xff] %v14454_v32  ;;  %v230_v8 = vld [vmem:[#allocation4 + $0x2a8] sm:$0xff]  ;;  %v233_v24 = vld [vmem:[#allocation4 + $0x2c0] sm:$0xff]  ;;  %17169 = vst [vmem:[#allocation72_spill] sm:$0xff] %v14471_v4 }
 0x1a0   :  { %10974 = vmatprep.subr.bf16.mxu0 %v14437_v18  ;;  %11002 = vmatprep.subr.bf16.mxu1 %v16846_v57  ;;  %v228_v18 = vld [vmem:[#allocation4 + $0x298] sm:$0xff]  ;;  %v14467_v62 = vpack.c.bf16 %v233_v24, %v230_v8  ;;  %v238_v8 = vld [vmem:[#allocation4 + $0x2e8] sm:$0xff] }
 0x1a1   :  { %v14464_v46 = vpack.c.bf16 %v228_v18, %v225_v6  ;;  %v237_v6 = vld [vmem:[#allocation4 + $0x2e0] sm:$0xff] }
 0x1a2   :  { %17168 = vst [vmem:[#allocation71_spill] sm:$0xff] %v14467_v62 }
 0x1a3   :  { %10976 = vmatpush1.bf16.msra.mxu0 %v14441_v51  ;;  %11004 = vmatpush3.bf16.msra.mxu1 %v14444_v0  ;;  %17167 = vst [vmem:[#allocation70_spill] sm:$0xff] %v14464_v46  ;;  %v236_v0 = vld [vmem:[#allocation4 + $0x2d8] sm:$0xff]  ;;  %v239_v51 = vld [vmem:[#allocation4 + $0x2f0] sm:$0xff] }
 0x1a4   :  { %10978 = vmatprep.subr.bf16.mxu0 %v14447_v50  ;;  %11005 = vmatprep.subr.bf16.mxu1 %v16846_v57  ;;  %v234_v50 = vld [vmem:[#allocation4 + $0x2c8] sm:$0xff]  ;;  %v14477_v24 = vpack.c.bf16 %v239_v51, %v236_v0  ;;  %v82_v51 = vld [vmem:[%s16780_s0 + $0x10] sm:$0xff]  ;;  %v83_v0 = vld [vmem:[%s16780_s0 + $0x18] sm:$0xff] }
 0x1a5   :  { %v14474_v18 = vpack.c.bf16 %v234_v50, %v231_v2  ;;  %900 = vperm.xlu1 %13592, %v82_v51   ;;  %v85_v50 = vld [vmem:[%s16780_s0 + $0x28] sm:$0xff] }
 0x1a6   :  { %17171 = vst [vmem:[#allocation74_spill] sm:$0xff] %v14477_v24 }
 0x1a7   :  { %10980 = vmatpush1.bf16.msra.mxu0 %v14451_v11  ;;  %11007 = vmatpush3.bf16.msra.mxu1 %v14454_v32  ;;  %17170 = vst [vmem:[#allocation73_spill] sm:$0xff] %v14474_v18  ;;  %v14481_v32 = vpack.c.bf16 %v238_v8, %v235_v30 }
 0x1a8   :  { %10982 = vmatprep.subr.bf16.mxu0 %v14457_v23  ;;  %11008 = vmatprep.subr.bf16.mxu1 %v16846_v57  ;;  %v240_v23 = vld [vmem:[#allocation4 + $0x2f8] sm:$0xff] }
 0x1a9   :  { %17172 = vst [vmem:[#allocation75_spill] sm:$0xff] %v14481_v32  ;;  %v14484_v55 = vpack.c.bf16 %v240_v23, %v237_v6  ;;  %1378 = vperm.xlu1 %13592, %v83_v0   ;;  %v14538_v23 = vpop.permute.xlu0 %422 }
 0x1aa   :  { %17174 = vst [vmem:[#allocation77_spill] sm:$0xff] %v14538_v23  ;;  %v425_v2 = vmul.f32 %v14538_v23, %v14296_v26  ;;  %v426_v30 = vmul.f32 %v14538_v23, %v14305_v34  ;;  %v427_v34 = vmul.f32 %v14538_v23, %v14312_v52 }
 0x1ab   :  { %10984 = vmatpush1.bf16.msra.mxu0 %v14461_v29  ;;  %11010 = vmatpush3.bf16.msra.mxu1 %v14464_v46  ;;  %17173 = vst [vmem:[#allocation76_spill] sm:$0xff] %v14484_v55 }
 0x1ac   :  { %10986 = vmatprep.subr.bf16.mxu0 %v14467_v62  ;;  %11011 = vmatprep.subr.bf16.mxu1 %v16846_v57  ;;  %v428_v8 = vadd.f32 %v425_v2, %v14302_v31 }
 0x1ad   :  { %2334 = vperm.xlu1 %13592, %v85_v50  }
 0x1af   :  { %10988 = vmatpush1.bf16.msra.mxu0 %v14471_v4  ;;  %11013 = vmatpush3.bf16.msra.mxu1 %v14474_v18 }
 0x1b0   :  { %10990 = vmatprep.subr.bf16.mxu0 %v14477_v24  ;;  %11014 = vmatprep.subr.bf16.mxu1 %v16846_v57 }
 0x1b1   :  { %3290 = vperm.xlu1 %13592, %v87_v36  }
 0x1b3   :  { %10992 = vmatpush1.bf16.msra.mxu0 %v14481_v32  ;;  %11016 = vmatpush3.bf16.msra.mxu1 %v14484_v55 }
 0x1b4   :  { %11018 = vmatprep.subr.bf16.mxu0 %v14162_v5  ;;  %11049 = vmatprep.subr.bf16.mxu1 %v16846_v57 }
 0x1b6   :  { %800 = vmatmul.mubr.f32.vlgmr.msra.gmra.mrb[2].mxu0 %v17156_v47  ;;  %9207 = vmatmul.mubr.f32.vlgmr.msra.gmra.mrb[8].mxu1 %v17156_v47 }
 0x1b7   :  { %11020 = vmatpush1.bf16.msra.mxu0 %v14164_v9  ;;  %11051 = vmatpush3.bf16.msra.mxu1 %v14237_v56 }
 0x1b8   :  { %11022 = vmatprep.subr.bf16.mxu0 %v14166_v10  ;;  %11052 = vmatprep.subr.bf16.mxu1 %v16846_v57 }
 0x1b9   :  { %973 = vmatprep.mubr.f32.mxu0 %v17156_v47  ;;  %9241 = vmatprep.mubr.msk.f32.mxu1 %vm14064_vm0, %v17156_v47 }
 0x1bb   :  { %11024 = vmatpush1.bf16.msra.mxu0 %v14171_v15  ;;  %11054 = vmatpush3.bf16.msra.mxu1 %v14243_v60 }
 0x1bc   :  { %11026 = vmatprep.subr.bf16.mxu0 %v14175_v16  ;;  %11055 = vmatprep.subr.bf16.mxu1 %v16846_v57 }
 0x1bf   :  { %11028 = vmatpush1.bf16.msra.mxu0 %v14179_v21  ;;  %11057 = vmatpush3.bf16.msra.mxu1 %v14249_v63 }
 0x1c0   :  { %11030 = vmatprep.subr.bf16.mxu0 %v14183_v22  ;;  %11058 = vmatprep.subr.bf16.mxu1 %v16846_v57 }
 0x1c3   :  { %11032 = vmatpush1.bf16.msra.mxu0 %v14187_v27  ;;  %11060 = vmatpush3.bf16.msra.mxu1 %v14253_v3 }
 0x1c4   :  { %11034 = vmatprep.subr.bf16.mxu0 %v14191_v28  ;;  %11061 = vmatprep.subr.bf16.mxu1 %v16846_v57 }
 0x1c7   :  { %11036 = vmatpush1.bf16.msra.mxu0 %v14195_v33  ;;  %11063 = vmatpush3.bf16.msra.mxu1 %v14257_v7 }
 0x1c8   :  { %11038 = vmatprep.subr.bf16.mxu0 %v14202_v35  ;;  %11064 = vmatprep.subr.bf16.mxu1 %v16846_v57 }
 0x1cb   :  { %11040 = vmatpush1.bf16.msra.mxu0 %v14209_v41  ;;  %11066 = vmatpush3.bf16.msra.mxu1 %v14261_v12 }
 0x1cc   :  { %11042 = vmatprep.subr.bf16.mxu0 %v14213_v42  ;;  %11067 = vmatprep.subr.bf16.mxu1 %v16846_v57 }
 0x1cf   :  { %11044 = vmatpush1.bf16.msra.mxu0 %v14220_v48  ;;  %11069 = vmatpush3.bf16.msra.mxu1 %v14265_v17 }
 0x1d0   :  { %11046 = vmatprep.subr.bf16.mxu0 %v14224_v49  ;;  %11070 = vmatprep.subr.bf16.mxu1 %v16846_v57 }
 0x1d3   :  { %11048 = vmatpush1.bf16.msra.mxu0 %v14231_v53  ;;  %11072 = vmatpush3.bf16.msra.mxu1 %v14269_v20 }
 0x1d4   :  { %11074 = vmatprep.subr.bf16.mxu0 %v14293_v25  ;;  %11105 = vmatprep.subr.bf16.mxu1 %v16846_v57  ;;  %v429_v25 = vadd.f32 %v426_v30, %v14309_v43 }
 0x249   :  { %v497_v6 = vpop.f32.mrb[0].mxu0  ;;  %v568_v51 = vpop.f32.mrb[4].mxu1 }
 0x24a   :  { %v572_v0 = vadd.f32 %v497_v6, %v428_v8  ;;  %v499_v57 = vpop.f32.mrb[1].mxu0  ;;  %v9138_v50 = vpop.f32.mrb[5].mxu1  ;;  %v586_v31 = vadd.f32 %v568_v51, %v14314_v54  ;;  %v430_v6 = vadd.f32 %v427_v34, %v14318_v59  ;;  %v14577_v34 = vld [vmem:[#allocation6 + $0x20] sm:$0xff] }
 0x24b   :  { %v573_v53 = vadd.f32 %v499_v57, %v429_v25 }
 0x24c   :  { %v8166_v20 = vmul.f32 -1.442695, %v572_v0 }
 0x24d   :  { %v8167_v49 = vmul.f32 -1.442695, %v573_v53 }
 0x24e   :  { %13603 = vpow2.f32 %v8166_v20 }
 0x24f   :  { %13605 = vpow2.f32 %v8167_v49 }
 0x258   :  { %v13604_v17 = vpop.eup %13603 }
 0x259   :  { %v580_v26 = vadd.f32 1.0, %v13604_v17  ;;  %v13606_v36 = vpop.eup %13605 }
 0x25a   :  { %v581_v2 = vadd.f32 1.0, %v13606_v36 }
 0x25b   :  { %13607 = vrcp.f32 %v580_v26 }
 0x25c   :  { %13609 = vrcp.f32 %v581_v2 }
 0x265   :  { %v13608_v8 = vpop.eup %13607 }
 0x266   :  { %v587_v50 = vmul.f32 %v13608_v8, %v586_v31  ;;  %v13610_v53 = vpop.eup %13609  ;;  %v17175_v31 = vmov 0.0|0.0   ;;  %v14582_v8 = vld [vmem:[#allocation6 + $0x28] sm:$0xff] }
 0x267   :  { %v590_v17 = vsub.f32 1.0, %v13610_v53  ;;  %v592_v26 = vmul.f32 %v13610_v53, %v14326_v44  ;;  %v17176_v44 = vld [vmem:[#allocation41_spill] sm:$0xff]  ;;  %v17180_v53 = vld [vmem:[#allocation44_spill] sm:$0xff] }
 0x268   :  { %v588_v30 = vadd.f32 %v587_v50, %v430_v6  ;;  %17177 = vst [vmem:[#allocation41_spill] sm:$0xff] %v14582_v8  ;;  %v17178_v50 = vld [vmem:[#allocation42_spill] sm:$0xff] }
 0x269   :  { %v14553_v57 = vpop.f32.mrb[6].mxu1 }
 0x26a   :  { %13611 = vtanh.f32 %v588_v30  ;;  %v9173_v49 = vpop.f32.mrb[7].mxu1  ;;  %v17179_v30 = vld [vmem:[#allocation43_spill] sm:$0xff] }
 0x274   :  { %v13612_v20 = vpop.eup %13611 }
 0x275   :  { %v591_v25 = vmul.f32 %v13612_v20, %v590_v17 }
 0x277   :  { %v14556_v0 = vadd.f32 %v592_v26, %v591_v25  ;;  %v17181_v25 = vld [vmem:[#allocation45_spill] sm:$0xff]  ;;  %v17182_v26 = vld [vmem:[#allocation46_spill] sm:$0xff] }
 0x279   :  { %974 = vmatmul.mubr.f32.vlgmr.msra.gmra.mrb[4].mxu0 %v14556_v0  ;;  %9242 = vmatmul.mubr.f32.vlgmr.msra.gmra.mrb[10].mxu1 %v14556_v0 }
 0x27a   :  { %11076 = vmatpush1.bf16.msra.mxu0 %v14322_v38  ;;  %11107 = vmatpush3.bf16.msra.mxu1 %v14324_v39 }
 0x27b   :  { %11078 = vmatprep.subr.bf16.mxu0 %v14328_v45  ;;  %11108 = vmatprep.subr.bf16.mxu1 %v17175_v31 }
 0x27c   :  { %1136 = vmatprep.mubr.f32.mxu0 %v17156_v47  ;;  %9276 = vmatprep.mubr.msk.f32.mxu1 %vm14064_vm0, %v17156_v47 }
 0x27e   :  { %11080 = vmatpush1.bf16.msra.mxu0 %v14334_v58  ;;  %11110 = vmatpush3.bf16.msra.mxu1 %v14336_v61 }
 0x27f   :  { %11082 = vmatprep.subr.bf16.mxu0 %v14340_v1  ;;  %11111 = vmatprep.subr.bf16.mxu1 %v17175_v31 }
 0x282   :  { %11084 = vmatpush1.bf16.msra.mxu0 %v14347_v13  ;;  %11113 = vmatpush3.bf16.msra.mxu1 %v14349_v14 }
 0x283   :  { %11086 = vmatprep.subr.bf16.mxu0 %v14353_v19  ;;  %11114 = vmatprep.subr.bf16.mxu1 %v17175_v31 }
 0x286   :  { %11088 = vmatpush1.bf16.msra.mxu0 %v14357_v37  ;;  %11116 = vmatpush3.bf16.msra.mxu1 %v14359_v40 }
 0x287   :  { %11090 = vmatprep.subr.bf16.mxu0 %v17176_v44  ;;  %11117 = vmatprep.subr.bf16.mxu1 %v17175_v31 }
 0x289   :  { %v801_v51 = vpop.f32.mrb[2].mxu0  ;;  %v872_v36 = vpop.f32.mrb[8].mxu1 }
 0x28a   :  { %v13513_v2 = vadd.f32 %v801_v51, %v14577_v34  ;;  %v803_v6 = vpop.f32.mrb[3].mxu0  ;;  %11092 = vmatpush1.bf16.msra.mxu0 %v17178_v50  ;;  %11119 = vmatpush3.bf16.msra.mxu1 %v17179_v30  ;;  %v9208_v49 = vpop.f32.mrb[9].mxu1  ;;  %v17183_v51 = vld [vmem:[#allocation47_spill] sm:$0xff]  ;;  %v17184_v50 = vld [vmem:[#allocation48_spill] sm:$0xff] }
 0x28b   :  { %11094 = vmatprep.subr.bf16.mxu0 %v17180_v53  ;;  %11120 = vmatprep.subr.bf16.mxu1 %v17175_v31  ;;  %v13514_v20 = vadd.f32 %v803_v6, %v14582_v8  ;;  %v17185_v49 = vld [vmem:[#allocation49_spill] sm:$0xff]  ;;  %v17186_v53 = vld [vmem:[#allocation50_spill] sm:$0xff]  ;;  %v17188_v6 = vld [vmem:[#allocation52_spill] sm:$0xff] }
 0x28c   :  { %v8168_v17 = vmul.f32 -1.442695, %v13513_v2  ;;  %v17187_v2 = vld [vmem:[#allocation51_spill] sm:$0xff] }
 0x28d   :  { %v8169_v23 = vmul.f32 -1.442695, %v13514_v20  ;;  %v17190_v20 = vld [vmem:[#allocation54_spill] sm:$0xff]  ;;  %v17200_v8 = vld [vmem:[#allocation63_spill] sm:$0xff] }
 0x28e   :  { %13613 = vpow2.f32 %v8168_v17  ;;  %11096 = vmatpush1.bf16.msra.mxu0 %v17181_v25  ;;  %11122 = vmatpush3.bf16.msra.mxu1 %v17182_v26  ;;  %v17189_v17 = vld [vmem:[#allocation53_spill] sm:$0xff]  ;;  %v17199_v25 = vld [vmem:[#allocation62_spill] sm:$0xff] }
 0x28f   :  { %11098 = vmatprep.subr.bf16.mxu0 %v17183_v51  ;;  %11123 = vmatprep.subr.bf16.mxu1 %v17175_v31  ;;  %13615 = vpow2.f32 %v8169_v23  ;;  %v17192_v23 = vld [vmem:[#allocation56_spill] sm:$0xff] }
 0x292   :  { %11100 = vmatpush1.bf16.msra.mxu0 %v17184_v50  ;;  %11125 = vmatpush3.bf16.msra.mxu1 %v17185_v49  ;;  %v17198_v49 = vld [vmem:[#allocation61_spill] sm:$0xff]  ;;  %v14619_v50 = vld [vmem:[#allocation6 + $0x30] sm:$0xff] }
 0x293   :  { %11102 = vmatprep.subr.bf16.mxu0 %v17186_v53  ;;  %11126 = vmatprep.subr.bf16.mxu1 %v17175_v31  ;;  %v17191_v53 = vld [vmem:[#allocation55_spill] sm:$0xff] }
 0x296   :  { %11104 = vmatpush1.bf16.msra.mxu0 %v17187_v2  ;;  %11128 = vmatpush3.bf16.msra.mxu1 %v17188_v6  ;;  %v17195_v2 = vld [vmem:[#allocation59_spill] sm:$0xff] }
 0x297   :  { %11130 = vmatprep.subr.bf16.mxu0 %v17189_v17  ;;  %11161 = vmatprep.subr.bf16.mxu1 %v17175_v31  ;;  %v17193_v17 = vld [vmem:[#allocation57_spill] sm:$0xff] }
 0x298   :  { %v13614_v51 = vpop.eup %13613 }
 0x299   :  { %v884_v26 = vadd.f32 1.0, %v13614_v51  ;;  %1137 = vmatmul.mubr.f32.vlgmr.msra.gmra.mrb[6].mxu0 %v14556_v0  ;;  %9277 = vmatmul.mubr.f32.vlgmr.msra.gmra.mrb[12].mxu1 %v14556_v0  ;;  %v17194_v51 = vld [vmem:[#allocation58_spill] sm:$0xff]  ;;  %v13616_v6 = vpop.eup %13615 }
 0x29a   :  { %11132 = vmatpush1.bf16.msra.mxu0 %v17190_v20  ;;  %11163 = vmatpush3.bf16.msra.mxu1 %v17191_v53  ;;  %v14614_v53 = vld [vmem:[#allocation6 + $0x38] sm:$0xff]  ;;  %v17197_v20 = vld [vmem:[#allocation60_spill] sm:$0xff] }
 0x29b   :  { %13617 = vrcp.f32 %v884_v26  ;;  %11134 = vmatprep.subr.bf16.mxu0 %v17192_v23  ;;  %11164 = vmatprep.subr.bf16.mxu1 %v17175_v31  ;;  %17196 = vst [vmem:[#allocation43_spill] sm:$0xff] %v14614_v53  ;;  %v885_v26 = vadd.f32 1.0, %v13616_v6  ;;  %v890_v23 = vadd.f32 %v872_v36, %v14614_v53  ;;  %v17201_v6 = vld [vmem:[#allocation64_spill] sm:$0xff]  ;;  %v17202_v36 = vld [vmem:[#allocation65_spill] sm:$0xff] }
 0x29c   :  { %1277 = vmatprep.mubr.f32.mxu0 %v17156_v47  ;;  %9311 = vmatprep.mubr.msk.f32.mxu1 %vm14064_vm0, %v17156_v47 }
 0x29d   :  { %13619 = vrcp.f32 %v885_v26  ;;  %v17205_v26 = vld [vmem:[#allocation34_spill] sm:$0xff] }
 0x29e   :  { %11136 = vmatpush1.bf16.msra.mxu0 %v17193_v17  ;;  %11166 = vmatpush3.bf16.msra.mxu1 %v17194_v51 }
 0x29f   :  { %11138 = vmatprep.subr.bf16.mxu0 %v17195_v2  ;;  %11167 = vmatprep.subr.bf16.mxu1 %v17175_v31  ;;  %v732_v2 = vadd.f32 %v14553_v57, %v14619_v50 }
 0x2a2   :  { %11140 = vmatpush1.bf16.msra.mxu0 %v17197_v20  ;;  %11169 = vmatpush3.bf16.msra.mxu1 %v17198_v49  ;;  %v17204_v49 = vld [vmem:[#allocation68_spill] sm:$0xff] }
 0x2a3   :  { %11142 = vmatprep.subr.bf16.mxu0 %v17199_v25  ;;  %11170 = vmatprep.subr.bf16.mxu1 %v17175_v31  ;;  %v17203_v25 = vld [vmem:[#allocation67_spill] sm:$0xff] }
 0x2a5   :  { %v13618_v51 = vpop.eup %13617 }
 0x2a6   :  { %v891_v17 = vmul.f32 %v13618_v51, %v890_v23  ;;  %11144 = vmatpush1.bf16.msra.mxu0 %v17200_v8  ;;  %11172 = vmatpush3.bf16.msra.mxu1 %v17201_v6 }
 0x2a7   :  { %11146 = vmatprep.subr.bf16.mxu0 %v17202_v36  ;;  %11173 = vmatprep.subr.bf16.mxu1 %v17175_v31  ;;  %v13620_v57 = vpop.eup %13619 }
 0x2a8   :  { %v892_v53 = vadd.f32 %v891_v17, %v732_v2  ;;  %v896_v23 = vmul.f32 0.0, %v13620_v57 }
 0x2aa   :  { %13621 = vtanh.f32 %v892_v53  ;;  %11148 = vmatpush1.bf16.msra.mxu0 %v14451_v11  ;;  %11175 = vmatpush3.bf16.msra.mxu1 %v17203_v25  ;;  %v894_v53 = vsub.f32 1.0, %v13620_v57  ;;  %v17206_v57 = vld [vmem:[#allocation26_spill] sm:$0xff] }
 0x2ab   :  { %11150 = vmatprep.subr.bf16.mxu0 %v17204_v49  ;;  %11176 = vmatprep.subr.bf16.mxu1 %v17175_v31 }
 0x2ae   :  { %11152 = vmatpush1.bf16.msra.mxu0 %v14461_v29  ;;  %11178 = vmatpush3.bf16.msra.mxu1 %v14464_v46 }
 0x2af   :  { %11154 = vmatprep.subr.bf16.mxu0 %v14467_v62  ;;  %11179 = vmatprep.subr.bf16.mxu1 %v17175_v31 }
 0x2b2   :  { %11156 = vmatpush1.bf16.msra.mxu0 %v14471_v4  ;;  %11181 = vmatpush3.bf16.msra.mxu1 %v14474_v18 }
 0x2b3   :  { %11158 = vmatprep.subr.bf16.mxu0 %v14477_v24  ;;  %11182 = vmatprep.subr.bf16.mxu1 %v17175_v31 }
 0x2b4   :  { %v13622_v2 = vpop.eup %13621 }
 0x2b5   :  { %v895_v17 = vmul.f32 %v13622_v2, %v894_v53  ;;  %v17207_v53 = vld [vmem:[#allocation27_spill] sm:$0xff] }
 0x2b6   :  { %11160 = vmatpush1.bf16.msra.mxu0 %v14481_v32  ;;  %11184 = vmatpush3.bf16.msra.mxu1 %v14484_v55  ;;  %v17208_v2 = vld [vmem:[#allocation35_spill] sm:$0xff] }
 0x2b7   :  { %v14643_v51 = vadd.f32 %v896_v23, %v895_v17  ;;  %11186 = vmatprep.subr.bf16.mxu0 %v14162_v5  ;;  %11217 = vmatprep.subr.bf16.mxu1 %v17175_v31  ;;  %v17209_v17 = vld [vmem:[#allocation36_spill] sm:$0xff]  ;;  %v14684_v23 = vpop.permute.xlu1 %900 }
 0x2b8   :  { %17210 = vst [vmem:[#allocation60_spill] sm:$0xff] %v14684_v23 }
 0x2b9   :  { %1278 = vmatmul.mubr.f32.vlgmr.msra.gmra.mrb[6].mxu0 %v14643_v51  ;;  %9312 = vmatmul.mubr.f32.vlgmr.msra.gmra.mrb[14].mxu1 %v14643_v51 }
 0x2ba   :  { %11188 = vmatpush1.bf16.msra.mxu0 %v14164_v9  ;;  %11219 = vmatpush3.bf16.msra.mxu1 %v14237_v56 }
 0x2bb   :  { %11190 = vmatprep.subr.bf16.mxu0 %v14166_v10  ;;  %11220 = vmatprep.subr.bf16.mxu1 %v17175_v31 }
 0x2bc   :  { %1451 = vmatprep.mubr.f32.mxu0 %v17156_v47  ;;  %9346 = vmatprep.mubr.msk.f32.mxu1 %vm14064_vm0, %v17156_v47 }
 0x2be   :  { %11192 = vmatpush1.bf16.msra.mxu0 %v14171_v15  ;;  %11222 = vmatpush3.bf16.msra.mxu1 %v14243_v60 }
 0x2bf   :  { %11194 = vmatprep.subr.bf16.mxu0 %v14175_v16  ;;  %11223 = vmatprep.subr.bf16.mxu1 %v17175_v31 }
 0x2c2   :  { %11196 = vmatpush1.bf16.msra.mxu0 %v14179_v21  ;;  %11225 = vmatpush3.bf16.msra.mxu1 %v14249_v63 }
 0x2c3   :  { %11198 = vmatprep.subr.bf16.mxu0 %v14183_v22  ;;  %11226 = vmatprep.subr.bf16.mxu1 %v17175_v31 }
 0x2c6   :  { %11200 = vmatpush1.bf16.msra.mxu0 %v14187_v27  ;;  %11228 = vmatpush3.bf16.msra.mxu1 %v14253_v3 }
 0x2c7   :  { %11202 = vmatprep.subr.bf16.mxu0 %v14191_v28  ;;  %11229 = vmatprep.subr.bf16.mxu1 %v17175_v31 }
 0x2ca   :  { %11204 = vmatpush1.bf16.msra.mxu0 %v14195_v33  ;;  %11231 = vmatpush3.bf16.msra.mxu1 %v14257_v7 }
 0x2cb   :  { %11206 = vmatprep.subr.bf16.mxu0 %v14202_v35  ;;  %11232 = vmatprep.subr.bf16.mxu1 %v17175_v31 }
 0x2ce   :  { %11208 = vmatpush1.bf16.msra.mxu0 %v14209_v41  ;;  %11234 = vmatpush3.bf16.msra.mxu1 %v14261_v12  ;;  %v17213_v41 = vld [vmem:[#allocation39_spill] sm:$0xff] }
 0x2cf   :  { %11210 = vmatprep.subr.bf16.mxu0 %v14213_v42  ;;  %11235 = vmatprep.subr.bf16.mxu1 %v17175_v31  ;;  %v17211_v42 = vld [vmem:[#allocation37_spill] sm:$0xff] }
 0x2d0   :  { %v903_v12 = vmul.f32 %v14684_v23, %v17211_v42 }
 0x2d2   :  { %11212 = vmatpush1.bf16.msra.mxu0 %v14220_v48  ;;  %11237 = vmatpush3.bf16.msra.mxu1 %v17205_v26  ;;  %v17212_v48 = vld [vmem:[#allocation40_spill] sm:$0xff] }
 0x2d3   :  { %11214 = vmatprep.subr.bf16.mxu0 %v17206_v57  ;;  %11238 = vmatprep.subr.bf16.mxu1 %v17175_v31  ;;  %v904_v26 = vmul.f32 %v14684_v23, %v17212_v48  ;;  %v906_v57 = vadd.f32 %v903_v12, %v17213_v41  ;;  %v905_v48 = vmul.f32 %v14684_v23, %v14312_v52 }
 0x2d6   :  { %11216 = vmatpush1.bf16.msra.mxu0 %v17207_v53  ;;  %11240 = vmatpush3.bf16.msra.mxu1 %v17208_v2  ;;  %v907_v53 = vadd.f32 %v904_v26, %v14309_v43 }
 0x2d7   :  { %11242 = vmatprep.subr.bf16.mxu0 %v17209_v17  ;;  %11273 = vmatprep.subr.bf16.mxu1 %v17175_v31 }
 0x34c   :  { %v975_v35 = vpop.f32.mrb[4].mxu0  ;;  %v1046_v7 = vpop.f32.mrb[10].mxu1 }
 0x34d   :  { %v1050_v33 = vadd.f32 %v975_v35, %v906_v57  ;;  %v977_v2 = vpop.f32.mrb[5].mxu0  ;;  %v9243_v28 = vpop.f32.mrb[11].mxu1  ;;  %v1064_v12 = vadd.f32 %v1046_v7, %v14314_v54  ;;  %v908_v35 = vadd.f32 %v905_v48, %v14318_v59 }
 0x34e   :  { %v1051_v3 = vadd.f32 %v977_v2, %v907_v53  ;;  %v17214_v53 = vld [vmem:[#allocation42_spill] sm:$0xff]  ;;  %v17215_v2 = vld [vmem:[#allocation44_spill] sm:$0xff] }
 0x34f   :  { %v8170_v17 = vmul.f32 -1.442695, %v1050_v33 }
 0x350   :  { %v8171_v27 = vmul.f32 -1.442695, %v1051_v3 }
 0x351   :  { %13623 = vpow2.f32 %v8170_v17 }
 0x352   :  { %13625 = vpow2.f32 %v8171_v27 }
 0x35b   :  { %v13624_v22 = vpop.eup %13623 }
 0x35c   :  { %v1058_v63 = vadd.f32 1.0, %v13624_v22  ;;  %v13626_v42 = vpop.eup %13625 }
 0x35d   :  { %v1059_v41 = vadd.f32 1.0, %v13626_v42  ;;  %v17216_v42 = vld [vmem:[#allocation41_spill] sm:$0xff] }
 0x35e   :  { %13627 = vrcp.f32 %v1058_v63 }
 0x35f   :  { %13629 = vrcp.f32 %v1059_v41  ;;  %v17217_v41 = vld [vmem:[#allocation45_spill] sm:$0xff] }
 0x368   :  { %v13628_v21 = vpop.eup %13627 }
 0x369   :  { %v1065_v43 = vmul.f32 %v13628_v21, %v1064_v12  ;;  %v13630_v3 = vpop.eup %13629  ;;  %v17218_v12 = vld [vmem:[#allocation46_spill] sm:$0xff] }
 0x36a   :  { %v1068_v22 = vsub.f32 1.0, %v13630_v3  ;;  %v1070_v57 = vmul.f32 %v13630_v3, %v14556_v0  ;;  %v17222_v3 = vld [vmem:[#allocation50_spill] sm:$0xff] }
 0x36b   :  { %v1066_v28 = vadd.f32 %v1065_v43, %v908_v35  ;;  %v17219_v35 = vld [vmem:[#allocation47_spill] sm:$0xff] }
 0x36c   :  { %v14696_v33 = vpop.f32.mrb[12].mxu1 }
 0x36d   :  { %13631 = vtanh.f32 %v1066_v28  ;;  %v9278_v27 = vpop.f32.mrb[13].mxu1  ;;  %v17220_v28 = vld [vmem:[#allocation48_spill] sm:$0xff] }
 0x36e   :  { %v17221_v27 = vld [vmem:[#allocation49_spill] sm:$0xff] }
 0x377   :  { %v13632_v63 = vpop.eup %13631 }
 0x378   :  { %v1069_v26 = vmul.f32 %v13632_v63, %v1068_v22  ;;  %v17223_v22 = vld [vmem:[#allocation51_spill] sm:$0xff]  ;;  %v17224_v63 = vld [vmem:[#allocation52_spill] sm:$0xff] }
 0x37a   :  { %v14699_v52 = vadd.f32 %v1070_v57, %v1069_v26  ;;  %v17225_v26 = vld [vmem:[#allocation53_spill] sm:$0xff] }
 0x37c   :  { %1452 = vmatmul.mubr.f32.vlgmr.msra.gmra.mrb[8].mxu0 %v14699_v52  ;;  %9347 = vmatmul.mubr.f32.vlgmr.msra.gmra.mrb[16].mxu1 %v14699_v52 }
 0x37d   :  { %11244 = vmatpush1.bf16.msra.mxu0 %v14322_v38  ;;  %11275 = vmatpush3.bf16.msra.mxu1 %v14324_v39 }
 0x37e   :  { %11246 = vmatprep.subr.bf16.mxu0 %v14328_v45  ;;  %11276 = vmatprep.subr.bf16.mxu1 %v17175_v31 }
 0x37f   :  { %1614 = vmatprep.mubr.f32.mxu0 %v17156_v47  ;;  %9381 = vmatprep.mubr.msk.f32.mxu1 %vm14064_vm0, %v17156_v47 }
 0x381   :  { %11248 = vmatpush1.bf16.msra.mxu0 %v14334_v58  ;;  %11278 = vmatpush3.bf16.msra.mxu1 %v14336_v61 }
 0x382   :  { %11250 = vmatprep.subr.bf16.mxu0 %v14340_v1  ;;  %11279 = vmatprep.subr.bf16.mxu1 %v17175_v31 }
 0x385   :  { %11252 = vmatpush1.bf16.msra.mxu0 %v14347_v13  ;;  %11281 = vmatpush3.bf16.msra.mxu1 %v14349_v14 }
 0x386   :  { %11254 = vmatprep.subr.bf16.mxu0 %v14353_v19  ;;  %11282 = vmatprep.subr.bf16.mxu1 %v17175_v31 }
 0x389   :  { %11256 = vmatpush1.bf16.msra.mxu0 %v14357_v37  ;;  %11284 = vmatpush3.bf16.msra.mxu1 %v14359_v40 }
 0x38a   :  { %11258 = vmatprep.subr.bf16.mxu0 %v17176_v44  ;;  %11285 = vmatprep.subr.bf16.mxu1 %v17175_v31 }
 0x38c   :  { %v1279_v21 = vpop.f32.mrb[6].mxu0  ;;  %v1350_v7 = vpop.f32.mrb[14].mxu1 }
 0x38d   :  { %v13515_v54 = vadd.f32 %v1279_v21, %v14577_v34  ;;  %v1281_v59 = vpop.f32.mrb[7].mxu0  ;;  %v9313_v0 = vpop.f32.mrb[15].mxu1  ;;  %11260 = vmatpush1.bf16.msra.mxu0 %v17214_v53  ;;  %11287 = vmatpush3.bf16.msra.mxu1 %v17179_v30 }
 0x38e   :  { %11262 = vmatprep.subr.bf16.mxu0 %v17215_v2  ;;  %11288 = vmatprep.subr.bf16.mxu1 %v17175_v31  ;;  %v13516_v48 = vadd.f32 %v1281_v59, %v17216_v42  ;;  %v17227_v59 = vld [vmem:[#allocation55_spill] sm:$0xff]  ;;  %v17228_v0 = vld [vmem:[#allocation56_spill] sm:$0xff] }
 0x38f   :  { %v8172_v17 = vmul.f32 -1.442695, %v13515_v54  ;;  %v17226_v54 = vld [vmem:[#allocation54_spill] sm:$0xff] }
 0x390   :  { %v8173_v43 = vmul.f32 -1.442695, %v13516_v48  ;;  %v17230_v48 = vld [vmem:[#allocation58_spill] sm:$0xff] }
 0x391   :  { %13633 = vpow2.f32 %v8172_v17  ;;  %11264 = vmatpush1.bf16.msra.mxu0 %v17217_v41  ;;  %11290 = vmatpush3.bf16.msra.mxu1 %v17218_v12  ;;  %v17229_v17 = vld [vmem:[#allocation57_spill] sm:$0xff] }
 0x392   :  { %11266 = vmatprep.subr.bf16.mxu0 %v17219_v35  ;;  %11291 = vmatprep.subr.bf16.mxu1 %v17175_v31  ;;  %13635 = vpow2.f32 %v8173_v43 }
 0x395   :  { %11268 = vmatpush1.bf16.msra.mxu0 %v17220_v28  ;;  %11293 = vmatpush3.bf16.msra.mxu1 %v17221_v27 }
 0x396   :  { %11270 = vmatprep.subr.bf16.mxu0 %v17222_v3  ;;  %11294 = vmatprep.subr.bf16.mxu1 %v17175_v31 }
 0x399   :  { %11272 = vmatpush1.bf16.msra.mxu0 %v17223_v22  ;;  %11296 = vmatpush3.bf16.msra.mxu1 %v17224_v63 }
 0x39a   :  { %11298 = vmatprep.subr.bf16.mxu0 %v17225_v26  ;;  %11329 = vmatprep.subr.bf16.mxu1 %v17175_v31 }
 0x39b   :  { %v13634_v57 = vpop.eup %13633 }
 0x39c   :  { %v1362_v21 = vadd.f32 1.0, %v13634_v57  ;;  %1615 = vmatmul.mubr.f32.vlgmr.msra.gmra.mrb[10].mxu0 %v14699_v52  ;;  %9382 = vmatmul.mubr.f32.vlgmr.msra.gmra.mrb[18].mxu1 %v14699_v52  ;;  %v13636_v43 = vpop.eup %13635  ;;  %v17231_v57 = vld [vmem:[#allocation59_spill] sm:$0xff] }
 0x39d   :  { %11300 = vmatpush1.bf16.msra.mxu0 %v17226_v54  ;;  %11331 = vmatpush3.bf16.msra.mxu1 %v17227_v59  ;;  %v1363_v23 = vadd.f32 1.0, %v13636_v43  ;;  %v17234_v59 = vld [vmem:[#allocation43_spill] sm:$0xff] }
 0x39e   :  { %13637 = vrcp.f32 %v1362_v21  ;;  %11302 = vmatprep.subr.bf16.mxu0 %v17228_v0  ;;  %11332 = vmatprep.subr.bf16.mxu1 %v17175_v31  ;;  %v17232_v21 = vld [vmem:[#allocation61_spill] sm:$0xff]  ;;  %v17233_v0 = vld [vmem:[#allocation62_spill] sm:$0xff]  ;;  %v1368_v54 = vadd.f32 %v1350_v7, %v17234_v59 }
 0x39f   :  { %1755 = vmatprep.mubr.f32.mxu0 %v17156_v47  ;;  %9416 = vmatprep.mubr.msk.f32.mxu1 %vm14064_vm0, %v17156_v47  ;;  %13639 = vrcp.f32 %v1363_v23 }
 0x3a1   :  { %11304 = vmatpush1.bf16.msra.mxu0 %v17229_v17  ;;  %11334 = vmatpush3.bf16.msra.mxu1 %v17230_v48  ;;  %v1210_v48 = vadd.f32 %v14696_v33, %v14619_v50 }
 0x3a2   :  { %11306 = vmatprep.subr.bf16.mxu0 %v17231_v57  ;;  %11335 = vmatprep.subr.bf16.mxu1 %v17175_v31 }
 0x3a5   :  { %11308 = vmatpush1.bf16.msra.mxu0 %v17197_v20  ;;  %11337 = vmatpush3.bf16.msra.mxu1 %v17232_v21 }
 0x3a6   :  { %11310 = vmatprep.subr.bf16.mxu0 %v17233_v0  ;;  %11338 = vmatprep.subr.bf16.mxu1 %v17175_v31 }
 0x3a8   :  { %v13638_v26 = vpop.eup %13637 }
 0x3a9   :  { %v1369_v17 = vmul.f32 %v13638_v26, %v1368_v54  ;;  %11312 = vmatpush1.bf16.msra.mxu0 %v17200_v8  ;;  %11340 = vmatpush3.bf16.msra.mxu1 %v17201_v6  ;;  %v13640_v23 = vpop.eup %13639 }
 0x3aa   :  { %11314 = vmatprep.subr.bf16.mxu0 %v17202_v36  ;;  %11341 = vmatprep.subr.bf16.mxu1 %v17175_v31  ;;  %v1372_v33 = vsub.f32 1.0, %v13640_v23  ;;  %v1374_v54 = vmul.f32 %v13640_v23, %v14643_v51  ;;  %v17236_v51 = vld [vmem:[#allocation17_spill] sm:$0xff]  ;;  %v17239_v23 = vld [vmem:[#allocation19_spill] sm:$0xff] }
 0x3ab   :  { %v1370_v43 = vadd.f32 %v1369_v17, %v1210_v48  ;;  %v17237_v48 = vld [vmem:[#allocation30_spill] sm:$0xff] }
 0x3ad   :  { %13641 = vtanh.f32 %v1370_v43  ;;  %11316 = vmatpush1.bf16.msra.mxu0 %v14451_v11  ;;  %11343 = vmatpush3.bf16.msra.mxu1 %v17203_v25  ;;  %v17238_v43 = vld [vmem:[#allocation18_spill] sm:$0xff] }
 0x3ae   :  { %11318 = vmatprep.subr.bf16.mxu0 %v17204_v49  ;;  %11344 = vmatprep.subr.bf16.mxu1 %v17175_v31 }
 0x3b1   :  { %11320 = vmatpush1.bf16.msra.mxu0 %v14461_v29  ;;  %11346 = vmatpush3.bf16.msra.mxu1 %v14464_v46 }
 0x3b2   :  { %11322 = vmatprep.subr.bf16.mxu0 %v14467_v62  ;;  %11347 = vmatprep.subr.bf16.mxu1 %v17175_v31 }
 0x3b5   :  { %11324 = vmatpush1.bf16.msra.mxu0 %v14471_v4  ;;  %11349 = vmatpush3.bf16.msra.mxu1 %v14474_v18 }
 0x3b6   :  { %11326 = vmatprep.subr.bf16.mxu0 %v14477_v24  ;;  %11350 = vmatprep.subr.bf16.mxu1 %v17175_v31  ;;  %v14836_v24 = vld [vmem:[#allocation2 + $0x10] sm:$0xff] }
 0x3b7   :  { %v13642_v7 = vpop.eup %13641  ;;  %17259 = vst [vmem:[#allocation44_spill] sm:$0xff] %v14836_v24 }
 0x3b8   :  { %v1373_v26 = vmul.f32 %v13642_v7, %v1372_v33  ;;  %v17240_v33 = vld [vmem:[#allocation31_spill] sm:$0xff]  ;;  %v17241_v7 = vld [vmem:[#allocation20_spill] sm:$0xff] }
 0x3b9   :  { %11328 = vmatpush1.bf16.msra.mxu0 %v14481_v32  ;;  %11352 = vmatpush3.bf16.msra.mxu1 %v14484_v55 }
 0x3ba   :  { %v14779_v17 = vadd.f32 %v1374_v54, %v1373_v26  ;;  %11354 = vmatprep.subr.bf16.mxu0 %v14162_v5  ;;  %11385 = vmatprep.subr.bf16.mxu1 %v17175_v31  ;;  %v17242_v26 = vld [vmem:[#allocation21_spill] sm:$0xff]  ;;  %v17243_v54 = vld [vmem:[#allocation32_spill] sm:$0xff] }
 0x3bc   :  { %17235 = vst [vmem:[#allocation63_spill] sm:$0xff] %v14779_v17  ;;  %1756 = vmatmul.mubr.f32.vlgmr.msra.gmra.mrb[10].mxu0 %v14779_v17  ;;  %9417 = vmatmul.mubr.f32.vlgmr.msra.gmra.mrb[20].mxu1 %v14779_v17 }
 0x3bd   :  { %11356 = vmatpush1.bf16.msra.mxu0 %v14164_v9  ;;  %11387 = vmatpush3.bf16.msra.mxu1 %v14237_v56  ;;  %v14833_v56 = vld [vmem:[#allocation6 + $0x8] sm:$0xff] }
 0x3be   :  { %11358 = vmatprep.subr.bf16.mxu0 %v14166_v10  ;;  %11388 = vmatprep.subr.bf16.mxu1 %v17175_v31  ;;  %17258 = vst [vmem:[#allocation42_spill] sm:$0xff] %v14833_v56 }
 0x3bf   :  { %1929 = vmatprep.mubr.f32.mxu0 %v17156_v47  ;;  %9451 = vmatprep.mubr.msk.f32.mxu1 %vm14064_vm0, %v17156_v47 }
 0x3c1   :  { %11360 = vmatpush1.bf16.msra.mxu0 %v14171_v15  ;;  %11390 = vmatpush3.bf16.msra.mxu1 %v14243_v60 }
 0x3c2   :  { %11362 = vmatprep.subr.bf16.mxu0 %v14175_v16  ;;  %11391 = vmatprep.subr.bf16.mxu1 %v17175_v31  ;;  %v17244_v16 = vld [vmem:[#allocation22_spill] sm:$0xff] }
 0x3c5   :  { %11364 = vmatpush1.bf16.msra.mxu0 %v17236_v51  ;;  %11393 = vmatpush3.bf16.msra.mxu1 %v17237_v48  ;;  %v17245_v48 = vld [vmem:[#allocation23_spill] sm:$0xff]  ;;  %v17247_v51 = vld [vmem:[#allocation24_spill] sm:$0xff] }
 0x3c6   :  { %11366 = vmatprep.subr.bf16.mxu0 %v17238_v43  ;;  %11394 = vmatprep.subr.bf16.mxu1 %v17175_v31  ;;  %v17246_v43 = vld [vmem:[#allocation33_spill] sm:$0xff] }
 0x3c9   :  { %11368 = vmatpush1.bf16.msra.mxu0 %v17239_v23  ;;  %11396 = vmatpush3.bf16.msra.mxu1 %v17240_v33  ;;  %v17248_v33 = vld [vmem:[#allocation25_spill] sm:$0xff]  ;;  %v17250_v23 = vld [vmem:[#allocation26_spill] sm:$0xff] }
 0x3ca   :  { %11370 = vmatprep.subr.bf16.mxu0 %v17241_v7  ;;  %11397 = vmatprep.subr.bf16.mxu1 %v17175_v31  ;;  %v17249_v7 = vld [vmem:[#allocation34_spill] sm:$0xff] }
 0x3cd   :  { %11372 = vmatpush1.bf16.msra.mxu0 %v17242_v26  ;;  %11399 = vmatpush3.bf16.msra.mxu1 %v17243_v54  ;;  %v17251_v54 = vld [vmem:[#allocation27_spill] sm:$0xff]  ;;  %v17253_v26 = vld [vmem:[#allocation36_spill] sm:$0xff] }
 0x3ce   :  { %11374 = vmatprep.subr.bf16.mxu0 %v17244_v16  ;;  %11400 = vmatprep.subr.bf16.mxu1 %v17175_v31  ;;  %v17252_v16 = vld [vmem:[#allocation35_spill] sm:$0xff] }
 0x3d1   :  { %11376 = vmatpush1.bf16.msra.mxu0 %v17245_v48  ;;  %11402 = vmatpush3.bf16.msra.mxu1 %v17246_v43  ;;  %v14820_v43 = vpop.permute.xlu1 %1378  ;;  %v14830_v48 = vld [vmem:[#allocation6] sm:$0xff] }
 0x3d2   :  { %11378 = vmatprep.subr.bf16.mxu0 %v17247_v51  ;;  %11403 = vmatprep.subr.bf16.mxu1 %v17175_v31  ;;  %17254 = vst [vmem:[#allocation64_spill] sm:$0xff] %v14820_v43  ;;  %v14822_v51 = vld [vmem:[#allocation2] sm:$0xff]  ;;  %17257 = vst [vmem:[#allocation39_spill] sm:$0xff] %v14830_v48 }
 0x3d3   :  { %17255 = vst [vmem:[#allocation37_spill] sm:$0xff] %v14822_v51 }
 0x3d5   :  { %11380 = vmatpush1.bf16.msra.mxu0 %v17248_v33  ;;  %11405 = vmatpush3.bf16.msra.mxu1 %v17249_v7  ;;  %v1381_v33 = vmul.f32 %v14822_v51, %v14820_v43  ;;  %v14826_v7 = vld [vmem:[#allocation2 + $0x8] sm:$0xff] }
 0x3d6   :  { %11382 = vmatprep.subr.bf16.mxu0 %v17250_v23  ;;  %11406 = vmatprep.subr.bf16.mxu1 %v17175_v31  ;;  %17256 = vst [vmem:[#allocation40_spill] sm:$0xff] %v14826_v7  ;;  %v1382_v23 = vmul.f32 %v14826_v7, %v14820_v43 }
 0x3d8   :  { %v1385_v9 = vadd.f32 %v14833_v56, %v1382_v23 }
 0x3d9   :  { %11384 = vmatpush1.bf16.msra.mxu0 %v17251_v54  ;;  %11408 = vmatpush3.bf16.msra.mxu1 %v17252_v16  ;;  %v1384_v16 = vadd.f32 %v14830_v48, %v1381_v33 }
 0x3da   :  { %11410 = vmatprep.subr.bf16.mxu0 %v17253_v26  ;;  %11441 = vmatprep.subr.bf16.mxu1 %v17175_v31 }
 0x44f   :  { %v1453_v54 = vpop.f32.mrb[8].mxu0  ;;  %v1524_v26 = vpop.f32.mrb[16].mxu1 }
 0x450   :  { %v1528_v60 = vadd.f32 %v1453_v54, %v1384_v16  ;;  %v1455_v15 = vpop.f32.mrb[9].mxu0  ;;  %v9348_v10 = vpop.f32.mrb[17].mxu1  ;;  %v1383_v16 = vmul.f32 %v14836_v24, %v14820_v43 }
 0x451   :  { %v1529_v51 = vadd.f32 %v1455_v15, %v1385_v9  ;;  %v14840_v10 = vld [vmem:[#allocation6 + $0x18] sm:$0xff] }
 0x452   :  { %v8174_v5 = vmul.f32 -1.442695, %v1528_v60  ;;  %v1542_v54 = vadd.f32 %v14840_v10, %v1524_v26  ;;  %v14843_v60 = vld [vmem:[#allocation6 + $0x10] sm:$0xff] }
 0x453   :  { %v8175_v55 = vmul.f32 -1.442695, %v1529_v51 }
 0x454   :  { %13643 = vpow2.f32 %v8174_v5  ;;  %v1386_v5 = vadd.f32 %v14843_v60, %v1383_v16 }
 0x455   :  { %13645 = vpow2.f32 %v8175_v55 }
 0x45e   :  { %v13644_v32 = vpop.eup %13643 }
 0x45f   :  { %v1536_v7 = vadd.f32 1.0, %v13644_v32  ;;  %v13646_v17 = vpop.eup %13645 }
 0x460   :  { %v1537_v33 = vadd.f32 1.0, %v13646_v17 }
 0x461   :  { %13647 = vrcp.f32 %v1536_v7 }
 0x462   :  { %13649 = vrcp.f32 %v1537_v33 }
 0x46b   :  { %v13648_v23 = vpop.eup %13647 }
 0x46c   :  { %v1543_v9 = vmul.f32 %v13648_v23, %v1542_v54  ;;  %v13650_v51 = vpop.eup %13649 }
 0x46d   :  { %v1546_v7 = vsub.f32 1.0, %v13650_v51  ;;  %v1548_v24 = vmul.f32 %v13650_v51, %v14699_v52  ;;  %v17264_v51 = vld [vmem:[#allocation57_spill] sm:$0xff] }
 0x46e   :  { %v1544_v15 = vadd.f32 %v1543_v9, %v1386_v5  ;;  %v17261_v9 = vld [vmem:[#allocation54_spill] sm:$0xff] }
 0x46f   :  { %v14846_v32 = vpop.f32.mrb[18].mxu1 }
 0x470   :  { %13651 = vtanh.f32 %v1544_v15  ;;  %v9383_v55 = vpop.f32.mrb[19].mxu1  ;;  %v17262_v15 = vld [vmem:[#allocation55_spill] sm:$0xff] }
 0x471   :  { %v17263_v55 = vld [vmem:[#allocation56_spill] sm:$0xff] }
 0x47a   :  { %v13652_v43 = vpop.eup %13651 }
 0x47b   :  { %v1547_v17 = vmul.f32 %v13652_v43, %v1546_v7  ;;  %v17265_v7 = vld [vmem:[#allocation58_spill] sm:$0xff] }
 0x47d   :  { %v14849_v56 = vadd.f32 %v1548_v24, %v1547_v17 }
 0x47f   :  { %1930 = vmatmul.mubr.f32.vlgmr.msra.gmra.mrb[12].mxu0 %v14849_v56  ;;  %9452 = vmatmul.mubr.f32.vlgmr.msra.gmra.mrb[22].mxu1 %v14849_v56 }
 0x480   :  { %11412 = vmatpush1.bf16.msra.mxu0 %v14322_v38  ;;  %11443 = vmatpush3.bf16.msra.mxu1 %v14324_v39 }
 0x481   :  { %11414 = vmatprep.subr.bf16.mxu0 %v14328_v45  ;;  %11444 = vmatprep.subr.bf16.mxu1 %v17175_v31 }
 0x482   :  { %2092 = vmatprep.mubr.f32.mxu0 %v17156_v47  ;;  %9486 = vmatprep.mubr.msk.f32.mxu1 %vm14064_vm0, %v17156_v47 }
 0x484   :  { %11416 = vmatpush1.bf16.msra.mxu0 %v14334_v58  ;;  %11446 = vmatpush3.bf16.msra.mxu1 %v14336_v61 }
 0x485   :  { %11418 = vmatprep.subr.bf16.mxu0 %v14340_v1  ;;  %11447 = vmatprep.subr.bf16.mxu1 %v17175_v31 }
 0x488   :  { %11420 = vmatpush1.bf16.msra.mxu0 %v14347_v13  ;;  %11449 = vmatpush3.bf16.msra.mxu1 %v14349_v14 }
 0x489   :  { %11422 = vmatprep.subr.bf16.mxu0 %v14353_v19  ;;  %11450 = vmatprep.subr.bf16.mxu1 %v17175_v31 }
 0x48c   :  { %11424 = vmatpush1.bf16.msra.mxu0 %v14357_v37  ;;  %11452 = vmatpush3.bf16.msra.mxu1 %v14359_v40 }
 0x48d   :  { %11426 = vmatprep.subr.bf16.mxu0 %v17176_v44  ;;  %11453 = vmatprep.subr.bf16.mxu1 %v17175_v31 }
 0x48f   :  { %v1757_v24 = vpop.f32.mrb[10].mxu0  ;;  %v1828_v52 = vpop.f32.mrb[20].mxu1 }
 0x490   :  { %v13517_v43 = vadd.f32 %v1757_v24, %v14577_v34  ;;  %v1759_v26 = vpop.f32.mrb[11].mxu0  ;;  %v9418_v16 = vpop.f32.mrb[21].mxu1  ;;  %11428 = vmatpush1.bf16.msra.mxu0 %v17214_v53  ;;  %11455 = vmatpush3.bf16.msra.mxu1 %v17179_v30 }
 0x491   :  { %11430 = vmatprep.subr.bf16.mxu0 %v17215_v2  ;;  %11456 = vmatprep.subr.bf16.mxu1 %v17175_v31  ;;  %v13518_v54 = vadd.f32 %v1759_v26, %v17216_v42  ;;  %v17260_v42 = vld [vmem:[#allocation53_spill] sm:$0xff]  ;;  %v1688_v16 = vadd.f32 %v14846_v32, %v14619_v50 }
 0x492   :  { %v8176_v33 = vmul.f32 -1.442695, %v13517_v43  ;;  %v1846_v43 = vadd.f32 %v1828_v52, %v17234_v59  ;;  %v17266_v59 = vld [vmem:[#allocation74_spill] sm:$0xff] }
 0x493   :  { %v8177_v34 = vmul.f32 -1.442695, %v13518_v54 }
 0x494   :  { %13653 = vpow2.f32 %v8176_v33  ;;  %11432 = vmatpush1.bf16.msra.mxu0 %v17217_v41  ;;  %11458 = vmatpush3.bf16.msra.mxu1 %v17218_v12 }
 0x495   :  { %11434 = vmatprep.subr.bf16.mxu0 %v17219_v35  ;;  %11459 = vmatprep.subr.bf16.mxu1 %v17175_v31  ;;  %13655 = vpow2.f32 %v8177_v34 }
 0x498   :  { %11436 = vmatpush1.bf16.msra.mxu0 %v17220_v28  ;;  %11461 = vmatpush3.bf16.msra.mxu1 %v17221_v27 }
 0x499   :  { %11438 = vmatprep.subr.bf16.mxu0 %v17222_v3  ;;  %11462 = vmatprep.subr.bf16.mxu1 %v17175_v31 }
 0x49c   :  { %11440 = vmatpush1.bf16.msra.mxu0 %v17223_v22  ;;  %11464 = vmatpush3.bf16.msra.mxu1 %v17224_v63 }
 0x49d   :  { %11466 = vmatprep.subr.bf16.mxu0 %v17260_v42  ;;  %11497 = vmatprep.subr.bf16.mxu1 %v17175_v31 }
 0x49e   :  { %v13654_v23 = vpop.eup %13653 }
 0x49f   :  { %v1840_v5 = vadd.f32 1.0, %v13654_v23  ;;  %2093 = vmatmul.mubr.f32.vlgmr.msra.gmra.mrb[14].mxu0 %v14849_v56  ;;  %9487 = vmatmul.mubr.f32.vlgmr.msra.gmra.mrb[24].mxu1 %v14849_v56  ;;  %v13656_v17 = vpop.eup %13655  ;;  %v17267_v23 = vld [vmem:[#allocation63_spill] sm:$0xff] }
 0x4a0   :  { %11468 = vmatpush1.bf16.msra.mxu0 %v17261_v9  ;;  %11499 = vmatpush3.bf16.msra.mxu1 %v17262_v15  ;;  %v1841_v24 = vadd.f32 1.0, %v13656_v17  ;;  %v17268_v17 = vld [vmem:[#allocation75_spill] sm:$0xff] }
 0x4a1   :  { %13657 = vrcp.f32 %v1840_v5  ;;  %11470 = vmatprep.subr.bf16.mxu0 %v17263_v55  ;;  %11500 = vmatprep.subr.bf16.mxu1 %v17175_v31 }
 0x4a2   :  { %2233 = vmatprep.mubr.f32.mxu0 %v17156_v47  ;;  %9521 = vmatprep.mubr.msk.f32.mxu1 %vm14064_vm0, %v17156_v47  ;;  %13659 = vrcp.f32 %v1841_v24  ;;  %v17269_v24 = vld [vmem:[#allocation76_spill] sm:$0xff] }
 0x4a4   :  { %11472 = vmatpush1.bf16.msra.mxu0 %v17264_v51  ;;  %11502 = vmatpush3.bf16.msra.mxu1 %v17265_v7 }
 0x4a5   :  { %11474 = vmatprep.subr.bf16.mxu0 %v17231_v57  ;;  %11503 = vmatprep.subr.bf16.mxu1 %v17175_v31 }
 0x4a8   :  { %11476 = vmatpush1.bf16.msra.mxu0 %v17197_v20  ;;  %11505 = vmatpush3.bf16.msra.mxu1 %v17232_v21 }
 0x4a9   :  { %11478 = vmatprep.subr.bf16.mxu0 %v17233_v0  ;;  %11506 = vmatprep.subr.bf16.mxu1 %v17175_v31 }
 0x4ab   :  { %v13658_v26 = vpop.eup %13657 }
 0x4ac   :  { %v1847_v33 = vmul.f32 %v13658_v26, %v1846_v43  ;;  %11480 = vmatpush1.bf16.msra.mxu0 %v17200_v8  ;;  %11508 = vmatpush3.bf16.msra.mxu1 %v17201_v6  ;;  %v13660_v50 = vpop.eup %13659  ;;  %v17271_v26 = vld [vmem:[#allocation12_spill] sm:$0xff] }
 0x4ad   :  { %11482 = vmatprep.subr.bf16.mxu0 %v17202_v36  ;;  %11509 = vmatprep.subr.bf16.mxu1 %v17175_v31  ;;  %v1850_v32 = vsub.f32 1.0, %v13660_v50  ;;  %v1852_v5 = vmul.f32 %v13660_v50, %v17267_v23  ;;  %v17275_v50 = vld [vmem:[#allocation15_spill] sm:$0xff]  ;;  %v17279_v23 = vld [vmem:[#allocation30_spill] sm:$0xff] }
 0x4ae   :  { %v1848_v54 = vadd.f32 %v1847_v33, %v1688_v16  ;;  %v17272_v16 = vld [vmem:[#allocation13_spill] sm:$0xff]  ;;  %v17273_v33 = vld [vmem:[#allocation28_spill] sm:$0xff] }
 0x4b0   :  { %13661 = vtanh.f32 %v1848_v54  ;;  %11484 = vmatpush1.bf16.msra.mxu0 %v14451_v11  ;;  %11511 = vmatpush3.bf16.msra.mxu1 %v17203_v25  ;;  %v17274_v54 = vld [vmem:[#allocation14_spill] sm:$0xff] }
 0x4b1   :  { %11486 = vmatprep.subr.bf16.mxu0 %v17204_v49  ;;  %11512 = vmatprep.subr.bf16.mxu1 %v17175_v31 }
 0x4b4   :  { %11488 = vmatpush1.bf16.msra.mxu0 %v14461_v29  ;;  %11514 = vmatpush3.bf16.msra.mxu1 %v14464_v46 }
 0x4b5   :  { %11490 = vmatprep.subr.bf16.mxu0 %v14467_v62  ;;  %11515 = vmatprep.subr.bf16.mxu1 %v17175_v31 }
 0x4b8   :  { %11492 = vmatpush1.bf16.msra.mxu0 %v14471_v4  ;;  %11517 = vmatpush3.bf16.msra.mxu1 %v14474_v18 }
 0x4b9   :  { %11494 = vmatprep.subr.bf16.mxu0 %v17266_v59  ;;  %11518 = vmatprep.subr.bf16.mxu1 %v17175_v31 }
 0x4ba   :  { %v13662_v52 = vpop.eup %13661 }
 0x4bb   :  { %v1851_v34 = vmul.f32 %v13662_v52, %v1850_v32  ;;  %v17276_v32 = vld [vmem:[#allocation29_spill] sm:$0xff]  ;;  %v17277_v52 = vld [vmem:[#allocation16_spill] sm:$0xff] }
 0x4bc   :  { %11496 = vmatpush1.bf16.msra.mxu0 %v17268_v17  ;;  %11520 = vmatpush3.bf16.msra.mxu1 %v17269_v24 }
 0x4bd   :  { %v14929_v43 = vadd.f32 %v1852_v5, %v1851_v34  ;;  %11522 = vmatprep.subr.bf16.mxu0 %v17271_v26  ;;  %11553 = vmatprep.subr.bf16.mxu1 %v17175_v31  ;;  %v17278_v34 = vld [vmem:[#allocation17_spill] sm:$0xff]  ;;  %v17280_v5 = vld [vmem:[#allocation18_spill] sm:$0xff] }
 0x4bf   :  { %17270 = vst [vmem:[#allocation41_spill] sm:$0xff] %v14929_v43  ;;  %2234 = vmatmul.mubr.f32.vlgmr.msra.gmra.mrb[14].mxu0 %v14929_v43  ;;  %9522 = vmatmul.mubr.f32.vlgmr.msra.gmra.mrb[26].mxu1 %v14929_v43 }
 0x4c0   :  { %11524 = vmatpush1.bf16.msra.mxu0 %v17272_v16  ;;  %11555 = vmatpush3.bf16.msra.mxu1 %v17273_v33  ;;  %v17282_v33 = vld [vmem:[#allocation31_spill] sm:$0xff]  ;;  %v17283_v16 = vld [vmem:[#allocation20_spill] sm:$0xff] }
 0x4c1   :  { %11526 = vmatprep.subr.bf16.mxu0 %v17274_v54  ;;  %11556 = vmatprep.subr.bf16.mxu1 %v17175_v31  ;;  %v17281_v54 = vld [vmem:[#allocation19_spill] sm:$0xff] }
 0x4c2   :  { %2407 = vmatprep.mubr.f32.mxu0 %v17156_v47  ;;  %9556 = vmatprep.mubr.msk.f32.mxu1 %vm14064_vm0, %v17156_v47 }
 0x4c4   :  { %11528 = vmatpush1.bf16.msra.mxu0 %v17275_v50  ;;  %11558 = vmatpush3.bf16.msra.mxu1 %v17276_v32  ;;  %v17284_v32 = vld [vmem:[#allocation21_spill] sm:$0xff]  ;;  %v17286_v50 = vld [vmem:[#allocation22_spill] sm:$0xff] }
 0x4c5   :  { %11530 = vmatprep.subr.bf16.mxu0 %v17277_v52  ;;  %11559 = vmatprep.subr.bf16.mxu1 %v17175_v31  ;;  %v17285_v52 = vld [vmem:[#allocation32_spill] sm:$0xff] }
 0x4c8   :  { %11532 = vmatpush1.bf16.msra.mxu0 %v17278_v34  ;;  %11561 = vmatpush3.bf16.msra.mxu1 %v17279_v23  ;;  %v17287_v23 = vld [vmem:[#allocation23_spill] sm:$0xff]  ;;  %v17289_v34 = vld [vmem:[#allocation24_spill] sm:$0xff] }
 0x4c9   :  { %11534 = vmatprep.subr.bf16.mxu0 %v17280_v5  ;;  %11562 = vmatprep.subr.bf16.mxu1 %v17175_v31  ;;  %v17288_v5 = vld [vmem:[#allocation33_spill] sm:$0xff] }
 0x4cc   :  { %11536 = vmatpush1.bf16.msra.mxu0 %v17281_v54  ;;  %11564 = vmatpush3.bf16.msra.mxu1 %v17282_v33  ;;  %v17290_v33 = vld [vmem:[#allocation25_spill] sm:$0xff]  ;;  %v17292_v54 = vld [vmem:[#allocation26_spill] sm:$0xff] }
 0x4cd   :  { %11538 = vmatprep.subr.bf16.mxu0 %v17283_v16  ;;  %11565 = vmatprep.subr.bf16.mxu1 %v17175_v31  ;;  %v17291_v16 = vld [vmem:[#allocation34_spill] sm:$0xff] }
 0x4d0   :  { %11540 = vmatpush1.bf16.msra.mxu0 %v17284_v32  ;;  %11567 = vmatpush3.bf16.msra.mxu1 %v17285_v52  ;;  %v17293_v52 = vld [vmem:[#allocation27_spill] sm:$0xff]  ;;  %v17295_v32 = vld [vmem:[#allocation36_spill] sm:$0xff] }
 0x4d1   :  { %11542 = vmatprep.subr.bf16.mxu0 %v17286_v50  ;;  %11568 = vmatprep.subr.bf16.mxu1 %v17175_v31  ;;  %v17294_v50 = vld [vmem:[#allocation35_spill] sm:$0xff] }
 0x4d4   :  { %11544 = vmatpush1.bf16.msra.mxu0 %v17287_v23  ;;  %11570 = vmatpush3.bf16.msra.mxu1 %v17288_v5  ;;  %v14970_v5 = vpop.permute.xlu0 %1856 }
 0x4d5   :  { %11546 = vmatprep.subr.bf16.mxu0 %v17289_v34  ;;  %11571 = vmatprep.subr.bf16.mxu1 %v17175_v31  ;;  %17296 = vst [vmem:[#allocation45_spill] sm:$0xff] %v14970_v5  ;;  %v17297_v34 = vld [vmem:[#allocation37_spill] sm:$0xff] }
 0x4d6   :  { %v1859_v23 = vmul.f32 %v17297_v34, %v14970_v5 }
 0x4d8   :  { %11548 = vmatpush1.bf16.msra.mxu0 %v17290_v33  ;;  %11573 = vmatpush3.bf16.msra.mxu1 %v17291_v16  ;;  %v17298_v33 = vld [vmem:[#allocation40_spill] sm:$0xff] }
 0x4d9   :  { %11550 = vmatprep.subr.bf16.mxu0 %v17292_v54  ;;  %11574 = vmatprep.subr.bf16.mxu1 %v17175_v31  ;;  %v1860_v16 = vmul.f32 %v17298_v33, %v14970_v5  ;;  %v1862_v54 = vadd.f32 %v14830_v48, %v1859_v23  ;;  %v17300_v33 = vld [vmem:[#allocation44_spill] sm:$0xff] }
 0x4da   :  { %v1861_v29 = vmul.f32 %v17300_v33, %v14970_v5  ;;  %v17309_v5 = vld [vmem:[#allocation76_spill] sm:$0xff] }
 0x4dc   :  { %11552 = vmatpush1.bf16.msra.mxu0 %v17293_v52  ;;  %11576 = vmatpush3.bf16.msra.mxu1 %v17294_v50  ;;  %v17299_v50 = vld [vmem:[#allocation42_spill] sm:$0xff] }
 0x4dd   :  { %11578 = vmatprep.subr.bf16.mxu0 %v17295_v32  ;;  %11609 = vmatprep.subr.bf16.mxu1 %v17175_v31  ;;  %v1863_v59 = vadd.f32 %v17299_v50, %v1860_v16 }
 0x552   :  { %v1931_v26 = vpop.f32.mrb[12].mxu0  ;;  %v2002_v24 = vpop.f32.mrb[22].mxu1 }
 0x553   :  { %v2006_v17 = vadd.f32 %v1931_v26, %v1862_v54  ;;  %v1933_v52 = vpop.f32.mrb[13].mxu0  ;;  %v9453_v43 = vpop.f32.mrb[23].mxu1  ;;  %v2020_v48 = vadd.f32 %v14840_v10, %v2002_v24 }
 0x554   :  { %v2007_v18 = vadd.f32 %v1933_v52, %v1863_v59  ;;  %v1864_v43 = vadd.f32 %v14843_v60, %v1861_v29 }
 0x555   :  { %v8178_v32 = vmul.f32 -1.442695, %v2006_v17 }
 0x556   :  { %v8179_v4 = vmul.f32 -1.442695, %v2007_v18 }
 0x557   :  { %13663 = vpow2.f32 %v8178_v32 }
 0x558   :  { %13665 = vpow2.f32 %v8179_v4 }
 0x561   :  { %v13664_v62 = vpop.eup %13663 }
 0x562   :  { %v2014_v46 = vadd.f32 1.0, %v13664_v62  ;;  %v13666_v34 = vpop.eup %13665 }
 0x563   :  { %v2015_v23 = vadd.f32 1.0, %v13666_v34 }
 0x564   :  { %13667 = vrcp.f32 %v2014_v46 }
 0x565   :  { %13669 = vrcp.f32 %v2015_v23 }
 0x56e   :  { %v13668_v26 = vpop.eup %13667 }
 0x56f   :  { %v2021_v54 = vmul.f32 %v13668_v26, %v2020_v48  ;;  %v13670_v18 = vpop.eup %13669  ;;  %v15008_v48 = vld [vmem:[#allocation6 + $0x20] sm:$0xff] }
 0x570   :  { %v2024_v62 = vsub.f32 1.0, %v13670_v18  ;;  %v2026_v32 = vmul.f32 %v13670_v18, %v14849_v56 }
 0x571   :  { %v2022_v17 = vadd.f32 %v2021_v54, %v1864_v43  ;;  %v15015_v43 = vld [vmem:[#allocation6 + $0x28] sm:$0xff] }
 0x572   :  { %v14982_v59 = vpop.f32.mrb[24].mxu1 }
 0x573   :  { %13671 = vtanh.f32 %v2022_v17  ;;  %v9488_v4 = vpop.f32.mrb[25].mxu1 }
 0x57d   :  { %v13672_v46 = vpop.eup %13671 }
 0x57e   :  { %v2025_v16 = vmul.f32 %v13672_v46, %v2024_v62 }
 0x580   :  { %v14985_v52 = vadd.f32 %v2026_v32, %v2025_v16  ;;  %v15047_v16 = vld [vmem:[#allocation6 + $0x38] sm:$0xff] }
 0x582   :  { %2408 = vmatmul.mubr.f32.vlgmr.msra.gmra.mrb[16].mxu0 %v14985_v52  ;;  %9557 = vmatmul.mubr.f32.vlgmr.msra.gmra.mrb[28].mxu1 %v14985_v52 }
 0x583   :  { %11580 = vmatpush1.bf16.msra.mxu0 %v14322_v38  ;;  %11611 = vmatpush3.bf16.msra.mxu1 %v14324_v39 }
 0x584   :  { %11582 = vmatprep.subr.bf16.mxu0 %v14328_v45  ;;  %11612 = vmatprep.subr.bf16.mxu1 %v17175_v31 }
 0x585   :  { %2570 = vmatprep.mubr.f32.mxu0 %v17156_v47  ;;  %9591 = vmatprep.mubr.msk.f32.mxu1 %vm14064_vm0, %v17156_v47 }
 0x587   :  { %11584 = vmatpush1.bf16.msra.mxu0 %v14334_v58  ;;  %11614 = vmatpush3.bf16.msra.mxu1 %v14336_v61 }
 0x588   :  { %11586 = vmatprep.subr.bf16.mxu0 %v14340_v1  ;;  %11615 = vmatprep.subr.bf16.mxu1 %v17175_v31 }
 0x58b   :  { %11588 = vmatpush1.bf16.msra.mxu0 %v14347_v13  ;;  %11617 = vmatpush3.bf16.msra.mxu1 %v14349_v14 }
 0x58c   :  { %11590 = vmatprep.subr.bf16.mxu0 %v14353_v19  ;;  %11618 = vmatprep.subr.bf16.mxu1 %v17175_v31 }
 0x58f   :  { %11592 = vmatpush1.bf16.msra.mxu0 %v14357_v37  ;;  %11620 = vmatpush3.bf16.msra.mxu1 %v14359_v40 }
 0x590   :  { %11594 = vmatprep.subr.bf16.mxu0 %v17176_v44  ;;  %11621 = vmatprep.subr.bf16.mxu1 %v17175_v31 }
 0x592   :  { %v2235_v56 = vpop.f32.mrb[14].mxu0  ;;  %v2306_v29 = vpop.f32.mrb[26].mxu1 }
 0x593   :  { %v13519_v24 = vadd.f32 %v15008_v48, %v2235_v56  ;;  %v2237_v34 = vpop.f32.mrb[15].mxu0  ;;  %v9523_v23 = vpop.f32.mrb[27].mxu1  ;;  %11596 = vmatpush1.bf16.msra.mxu0 %v17214_v53  ;;  %11623 = vmatpush3.bf16.msra.mxu1 %v17179_v30  ;;  %v2324_v32 = vadd.f32 %v15047_v16, %v2306_v29  ;;  %v17302_v29 = vld [vmem:[#allocation70_spill] sm:$0xff] }
 0x594   :  { %11598 = vmatprep.subr.bf16.mxu0 %v17215_v2  ;;  %11624 = vmatprep.subr.bf16.mxu1 %v17175_v31  ;;  %v13520_v54 = vadd.f32 %v15015_v43, %v2237_v34 }
 0x595   :  { %v8180_v26 = vmul.f32 -1.442695, %v13519_v24  ;;  %v15050_v24 = vld [vmem:[#allocation6 + $0x30] sm:$0xff] }
 0x596   :  { %v8181_v17 = vmul.f32 -1.442695, %v13520_v54  ;;  %v2166_v34 = vadd.f32 %v15050_v24, %v14982_v59  ;;  %v17301_v59 = vld [vmem:[#allocation69_spill] sm:$0xff]  ;;  %v17303_v54 = vld [vmem:[#allocation71_spill] sm:$0xff] }
 0x597   :  { %13673 = vpow2.f32 %v8180_v26  ;;  %11600 = vmatpush1.bf16.msra.mxu0 %v17217_v41  ;;  %11626 = vmatpush3.bf16.msra.mxu1 %v17218_v12 }
 0x598   :  { %11602 = vmatprep.subr.bf16.mxu0 %v17219_v35  ;;  %11627 = vmatprep.subr.bf16.mxu1 %v17175_v31  ;;  %13675 = vpow2.f32 %v8181_v17 }
 0x59b   :  { %11604 = vmatpush1.bf16.msra.mxu0 %v17220_v28  ;;  %11629 = vmatpush3.bf16.msra.mxu1 %v17221_v27 }
 0x59c   :  { %11606 = vmatprep.subr.bf16.mxu0 %v17222_v3  ;;  %11630 = vmatprep.subr.bf16.mxu1 %v17175_v31 }
 0x59f   :  { %11608 = vmatpush1.bf16.msra.mxu0 %v17223_v22  ;;  %11632 = vmatpush3.bf16.msra.mxu1 %v17224_v63 }
 0x5a0   :  { %11634 = vmatprep.subr.bf16.mxu0 %v17260_v42  ;;  %11665 = vmatprep.subr.bf16.mxu1 %v17175_v31 }
 0x5a1   :  { %v13674_v4 = vpop.eup %13673 }
 0x5a2   :  { %v2318_v18 = vadd.f32 1.0, %v13674_v4  ;;  %2571 = vmatmul.mubr.f32.vlgmr.msra.gmra.mrb[18].mxu0 %v14985_v52  ;;  %9592 = vmatmul.mubr.f32.vlgmr.msra.gmra.mrb[30].mxu1 %v14985_v52  ;;  %v13676_v62 = vpop.eup %13675  ;;  %v17304_v4 = vld [vmem:[#allocation72_spill] sm:$0xff] }
 0x5a3   :  { %11636 = vmatpush1.bf16.msra.mxu0 %v17261_v9  ;;  %11667 = vmatpush3.bf16.msra.mxu1 %v17262_v15  ;;  %v2319_v46 = vadd.f32 1.0, %v13676_v62  ;;  %v17306_v62 = vld [vmem:[#allocation74_spill] sm:$0xff] }
 0x5a4   :  { %13677 = vrcp.f32 %v2318_v18  ;;  %11638 = vmatprep.subr.bf16.mxu0 %v17263_v55  ;;  %11668 = vmatprep.subr.bf16.mxu1 %v17175_v31  ;;  %v17305_v18 = vld [vmem:[#allocation73_spill] sm:$0xff] }
 0x5a5   :  { %2711 = vmatprep.mubr.f32.mxu0 %v17156_v47  ;;  %9626 = vmatprep.mubr.msk.f32.mxu1 %vm14064_vm0, %v17156_v47  ;;  %13679 = vrcp.f32 %v2319_v46 }
 0x5a7   :  { %11640 = vmatpush1.bf16.msra.mxu0 %v17264_v51  ;;  %11670 = vmatpush3.bf16.msra.mxu1 %v17265_v7 }
 0x5a8   :  { %11642 = vmatprep.subr.bf16.mxu0 %v17231_v57  ;;  %11671 = vmatprep.subr.bf16.mxu1 %v17175_v31 }
 0x5ab   :  { %11644 = vmatpush1.bf16.msra.mxu0 %v17197_v20  ;;  %11673 = vmatpush3.bf16.msra.mxu1 %v17232_v21 }
 0x5ac   :  { %11646 = vmatprep.subr.bf16.mxu0 %v17233_v0  ;;  %11674 = vmatprep.subr.bf16.mxu1 %v17175_v31 }
 0x5ae   :  { %v13678_v56 = vpop.eup %13677 }
 0x5af   :  { %v2325_v23 = vmul.f32 %v13678_v56, %v2324_v32  ;;  %11648 = vmatpush1.bf16.msra.mxu0 %v17200_v8  ;;  %11676 = vmatpush3.bf16.msra.mxu1 %v17201_v6  ;;  %v13680_v17 = vpop.eup %13679 }
 0x5b0   :  { %11650 = vmatprep.subr.bf16.mxu0 %v17202_v36  ;;  %11677 = vmatprep.subr.bf16.mxu1 %v17175_v31  ;;  %v2328_v46 = vsub.f32 1.0, %v13680_v17 }
 0x5b1   :  { %v2326_v26 = vadd.f32 %v2325_v23, %v2166_v34  ;;  %v17307_v34 = vld [vmem:[#allocation41_spill] sm:$0xff] }
 0x5b2   :  { %v2330_v23 = vmul.f32 %v13680_v17, %v17307_v34  ;;  %v17315_v17 = vld [vmem:[#allocation15_spill] sm:$0xff]  ;;  %v17318_v34 = vld [vmem:[#allocation17_spill] sm:$0xff] }
 0x5b3   :  { %13681 = vtanh.f32 %v2326_v26  ;;  %11652 = vmatpush1.bf16.msra.mxu0 %v14451_v11  ;;  %11679 = vmatpush3.bf16.msra.mxu1 %v17203_v25  ;;  %v17308_v26 = vld [vmem:[#allocation75_spill] sm:$0xff] }
 0x5b4   :  { %11654 = vmatprep.subr.bf16.mxu0 %v17204_v49  ;;  %11680 = vmatprep.subr.bf16.mxu1 %v17175_v31 }
 0x5b7   :  { %11656 = vmatpush1.bf16.msra.mxu0 %v17301_v59  ;;  %11682 = vmatpush3.bf16.msra.mxu1 %v17302_v29  ;;  %v17311_v29 = vld [vmem:[#allocation12_spill] sm:$0xff] }
 0x5b8   :  { %11658 = vmatprep.subr.bf16.mxu0 %v17303_v54  ;;  %11683 = vmatprep.subr.bf16.mxu1 %v17175_v31 }
 0x5bb   :  { %11660 = vmatpush1.bf16.msra.mxu0 %v17304_v4  ;;  %11685 = vmatpush3.bf16.msra.mxu1 %v17305_v18  ;;  %v17313_v18 = vld [vmem:[#allocation28_spill] sm:$0xff] }
 0x5bc   :  { %11662 = vmatprep.subr.bf16.mxu0 %v17306_v62  ;;  %11686 = vmatprep.subr.bf16.mxu1 %v17175_v31  ;;  %v17312_v62 = vld [vmem:[#allocation13_spill] sm:$0xff] }
 0x5bd   :  { %v13682_v32 = vpop.eup %13681 }
 0x5be   :  { %v2329_v56 = vmul.f32 %v13682_v32, %v2328_v46  ;;  %v17314_v46 = vld [vmem:[#allocation14_spill] sm:$0xff]  ;;  %v17316_v32 = vld [vmem:[#allocation29_spill] sm:$0xff] }
 0x5bf   :  { %11664 = vmatpush1.bf16.msra.mxu0 %v17308_v26  ;;  %11688 = vmatpush3.bf16.msra.mxu1 %v17309_v5  ;;  %v17339_v5 = vld [vmem:[#allocation39_spill] sm:$0xff] }
 0x5c0   :  { %v15073_v54 = vadd.f32 %v2330_v23, %v2329_v56  ;;  %11690 = vmatprep.subr.bf16.mxu0 %v17311_v29  ;;  %11721 = vmatprep.subr.bf16.mxu1 %v17175_v31  ;;  %v17317_v56 = vld [vmem:[#allocation16_spill] sm:$0xff]  ;;  %v17319_v23 = vld [vmem:[#allocation30_spill] sm:$0xff] }
 0x5c1   :  { %v17323_v29 = vld [vmem:[#allocation20_spill] sm:$0xff] }
 0x5c2   :  { %17310 = vst [vmem:[#allocation46_spill] sm:$0xff] %v15073_v54  ;;  %2712 = vmatmul.mubr.f32.vlgmr.msra.gmra.mrb[18].mxu0 %v15073_v54  ;;  %9627 = vmatmul.mubr.f32.vlgmr.msra.gmra.mrb[32].mxu1 %v15073_v54 }
 0x5c3   :  { %11692 = vmatpush1.bf16.msra.mxu0 %v17312_v62  ;;  %11723 = vmatpush3.bf16.msra.mxu1 %v17313_v18  ;;  %v17321_v18 = vld [vmem:[#allocation19_spill] sm:$0xff] }
 0x5c4   :  { %11694 = vmatprep.subr.bf16.mxu0 %v17314_v46  ;;  %11724 = vmatprep.subr.bf16.mxu1 %v17175_v31  ;;  %v17320_v46 = vld [vmem:[#allocation18_spill] sm:$0xff]  ;;  %v17322_v62 = vld [vmem:[#allocation31_spill] sm:$0xff] }
 0x5c5   :  { %2885 = vmatprep.mubr.f32.mxu0 %v17156_v47  ;;  %9661 = vmatprep.mubr.msk.f32.mxu1 %vm14064_vm0, %v17156_v47 }
 0x5c7   :  { %11696 = vmatpush1.bf16.msra.mxu0 %v17315_v17  ;;  %11726 = vmatpush3.bf16.msra.mxu1 %v17316_v32  ;;  %v17324_v32 = vld [vmem:[#allocation21_spill] sm:$0xff]  ;;  %v17326_v17 = vld [vmem:[#allocation22_spill] sm:$0xff] }
 0x5c8   :  { %11698 = vmatprep.subr.bf16.mxu0 %v17317_v56  ;;  %11727 = vmatprep.subr.bf16.mxu1 %v17175_v31  ;;  %v17325_v56 = vld [vmem:[#allocation32_spill] sm:$0xff] }
 0x5cb   :  { %11700 = vmatpush1.bf16.msra.mxu0 %v17318_v34  ;;  %11729 = vmatpush3.bf16.msra.mxu1 %v17319_v23  ;;  %v17327_v23 = vld [vmem:[#allocation23_spill] sm:$0xff]  ;;  %v17329_v34 = vld [vmem:[#allocation24_spill] sm:$0xff] }
 0x5cc   :  { %11702 = vmatprep.subr.bf16.mxu0 %v17320_v46  ;;  %11730 = vmatprep.subr.bf16.mxu1 %v17175_v31  ;;  %v17328_v46 = vld [vmem:[#allocation33_spill] sm:$0xff] }
 0x5cf   :  { %11704 = vmatpush1.bf16.msra.mxu0 %v17321_v18  ;;  %11732 = vmatpush3.bf16.msra.mxu1 %v17322_v62  ;;  %v17330_v62 = vld [vmem:[#allocation25_spill] sm:$0xff]  ;;  %v17332_v18 = vld [vmem:[#allocation26_spill] sm:$0xff] }
 0x5d0   :  { %11706 = vmatprep.subr.bf16.mxu0 %v17323_v29  ;;  %11733 = vmatprep.subr.bf16.mxu1 %v17175_v31  ;;  %v17331_v29 = vld [vmem:[#allocation34_spill] sm:$0xff] }
 0x5d3   :  { %11708 = vmatpush1.bf16.msra.mxu0 %v17324_v32  ;;  %11735 = vmatpush3.bf16.msra.mxu1 %v17325_v56  ;;  %v17333_v56 = vld [vmem:[#allocation27_spill] sm:$0xff]  ;;  %v17335_v32 = vld [vmem:[#allocation36_spill] sm:$0xff] }
 0x5d4   :  { %11710 = vmatprep.subr.bf16.mxu0 %v17326_v17  ;;  %11736 = vmatprep.subr.bf16.mxu1 %v17175_v31  ;;  %v17334_v17 = vld [vmem:[#allocation35_spill] sm:$0xff] }
 0x5d7   :  { %11712 = vmatpush1.bf16.msra.mxu0 %v17327_v23  ;;  %11738 = vmatpush3.bf16.msra.mxu1 %v17328_v46  ;;  %v15114_v46 = vpop.permute.xlu1 %2334 }
 0x5d8   :  { %11714 = vmatprep.subr.bf16.mxu0 %v17329_v34  ;;  %11739 = vmatprep.subr.bf16.mxu1 %v17175_v31  ;;  %17336 = vst [vmem:[#allocation47_spill] sm:$0xff] %v15114_v46  ;;  %v17337_v34 = vld [vmem:[#allocation37_spill] sm:$0xff] }
 0x5d9   :  { %v2337_v23 = vmul.f32 %v17337_v34, %v15114_v46 }
 0x5db   :  { %11716 = vmatpush1.bf16.msra.mxu0 %v17330_v62  ;;  %11741 = vmatpush3.bf16.msra.mxu1 %v17331_v29  ;;  %v17338_v62 = vld [vmem:[#allocation40_spill] sm:$0xff] }
 0x5dc   :  { %11718 = vmatprep.subr.bf16.mxu0 %v17332_v18  ;;  %11742 = vmatprep.subr.bf16.mxu1 %v17175_v31  ;;  %v2338_v29 = vmul.f32 %v17338_v62, %v15114_v46  ;;  %v2340_v18 = vadd.f32 %v17339_v5, %v2337_v23  ;;  %v2339_v62 = vmul.f32 %v17300_v33, %v15114_v46  ;;  %v17356_v46 = vld [vmem:[#allocation28_spill] sm:$0xff] }
 0x5df   :  { %11720 = vmatpush1.bf16.msra.mxu0 %v17333_v56  ;;  %11744 = vmatpush3.bf16.msra.mxu1 %v17334_v17  ;;  %v2341_v17 = vadd.f32 %v17299_v50, %v2338_v29 }
 0x5e0   :  { %11746 = vmatprep.subr.bf16.mxu0 %v17335_v32  ;;  %11777 = vmatprep.subr.bf16.mxu1 %v17175_v31 }
 0x655   :  { %v2409_v26 = vpop.f32.mrb[16].mxu0  ;;  %v2480_v54 = vpop.f32.mrb[28].mxu1 }
 0x656   :  { %v2484_v4 = vadd.f32 %v2409_v26, %v2340_v18  ;;  %v2411_v56 = vpop.f32.mrb[17].mxu0  ;;  %v9558_v59 = vpop.f32.mrb[29].mxu1  ;;  %v2498_v23 = vadd.f32 %v14840_v10, %v2480_v54 }
 0x657   :  { %v2485_v49 = vadd.f32 %v2411_v56, %v2341_v17  ;;  %v2342_v59 = vadd.f32 %v14843_v60, %v2339_v62 }
 0x658   :  { %v8182_v32 = vmul.f32 -1.442695, %v2484_v4 }
 0x659   :  { %v8183_v25 = vmul.f32 -1.442695, %v2485_v49 }
 0x65a   :  { %13683 = vpow2.f32 %v8182_v32 }
 0x65b   :  { %13685 = vpow2.f32 %v8183_v25 }
 0x664   :  { %v13684_v11 = vpop.eup %13683 }
 0x665   :  { %v2492_v36 = vadd.f32 1.0, %v13684_v11  ;;  %v13686_v34 = vpop.eup %13685 }
 0x666   :  { %v2493_v5 = vadd.f32 1.0, %v13686_v34 }
 0x667   :  { %13687 = vrcp.f32 %v2492_v36 }
 0x668   :  { %13689 = vrcp.f32 %v2493_v5 }
 0x671   :  { %v13688_v18 = vpop.eup %13687 }
 0x672   :  { %v2499_v26 = vmul.f32 %v13688_v18, %v2498_v23  ;;  %v13690_v49 = vpop.eup %13689 }
 0x673   :  { %v2502_v11 = vsub.f32 1.0, %v13690_v49  ;;  %v2504_v17 = vmul.f32 %v13690_v49, %v14985_v52 }
 0x674   :  { %v2500_v50 = vadd.f32 %v2499_v26, %v2342_v59 }
 0x675   :  { %v15126_v29 = vpop.f32.mrb[30].mxu1 }
 0x676   :  { %13691 = vtanh.f32 %v2500_v50  ;;  %v9593_v25 = vpop.f32.mrb[31].mxu1 }
 0x677   :  { %v2644_v25 = vadd.f32 %v15050_v24, %v15126_v29  ;;  %v17344_v29 = vld [vmem:[#allocation69_spill] sm:$0xff] }
 0x680   :  { %v13692_v36 = vpop.eup %13691 }
 0x681   :  { %v2503_v4 = vmul.f32 %v13692_v36, %v2502_v11  ;;  %v17340_v11 = vld [vmem:[#allocation65_spill] sm:$0xff] }
 0x683   :  { %v15129_v33 = vadd.f32 %v2504_v17, %v2503_v4  ;;  %v17341_v4 = vld [vmem:[#allocation66_spill] sm:$0xff]  ;;  %v17342_v17 = vld [vmem:[#allocation67_spill] sm:$0xff] }
 0x685   :  { %2886 = vmatmul.mubr.f32.vlgmr.msra.gmra.mrb[20].mxu0 %v15129_v33  ;;  %9662 = vmatmul.mubr.f32.vlgmr.msra.gmra.mrb[34].mxu1 %v15129_v33 }
 0x686   :  { %11748 = vmatpush1.bf16.msra.mxu0 %v14322_v38  ;;  %11779 = vmatpush3.bf16.msra.mxu1 %v14324_v39 }
 0x687   :  { %11750 = vmatprep.subr.bf16.mxu0 %v14328_v45  ;;  %11780 = vmatprep.subr.bf16.mxu1 %v17175_v31 }
 0x688   :  { %3048 = vmatprep.mubr.f32.mxu0 %v17156_v47  ;;  %9696 = vmatprep.mubr.msk.f32.mxu1 %vm14064_vm0, %v17156_v47 }
 0x68a   :  { %11752 = vmatpush1.bf16.msra.mxu0 %v14334_v58  ;;  %11782 = vmatpush3.bf16.msra.mxu1 %v14336_v61 }
 0x68b   :  { %11754 = vmatprep.subr.bf16.mxu0 %v14340_v1  ;;  %11783 = vmatprep.subr.bf16.mxu1 %v17175_v31 }
 0x68e   :  { %11756 = vmatpush1.bf16.msra.mxu0 %v14347_v13  ;;  %11785 = vmatpush3.bf16.msra.mxu1 %v14349_v14 }
 0x68f   :  { %11758 = vmatprep.subr.bf16.mxu0 %v14353_v19  ;;  %11786 = vmatprep.subr.bf16.mxu1 %v17175_v31 }
 0x692   :  { %11760 = vmatpush1.bf16.msra.mxu0 %v14357_v37  ;;  %11788 = vmatpush3.bf16.msra.mxu1 %v14359_v40 }
 0x693   :  { %11762 = vmatprep.subr.bf16.mxu0 %v17176_v44  ;;  %11789 = vmatprep.subr.bf16.mxu1 %v17175_v31 }
 0x695   :  { %v2713_v10 = vpop.f32.mrb[18].mxu0  ;;  %v2784_v60 = vpop.f32.mrb[32].mxu1 }
 0x696   :  { %v13521_v52 = vadd.f32 %v15008_v48, %v2713_v10  ;;  %v2715_v54 = vpop.f32.mrb[19].mxu0  ;;  %v9628_v32 = vpop.f32.mrb[33].mxu1  ;;  %11764 = vmatpush1.bf16.msra.mxu0 %v17214_v53  ;;  %11791 = vmatpush3.bf16.msra.mxu1 %v17179_v30  ;;  %v2802_v26 = vadd.f32 %v15047_v16, %v2784_v60  ;;  %v17343_v10 = vld [vmem:[#allocation68_spill] sm:$0xff]  ;;  %v17345_v60 = vld [vmem:[#allocation70_spill] sm:$0xff] }
 0x697   :  { %11766 = vmatprep.subr.bf16.mxu0 %v17215_v2  ;;  %11792 = vmatprep.subr.bf16.mxu1 %v17175_v31  ;;  %v13522_v34 = vadd.f32 %v15015_v43, %v2715_v54  ;;  %v17347_v32 = vld [vmem:[#allocation72_spill] sm:$0xff] }
 0x698   :  { %v8184_v56 = vmul.f32 -1.442695, %v13521_v52  ;;  %v17346_v52 = vld [vmem:[#allocation71_spill] sm:$0xff] }
 0x699   :  { %v8185_v62 = vmul.f32 -1.442695, %v13522_v34  ;;  %v17349_v34 = vld [vmem:[#allocation74_spill] sm:$0xff] }
 0x69a   :  { %13693 = vpow2.f32 %v8184_v56  ;;  %11768 = vmatpush1.bf16.msra.mxu0 %v17217_v41  ;;  %11794 = vmatpush3.bf16.msra.mxu1 %v17218_v12  ;;  %v17348_v56 = vld [vmem:[#allocation73_spill] sm:$0xff] }
 0x69b   :  { %11770 = vmatprep.subr.bf16.mxu0 %v17219_v35  ;;  %11795 = vmatprep.subr.bf16.mxu1 %v17175_v31  ;;  %13695 = vpow2.f32 %v8185_v62 }
 0x69e   :  { %11772 = vmatpush1.bf16.msra.mxu0 %v17220_v28  ;;  %11797 = vmatpush3.bf16.msra.mxu1 %v17221_v27 }
 0x69f   :  { %11774 = vmatprep.subr.bf16.mxu0 %v17222_v3  ;;  %11798 = vmatprep.subr.bf16.mxu1 %v17175_v31 }
 0x6a2   :  { %11776 = vmatpush1.bf16.msra.mxu0 %v17223_v22  ;;  %11800 = vmatpush3.bf16.msra.mxu1 %v17224_v63 }
 0x6a3   :  { %11802 = vmatprep.subr.bf16.mxu0 %v17260_v42  ;;  %11833 = vmatprep.subr.bf16.mxu1 %v17175_v31 }
 0x6a4   :  { %v13694_v5 = vpop.eup %13693 }
 0x6a5   :  { %v2796_v23 = vadd.f32 1.0, %v13694_v5  ;;  %3049 = vmatmul.mubr.f32.vlgmr.msra.gmra.mrb[22].mxu0 %v15129_v33  ;;  %9697 = vmatmul.mubr.f32.vlgmr.msra.gmra.mrb[36].mxu1 %v15129_v33  ;;  %v13696_v18 = vpop.eup %13695 }
 0x6a6   :  { %11804 = vmatpush1.bf16.msra.mxu0 %v17261_v9  ;;  %11835 = vmatpush3.bf16.msra.mxu1 %v17262_v15  ;;  %v2797_v59 = vadd.f32 1.0, %v13696_v18  ;;  %v17350_v18 = vld [vmem:[#allocation46_spill] sm:$0xff] }
 0x6a7   :  { %13697 = vrcp.f32 %v2796_v23  ;;  %11806 = vmatprep.subr.bf16.mxu0 %v17263_v55  ;;  %11836 = vmatprep.subr.bf16.mxu1 %v17175_v31 }
 0x6a8   :  { %3189 = vmatprep.mubr.f32.mxu0 %v17156_v47  ;;  %9731 = vmatprep.mubr.msk.f32.mxu1 %vm14064_vm0, %v17156_v47  ;;  %13699 = vrcp.f32 %v2797_v59 }
 0x6aa   :  { %11808 = vmatpush1.bf16.msra.mxu0 %v17264_v51  ;;  %11838 = vmatpush3.bf16.msra.mxu1 %v17265_v7 }
 0x6ab   :  { %11810 = vmatprep.subr.bf16.mxu0 %v17231_v57  ;;  %11839 = vmatprep.subr.bf16.mxu1 %v17175_v31 }
 0x6ae   :  { %11812 = vmatpush1.bf16.msra.mxu0 %v17197_v20  ;;  %11841 = vmatpush3.bf16.msra.mxu1 %v17232_v21 }
 0x6af   :  { %11814 = vmatprep.subr.bf16.mxu0 %v17233_v0  ;;  %11842 = vmatprep.subr.bf16.mxu1 %v17175_v31 }
 0x6b1   :  { %v13698_v50 = vpop.eup %13697 }
 0x6b2   :  { %v2803_v49 = vmul.f32 %v13698_v50, %v2802_v26  ;;  %11816 = vmatpush1.bf16.msra.mxu0 %v17200_v8  ;;  %11844 = vmatpush3.bf16.msra.mxu1 %v17201_v6  ;;  %v13700_v54 = vpop.eup %13699  ;;  %v17351_v26 = vld [vmem:[#allocation75_spill] sm:$0xff]  ;;  %v17352_v50 = vld [vmem:[#allocation76_spill] sm:$0xff] }
 0x6b3   :  { %11818 = vmatprep.subr.bf16.mxu0 %v17340_v11  ;;  %11845 = vmatprep.subr.bf16.mxu1 %v17175_v31  ;;  %v2806_v62 = vsub.f32 1.0, %v13700_v54  ;;  %v2808_v59 = vmul.f32 %v13700_v54, %v17350_v18  ;;  %v17358_v54 = vld [vmem:[#allocation15_spill] sm:$0xff]  ;;  %v17361_v18 = vld [vmem:[#allocation17_spill] sm:$0xff] }
 0x6b4   :  { %v2804_v36 = vadd.f32 %v2803_v49, %v2644_v25  ;;  %v17354_v49 = vld [vmem:[#allocation12_spill] sm:$0xff] }
 0x6b6   :  { %13701 = vtanh.f32 %v2804_v36  ;;  %11820 = vmatpush1.bf16.msra.mxu0 %v17341_v4  ;;  %11847 = vmatpush3.bf16.msra.mxu1 %v17342_v17  ;;  %v17355_v36 = vld [vmem:[#allocation13_spill] sm:$0xff] }
 0x6b7   :  { %11822 = vmatprep.subr.bf16.mxu0 %v17343_v10  ;;  %11848 = vmatprep.subr.bf16.mxu1 %v17175_v31  ;;  %v15266_v10 = vld [vmem:[#allocation2 + $0x10] sm:$0xff] }
 0x6b8   :  { %17383 = vst [vmem:[#allocation59_spill] sm:$0xff] %v15266_v10 }
 0x6ba   :  { %11824 = vmatpush1.bf16.msra.mxu0 %v17344_v29  ;;  %11850 = vmatpush3.bf16.msra.mxu1 %v17345_v60 }
 0x6bb   :  { %11826 = vmatprep.subr.bf16.mxu0 %v17346_v52  ;;  %11851 = vmatprep.subr.bf16.mxu1 %v17175_v31 }
 0x6be   :  { %11828 = vmatpush1.bf16.msra.mxu0 %v17347_v32  ;;  %11853 = vmatpush3.bf16.msra.mxu1 %v17348_v56 }
 0x6bf   :  { %11830 = vmatprep.subr.bf16.mxu0 %v17349_v34  ;;  %11854 = vmatprep.subr.bf16.mxu1 %v17175_v31  ;;  %v15263_v34 = vld [vmem:[#allocation6 + $0x8] sm:$0xff] }
 0x6c0   :  { %v13702_v5 = vpop.eup %13701  ;;  %17382 = vst [vmem:[#allocation52_spill] sm:$0xff] %v15263_v34 }
 0x6c1   :  { %v2807_v23 = vmul.f32 %v13702_v5, %v2806_v62  ;;  %v17357_v62 = vld [vmem:[#allocation14_spill] sm:$0xff]  ;;  %v17359_v5 = vld [vmem:[#allocation29_spill] sm:$0xff] }
 0x6c2   :  { %11832 = vmatpush1.bf16.msra.mxu0 %v17351_v26  ;;  %11856 = vmatpush3.bf16.msra.mxu1 %v17352_v50 }
 0x6c3   :  { %v15209_v25 = vadd.f32 %v2808_v59, %v2807_v23  ;;  %11858 = vmatprep.subr.bf16.mxu0 %v17354_v49  ;;  %11889 = vmatprep.subr.bf16.mxu1 %v17175_v31  ;;  %v17360_v23 = vld [vmem:[#allocation16_spill] sm:$0xff]  ;;  %v17363_v59 = vld [vmem:[#allocation18_spill] sm:$0xff]  ;;  %v17364_v49 = vld [vmem:[#allocation19_spill] sm:$0xff] }
 0x6c5   :  { %17353 = vst [vmem:[#allocation48_spill] sm:$0xff] %v15209_v25  ;;  %3190 = vmatmul.mubr.f32.vlgmr.msra.gmra.mrb[22].mxu0 %v15209_v25  ;;  %9732 = vmatmul.mubr.f32.vlgmr.msra.gmra.mrb[38].mxu1 %v15209_v25 }
 0x6c6   :  { %11860 = vmatpush1.bf16.msra.mxu0 %v17355_v36  ;;  %11891 = vmatpush3.bf16.msra.mxu1 %v17356_v46  ;;  %v17362_v46 = vld [vmem:[#allocation30_spill] sm:$0xff]  ;;  %v17365_v36 = vld [vmem:[#allocation31_spill] sm:$0xff] }
 0x6c7   :  { %11862 = vmatprep.subr.bf16.mxu0 %v17357_v62  ;;  %11892 = vmatprep.subr.bf16.mxu1 %v17175_v31  ;;  %v17366_v62 = vld [vmem:[#allocation20_spill] sm:$0xff] }
 0x6c8   :  { %3363 = vmatprep.mubr.f32.mxu0 %v17156_v47  ;;  %9766 = vmatprep.mubr.msk.f32.mxu1 %vm14064_vm0, %v17156_v47 }
 0x6ca   :  { %11864 = vmatpush1.bf16.msra.mxu0 %v17358_v54  ;;  %11894 = vmatpush3.bf16.msra.mxu1 %v17359_v5  ;;  %v17367_v54 = vld [vmem:[#allocation21_spill] sm:$0xff]  ;;  %v17368_v5 = vld [vmem:[#allocation32_spill] sm:$0xff] }
 0x6cb   :  { %11866 = vmatprep.subr.bf16.mxu0 %v17360_v23  ;;  %11895 = vmatprep.subr.bf16.mxu1 %v17175_v31  ;;  %v17369_v23 = vld [vmem:[#allocation22_spill] sm:$0xff] }
 0x6ce   :  { %11868 = vmatpush1.bf16.msra.mxu0 %v17361_v18  ;;  %11897 = vmatpush3.bf16.msra.mxu1 %v17362_v46  ;;  %v17370_v18 = vld [vmem:[#allocation23_spill] sm:$0xff]  ;;  %v17371_v46 = vld [vmem:[#allocation33_spill] sm:$0xff] }
 0x6cf   :  { %11870 = vmatprep.subr.bf16.mxu0 %v17363_v59  ;;  %11898 = vmatprep.subr.bf16.mxu1 %v17175_v31  ;;  %v17372_v59 = vld [vmem:[#allocation24_spill] sm:$0xff] }
 0x6d2   :  { %11872 = vmatpush1.bf16.msra.mxu0 %v17364_v49  ;;  %11900 = vmatpush3.bf16.msra.mxu1 %v17365_v36  ;;  %v17373_v49 = vld [vmem:[#allocation25_spill] sm:$0xff]  ;;  %v17374_v36 = vld [vmem:[#allocation34_spill] sm:$0xff] }
 0x6d3   :  { %11874 = vmatprep.subr.bf16.mxu0 %v17366_v62  ;;  %11901 = vmatprep.subr.bf16.mxu1 %v17175_v31  ;;  %v17375_v62 = vld [vmem:[#allocation26_spill] sm:$0xff] }
 0x6d6   :  { %11876 = vmatpush1.bf16.msra.mxu0 %v17367_v54  ;;  %11903 = vmatpush3.bf16.msra.mxu1 %v17368_v5  ;;  %v17376_v54 = vld [vmem:[#allocation27_spill] sm:$0xff] }
 0x6d7   :  { %11878 = vmatprep.subr.bf16.mxu0 %v17369_v23  ;;  %11904 = vmatprep.subr.bf16.mxu1 %v17175_v31  ;;  %v17377_v5 = vld [vmem:[#allocation35_spill] sm:$0xff]  ;;  %v17378_v23 = vld [vmem:[#allocation36_spill] sm:$0xff] }
 0x6da   :  { %11880 = vmatpush1.bf16.msra.mxu0 %v17370_v18  ;;  %11906 = vmatpush3.bf16.msra.mxu1 %v17371_v46  ;;  %v15250_v18 = vpop.permute.xlu0 %2812  ;;  %v15252_v46 = vld [vmem:[#allocation2] sm:$0xff] }
 0x6db   :  { %11882 = vmatprep.subr.bf16.mxu0 %v17372_v59  ;;  %11907 = vmatprep.subr.bf16.mxu1 %v17175_v31  ;;  %17379 = vst [vmem:[#allocation49_spill] sm:$0xff] %v15250_v18  ;;  %17380 = vst [vmem:[#allocation50_spill] sm:$0xff] %v15252_v46  ;;  %v2815_v59 = vmul.f32 %v15252_v46, %v15250_v18 }
 0x6de   :  { %11884 = vmatpush1.bf16.msra.mxu0 %v17373_v49  ;;  %11909 = vmatpush3.bf16.msra.mxu1 %v17374_v36  ;;  %v15256_v49 = vld [vmem:[#allocation2 + $0x8] sm:$0xff] }
 0x6df   :  { %11886 = vmatprep.subr.bf16.mxu0 %v17375_v62  ;;  %11910 = vmatprep.subr.bf16.mxu1 %v17175_v31  ;;  %17381 = vst [vmem:[#allocation51_spill] sm:$0xff] %v15256_v49  ;;  %v2816_v36 = vmul.f32 %v15256_v49, %v15250_v18  ;;  %v15260_v62 = vld [vmem:[#allocation6] sm:$0xff] }
 0x6e1   :  { %v2819_v56 = vadd.f32 %v15263_v34, %v2816_v36 }
 0x6e2   :  { %11888 = vmatpush1.bf16.msra.mxu0 %v17376_v54  ;;  %11912 = vmatpush3.bf16.msra.mxu1 %v17377_v5  ;;  %v2818_v54 = vadd.f32 %v15260_v62, %v2815_v59  ;;  %v2817_v59 = vmul.f32 %v15266_v10, %v15250_v18 }
 0x6e3   :  { %11914 = vmatprep.subr.bf16.mxu0 %v17378_v23  ;;  %11945 = vmatprep.subr.bf16.mxu1 %v17175_v31 }
 0x758   :  { %v2887_v5 = vpop.f32.mrb[20].mxu0  ;;  %v2958_v23 = vpop.f32.mrb[34].mxu1 }
 0x759   :  { %v2962_v50 = vadd.f32 %v2887_v5, %v2818_v54  ;;  %v2889_v26 = vpop.f32.mrb[21].mxu0  ;;  %v9663_v25 = vpop.f32.mrb[35].mxu1 }
 0x75a   :  { %v2963_v46 = vadd.f32 %v2889_v26, %v2819_v56  ;;  %v15270_v25 = vld [vmem:[#allocation6 + $0x18] sm:$0xff] }
 0x75b   :  { %v8186_v32 = vmul.f32 -1.442695, %v2962_v50  ;;  %v2976_v5 = vadd.f32 %v15270_v25, %v2958_v23  ;;  %v15273_v50 = vld [vmem:[#allocation6 + $0x10] sm:$0xff] }
 0x75c   :  { %v8187_v52 = vmul.f32 -1.442695, %v2963_v46 }
 0x75d   :  { %13703 = vpow2.f32 %v8186_v32  ;;  %v2820_v32 = vadd.f32 %v15273_v50, %v2817_v59 }
 0x75e   :  { %13705 = vpow2.f32 %v8187_v52 }
 0x767   :  { %v13704_v60 = vpop.eup %13703 }
 0x768   :  { %v2970_v49 = vadd.f32 1.0, %v13704_v60  ;;  %v13706_v29 = vpop.eup %13705 }
 0x769   :  { %v2971_v54 = vadd.f32 1.0, %v13706_v29 }
 0x76a   :  { %13707 = vrcp.f32 %v2970_v49 }
 0x76b   :  { %13709 = vrcp.f32 %v2971_v54 }
 0x774   :  { %v13708_v36 = vpop.eup %13707 }
 0x775   :  { %v2977_v52 = vmul.f32 %v13708_v36, %v2976_v5  ;;  %v13710_v46 = vpop.eup %13709 }
 0x776   :  { %v2980_v49 = vsub.f32 1.0, %v13710_v46  ;;  %v2982_v10 = vmul.f32 %v13710_v46, %v15129_v33 }
 0x777   :  { %v2978_v60 = vadd.f32 %v2977_v52, %v2820_v32 }
 0x778   :  { %v15276_v56 = vpop.f32.mrb[36].mxu1 }
 0x779   :  { %13711 = vtanh.f32 %v2978_v60  ;;  %v9698_v26 = vpop.f32.mrb[37].mxu1  ;;  %v3122_v46 = vadd.f32 %v15050_v24, %v15276_v56  ;;  %v17385_v56 = vld [vmem:[#allocation69_spill] sm:$0xff] }
 0x783   :  { %v13712_v18 = vpop.eup %13711 }
 0x784   :  { %v2981_v29 = vmul.f32 %v13712_v18, %v2980_v49 }
 0x786   :  { %v15279_v34 = vadd.f32 %v2982_v10, %v2981_v29 }
 0x788   :  { %3364 = vmatmul.mubr.f32.vlgmr.msra.gmra.mrb[24].mxu0 %v15279_v34  ;;  %9767 = vmatmul.mubr.f32.vlgmr.msra.gmra.mrb[40].mxu1 %v15279_v34 }
 0x789   :  { %11916 = vmatpush1.bf16.msra.mxu0 %v14322_v38  ;;  %11947 = vmatpush3.bf16.msra.mxu1 %v14324_v39 }
 0x78a   :  { %11918 = vmatprep.subr.bf16.mxu0 %v14328_v45  ;;  %11948 = vmatprep.subr.bf16.mxu1 %v17175_v31 }
 0x78b   :  { %3526 = vmatprep.mubr.f32.mxu0 %v17156_v47  ;;  %9801 = vmatprep.mubr.msk.f32.mxu1 %vm14064_vm0, %v17156_v47 }
 0x78d   :  { %11920 = vmatpush1.bf16.msra.mxu0 %v14334_v58  ;;  %11950 = vmatpush3.bf16.msra.mxu1 %v14336_v61 }
 0x78e   :  { %11922 = vmatprep.subr.bf16.mxu0 %v14340_v1  ;;  %11951 = vmatprep.subr.bf16.mxu1 %v17175_v31 }
 0x791   :  { %11924 = vmatpush1.bf16.msra.mxu0 %v14347_v13  ;;  %11953 = vmatpush3.bf16.msra.mxu1 %v14349_v14 }
 0x792   :  { %11926 = vmatprep.subr.bf16.mxu0 %v14353_v19  ;;  %11954 = vmatprep.subr.bf16.mxu1 %v17175_v31 }
 0x795   :  { %11928 = vmatpush1.bf16.msra.mxu0 %v14357_v37  ;;  %11956 = vmatpush3.bf16.msra.mxu1 %v14359_v40 }
 0x796   :  { %11930 = vmatprep.subr.bf16.mxu0 %v17176_v44  ;;  %11957 = vmatprep.subr.bf16.mxu1 %v17175_v31 }
 0x798   :  { %v3191_v33 = vpop.f32.mrb[22].mxu0  ;;  %v3262_v10 = vpop.f32.mrb[38].mxu1 }
 0x799   :  { %v13523_v23 = vadd.f32 %v15008_v48, %v3191_v33  ;;  %v3193_v18 = vpop.f32.mrb[23].mxu0  ;;  %v9733_v59 = vpop.f32.mrb[39].mxu1  ;;  %11932 = vmatpush1.bf16.msra.mxu0 %v17214_v53  ;;  %11959 = vmatpush3.bf16.msra.mxu1 %v17179_v30  ;;  %v3280_v60 = vadd.f32 %v15047_v16, %v3262_v10  ;;  %v17384_v33 = vld [vmem:[#allocation68_spill] sm:$0xff]  ;;  %v17386_v10 = vld [vmem:[#allocation70_spill] sm:$0xff] }
 0x79a   :  { %11934 = vmatprep.subr.bf16.mxu0 %v17215_v2  ;;  %11960 = vmatprep.subr.bf16.mxu1 %v17175_v31  ;;  %v13524_v5 = vadd.f32 %v15015_v43, %v3193_v18  ;;  %v17388_v59 = vld [vmem:[#allocation72_spill] sm:$0xff] }
 0x79b   :  { %v8188_v54 = vmul.f32 -1.442695, %v13523_v23  ;;  %v17387_v23 = vld [vmem:[#allocation71_spill] sm:$0xff] }
 0x79c   :  { %v8189_v48 = vmul.f32 -1.442695, %v13524_v5  ;;  %v17390_v5 = vld [vmem:[#allocation74_spill] sm:$0xff] }
 0x79d   :  { %13713 = vpow2.f32 %v8188_v54  ;;  %11936 = vmatpush1.bf16.msra.mxu0 %v17217_v41  ;;  %11962 = vmatpush3.bf16.msra.mxu1 %v17218_v12  ;;  %v17389_v54 = vld [vmem:[#allocation73_spill] sm:$0xff] }
 0x79e   :  { %11938 = vmatprep.subr.bf16.mxu0 %v17219_v35  ;;  %11963 = vmatprep.subr.bf16.mxu1 %v17175_v31  ;;  %13715 = vpow2.f32 %v8189_v48 }
 0x7a1   :  { %11940 = vmatpush1.bf16.msra.mxu0 %v17220_v28  ;;  %11965 = vmatpush3.bf16.msra.mxu1 %v17221_v27 }
 0x7a2   :  { %11942 = vmatprep.subr.bf16.mxu0 %v17222_v3  ;;  %11966 = vmatprep.subr.bf16.mxu1 %v17175_v31 }
 0x7a5   :  { %11944 = vmatpush1.bf16.msra.mxu0 %v17223_v22  ;;  %11968 = vmatpush3.bf16.msra.mxu1 %v17224_v63 }
 0x7a6   :  { %11970 = vmatprep.subr.bf16.mxu0 %v17260_v42  ;;  %12001 = vmatprep.subr.bf16.mxu1 %v17175_v31 }
 0x7a7   :  { %v13714_v43 = vpop.eup %13713 }
 0x7a8   :  { %v3274_v36 = vadd.f32 1.0, %v13714_v43  ;;  %3527 = vmatmul.mubr.f32.vlgmr.msra.gmra.mrb[26].mxu0 %v15279_v34  ;;  %9802 = vmatmul.mubr.f32.vlgmr.msra.gmra.mrb[42].mxu1 %v15279_v34  ;;  %v13716_v32 = vpop.eup %13715 }
 0x7a9   :  { %11972 = vmatpush1.bf16.msra.mxu0 %v17261_v9  ;;  %12003 = vmatpush3.bf16.msra.mxu1 %v17262_v15  ;;  %v3275_v52 = vadd.f32 1.0, %v13716_v32  ;;  %v17391_v32 = vld [vmem:[#allocation48_spill] sm:$0xff] }
 0x7aa   :  { %13717 = vrcp.f32 %v3274_v36  ;;  %11974 = vmatprep.subr.bf16.mxu0 %v17263_v55  ;;  %12004 = vmatprep.subr.bf16.mxu1 %v17175_v31 }
 0x7ab   :  { %3667 = vmatprep.mubr.f32.mxu0 %v17156_v47  ;;  %9836 = vmatprep.mubr.msk.f32.mxu1 %vm14064_vm0, %v17156_v47  ;;  %13719 = vrcp.f32 %v3275_v52 }
 0x7ad   :  { %11976 = vmatpush1.bf16.msra.mxu0 %v17264_v51  ;;  %12006 = vmatpush3.bf16.msra.mxu1 %v17265_v7 }
 0x7ae   :  { %11978 = vmatprep.subr.bf16.mxu0 %v17231_v57  ;;  %12007 = vmatprep.subr.bf16.mxu1 %v17175_v31 }
 0x7b1   :  { %11980 = vmatpush1.bf16.msra.mxu0 %v17197_v20  ;;  %12009 = vmatpush3.bf16.msra.mxu1 %v17232_v21 }
 0x7b2   :  { %11982 = vmatprep.subr.bf16.mxu0 %v17233_v0  ;;  %12010 = vmatprep.subr.bf16.mxu1 %v17175_v31 }
 0x7b4   :  { %v13718_v26 = vpop.eup %13717 }
 0x7b5   :  { %v3281_v49 = vmul.f32 %v13718_v26, %v3280_v60  ;;  %11984 = vmatpush1.bf16.msra.mxu0 %v17200_v8  ;;  %12012 = vmatpush3.bf16.msra.mxu1 %v17201_v6  ;;  %v13720_v18 = vpop.eup %13719  ;;  %v17392_v60 = vld [vmem:[#allocation75_spill] sm:$0xff]  ;;  %v17393_v26 = vld [vmem:[#allocation76_spill] sm:$0xff] }
 0x7b6   :  { %11986 = vmatprep.subr.bf16.mxu0 %v17340_v11  ;;  %12013 = vmatprep.subr.bf16.mxu1 %v17175_v31  ;;  %v3284_v48 = vsub.f32 1.0, %v13720_v18  ;;  %v3286_v52 = vmul.f32 %v13720_v18, %v17391_v32 }
 0x7b7   :  { %v3282_v29 = vadd.f32 %v3281_v49, %v3122_v46  ;;  %v17394_v49 = vld [vmem:[#allocation36_spill] sm:$0xff] }
 0x7b9   :  { %13721 = vtanh.f32 %v3282_v29  ;;  %11988 = vmatpush1.bf16.msra.mxu0 %v17341_v4  ;;  %12015 = vmatpush3.bf16.msra.mxu1 %v17342_v17 }
 0x7ba   :  { %11990 = vmatprep.subr.bf16.mxu0 %v17384_v33  ;;  %12016 = vmatprep.subr.bf16.mxu1 %v17175_v31 }
 0x7bd   :  { %11992 = vmatpush1.bf16.msra.mxu0 %v17385_v56  ;;  %12018 = vmatpush3.bf16.msra.mxu1 %v17386_v10 }
 0x7be   :  { %11994 = vmatprep.subr.bf16.mxu0 %v17387_v23  ;;  %12019 = vmatprep.subr.bf16.mxu1 %v17175_v31 }
 0x7c1   :  { %11996 = vmatpush1.bf16.msra.mxu0 %v17388_v59  ;;  %12021 = vmatpush3.bf16.msra.mxu1 %v17389_v54 }
 0x7c2   :  { %11998 = vmatprep.subr.bf16.mxu0 %v17390_v5  ;;  %12022 = vmatprep.subr.bf16.mxu1 %v17175_v31 }
 0x7c3   :  { %v13722_v43 = vpop.eup %13721 }
 0x7c4   :  { %v3285_v36 = vmul.f32 %v13722_v43, %v3284_v48 }
 0x7c5   :  { %12000 = vmatpush1.bf16.msra.mxu0 %v17392_v60  ;;  %12024 = vmatpush3.bf16.msra.mxu1 %v17393_v26 }
 0x7c6   :  { %v15359_v46 = vadd.f32 %v3286_v52, %v3285_v36  ;;  %12026 = vmatprep.subr.bf16.mxu0 %v17394_v49  ;;  %12057 = vmatprep.subr.bf16.mxu1 %v17175_v31 }
 0x7c8   :  { %3668 = vmatmul.mubr.f32.vlgmr.msra.gmra.mrb[26].mxu0 %v15359_v46  ;;  %9837 = vmatmul.mubr.f32.vlgmr.msra.gmra.mrb[44].mxu1 %v15359_v46 }
 0x7c9   :  { %12028 = vmatpush1.bf16.msra.mxu0 %v14322_v38  ;;  %12059 = vmatpush3.bf16.msra.mxu1 %v14324_v39  ;;  %v15400_v38 = vpop.permute.xlu1 %3290  ;;  %v17396_v39 = vld [vmem:[#allocation50_spill] sm:$0xff] }
 0x7ca   :  { %12030 = vmatprep.subr.bf16.mxu0 %v14328_v45  ;;  %12060 = vmatprep.subr.bf16.mxu1 %v17175_v31  ;;  %17395 = vst [vmem:[#allocation61_spill] sm:$0xff] %v15400_v38  ;;  %v3293_v45 = vmul.f32 %v17396_v39, %v15400_v38 }
 0x7cb   :  { %3830 = vmatprep.mubr.f32.mxu0 %v17156_v47  ;;  %9871 = vmatprep.mubr.msk.f32.mxu1 %vm14064_vm0, %v17156_v47 }
 0x7cd   :  { %12032 = vmatpush1.bf16.msra.mxu0 %v14334_v58  ;;  %12062 = vmatpush3.bf16.msra.mxu1 %v14336_v61  ;;  %v17397_v58 = vld [vmem:[#allocation51_spill] sm:$0xff] }
 0x7ce   :  { %12034 = vmatprep.subr.bf16.mxu0 %v14340_v1  ;;  %12063 = vmatprep.subr.bf16.mxu1 %v17175_v31  ;;  %v3294_v61 = vmul.f32 %v17397_v58, %v15400_v38  ;;  %v3296_v1 = vadd.f32 %v15260_v62, %v3293_v45  ;;  %v4077_v58 = vld [vmem:[#allocation4 + $0x310] sm:$0xff] }
 0x7d1   :  { %12036 = vmatpush1.bf16.msra.mxu0 %v14347_v13  ;;  %12065 = vmatpush3.bf16.msra.mxu1 %v14349_v14 }
 0x7d2   :  { %12038 = vmatprep.subr.bf16.mxu0 %v14353_v19  ;;  %12066 = vmatprep.subr.bf16.mxu1 %v17175_v31 }
 0x7d5   :  { %12040 = vmatpush1.bf16.msra.mxu0 %v14357_v37  ;;  %12068 = vmatpush3.bf16.msra.mxu1 %v14359_v40 }
 0x7d6   :  { %12042 = vmatprep.subr.bf16.mxu0 %v17176_v44  ;;  %12069 = vmatprep.subr.bf16.mxu1 %v17175_v31  ;;  %v17398_v44 = vld [vmem:[#allocation52_spill] sm:$0xff] }
 0x7d9   :  { %12044 = vmatpush1.bf16.msra.mxu0 %v17214_v53  ;;  %12071 = vmatpush3.bf16.msra.mxu1 %v17179_v30  ;;  %v3297_v30 = vadd.f32 %v17398_v44, %v3294_v61  ;;  %v4080_v61 = vld [vmem:[#allocation4 + $0x328] sm:$0xff] }
 0x7da   :  { %12046 = vmatprep.subr.bf16.mxu0 %v17215_v2  ;;  %12072 = vmatprep.subr.bf16.mxu1 %v17175_v31 }
 0x7dd   :  { %12048 = vmatpush1.bf16.msra.mxu0 %v17217_v41  ;;  %12074 = vmatpush3.bf16.msra.mxu1 %v17218_v12 }
 0x7de   :  { %12050 = vmatprep.subr.bf16.mxu0 %v17219_v35  ;;  %12075 = vmatprep.subr.bf16.mxu1 %v17175_v31 }
 0x7e1   :  { %12052 = vmatpush1.bf16.msra.mxu0 %v17220_v28  ;;  %12077 = vmatpush3.bf16.msra.mxu1 %v17221_v27  ;;  %v17399_v27 = vld [vmem:[#allocation59_spill] sm:$0xff] }
 0x7e2   :  { %12054 = vmatprep.subr.bf16.mxu0 %v17222_v3  ;;  %12078 = vmatprep.subr.bf16.mxu1 %v17175_v31  ;;  %v3295_v3 = vmul.f32 %v17399_v27, %v15400_v38  ;;  %v4087_v27 = vld [vmem:[#allocation4 + $0x360] sm:$0xff]  ;;  %v4170_v38 = vld [vmem:[#allocation2 + $0x5c8] sm:$0xff] }
 0x7e4   :  { %v3298_v62 = vadd.f32 %v15273_v50, %v3295_v3 }
 0x7e5   :  { %12056 = vmatpush1.bf16.msra.mxu0 %v17223_v22  ;;  %12080 = vmatpush3.bf16.msra.mxu1 %v17224_v63 }
 0x7e6   :  { %12082 = vmatprep.subr.bf16.mxu0 %v17260_v42  ;;  %12113 = vmatprep.subr.bf16.mxu1 %v17175_v31 }
 0x85b   :  { %v3365_v13 = vpop.f32.mrb[24].mxu0  ;;  %v3436_v14 = vpop.f32.mrb[40].mxu1 }
 0x85c   :  { %v3440_v19 = vadd.f32 %v3365_v13, %v3296_v1  ;;  %v3367_v37 = vpop.f32.mrb[25].mxu0  ;;  %v9768_v40 = vpop.f32.mrb[41].mxu1  ;;  %v3454_v63 = vadd.f32 %v15270_v25, %v3436_v14  ;;  %v4082_v13 = vld [vmem:[#allocation4 + $0x338] sm:$0xff]  ;;  %v4085_v14 = vld [vmem:[#allocation4 + $0x350] sm:$0xff] }
 0x85d   :  { %v3441_v2 = vadd.f32 %v3367_v37, %v3297_v30  ;;  %v15472_v40 = vpack.c.bf16 %v4080_v61, %v4077_v58  ;;  %v15476_v30 = vpack.c.bf16 %v4085_v14, %v4082_v13  ;;  %v4114_v58 = vld [vmem:[#allocation4 + $0x438] sm:$0xff]  ;;  %v4113_v61 = vld [vmem:[#allocation4 + $0x430] sm:$0xff] }
 0x85e   :  { %v8190_v53 = vmul.f32 -1.442695, %v3440_v19  ;;  %v4118_v13 = vld [vmem:[#allocation4 + $0x458] sm:$0xff]  ;;  %v4121_v14 = vld [vmem:[#allocation4 + $0x470] sm:$0xff] }
 0x85f   :  { %v8191_v41 = vmul.f32 -1.442695, %v3441_v2  ;;  %17402 = vst [vmem:[#allocation53_spill] sm:$0xff] %v15472_v40  ;;  %17403 = vst [vmem:[#allocation54_spill] sm:$0xff] %v15476_v30  ;;  %v4083_v2 = vld [vmem:[#allocation4 + $0x340] sm:$0xff] }
 0x860   :  { %13723 = vpow2.f32 %v8190_v53  ;;  %v4084_v53 = vld [vmem:[#allocation4 + $0x348] sm:$0xff] }
 0x861   :  { %13725 = vpow2.f32 %v8191_v41  ;;  %v4086_v41 = vld [vmem:[#allocation4 + $0x358] sm:$0xff] }
 0x86a   :  { %v13724_v12 = vpop.eup %13723 }
 0x86b   :  { %v3448_v35 = vadd.f32 1.0, %v13724_v12  ;;  %v13726_v28 = vpop.eup %13725  ;;  %v4088_v12 = vld [vmem:[#allocation4 + $0x368] sm:$0xff] }
 0x86c   :  { %v3449_v22 = vadd.f32 1.0, %v13726_v28  ;;  %v15484_v28 = vpack.c.bf16 %v4086_v41, %v4083_v2  ;;  %v4120_v2 = vld [vmem:[#allocation4 + $0x468] sm:$0xff]  ;;  %v4119_v41 = vld [vmem:[#allocation4 + $0x460] sm:$0xff] }
 0x86d   :  { %13727 = vrcp.f32 %v3448_v35  ;;  %v4091_v35 = vld [vmem:[#allocation4 + $0x380] sm:$0xff] }
 0x86e   :  { %13729 = vrcp.f32 %v3449_v22  ;;  %17405 = vst [vmem:[#allocation56_spill] sm:$0xff] %v15484_v28  ;;  %v15488_v3 = vpack.c.bf16 %v4091_v35, %v4088_v12  ;;  %v4090_v22 = vld [vmem:[#allocation4 + $0x378] sm:$0xff] }
 0x86f   :  { %v4122_v12 = vld [vmem:[#allocation4 + $0x478] sm:$0xff] }
 0x870   :  { %17406 = vst [vmem:[#allocation57_spill] sm:$0xff] %v15488_v3 }
 0x877   :  { %v13728_v42 = vpop.eup %13727 }
 0x878   :  { %v3455_v29 = vmul.f32 %v13728_v42, %v3454_v63  ;;  %v13730_v36 = vpop.eup %13729  ;;  %v4089_v63 = vld [vmem:[#allocation4 + $0x370] sm:$0xff]  ;;  %v4092_v42 = vld [vmem:[#allocation4 + $0x388] sm:$0xff] }
 0x879   :  { %v3458_v32 = vsub.f32 1.0, %v13730_v36  ;;  %v3460_v39 = vmul.f32 %v13730_v36, %v15279_v34 }
 0x87a   :  { %v3456_v18 = vadd.f32 %v3455_v29, %v3298_v62  ;;  %v4094_v62 = vld [vmem:[#allocation4 + $0x398] sm:$0xff]  ;;  %v4097_v29 = vld [vmem:[#allocation4 + $0x3b0] sm:$0xff] }
 0x87b   :  { %v15412_v48 = vpop.f32.mrb[42].mxu1  ;;  %v15501_v36 = vpack.c.bf16 %v4097_v29, %v4094_v62  ;;  %v4133_v62 = vld [vmem:[#allocation2 + $0x4a0] sm:$0xff] }
 0x87c   :  { %13731 = vtanh.f32 %v3456_v18  ;;  %v9803_v43 = vpop.f32.mrb[43].mxu1  ;;  %v15495_v18 = vpack.c.bf16 %v4090_v22, %v4087_v27  ;;  %v15547_v27 = vpack.c.bf16 %v4122_v12, %v4119_v41 }
 0x87d   :  { %v4093_v43 = vld [vmem:[#allocation4 + $0x390] sm:$0xff]  ;;  %17409 = vst [vmem:[#allocation42_spill] sm:$0xff] %v15501_v36 }
 0x87e   :  { %17407 = vst [vmem:[#allocation58_spill] sm:$0xff] %v15495_v18  ;;  %17423 = vst [vmem:[#allocation15_spill] sm:$0xff] %v15547_v27 }
 0x886   :  { %v13732_v52 = vpop.eup %13731 }
 0x887   :  { %v3459_v49 = vmul.f32 %v13732_v52, %v3458_v32  ;;  %v4096_v32 = vld [vmem:[#allocation4 + $0x3a8] sm:$0xff]  ;;  %v4095_v52 = vld [vmem:[#allocation4 + $0x3a0] sm:$0xff] }
 0x889   :  { %v15415_v45 = vadd.f32 %v3460_v39, %v3459_v49  ;;  %v4098_v49 = vld [vmem:[#allocation4 + $0x3b8] sm:$0xff]  ;;  %v4100_v39 = vld [vmem:[#allocation4 + $0x3c8] sm:$0xff] }
 0x88b   :  { %3831 = vmatmul.mubr.f32.vlgmr.msra.gmra.mrb[28].mxu0 %v15415_v45  ;;  %8151 = vst [vmem:[%s16787_s7] sm:$0xff] %v15415_v45  ;;  %9872 = vmatmul.mubr.f32.vlgmr.msra.gmra.mrb[46].mxu1 %v15415_v45 }
 0x88c   :  { %12084 = vmatpush1.bf16.msra.mxu0 %v17261_v9  ;;  %12115 = vmatpush3.bf16.msra.mxu1 %v17262_v15  ;;  %v15442_v15 = vld [vmem:[#allocation6 + $0x20] sm:$0xff] }
 0x88d   :  { %12086 = vmatprep.subr.bf16.mxu0 %v17263_v55  ;;  %12116 = vmatprep.subr.bf16.mxu1 %v17175_v31 }
 0x88e   :  { %3971 = vmatprep.mubr.f32.mxu0 %v17156_v47  ;;  %9906 = vmatprep.mubr.msk.f32.mxu1 %vm14064_vm0, %v17156_v47 }
 0x890   :  { %12088 = vmatpush1.bf16.msra.mxu0 %v17264_v51  ;;  %12118 = vmatpush3.bf16.msra.mxu1 %v17265_v7  ;;  %v4076_v51 = vld [vmem:[#allocation4 + $0x308] sm:$0xff]  ;;  %v4079_v7 = vld [vmem:[#allocation4 + $0x320] sm:$0xff] }
 0x891   :  { %12090 = vmatprep.subr.bf16.mxu0 %v17231_v57  ;;  %12119 = vmatprep.subr.bf16.mxu1 %v17175_v31 }
 0x894   :  { %12092 = vmatpush1.bf16.msra.mxu0 %v17197_v20  ;;  %12121 = vmatpush3.bf16.msra.mxu1 %v17232_v21 }
 0x895   :  { %12094 = vmatprep.subr.bf16.mxu0 %v17233_v0  ;;  %12122 = vmatprep.subr.bf16.mxu1 %v17175_v31 }
 0x898   :  { %12096 = vmatpush1.bf16.msra.mxu0 %v17200_v8  ;;  %12124 = vmatpush3.bf16.msra.mxu1 %v17201_v6  ;;  %v15449_v6 = vld [vmem:[#allocation6 + $0x28] sm:$0xff] }
 0x899   :  { %12098 = vmatprep.subr.bf16.mxu0 %v17340_v11  ;;  %12125 = vmatprep.subr.bf16.mxu1 %v17175_v31 }
 0x89b   :  { %v3669_v9 = vpop.f32.mrb[26].mxu0  ;;  %v3740_v57 = vpop.f32.mrb[44].mxu1 }
 0x89c   :  { %v13525_v20 = vadd.f32 %v15442_v15, %v3669_v9  ;;  %v3671_v55 = vpop.f32.mrb[27].mxu0  ;;  %v9838_v21 = vpop.f32.mrb[45].mxu1  ;;  %12100 = vmatpush1.bf16.msra.mxu0 %v17341_v4  ;;  %12127 = vmatpush3.bf16.msra.mxu1 %v17342_v17  ;;  %v15460_v4 = vpack.c.bf16 %v4079_v7, %v4076_v51  ;;  %v4103_v9 = vld [vmem:[#allocation4 + $0x3e0] sm:$0xff]  ;;  %v4104_v51 = vld [vmem:[#allocation4 + $0x3e8] sm:$0xff]  ;;  %v4106_v7 = vld [vmem:[#allocation4 + $0x3f8] sm:$0xff] }
 0x89d   :  { %12102 = vmatprep.subr.bf16.mxu0 %v17384_v33  ;;  %12128 = vmatprep.subr.bf16.mxu1 %v17175_v31  ;;  %v13526_v0 = vadd.f32 %v15449_v6, %v3671_v55  ;;  %v3758_v33 = vadd.f32 %v15047_v16, %v3740_v57  ;;  %v15505_v57 = vpack.c.bf16 %v4096_v32, %v4093_v43  ;;  %v4099_v55 = vld [vmem:[#allocation4 + $0x3c0] sm:$0xff] }
 0x89e   :  { %v8192_v8 = vmul.f32 -1.442695, %v13525_v20  ;;  %17400 = vst [vmem:[#allocation62_spill] sm:$0xff] %v15460_v4  ;;  %v15507_v20 = vpack.c.bf16 %v4098_v49, %v4095_v52  ;;  %v15511_v21 = vpack.c.bf16 %v4103_v9, %v4100_v39 }
 0x89f   :  { %v8193_v11 = vmul.f32 -1.442695, %v13526_v0  ;;  %17410 = vst [vmem:[#allocation44_spill] sm:$0xff] %v15505_v57  ;;  %v4101_v0 = vld [vmem:[#allocation4 + $0x3d0] sm:$0xff] }
 0x8a0   :  { %13733 = vpow2.f32 %v8192_v8  ;;  %12104 = vmatpush1.bf16.msra.mxu0 %v17385_v56  ;;  %12130 = vmatpush3.bf16.msra.mxu1 %v17386_v10  ;;  %v3600_v10 = vadd.f32 %v15050_v24, %v15412_v48  ;;  %v4081_v24 = vld [vmem:[#allocation4 + $0x330] sm:$0xff]  ;;  %v15497_v48 = vpack.c.bf16 %v4092_v42, %v4089_v63  ;;  %17411 = vst [vmem:[#allocation41_spill] sm:$0xff] %v15507_v20  ;;  %17412 = vst [vmem:[#allocation37_spill] sm:$0xff] %v15511_v21  ;;  %v4102_v8 = vld [vmem:[#allocation4 + $0x3d8] sm:$0xff] }
 0x8a1   :  { %12106 = vmatprep.subr.bf16.mxu0 %v17387_v23  ;;  %12131 = vmatprep.subr.bf16.mxu1 %v17175_v31  ;;  %13735 = vpow2.f32 %v8193_v11  ;;  %v4109_v11 = vld [vmem:[#allocation4 + $0x410] sm:$0xff]  ;;  %v4130_v42 = vld [vmem:[#allocation2 + $0x488] sm:$0xff] }
 0x8a2   :  { %17408 = vst [vmem:[#allocation63_spill] sm:$0xff] %v15497_v48  ;;  %v15591_v29 = vpack.c.bf16 %v4133_v62, %v4130_v42 }
 0x8a4   :  { %12108 = vmatpush1.bf16.msra.mxu0 %v17388_v59  ;;  %12133 = vmatpush3.bf16.msra.mxu1 %v17389_v54  ;;  %17424 = vst [vmem:[#allocation29_spill] sm:$0xff] %v15591_v29 }
 0x8a5   :  { %12110 = vmatprep.subr.bf16.mxu0 %v17390_v5  ;;  %12134 = vmatprep.subr.bf16.mxu1 %v17175_v31  ;;  %v4075_v5 = vld [vmem:[#allocation4 + $0x300] sm:$0xff] }
 0x8a8   :  { %12112 = vmatpush1.bf16.msra.mxu0 %v17392_v60  ;;  %12136 = vmatpush3.bf16.msra.mxu1 %v17393_v26  ;;  %v4078_v26 = vld [vmem:[#allocation4 + $0x318] sm:$0xff] }
 0x8a9   :  { %12138 = vmatprep.subr.bf16.mxu0 %v15460_v4  ;;  %12169 = vmatprep.subr.bf16.mxu1 %v17175_v31  ;;  %v15470_v37 = vpack.c.bf16 %v4078_v26, %v4075_v5 }
 0x8aa   :  { %v13734_v17 = vpop.eup %13733 }
 0x8ab   :  { %v3752_v34 = vadd.f32 1.0, %v13734_v17  ;;  %v13736_v25 = vpop.eup %13735  ;;  %17401 = vst [vmem:[#allocation43_spill] sm:$0xff] %v15470_v37  ;;  %v15515_v17 = vpack.c.bf16 %v4102_v8, %v4099_v55 }
 0x8ac   :  { %v3753_v50 = vadd.f32 1.0, %v13736_v25  ;;  %v4105_v25 = vld [vmem:[#allocation4 + $0x3f0] sm:$0xff] }
 0x8ad   :  { %13737 = vrcp.f32 %v3752_v34  ;;  %17413 = vst [vmem:[#allocation40_spill] sm:$0xff] %v15515_v17  ;;  %v15517_v34 = vpack.c.bf16 %v4104_v51, %v4101_v0 }
 0x8ae   :  { %13739 = vrcp.f32 %v3753_v50  ;;  %v15521_v50 = vpack.c.bf16 %v4109_v11, %v4106_v7  ;;  %v15596_v11 = vld [vmem:[#allocation2 + $0x300] sm:$0xff] }
 0x8af   :  { %17414 = vst [vmem:[#allocation39_spill] sm:$0xff] %v15517_v34  ;;  %17425 = vst [vmem:[#allocation16_spill] sm:$0xff] %v15596_v11 }
 0x8b0   :  { %17415 = vst [vmem:[#allocation65_spill] sm:$0xff] %v15521_v50 }
 0x8b7   :  { %v13738_v56 = vpop.eup %13737 }
 0x8b8   :  { %v3759_v23 = vmul.f32 %v13738_v56, %v3758_v33  ;;  %v13740_v54 = vpop.eup %13739  ;;  %v4108_v33 = vld [vmem:[#allocation4 + $0x408] sm:$0xff]  ;;  %v4107_v56 = vld [vmem:[#allocation4 + $0x400] sm:$0xff] }
 0x8b9   :  { %v3762_v60 = vsub.f32 1.0, %v13740_v54  ;;  %v3764_v16 = vmul.f32 %v13740_v54, %v15359_v46  ;;  %v15482_v46 = vpack.c.bf16 %v4084_v53, %v4081_v24  ;;  %v15525_v54 = vpack.c.bf16 %v4108_v33, %v4105_v25  ;;  %v4117_v24 = vld [vmem:[#allocation4 + $0x450] sm:$0xff]  ;;  %v15598_v33 = vld [vmem:[#allocation2 + $0x308] sm:$0xff] }
 0x8ba   :  { %v3760_v59 = vadd.f32 %v3759_v23, %v3600_v10  ;;  %v4110_v10 = vld [vmem:[#allocation4 + $0x418] sm:$0xff]  ;;  %v4112_v23 = vld [vmem:[#allocation4 + $0x428] sm:$0xff]  ;;  %v15541_v53 = vpack.c.bf16 %v4121_v14, %v4118_v13  ;;  %v15545_v35 = vpack.c.bf16 %v4120_v2, %v4117_v24  ;;  %17426 = vst [vmem:[#allocation17_spill] sm:$0xff] %v15598_v33 }
 0x8bb   :  { %17404 = vst [vmem:[#allocation55_spill] sm:$0xff] %v15482_v46  ;;  %17416 = vst [vmem:[#allocation66_spill] sm:$0xff] %v15525_v54  ;;  %v15527_v5 = vpack.c.bf16 %v4110_v10, %v4107_v56  ;;  %v13933_v56 = vld [vmem:[#allocation6 + $0x38] sm:$0xff]  ;;  %v15606_v13 = vld [vmem:[#allocation6 + $0x48] sm:$0xff] }
 0x8bc   :  { %13741 = vtanh.f32 %v3760_v59  ;;  %v4115_v59 = vld [vmem:[#allocation4 + $0x440] sm:$0xff]  ;;  %17421 = vst [vmem:[#allocation28_spill] sm:$0xff] %v15541_v53  ;;  %17422 = vst [vmem:[#allocation14_spill] sm:$0xff] %v15545_v35 }
 0x8bd   :  { %17417 = vst [vmem:[#allocation67_spill] sm:$0xff] %v15527_v5  ;;  %v15531_v26 = vpack.c.bf16 %v4115_v59, %v4112_v23 }
 0x8bf   :  { %17418 = vst [vmem:[#allocation46_spill] sm:$0xff] %v15531_v26 }
 0x8c6   :  { %v13742_v1 = vpop.eup %13741 }
 0x8c7   :  { %v3763_v19 = vmul.f32 %v13742_v1, %v3762_v60  ;;  %v4111_v60 = vld [vmem:[#allocation4 + $0x420] sm:$0xff]  ;;  %v4116_v1 = vld [vmem:[#allocation4 + $0x448] sm:$0xff] }
 0x8c9   :  { %v15474_v44 = vadd.f32 %v3764_v16, %v3763_v19  ;;  %v15535_v19 = vpack.c.bf16 %v4114_v58, %v4111_v60  ;;  %v15537_v16 = vpack.c.bf16 %v4116_v1, %v4113_v61  ;;  %v15602_v60 = vld [vmem:[#allocation6 + $0x40] sm:$0xff]  ;;  %v13934_v58 = vld [vmem:[#allocation6 + $0x30] sm:$0xff] }
 0x8ca   :  { %17428 = vst [vmem:[#allocation30_spill] sm:$0xff] %v15602_v60 }
 0x8cb   :  { %3972 = vmatmul.mubr.f32.vlgmr.msra.gmra.mrb[28].mxu0 %v15474_v44  ;;  %9907 = vmatmul.mubr.f32.vlgmr.msra.gmra.mrb[48].mxu1 %v15474_v44  ;;  %17419 = vst [vmem:[#allocation12_spill] sm:$0xff] %v15535_v19  ;;  %17420 = vst [vmem:[#allocation13_spill] sm:$0xff] %v15537_v16 }
 0x8cc   :  { %12140 = vmatpush1.bf16.msra.mxu0 %v15470_v37  ;;  %12171 = vmatpush3.bf16.msra.mxu1 %v15472_v40 }
 0x8cd   :  { %12142 = vmatprep.subr.bf16.mxu0 %v15476_v30  ;;  %12172 = vmatprep.subr.bf16.mxu1 %v17175_v31 }
 0x8ce   :  { %4301 = vmatprep.mubr.f32.mxu0 %v17156_v47  ;;  %9941 = vmatprep.mubr.msk.f32.mxu1 %vm14064_vm0, %v17156_v47 }
 0x8d0   :  { %12144 = vmatpush1.bf16.msra.mxu0 %v15482_v46  ;;  %12174 = vmatpush3.bf16.msra.mxu1 %v15484_v28 }
 0x8d1   :  { %12146 = vmatprep.subr.bf16.mxu0 %v15488_v3  ;;  %12175 = vmatprep.subr.bf16.mxu1 %v17175_v31 }
 0x8d4   :  { %12148 = vmatpush1.bf16.msra.mxu0 %v15495_v18  ;;  %12177 = vmatpush3.bf16.msra.mxu1 %v15497_v48 }
 0x8d5   :  { %12150 = vmatprep.subr.bf16.mxu0 %v15501_v36  ;;  %12178 = vmatprep.subr.bf16.mxu1 %v17175_v31 }
 0x8d8   :  { %12152 = vmatpush1.bf16.msra.mxu0 %v15505_v57  ;;  %12180 = vmatpush3.bf16.msra.mxu1 %v15507_v20 }
 0x8d9   :  { %12154 = vmatprep.subr.bf16.mxu0 %v15511_v21  ;;  %12181 = vmatprep.subr.bf16.mxu1 %v17175_v31 }
 0x8dc   :  { %12156 = vmatpush1.bf16.msra.mxu0 %v15515_v17  ;;  %12183 = vmatpush3.bf16.msra.mxu1 %v15517_v34 }
 0x8dd   :  { %12158 = vmatprep.subr.bf16.mxu0 %v15521_v50  ;;  %12184 = vmatprep.subr.bf16.mxu1 %v17175_v31 }
 0x8e0   :  { %12160 = vmatpush1.bf16.msra.mxu0 %v15525_v54  ;;  %12186 = vmatpush3.bf16.msra.mxu1 %v15527_v5 }
 0x8e1   :  { %12162 = vmatprep.subr.bf16.mxu0 %v15531_v26  ;;  %12187 = vmatprep.subr.bf16.mxu1 %v17175_v31 }
 0x8e4   :  { %12164 = vmatpush1.bf16.msra.mxu0 %v15535_v19  ;;  %12189 = vmatpush3.bf16.msra.mxu1 %v15537_v16 }
 0x8e5   :  { %12166 = vmatprep.subr.bf16.mxu0 %v15541_v53  ;;  %12190 = vmatprep.subr.bf16.mxu1 %v17175_v31 }
 0x8e8   :  { %12168 = vmatpush1.bf16.msra.mxu0 %v15545_v35  ;;  %12192 = vmatpush3.bf16.msra.mxu1 %v15547_v27 }
 0x8e9   :  { %12194 = vmatprep.subr.bf16.mxu0 %v15460_v4  ;;  %12225 = vmatprep.subr.bf16.mxu1 %v17175_v31 }
 0x8eb   :  { %4302 = vmatmul.mubr.f32.vlgmr.msra.gmra.mrb[30].mxu0 %v15415_v45  ;;  %9942 = vmatmul.mubr.f32.vlgmr.msra.gmra.mrb[50].mxu1 %v15415_v45 }
 0x8ec   :  { %12196 = vmatpush1.bf16.msra.mxu0 %v15470_v37  ;;  %12227 = vmatpush3.bf16.msra.mxu1 %v15472_v40 }
 0x8ed   :  { %12198 = vmatprep.subr.bf16.mxu0 %v15476_v30  ;;  %12228 = vmatprep.subr.bf16.mxu1 %v17175_v31 }
 0x8ee   :  { %4470 = vmatprep.mubr.f32.mxu0 %v17156_v47  ;;  %9976 = vmatprep.mubr.msk.f32.mxu1 %vm14064_vm0, %v17156_v47 }
 0x8f0   :  { %12200 = vmatpush1.bf16.msra.mxu0 %v15482_v46  ;;  %12230 = vmatpush3.bf16.msra.mxu1 %v15484_v28 }
 0x8f1   :  { %12202 = vmatprep.subr.bf16.mxu0 %v15488_v3  ;;  %12231 = vmatprep.subr.bf16.mxu1 %v17175_v31 }
 0x8f4   :  { %12204 = vmatpush1.bf16.msra.mxu0 %v15495_v18  ;;  %12233 = vmatpush3.bf16.msra.mxu1 %v15497_v48 }
 0x8f5   :  { %12206 = vmatprep.subr.bf16.mxu0 %v15501_v36  ;;  %12234 = vmatprep.subr.bf16.mxu1 %v17175_v31 }
 0x8f8   :  { %12208 = vmatpush1.bf16.msra.mxu0 %v15505_v57  ;;  %12236 = vmatpush3.bf16.msra.mxu1 %v15507_v20 }
 0x8f9   :  { %12210 = vmatprep.subr.bf16.mxu0 %v15511_v21  ;;  %12237 = vmatprep.subr.bf16.mxu1 %v17175_v31 }
 0x8fc   :  { %12212 = vmatpush1.bf16.msra.mxu0 %v15515_v17  ;;  %12239 = vmatpush3.bf16.msra.mxu1 %v15517_v34 }
 0x8fd   :  { %12214 = vmatprep.subr.bf16.mxu0 %v15521_v50  ;;  %12240 = vmatprep.subr.bf16.mxu1 %v17175_v31 }
 0x900   :  { %12216 = vmatpush1.bf16.msra.mxu0 %v15525_v54  ;;  %12242 = vmatpush3.bf16.msra.mxu1 %v15527_v5 }
 0x901   :  { %12218 = vmatprep.subr.bf16.mxu0 %v15531_v26  ;;  %12243 = vmatprep.subr.bf16.mxu1 %v17175_v31 }
 0x904   :  { %12220 = vmatpush1.bf16.msra.mxu0 %v15535_v19  ;;  %12245 = vmatpush3.bf16.msra.mxu1 %v15537_v16 }
 0x905   :  { %12222 = vmatprep.subr.bf16.mxu0 %v15541_v53  ;;  %12246 = vmatprep.subr.bf16.mxu1 %v17175_v31 }
 0x908   :  { %12224 = vmatpush1.bf16.msra.mxu0 %v15545_v35  ;;  %12248 = vmatpush3.bf16.msra.mxu1 %v15547_v27 }
 0x909   :  { %12281 = vmatprep.subr.bf16.mxu1 %v17175_v31  ;;  %12250 = vmatprep.subr.bf16.mxu0 %v15591_v29 }
 0x95e   :  { %v3903_v22 = vpop.f32.mrb[46].mxu1 }
 0x95f   :  { %v9873_v63 = vpop.f32.mrb[47].mxu1  ;;  %v3904_v61 = vadd.f32 %v13934_v58, %v3903_v22 }
 0x99e   :  { %v3973_v43 = vpop.f32.mrb[28].mxu0  ;;  %v4044_v32 = vpop.f32.mrb[48].mxu1 }
 0x99f   :  { %v13527_v52 = vadd.f32 %v15442_v15, %v3973_v43  ;;  %v3975_v49 = vpop.f32.mrb[29].mxu0  ;;  %v9908_v39 = vpop.f32.mrb[49].mxu1  ;;  %v4062_v10 = vadd.f32 %v13933_v56, %v4044_v32  ;;  %v17427_v15 = vld [vmem:[#allocation38_spill] sm:$0xff]  ;;  %v15619_v56 = vld [vmem:[#allocation6 + $0x58] sm:$0xff] }
 0x9a0   :  { %v13528_v55 = vadd.f32 %v15449_v6, %v3975_v49  ;;  %v4231_v23 = vmul.f32 %v15596_v11, %v17427_v15  ;;  %v4232_v6 = vmul.f32 %v15598_v33, %v17427_v15 }
 0x9a1   :  { %v8194_v9 = vmul.f32 -1.442695, %v13527_v52 }
 0x9a2   :  { %v8195_v8 = vmul.f32 -1.442695, %v13528_v55  ;;  %v4234_v24 = vadd.f32 %v4231_v23, %v15602_v60  ;;  %v4235_v12 = vadd.f32 %v4232_v6, %v15606_v13 }
 0x9a3   :  { %13743 = vpow2.f32 %v8194_v9 }
 0x9a4   :  { %13745 = vpow2.f32 %v8195_v8 }
 0x9ad   :  { %v13744_v0 = vpop.eup %13743 }
 0x9ae   :  { %v4056_v51 = vadd.f32 1.0, %v13744_v0  ;;  %v13746_v7 = vpop.eup %13745 }
 0x9af   :  { %v4057_v25 = vadd.f32 1.0, %v13746_v7 }
 0x9b0   :  { %13747 = vrcp.f32 %v4056_v51 }
 0x9b1   :  { %13749 = vrcp.f32 %v4057_v25  ;;  %v15617_v25 = vld [vmem:[#allocation2 + $0x310] sm:$0xff] }
 0x9ba   :  { %v13748_v59 = vpop.eup %13747 }
 0x9bb   :  { %v4063_v1 = vmul.f32 %v13748_v59, %v4062_v10  ;;  %v13750_v52 = vpop.eup %13749  ;;  %v4233_v10 = vmul.f32 %v15617_v25, %v17427_v15  ;;  %v4136_v15 = vld [vmem:[#allocation2 + $0x4b8] sm:$0xff] }
 0x9bc   :  { %v4066_v49 = vsub.f32 1.0, %v13750_v52  ;;  %v4068_v55 = vmul.f32 %v13750_v52, %v15474_v44  ;;  %v15623_v44 = vld [vmem:[#allocation6 + $0x50] sm:$0xff] }
 0x9bd   :  { %v4064_v14 = vadd.f32 %v4063_v1, %v3904_v61  ;;  %v4236_v58 = vadd.f32 %v4233_v10, %v15623_v44  ;;  %v4145_v10 = vld [vmem:[#allocation2 + $0x500] sm:$0xff] }
 0x9be   :  { %v4303_v2 = vpop.f32.mrb[30].mxu0  ;;  %v4374_v41 = vpop.f32.mrb[50].mxu1 }
 0x9bf   :  { %13751 = vtanh.f32 %v4064_v14  ;;  %v4378_v63 = vadd.f32 %v4303_v2, %v4234_v24  ;;  %v4305_v42 = vpop.f32.mrb[31].mxu0  ;;  %v9943_v62 = vpop.f32.mrb[51].mxu1  ;;  %v4392_v59 = vadd.f32 %v4374_v41, %v15619_v56  ;;  %v4129_v24 = vld [vmem:[#allocation2 + $0x480] sm:$0xff] }
 0x9c0   :  { %v4379_v43 = vadd.f32 %v4305_v42, %v4235_v12  ;;  %v4132_v12 = vld [vmem:[#allocation2 + $0x498] sm:$0xff]  ;;  %v4134_v42 = vld [vmem:[#allocation2 + $0x4a8] sm:$0xff] }
 0x9c1   :  { %v8196_v32 = vmul.f32 -1.442695, %v4378_v63  ;;  %v4131_v63 = vld [vmem:[#allocation2 + $0x490] sm:$0xff]  ;;  %v15628_v41 = vpack.c.bf16 %v4132_v12, %v4129_v24 }
 0x9c2   :  { %v8197_v22 = vmul.f32 -1.442695, %v4379_v43  ;;  %v4139_v43 = vld [vmem:[#allocation2 + $0x4d0] sm:$0xff] }
 0x9c3   :  { %13753 = vpow2.f32 %v8196_v32  ;;  %v4151_v24 = vld [vmem:[#allocation2 + $0x530] sm:$0xff] }
 0x9c4   :  { %13755 = vpow2.f32 %v8197_v22  ;;  %v15630_v22 = vpack.c.bf16 %v4134_v42, %v4131_v63  ;;  %v4147_v63 = vld [vmem:[#allocation2 + $0x510] sm:$0xff] }
 0x9c9   :  { %v13752_v39 = vpop.eup %13751 }
 0x9ca   :  { %v4067_v9 = vmul.f32 %v13752_v39, %v4066_v49  ;;  %v4135_v49 = vld [vmem:[#allocation2 + $0x4b0] sm:$0xff] }
 0x9cc   :  { %v15611_v8 = vadd.f32 %v4068_v55, %v4067_v9  ;;  %v15634_v9 = vpack.c.bf16 %v4139_v43, %v4136_v15  ;;  %v4138_v55 = vld [vmem:[#allocation2 + $0x4c8] sm:$0xff]  ;;  %v4149_v15 = vld [vmem:[#allocation2 + $0x520] sm:$0xff]  ;;  %v4152_v43 = vld [vmem:[#allocation2 + $0x538] sm:$0xff] }
 0x9cd   :  { %v13754_v0 = vpop.eup %13753 }
 0x9ce   :  { %v4386_v51 = vadd.f32 1.0, %v13754_v0  ;;  %8152 = vst [vmem:[%s16787_s7 + $0x8] sm:$0xff] %v15611_v8  ;;  %v13756_v7 = vpop.eup %13755  ;;  %v4137_v0 = vld [vmem:[#allocation2 + $0x4c0] sm:$0xff] }
 0x9cf   :  { %v4387_v23 = vadd.f32 1.0, %v13756_v7  ;;  %v4142_v7 = vld [vmem:[#allocation2 + $0x4e8] sm:$0xff] }
 0x9d0   :  { %13757 = vrcp.f32 %v4386_v51  ;;  %v4140_v51 = vld [vmem:[#allocation2 + $0x4d8] sm:$0xff] }
 0x9d1   :  { %13759 = vrcp.f32 %v4387_v23  ;;  %v15642_v23 = vpack.c.bf16 %v4140_v51, %v4137_v0  ;;  %v4153_v0 = vld [vmem:[#allocation2 + $0x540] sm:$0xff] }
 0x9da   :  { %v13758_v6 = vpop.eup %13757 }
 0x9db   :  { %v4393_v61 = vmul.f32 %v13758_v6, %v4392_v59  ;;  %v13760_v14 = vpop.eup %13759  ;;  %v4141_v59 = vld [vmem:[#allocation2 + $0x4e0] sm:$0xff]  ;;  %v15646_v6 = vpack.c.bf16 %v4145_v10, %v4142_v7  ;;  %v4156_v7 = vld [vmem:[#allocation2 + $0x558] sm:$0xff]  ;;  %v4155_v10 = vld [vmem:[#allocation2 + $0x550] sm:$0xff] }
 0x9dc   :  { %v4396_v2 = vsub.f32 1.0, %v13760_v14  ;;  %v4398_v52 = vmul.f32 %v13760_v14, %v15415_v45  ;;  %v15640_v45 = vpack.c.bf16 %v4138_v55, %v4135_v49  ;;  %v4148_v14 = vld [vmem:[#allocation2 + $0x518] sm:$0xff]  ;;  %v15665_v55 = vpack.c.bf16 %v4152_v43, %v4149_v15  ;;  %v4161_v15 = vld [vmem:[#allocation2 + $0x580] sm:$0xff] }
 0x9dd   :  { %v4394_v1 = vadd.f32 %v4393_v61, %v4236_v58  ;;  %v4144_v58 = vld [vmem:[#allocation2 + $0x4f8] sm:$0xff]  ;;  %v4143_v61 = vld [vmem:[#allocation2 + $0x4f0] sm:$0xff]  ;;  %v15659_v42 = vpack.c.bf16 %v4151_v24, %v4148_v14 }
 0x9de   :  { %17429 = vst [vmem:[#allocation18_spill] sm:$0xff] %v15665_v55  ;;  %v4159_v24 = vld [vmem:[#allocation2 + $0x570] sm:$0xff]  ;;  %v4164_v43 = vld [vmem:[#allocation2 + $0x598] sm:$0xff] }
 0x9df   :  { %13761 = vtanh.f32 %v4394_v1  ;;  %v4146_v1 = vld [vmem:[#allocation2 + $0x508] sm:$0xff] }
 0x9e0   :  { %v15655_v12 = vpack.c.bf16 %v4146_v1, %v4143_v61  ;;  %v4163_v61 = vld [vmem:[#allocation2 + $0x590] sm:$0xff]  ;;  %v15673_v1 = vpack.c.bf16 %v4156_v7, %v4153_v0  ;;  %v15685_v7 = vpack.c.bf16 %v4164_v43, %v4161_v15 }
 0x9e1   :  { %v4171_v15 = vld [vmem:[#allocation2 + $0x5d0] sm:$0xff] }
 0x9e2   :  { %17431 = vst [vmem:[#allocation31_spill] sm:$0xff] %v15673_v1  ;;  %17435 = vst [vmem:[#allocation22_spill] sm:$0xff] %v15685_v7 }
 0x9e9   :  { %v13762_v62 = vpop.eup %13761 }
 0x9ea   :  { %v4397_v32 = vmul.f32 %v13762_v62, %v4396_v2  ;;  %v15653_v2 = vpack.c.bf16 %v4144_v58, %v4141_v59  ;;  %v4150_v62 = vld [vmem:[#allocation2 + $0x528] sm:$0xff]  ;;  %v4160_v58 = vld [vmem:[#allocation2 + $0x578] sm:$0xff] }
 0x9eb   :  { %v15663_v49 = vpack.c.bf16 %v4150_v62, %v4147_v63  ;;  %v4158_v59 = vld [vmem:[#allocation2 + $0x568] sm:$0xff]  ;;  %v15679_v63 = vpack.c.bf16 %v4163_v61, %v4160_v58  ;;  %v4168_v58 = vld [vmem:[#allocation2 + $0x5b8] sm:$0xff]  ;;  %v4167_v61 = vld [vmem:[#allocation2 + $0x5b0] sm:$0xff] }
 0x9ec   :  { %v15632_v39 = vadd.f32 %v4398_v52, %v4397_v32  ;;  %v4154_v32 = vld [vmem:[#allocation2 + $0x548] sm:$0xff]  ;;  %v4157_v52 = vld [vmem:[#allocation2 + $0x560] sm:$0xff]  ;;  %v15675_v14 = vpack.c.bf16 %v4158_v59, %v4155_v10 }
 0x9ed   :  { %v15669_v51 = vpack.c.bf16 %v4157_v52, %v4154_v32  ;;  %17433 = vst [vmem:[#allocation21_spill] sm:$0xff] %v15679_v63  ;;  %v4162_v62 = vld [vmem:[#allocation2 + $0x588] sm:$0xff]  ;;  %v4169_v52 = vld [vmem:[#allocation2 + $0x5c0] sm:$0xff] }
 0x9ee   :  { %4471 = vmatmul.mubr.f32.vlgmr.msra.gmra.mrb[32].mxu0 %v15632_v39  ;;  %9977 = vmatmul.mubr.f32.vlgmr.msra.gmra.mrb[52].mxu1 %v15632_v39  ;;  %17432 = vst [vmem:[#allocation20_spill] sm:$0xff] %v15675_v14  ;;  %v4166_v32 = vld [vmem:[#allocation2 + $0x5a8] sm:$0xff]  ;;  %v15683_v0 = vpack.c.bf16 %v4162_v62, %v4159_v24  ;;  %v4165_v10 = vld [vmem:[#allocation2 + $0x5a0] sm:$0xff]  ;;  %v15695_v62 = vpack.c.bf16 %v4170_v38, %v4167_v61  ;;  %v4180_v61 = vld [vmem:[#allocation4 + $0x490] sm:$0xff] }
 0x9ef   :  { %12252 = vmatpush1.bf16.msra.mxu0 %v15628_v41  ;;  %12283 = vmatpush3.bf16.msra.mxu1 %v15630_v22  ;;  %17430 = vst [vmem:[#allocation19_spill] sm:$0xff] %v15669_v51  ;;  %v15689_v59 = vpack.c.bf16 %v4169_v52, %v4166_v32  ;;  %v15693_v24 = vpack.c.bf16 %v4168_v58, %v4165_v10  ;;  %v4174_v32 = vld [vmem:[#allocation2 + $0x5e8] sm:$0xff]  ;;  %v4173_v52 = vld [vmem:[#allocation2 + $0x5e0] sm:$0xff] }
 0x9f0   :  { %12254 = vmatprep.subr.bf16.mxu0 %v15634_v9  ;;  %12284 = vmatprep.subr.bf16.mxu1 %v17175_v31  ;;  %17434 = vst [vmem:[#allocation32_spill] sm:$0xff] %v15683_v0  ;;  %17438 = vst [vmem:[#allocation24_spill] sm:$0xff] %v15695_v62  ;;  %v15703_v10 = vpack.c.bf16 %v4174_v32, %v4171_v15  ;;  %v4178_v58 = vld [vmem:[#allocation4 + $0x480] sm:$0xff]  ;;  %v4184_v32 = vld [vmem:[#allocation4 + $0x4b0] sm:$0xff] }
 0x9f1   :  { %4633 = vmatprep.mubr.f32.mxu0 %v17156_v47  ;;  %10011 = vmatprep.mubr.msk.f32.mxu1 %vm14064_vm0, %v17156_v47  ;;  %17436 = vst [vmem:[#allocation23_spill] sm:$0xff] %v15689_v59  ;;  %17437 = vst [vmem:[#allocation33_spill] sm:$0xff] %v15693_v24 }
 0x9f2   :  { %17440 = vst [vmem:[#allocation34_spill] sm:$0xff] %v15703_v10 }
 0x9f3   :  { %12256 = vmatpush1.bf16.msra.mxu0 %v15640_v45  ;;  %12286 = vmatpush3.bf16.msra.mxu1 %v15642_v23 }
 0x9f4   :  { %12258 = vmatprep.subr.bf16.mxu0 %v15646_v6  ;;  %12287 = vmatprep.subr.bf16.mxu1 %v17175_v31 }
 0x9f7   :  { %12260 = vmatpush1.bf16.msra.mxu0 %v15653_v2  ;;  %12289 = vmatpush3.bf16.msra.mxu1 %v15655_v12 }
 0x9f8   :  { %12262 = vmatprep.subr.bf16.mxu0 %v15659_v42  ;;  %12290 = vmatprep.subr.bf16.mxu1 %v17175_v31 }
 0x9fb   :  { %12264 = vmatpush1.bf16.msra.mxu0 %v15663_v49  ;;  %12292 = vmatpush3.bf16.msra.mxu1 %v15665_v55  ;;  %v4175_v55 = vld [vmem:[#allocation2 + $0x5f0] sm:$0xff] }
 0x9fc   :  { %12266 = vmatprep.subr.bf16.mxu0 %v15669_v51  ;;  %12293 = vmatprep.subr.bf16.mxu1 %v17175_v31  ;;  %v4172_v51 = vld [vmem:[#allocation2 + $0x5d8] sm:$0xff] }
 0x9fd   :  { %v15699_v43 = vpack.c.bf16 %v4175_v55, %v4172_v51  ;;  %v4181_v51 = vld [vmem:[#allocation4 + $0x498] sm:$0xff] }
 0x9fe   :  { %v15713_v15 = vpack.c.bf16 %v4181_v51, %v4178_v58  ;;  %v4190_v51 = vld [vmem:[#allocation4 + $0x4e0] sm:$0xff] }
 0x9ff   :  { %12268 = vmatpush1.bf16.msra.mxu0 %v15673_v1  ;;  %12295 = vmatpush3.bf16.msra.mxu1 %v15675_v14  ;;  %17439 = vst [vmem:[#allocation25_spill] sm:$0xff] %v15699_v43  ;;  %v4179_v14 = vld [vmem:[#allocation4 + $0x488] sm:$0xff]  ;;  %v4182_v1 = vld [vmem:[#allocation4 + $0x4a0] sm:$0xff] }
 0xa00   :  { %12270 = vmatprep.subr.bf16.mxu0 %v15679_v63  ;;  %12296 = vmatprep.subr.bf16.mxu1 %v17175_v31  ;;  %v4176_v63 = vld [vmem:[#allocation2 + $0x5f8] sm:$0xff]  ;;  %v15709_v55 = vpack.c.bf16 %v4182_v1, %v4179_v14  ;;  %17443 = vst [vmem:[#allocation35_spill] sm:$0xff] %v15713_v15  ;;  %v4187_v14 = vld [vmem:[#allocation4 + $0x4c8] sm:$0xff] }
 0xa01   :  { %v15705_v38 = vpack.c.bf16 %v4176_v63, %v4173_v52  ;;  %v4186_v52 = vld [vmem:[#allocation4 + $0x4c0] sm:$0xff] }
 0xa02   :  { %17442 = vst [vmem:[#allocation27_spill] sm:$0xff] %v15709_v55 }
 0xa03   :  { %12272 = vmatpush1.bf16.msra.mxu0 %v15683_v0  ;;  %12298 = vmatpush3.bf16.msra.mxu1 %v15685_v7  ;;  %17441 = vst [vmem:[#allocation26_spill] sm:$0xff] %v15705_v38  ;;  %v4185_v7 = vld [vmem:[#allocation4 + $0x4b8] sm:$0xff]  ;;  %v4188_v0 = vld [vmem:[#allocation4 + $0x4d0] sm:$0xff] }
 0xa04   :  { %12274 = vmatprep.subr.bf16.mxu0 %v15689_v59  ;;  %12299 = vmatprep.subr.bf16.mxu1 %v17175_v31  ;;  %v4183_v59 = vld [vmem:[#allocation4 + $0x4a8] sm:$0xff]  ;;  %v15719_v1 = vpack.c.bf16 %v4188_v0, %v4185_v7  ;;  %v4193_v7 = vld [vmem:[#allocation4 + $0x4f8] sm:$0xff] }
 0xa05   :  { %v15715_v63 = vpack.c.bf16 %v4183_v59, %v4180_v61  ;;  %v15725_v59 = vpack.c.bf16 %v4187_v14, %v4184_v32  ;;  %v4192_v61 = vld [vmem:[#allocation4 + $0x4f0] sm:$0xff]  ;;  %v4199_v14 = vld [vmem:[#allocation4 + $0x528] sm:$0xff] }
 0xa06   :  { %17445 = vst [vmem:[#allocation69_spill] sm:$0xff] %v15719_v1 }
 0xa07   :  { %12276 = vmatpush1.bf16.msra.mxu0 %v15693_v24  ;;  %12301 = vmatpush3.bf16.msra.mxu1 %v15695_v62  ;;  %17444 = vst [vmem:[#allocation68_spill] sm:$0xff] %v15715_v63  ;;  %v4191_v62 = vld [vmem:[#allocation4 + $0x4e8] sm:$0xff]  ;;  %v4194_v24 = vld [vmem:[#allocation4 + $0x500] sm:$0xff]  ;;  %17446 = vst [vmem:[#allocation70_spill] sm:$0xff] %v15725_v59 }
 0xa08   :  { %12278 = vmatprep.subr.bf16.mxu0 %v15699_v43  ;;  %12302 = vmatprep.subr.bf16.mxu1 %v17175_v31  ;;  %v4189_v43 = vld [vmem:[#allocation4 + $0x4d8] sm:$0xff]  ;;  %v15731_v0 = vpack.c.bf16 %v4194_v24, %v4191_v62  ;;  %v4196_v24 = vld [vmem:[#allocation4 + $0x510] sm:$0xff] }
 0xa09   :  { %v15727_v58 = vpack.c.bf16 %v4189_v43, %v4186_v52  ;;  %v15738_v43 = vpack.c.bf16 %v4193_v7, %v4190_v51  ;;  %v4198_v52 = vld [vmem:[#allocation4 + $0x520] sm:$0xff]  ;;  %v15748_v51 = vpack.c.bf16 %v4199_v14, %v4196_v24  ;;  %v4208_v14 = vld [vmem:[#allocation4 + $0x570] sm:$0xff] }
 0xa0a   :  { %17448 = vst [vmem:[#allocation72_spill] sm:$0xff] %v15731_v0  ;;  %v4202_v7 = vld [vmem:[#allocation4 + $0x540] sm:$0xff] }
 0xa0b   :  { %12280 = vmatpush1.bf16.msra.mxu0 %v15703_v10  ;;  %12304 = vmatpush3.bf16.msra.mxu1 %v15705_v38  ;;  %17447 = vst [vmem:[#allocation71_spill] sm:$0xff] %v15727_v58  ;;  %v4197_v38 = vld [vmem:[#allocation4 + $0x518] sm:$0xff]  ;;  %v4200_v10 = vld [vmem:[#allocation4 + $0x530] sm:$0xff]  ;;  %17449 = vst [vmem:[#allocation73_spill] sm:$0xff] %v15738_v43 }
 0xa0c   :  { %12306 = vmatprep.subr.bf16.mxu0 %v15709_v55  ;;  %12337 = vmatprep.subr.bf16.mxu1 %v17175_v31  ;;  %v4195_v55 = vld [vmem:[#allocation4 + $0x508] sm:$0xff]  ;;  %v15744_v62 = vpack.c.bf16 %v4200_v10, %v4197_v38  ;;  %17452 = vst [vmem:[#allocation75_spill] sm:$0xff] %v15748_v51  ;;  %v4205_v38 = vld [vmem:[#allocation4 + $0x558] sm:$0xff] }
 0xa0d   :  { %v15740_v32 = vpack.c.bf16 %v4195_v55, %v4192_v61  ;;  %v4204_v61 = vld [vmem:[#allocation4 + $0x550] sm:$0xff]  ;;  %v15758_v24 = vpack.c.bf16 %v4205_v38, %v4202_v7  ;;  %v4214_v38 = vld [vmem:[#allocation4 + $0x5a0] sm:$0xff] }
 0xa0e   :  { %4634 = vmatmul.mubr.f32.vlgmr.msra.gmra.mrb[34].mxu0 %v15632_v39  ;;  %10012 = vmatmul.mubr.f32.vlgmr.msra.gmra.mrb[54].mxu1 %v15632_v39  ;;  %17451 = vst [vmem:[#allocation48_spill] sm:$0xff] %v15744_v62 }
 0xa0f   :  { %12308 = vmatpush1.bf16.msra.mxu0 %v15713_v15  ;;  %12339 = vmatpush3.bf16.msra.mxu1 %v15715_v63  ;;  %17450 = vst [vmem:[#allocation74_spill] sm:$0xff] %v15740_v32  ;;  %v4203_v63 = vld [vmem:[#allocation4 + $0x548] sm:$0xff]  ;;  %v4206_v15 = vld [vmem:[#allocation4 + $0x560] sm:$0xff]  ;;  %17455 = vst [vmem:[#allocation50_spill] sm:$0xff] %v15758_v24 }
 0xa10   :  { %12310 = vmatprep.subr.bf16.mxu0 %v15719_v1  ;;  %12340 = vmatprep.subr.bf16.mxu1 %v17175_v31  ;;  %v4201_v1 = vld [vmem:[#allocation4 + $0x538] sm:$0xff]  ;;  %v15754_v10 = vpack.c.bf16 %v4206_v15, %v4203_v63  ;;  %v4211_v63 = vld [vmem:[#allocation4 + $0x588] sm:$0xff] }
 0xa11   :  { %4774 = vmatprep.mubr.f32.mxu0 %v17156_v47  ;;  %10046 = vmatprep.mubr.msk.f32.mxu1 %vm14064_vm0, %v17156_v47  ;;  %v15750_v55 = vpack.c.bf16 %v4201_v1, %v4198_v52  ;;  %v4210_v52 = vld [vmem:[#allocation4 + $0x580] sm:$0xff]  ;;  %v15768_v7 = vpack.c.bf16 %v4211_v63, %v4208_v14  ;;  %v4220_v63 = vld [vmem:[#allocation4 + $0x5d0] sm:$0xff] }
 0xa12   :  { %17454 = vst [vmem:[#allocation36_spill] sm:$0xff] %v15754_v10 }
 0xa13   :  { %12312 = vmatpush1.bf16.msra.mxu0 %v15725_v59  ;;  %12342 = vmatpush3.bf16.msra.mxu1 %v15727_v58  ;;  %17453 = vst [vmem:[#allocation76_spill] sm:$0xff] %v15750_v55  ;;  %v4209_v58 = vld [vmem:[#allocation4 + $0x578] sm:$0xff]  ;;  %v4212_v59 = vld [vmem:[#allocation4 + $0x590] sm:$0xff]  ;;  %17458 = vst [vmem:[#allocation59_spill] sm:$0xff] %v15768_v7 }
 0xa14   :  { %12314 = vmatprep.subr.bf16.mxu0 %v15731_v0  ;;  %12343 = vmatprep.subr.bf16.mxu1 %v17175_v31  ;;  %v4207_v0 = vld [vmem:[#allocation4 + $0x568] sm:$0xff]  ;;  %v15764_v15 = vpack.c.bf16 %v4212_v59, %v4209_v58  ;;  %v4217_v58 = vld [vmem:[#allocation4 + $0x5b8] sm:$0xff] }
 0xa15   :  { %v15760_v1 = vpack.c.bf16 %v4207_v0, %v4204_v61  ;;  %v4216_v61 = vld [vmem:[#allocation4 + $0x5b0] sm:$0xff]  ;;  %v15778_v14 = vpack.c.bf16 %v4217_v58, %v4214_v38 }
 0xa16   :  { %17457 = vst [vmem:[#allocation52_spill] sm:$0xff] %v15764_v15 }
 0xa17   :  { %12316 = vmatpush1.bf16.msra.mxu0 %v15738_v43  ;;  %12345 = vmatpush3.bf16.msra.mxu1 %v15740_v32  ;;  %17456 = vst [vmem:[#allocation51_spill] sm:$0xff] %v15760_v1  ;;  %v4215_v32 = vld [vmem:[#allocation4 + $0x5a8] sm:$0xff]  ;;  %v4218_v43 = vld [vmem:[#allocation4 + $0x5c0] sm:$0xff]  ;;  %17461 = vst [vmem:[#allocation79_spill] sm:$0xff] %v15778_v14 }
 0xa18   :  { %12318 = vmatprep.subr.bf16.mxu0 %v15744_v62  ;;  %12346 = vmatprep.subr.bf16.mxu1 %v17175_v31  ;;  %v4213_v62 = vld [vmem:[#allocation4 + $0x598] sm:$0xff]  ;;  %v15774_v59 = vpack.c.bf16 %v4218_v43, %v4215_v32  ;;  %v4223_v32 = vld [vmem:[#allocation4 + $0x5e8] sm:$0xff] }
 0xa19   :  { %v15770_v0 = vpack.c.bf16 %v4213_v62, %v4210_v52  ;;  %v4222_v52 = vld [vmem:[#allocation4 + $0x5e0] sm:$0xff] }
 0xa1a   :  { %17460 = vst [vmem:[#allocation78_spill] sm:$0xff] %v15774_v59 }
 0xa1b   :  { %12320 = vmatpush1.bf16.msra.mxu0 %v15748_v51  ;;  %12348 = vmatpush3.bf16.msra.mxu1 %v15750_v55  ;;  %17459 = vst [vmem:[#allocation38_spill] sm:$0xff] %v15770_v0  ;;  %v4221_v55 = vld [vmem:[#allocation4 + $0x5d8] sm:$0xff]  ;;  %v4224_v51 = vld [vmem:[#allocation4 + $0x5f0] sm:$0xff] }
 0xa1c   :  { %12322 = vmatprep.subr.bf16.mxu0 %v15754_v10  ;;  %12349 = vmatprep.subr.bf16.mxu1 %v17175_v31  ;;  %v4219_v10 = vld [vmem:[#allocation4 + $0x5c8] sm:$0xff]  ;;  %v15784_v43 = vpack.c.bf16 %v4224_v51, %v4221_v55 }
 0xa1d   :  { %v15780_v62 = vpack.c.bf16 %v4219_v10, %v4216_v61  ;;  %v17466_v51 = vld [vmem:[#allocation77_spill] sm:$0xff] }
 0xa1e   :  { %17463 = vst [vmem:[#allocation81_spill] sm:$0xff] %v15784_v43  ;;  %v4400_v55 = vmul.f32 %v15596_v11, %v17466_v51  ;;  %v4401_v10 = vmul.f32 %v15598_v33, %v17466_v51  ;;  %v4402_v33 = vmul.f32 %v15617_v25, %v17466_v51 }
 0xa1f   :  { %12324 = vmatpush1.bf16.msra.mxu0 %v15758_v24  ;;  %12351 = vmatpush3.bf16.msra.mxu1 %v15760_v1  ;;  %17462 = vst [vmem:[#allocation80_spill] sm:$0xff] %v15780_v62 }
 0xa20   :  { %12326 = vmatprep.subr.bf16.mxu0 %v15764_v15  ;;  %12352 = vmatprep.subr.bf16.mxu1 %v17175_v31  ;;  %v4225_v15 = vld [vmem:[#allocation4 + $0x5f8] sm:$0xff] }
 0xa21   :  { %v15790_v38 = vpack.c.bf16 %v4225_v15, %v4222_v52  ;;  %v4403_v15 = vadd.f32 %v4400_v55, %v15602_v60 }
 0xa23   :  { %12328 = vmatpush1.bf16.msra.mxu0 %v15768_v7  ;;  %12354 = vmatpush3.bf16.msra.mxu1 %v15770_v0  ;;  %v15788_v7 = vpack.c.bf16 %v4223_v32, %v4220_v63  ;;  %17465 = vst [vmem:[#allocation83_spill] sm:$0xff] %v15790_v38  ;;  %v4404_v63 = vadd.f32 %v4401_v10, %v15606_v13 }
 0xa24   :  { %12330 = vmatprep.subr.bf16.mxu0 %v15774_v59  ;;  %12355 = vmatprep.subr.bf16.mxu1 %v17175_v31  ;;  %v4405_v10 = vadd.f32 %v4402_v33, %v15623_v44  ;;  %v17468_v33 = vld [vmem:[#allocation19_spill] sm:$0xff] }
 0xa25   :  { %17464 = vst [vmem:[#allocation82_spill] sm:$0xff] %v15788_v7 }
 0xa27   :  { %12332 = vmatpush1.bf16.msra.mxu0 %v15778_v14  ;;  %12357 = vmatpush3.bf16.msra.mxu1 %v15780_v62 }
 0xa28   :  { %12334 = vmatprep.subr.bf16.mxu0 %v15784_v43  ;;  %12358 = vmatprep.subr.bf16.mxu1 %v17175_v31 }
 0xa2b   :  { %12336 = vmatpush1.bf16.msra.mxu0 %v15788_v7  ;;  %12360 = vmatpush3.bf16.msra.mxu1 %v15790_v38 }
 0xa2c   :  { %12362 = vmatprep.subr.bf16.mxu0 %v15460_v4  ;;  %12393 = vmatprep.subr.bf16.mxu1 %v17175_v31 }
 0xa2e   :  { %4775 = vmatmul.mubr.f32.vlgmr.msra.gmra.mrb[34].mxu0 %v15611_v8  ;;  %10047 = vmatmul.mubr.f32.vlgmr.msra.gmra.mrb[56].mxu1 %v15611_v8 }
 0xa2f   :  { %12364 = vmatpush1.bf16.msra.mxu0 %v15470_v37  ;;  %12395 = vmatpush3.bf16.msra.mxu1 %v15472_v40 }
 0xa30   :  { %12366 = vmatprep.subr.bf16.mxu0 %v15476_v30  ;;  %12396 = vmatprep.subr.bf16.mxu1 %v17175_v31 }
 0xa31   :  { %4943 = vmatprep.mubr.f32.mxu0 %v17156_v47  ;;  %10081 = vmatprep.mubr.msk.f32.mxu1 %vm14064_vm0, %v17156_v47 }
 0xa33   :  { %12368 = vmatpush1.bf16.msra.mxu0 %v15482_v46  ;;  %12398 = vmatpush3.bf16.msra.mxu1 %v15484_v28 }
 0xa34   :  { %12370 = vmatprep.subr.bf16.mxu0 %v15488_v3  ;;  %12399 = vmatprep.subr.bf16.mxu1 %v17175_v31 }
 0xa37   :  { %12372 = vmatpush1.bf16.msra.mxu0 %v15495_v18  ;;  %12401 = vmatpush3.bf16.msra.mxu1 %v15497_v48 }
 0xa38   :  { %12374 = vmatprep.subr.bf16.mxu0 %v15501_v36  ;;  %12402 = vmatprep.subr.bf16.mxu1 %v17175_v31 }
 0xa3b   :  { %12376 = vmatpush1.bf16.msra.mxu0 %v15505_v57  ;;  %12404 = vmatpush3.bf16.msra.mxu1 %v15507_v20 }
 0xa3c   :  { %12378 = vmatprep.subr.bf16.mxu0 %v15511_v21  ;;  %12405 = vmatprep.subr.bf16.mxu1 %v17175_v31 }
 0xa3f   :  { %12380 = vmatpush1.bf16.msra.mxu0 %v15515_v17  ;;  %12407 = vmatpush3.bf16.msra.mxu1 %v15517_v34 }
 0xa40   :  { %12382 = vmatprep.subr.bf16.mxu0 %v15521_v50  ;;  %12408 = vmatprep.subr.bf16.mxu1 %v17175_v31 }
 0xa43   :  { %12384 = vmatpush1.bf16.msra.mxu0 %v15525_v54  ;;  %12410 = vmatpush3.bf16.msra.mxu1 %v15527_v5 }
 0xa44   :  { %12386 = vmatprep.subr.bf16.mxu0 %v15531_v26  ;;  %12411 = vmatprep.subr.bf16.mxu1 %v17175_v31 }
 0xa47   :  { %12388 = vmatpush1.bf16.msra.mxu0 %v15535_v19  ;;  %12413 = vmatpush3.bf16.msra.mxu1 %v15537_v16 }
 0xa48   :  { %12390 = vmatprep.subr.bf16.mxu0 %v15541_v53  ;;  %12414 = vmatprep.subr.bf16.mxu1 %v17175_v31 }
 0xa4b   :  { %12392 = vmatpush1.bf16.msra.mxu0 %v15545_v35  ;;  %12416 = vmatpush3.bf16.msra.mxu1 %v15547_v27 }
 0xa4c   :  { %12418 = vmatprep.subr.bf16.mxu0 %v15591_v29  ;;  %12449 = vmatprep.subr.bf16.mxu1 %v17175_v31 }
 0xac1   :  { %v4472_v58 = vpop.f32.mrb[32].mxu0  ;;  %v4543_v61 = vpop.f32.mrb[52].mxu1 }
 0xac2   :  { %v4547_v32 = vadd.f32 %v4472_v58, %v4403_v15  ;;  %v4474_v52 = vpop.f32.mrb[33].mxu0  ;;  %v9978_v35 = vpop.f32.mrb[53].mxu1  ;;  %v4561_v60 = vadd.f32 %v4543_v61, %v15619_v56 }
 0xac3   :  { %v4548_v27 = vadd.f32 %v4474_v52, %v4404_v63 }
 0xac4   :  { %v8198_v53 = vmul.f32 -1.442695, %v4547_v32  ;;  %v15874_v32 = vld [vmem:[#allocation6 + $0x68] sm:$0xff] }
 0xac5   :  { %v8199_v29 = vmul.f32 -1.442695, %v4548_v27  ;;  %17469 = vst [vmem:[#allocation77_spill] sm:$0xff] %v15874_v32 }
 0xac6   :  { %13763 = vpow2.f32 %v8198_v53 }
 0xac7   :  { %13765 = vpow2.f32 %v8199_v29 }
 0xad0   :  { %v13764_v16 = vpop.eup %13763 }
 0xad1   :  { %v4555_v19 = vadd.f32 1.0, %v13764_v16  ;;  %v13766_v11 = vpop.eup %13765 }
 0xad2   :  { %v4556_v55 = vadd.f32 1.0, %v13766_v11  ;;  %v15869_v11 = vld [vmem:[#allocation6 + $0x60] sm:$0xff] }
 0xad3   :  { %13767 = vrcp.f32 %v4555_v19 }
 0xad4   :  { %13769 = vrcp.f32 %v4556_v55 }
 0xadd   :  { %v13768_v26 = vpop.eup %13767 }
 0xade   :  { %v4562_v15 = vmul.f32 %v13768_v26, %v4561_v60  ;;  %v13770_v27 = vpop.eup %13769  ;;  %v17467_v26 = vld [vmem:[#allocation18_spill] sm:$0xff] }
 0xadf   :  { %v4565_v16 = vsub.f32 1.0, %v13770_v27  ;;  %v4567_v63 = vmul.f32 %v13770_v27, %v15632_v39 }
 0xae0   :  { %v4563_v35 = vadd.f32 %v4562_v15, %v4405_v10  ;;  %v17470_v10 = vld [vmem:[#allocation31_spill] sm:$0xff]  ;;  %v17471_v15 = vld [vmem:[#allocation20_spill] sm:$0xff] }
 0xae1   :  { %v15845_v58 = vpop.f32.mrb[54].mxu1 }
 0xae2   :  { %13771 = vtanh.f32 %v4563_v35  ;;  %v10013_v53 = vpop.f32.mrb[55].mxu1  ;;  %v17472_v35 = vld [vmem:[#allocation21_spill] sm:$0xff] }
 0xaec   :  { %v13772_v19 = vpop.eup %13771 }
 0xaed   :  { %v4566_v29 = vmul.f32 %v13772_v19, %v4565_v16  ;;  %v17473_v16 = vld [vmem:[#allocation32_spill] sm:$0xff]  ;;  %v17474_v19 = vld [vmem:[#allocation22_spill] sm:$0xff] }
 0xaef   :  { %v15848_v51 = vadd.f32 %v4567_v63, %v4566_v29  ;;  %v17475_v29 = vld [vmem:[#allocation23_spill] sm:$0xff] }
 0xaf1   :  { %4944 = vmatmul.mubr.f32.vlgmr.msra.gmra.mrb[36].mxu0 %v15848_v51  ;;  %10082 = vmatmul.mubr.f32.vlgmr.msra.gmra.mrb[58].mxu1 %v15848_v51 }
 0xaf2   :  { %12420 = vmatpush1.bf16.msra.mxu0 %v15628_v41  ;;  %12451 = vmatpush3.bf16.msra.mxu1 %v15630_v22 }
 0xaf3   :  { %12422 = vmatprep.subr.bf16.mxu0 %v15634_v9  ;;  %12452 = vmatprep.subr.bf16.mxu1 %v17175_v31 }
 0xaf4   :  { %5106 = vmatprep.mubr.f32.mxu0 %v17156_v47  ;;  %10116 = vmatprep.mubr.msk.f32.mxu1 %vm14064_vm0, %v17156_v47 }
 0xaf6   :  { %12424 = vmatpush1.bf16.msra.mxu0 %v15640_v45  ;;  %12454 = vmatpush3.bf16.msra.mxu1 %v15642_v23 }
 0xaf7   :  { %12426 = vmatprep.subr.bf16.mxu0 %v15646_v6  ;;  %12455 = vmatprep.subr.bf16.mxu1 %v17175_v31 }
 0xafa   :  { %12428 = vmatpush1.bf16.msra.mxu0 %v15653_v2  ;;  %12457 = vmatpush3.bf16.msra.mxu1 %v15655_v12 }
 0xafb   :  { %12430 = vmatprep.subr.bf16.mxu0 %v15659_v42  ;;  %12458 = vmatprep.subr.bf16.mxu1 %v17175_v31 }
 0xafe   :  { %12432 = vmatpush1.bf16.msra.mxu0 %v15663_v49  ;;  %12460 = vmatpush3.bf16.msra.mxu1 %v17467_v26 }
 0xaff   :  { %12434 = vmatprep.subr.bf16.mxu0 %v17468_v33  ;;  %12461 = vmatprep.subr.bf16.mxu1 %v17175_v31 }
 0xb01   :  { %v4776_v60 = vpop.f32.mrb[34].mxu0  ;;  %v4847_v39 = vpop.f32.mrb[56].mxu1 }
 0xb02   :  { %v13529_v61 = vadd.f32 %v4776_v60, %v15869_v11  ;;  %v4778_v52 = vpop.f32.mrb[35].mxu0  ;;  %v10048_v55 = vpop.f32.mrb[57].mxu1  ;;  %12436 = vmatpush1.bf16.msra.mxu0 %v17470_v10  ;;  %12463 = vmatpush3.bf16.msra.mxu1 %v17471_v15  ;;  %v17476_v60 = vld [vmem:[#allocation33_spill] sm:$0xff] }
 0xb03   :  { %12438 = vmatprep.subr.bf16.mxu0 %v17472_v35  ;;  %12464 = vmatprep.subr.bf16.mxu1 %v17175_v31  ;;  %v13530_v27 = vadd.f32 %v4778_v52, %v15874_v32  ;;  %v17477_v55 = vld [vmem:[#allocation24_spill] sm:$0xff]  ;;  %v17478_v35 = vld [vmem:[#allocation25_spill] sm:$0xff]  ;;  %v17480_v52 = vld [vmem:[#allocation26_spill] sm:$0xff] }
 0xb04   :  { %v8200_v53 = vmul.f32 -1.442695, %v13529_v61  ;;  %v17479_v61 = vld [vmem:[#allocation34_spill] sm:$0xff]  ;;  %v17491_v32 = vld [vmem:[#allocation75_spill] sm:$0xff] }
 0xb05   :  { %v8201_v63 = vmul.f32 -1.442695, %v13530_v27  ;;  %v17482_v27 = vld [vmem:[#allocation35_spill] sm:$0xff] }
 0xb06   :  { %13773 = vpow2.f32 %v8200_v53  ;;  %12440 = vmatpush1.bf16.msra.mxu0 %v17473_v16  ;;  %12466 = vmatpush3.bf16.msra.mxu1 %v17474_v19  ;;  %v17481_v53 = vld [vmem:[#allocation27_spill] sm:$0xff] }
 0xb07   :  { %12442 = vmatprep.subr.bf16.mxu0 %v17475_v29  ;;  %12467 = vmatprep.subr.bf16.mxu1 %v17175_v31  ;;  %13775 = vpow2.f32 %v8201_v63  ;;  %v17484_v63 = vld [vmem:[#allocation69_spill] sm:$0xff] }
 0xb0a   :  { %12444 = vmatpush1.bf16.msra.mxu0 %v17476_v60  ;;  %12469 = vmatpush3.bf16.msra.mxu1 %v17477_v55  ;;  %v15910_v55 = vld [vmem:[#allocation6 + $0x70] sm:$0xff]  ;;  %v17490_v60 = vld [vmem:[#allocation48_spill] sm:$0xff] }
 0xb0b   :  { %12446 = vmatprep.subr.bf16.mxu0 %v17478_v35  ;;  %12470 = vmatprep.subr.bf16.mxu1 %v17175_v31  ;;  %v17483_v35 = vld [vmem:[#allocation68_spill] sm:$0xff] }
 0xb0e   :  { %12448 = vmatpush1.bf16.msra.mxu0 %v17479_v61  ;;  %12472 = vmatpush3.bf16.msra.mxu1 %v17480_v52  ;;  %v17487_v61 = vld [vmem:[#allocation72_spill] sm:$0xff] }
 0xb0f   :  { %12474 = vmatprep.subr.bf16.mxu0 %v17481_v53  ;;  %12505 = vmatprep.subr.bf16.mxu1 %v17175_v31  ;;  %v17485_v53 = vld [vmem:[#allocation70_spill] sm:$0xff] }
 0xb10   :  { %v13774_v29 = vpop.eup %13773 }
 0xb11   :  { %v4859_v19 = vadd.f32 1.0, %v13774_v29  ;;  %5107 = vmatmul.mubr.f32.vlgmr.msra.gmra.mrb[38].mxu0 %v15848_v51  ;;  %10117 = vmatmul.mubr.f32.vlgmr.msra.gmra.mrb[60].mxu1 %v15848_v51  ;;  %v17486_v29 = vld [vmem:[#allocation71_spill] sm:$0xff]  ;;  %v13776_v52 = vpop.eup %13775 }
 0xb12   :  { %12476 = vmatpush1.bf16.msra.mxu0 %v17482_v27  ;;  %12507 = vmatpush3.bf16.msra.mxu1 %v17483_v35  ;;  %v15906_v35 = vld [vmem:[#allocation6 + $0x78] sm:$0xff]  ;;  %v17489_v27 = vld [vmem:[#allocation74_spill] sm:$0xff] }
 0xb13   :  { %13777 = vrcp.f32 %v4859_v19  ;;  %12478 = vmatprep.subr.bf16.mxu0 %v17484_v63  ;;  %12508 = vmatprep.subr.bf16.mxu1 %v17175_v31  ;;  %v4860_v19 = vadd.f32 1.0, %v13776_v52  ;;  %v17488_v63 = vld [vmem:[#allocation73_spill] sm:$0xff]  ;;  %v17492_v52 = vld [vmem:[#allocation76_spill] sm:$0xff] }
 0xb14   :  { %5247 = vmatprep.mubr.f32.mxu0 %v17156_v47  ;;  %10151 = vmatprep.mubr.msk.f32.mxu1 %vm14064_vm0, %v17156_v47 }
 0xb15   :  { %13779 = vrcp.f32 %v4860_v19 }
 0xb16   :  { %12480 = vmatpush1.bf16.msra.mxu0 %v17485_v53  ;;  %12510 = vmatpush3.bf16.msra.mxu1 %v17486_v29  ;;  %v4865_v29 = vadd.f32 %v4847_v39, %v15906_v35  ;;  %v17494_v39 = vld [vmem:[#allocation52_spill] sm:$0xff] }
 0xb17   :  { %12482 = vmatprep.subr.bf16.mxu0 %v17487_v61  ;;  %12511 = vmatprep.subr.bf16.mxu1 %v17175_v31  ;;  %v4707_v61 = vadd.f32 %v15845_v58, %v15910_v55  ;;  %v17495_v58 = vld [vmem:[#allocation59_spill] sm:$0xff] }
 0xb1a   :  { %12484 = vmatpush1.bf16.msra.mxu0 %v17488_v63  ;;  %12513 = vmatpush3.bf16.msra.mxu1 %v17489_v27  ;;  %v17493_v63 = vld [vmem:[#allocation36_spill] sm:$0xff] }
 0xb1b   :  { %12486 = vmatprep.subr.bf16.mxu0 %v17490_v60  ;;  %12514 = vmatprep.subr.bf16.mxu1 %v17175_v31 }
 0xb1d   :  { %v13778_v53 = vpop.eup %13777 }
 0xb1e   :  { %v4866_v16 = vmul.f32 %v13778_v53, %v4865_v29  ;;  %12488 = vmatpush1.bf16.msra.mxu0 %v17491_v32  ;;  %12516 = vmatpush3.bf16.msra.mxu1 %v17492_v52 }
 0xb1f   :  { %12490 = vmatprep.subr.bf16.mxu0 %v17493_v63  ;;  %12517 = vmatprep.subr.bf16.mxu1 %v17175_v31  ;;  %v13780_v53 = vpop.eup %13779 }
 0xb20   :  { %v4867_v27 = vadd.f32 %v4866_v16, %v4707_v61  ;;  %v4869_v16 = vsub.f32 1.0, %v13780_v53  ;;  %v4871_v29 = vmul.f32 %v13780_v53, %v15611_v8  ;;  %v17497_v8 = vld [vmem:[#allocation46_spill] sm:$0xff]  ;;  %v17498_v53 = vld [vmem:[#allocation12_spill] sm:$0xff] }
 0xb22   :  { %13781 = vtanh.f32 %v4867_v27  ;;  %12492 = vmatpush1.bf16.msra.mxu0 %v15758_v24  ;;  %12519 = vmatpush3.bf16.msra.mxu1 %v15760_v1 }
 0xb23   :  { %12494 = vmatprep.subr.bf16.mxu0 %v17494_v39  ;;  %12520 = vmatprep.subr.bf16.mxu1 %v17175_v31 }
 0xb26   :  { %12496 = vmatpush1.bf16.msra.mxu0 %v17495_v58  ;;  %12522 = vmatpush3.bf16.msra.mxu1 %v15770_v0 }
 0xb27   :  { %12498 = vmatprep.subr.bf16.mxu0 %v15774_v59  ;;  %12523 = vmatprep.subr.bf16.mxu1 %v17175_v31 }
 0xb2a   :  { %12500 = vmatpush1.bf16.msra.mxu0 %v15778_v14  ;;  %12525 = vmatpush3.bf16.msra.mxu1 %v15780_v62 }
 0xb2b   :  { %12502 = vmatprep.subr.bf16.mxu0 %v15784_v43  ;;  %12526 = vmatprep.subr.bf16.mxu1 %v17175_v31 }
 0xb2c   :  { %v13782_v61 = vpop.eup %13781 }
 0xb2d   :  { %v4870_v27 = vmul.f32 %v13782_v61, %v4869_v16  ;;  %v17499_v16 = vld [vmem:[#allocation13_spill] sm:$0xff]  ;;  %v17500_v61 = vld [vmem:[#allocation28_spill] sm:$0xff] }
 0xb2e   :  { %12504 = vmatpush1.bf16.msra.mxu0 %v15788_v7  ;;  %12528 = vmatpush3.bf16.msra.mxu1 %v15790_v38 }
 0xb2f   :  { %v15936_v19 = vadd.f32 %v4871_v29, %v4870_v27  ;;  %12530 = vmatprep.subr.bf16.mxu0 %v15460_v4  ;;  %12561 = vmatprep.subr.bf16.mxu1 %v17175_v31  ;;  %v17501_v27 = vld [vmem:[#allocation14_spill] sm:$0xff]  ;;  %v17502_v29 = vld [vmem:[#allocation15_spill] sm:$0xff] }
 0xb31   :  { %17496 = vst [vmem:[#allocation18_spill] sm:$0xff] %v15936_v19  ;;  %5248 = vmatmul.mubr.f32.vlgmr.msra.gmra.mrb[38].mxu0 %v15936_v19  ;;  %10152 = vmatmul.mubr.f32.vlgmr.msra.gmra.mrb[62].mxu1 %v15936_v19 }
 0xb32   :  { %12532 = vmatpush1.bf16.msra.mxu0 %v15470_v37  ;;  %12563 = vmatpush3.bf16.msra.mxu1 %v15472_v40 }
 0xb33   :  { %12534 = vmatprep.subr.bf16.mxu0 %v15476_v30  ;;  %12564 = vmatprep.subr.bf16.mxu1 %v17175_v31 }
 0xb34   :  { %5416 = vmatprep.mubr.f32.mxu0 %v17156_v47  ;;  %10186 = vmatprep.mubr.msk.f32.mxu1 %vm14064_vm0, %v17156_v47 }
 0xb36   :  { %12536 = vmatpush1.bf16.msra.mxu0 %v15482_v46  ;;  %12566 = vmatpush3.bf16.msra.mxu1 %v15484_v28 }
 0xb37   :  { %12538 = vmatprep.subr.bf16.mxu0 %v15488_v3  ;;  %12567 = vmatprep.subr.bf16.mxu1 %v17175_v31 }
 0xb3a   :  { %12540 = vmatpush1.bf16.msra.mxu0 %v15495_v18  ;;  %12569 = vmatpush3.bf16.msra.mxu1 %v15497_v48 }
 0xb3b   :  { %12542 = vmatprep.subr.bf16.mxu0 %v15501_v36  ;;  %12570 = vmatprep.subr.bf16.mxu1 %v17175_v31 }
 0xb3e   :  { %12544 = vmatpush1.bf16.msra.mxu0 %v15505_v57  ;;  %12572 = vmatpush3.bf16.msra.mxu1 %v15507_v20 }
 0xb3f   :  { %12546 = vmatprep.subr.bf16.mxu0 %v15511_v21  ;;  %12573 = vmatprep.subr.bf16.mxu1 %v17175_v31 }
 0xb42   :  { %12548 = vmatpush1.bf16.msra.mxu0 %v15515_v17  ;;  %12575 = vmatpush3.bf16.msra.mxu1 %v15517_v34  ;;  %v17506_v34 = vld [vmem:[#allocation17_spill] sm:$0xff]  ;;  %v17507_v17 = vld [vmem:[#allocation30_spill] sm:$0xff] }
 0xb43   :  { %12550 = vmatprep.subr.bf16.mxu0 %v15521_v50  ;;  %12576 = vmatprep.subr.bf16.mxu1 %v17175_v31  ;;  %v17503_v50 = vld [vmem:[#allocation29_spill] sm:$0xff] }
 0xb46   :  { %12552 = vmatpush1.bf16.msra.mxu0 %v15525_v54  ;;  %12578 = vmatpush3.bf16.msra.mxu1 %v15527_v5  ;;  %v17504_v5 = vld [vmem:[#allocation60_spill] sm:$0xff] }
 0xb47   :  { %12554 = vmatprep.subr.bf16.mxu0 %v17497_v8  ;;  %12579 = vmatprep.subr.bf16.mxu1 %v17175_v31  ;;  %v17505_v8 = vld [vmem:[#allocation16_spill] sm:$0xff] }
 0xb48   :  { %v4873_v54 = vmul.f32 %v17505_v8, %v17504_v5 }
 0xb4a   :  { %12556 = vmatpush1.bf16.msra.mxu0 %v17498_v53  ;;  %12581 = vmatpush3.bf16.msra.mxu1 %v17499_v16  ;;  %v4874_v53 = vmul.f32 %v17506_v34, %v17504_v5  ;;  %v4876_v16 = vadd.f32 %v4873_v54, %v17507_v17  ;;  %v4875_v34 = vmul.f32 %v15617_v25, %v17504_v5 }
 0xb4b   :  { %12558 = vmatprep.subr.bf16.mxu0 %v17500_v61  ;;  %12582 = vmatprep.subr.bf16.mxu1 %v17175_v31 }
 0xb4c   :  { %v4877_v20 = vadd.f32 %v4874_v53, %v15606_v13 }
 0xb4e   :  { %12560 = vmatpush1.bf16.msra.mxu0 %v17501_v27  ;;  %12584 = vmatpush3.bf16.msra.mxu1 %v17502_v29 }
 0xb4f   :  { %12586 = vmatprep.subr.bf16.mxu0 %v17503_v50  ;;  %12617 = vmatprep.subr.bf16.mxu1 %v17175_v31 }
 0xbc4   :  { %v4945_v21 = vpop.f32.mrb[36].mxu0  ;;  %v5016_v61 = vpop.f32.mrb[58].mxu1 }
 0xbc5   :  { %v5020_v57 = vadd.f32 %v4945_v21, %v4876_v16  ;;  %v4947_v27 = vpop.f32.mrb[37].mxu0  ;;  %v10083_v36 = vpop.f32.mrb[59].mxu1  ;;  %v5034_v54 = vadd.f32 %v5016_v61, %v15619_v56  ;;  %v4878_v21 = vadd.f32 %v4875_v34, %v15623_v44  ;;  %v17508_v16 = vld [vmem:[#allocation21_spill] sm:$0xff]  ;;  %v17511_v34 = vld [vmem:[#allocation22_spill] sm:$0xff] }
 0xbc6   :  { %v5021_v29 = vadd.f32 %v4947_v27, %v4877_v20  ;;  %v17509_v27 = vld [vmem:[#allocation77_spill] sm:$0xff] }
 0xbc7   :  { %v8202_v48 = vmul.f32 -1.442695, %v5020_v57 }
 0xbc8   :  { %v8203_v50 = vmul.f32 -1.442695, %v5021_v29 }
 0xbc9   :  { %13783 = vpow2.f32 %v8202_v48 }
 0xbca   :  { %13785 = vpow2.f32 %v8203_v50 }
 0xbd3   :  { %v13784_v18 = vpop.eup %13783 }
 0xbd4   :  { %v5028_v3 = vadd.f32 1.0, %v13784_v18  ;;  %v13786_v8 = vpop.eup %13785 }
 0xbd5   :  { %v5029_v17 = vadd.f32 1.0, %v13786_v8  ;;  %v17510_v8 = vld [vmem:[#allocation32_spill] sm:$0xff] }
 0xbd6   :  { %13787 = vrcp.f32 %v5028_v3 }
 0xbd7   :  { %13789 = vrcp.f32 %v5029_v17  ;;  %v17512_v17 = vld [vmem:[#allocation23_spill] sm:$0xff] }
 0xbe0   :  { %v13788_v28 = vpop.eup %13787 }
 0xbe1   :  { %v5035_v13 = vmul.f32 %v13788_v28, %v5034_v54  ;;  %v13790_v20 = vpop.eup %13789 }
 0xbe2   :  { %v5038_v18 = vsub.f32 1.0, %v13790_v20  ;;  %v5040_v53 = vmul.f32 %v13790_v20, %v15848_v51  ;;  %v17517_v20 = vld [vmem:[#allocation26_spill] sm:$0xff] }
 0xbe3   :  { %v5036_v36 = vadd.f32 %v5035_v13, %v4878_v21  ;;  %v17513_v21 = vld [vmem:[#allocation33_spill] sm:$0xff]  ;;  %v17514_v13 = vld [vmem:[#allocation24_spill] sm:$0xff] }
 0xbe4   :  { %v15987_v57 = vpop.f32.mrb[60].mxu1 }
 0xbe5   :  { %13791 = vtanh.f32 %v5036_v36  ;;  %v10118_v48 = vpop.f32.mrb[61].mxu1  ;;  %v17515_v36 = vld [vmem:[#allocation25_spill] sm:$0xff] }
 0xbe6   :  { %v17516_v48 = vld [vmem:[#allocation34_spill] sm:$0xff] }
 0xbef   :  { %v13792_v3 = vpop.eup %13791 }
 0xbf0   :  { %v5039_v50 = vmul.f32 %v13792_v3, %v5038_v18  ;;  %v17518_v18 = vld [vmem:[#allocation27_spill] sm:$0xff] }
 0xbf2   :  { %v15990_v5 = vadd.f32 %v5040_v53, %v5039_v50  ;;  %v17519_v53 = vld [vmem:[#allocation35_spill] sm:$0xff] }
 0xbf4   :  { %5417 = vmatmul.mubr.f32.vlgmr.msra.gmra.mrb[40].mxu0 %v15990_v5  ;;  %10187 = vmatmul.mubr.f32.vlgmr.msra.gmra.mrb[64].mxu1 %v15990_v5 }
 0xbf5   :  { %12588 = vmatpush1.bf16.msra.mxu0 %v15628_v41  ;;  %12619 = vmatpush3.bf16.msra.mxu1 %v15630_v22 }
 0xbf6   :  { %12590 = vmatprep.subr.bf16.mxu0 %v15634_v9  ;;  %12620 = vmatprep.subr.bf16.mxu1 %v17175_v31 }
 0xbf7   :  { %5579 = vmatprep.mubr.f32.mxu0 %v17156_v47  ;;  %10221 = vmatprep.mubr.msk.f32.mxu1 %vm14064_vm0, %v17156_v47 }
 0xbf9   :  { %12592 = vmatpush1.bf16.msra.mxu0 %v15640_v45  ;;  %12622 = vmatpush3.bf16.msra.mxu1 %v15642_v23 }
 0xbfa   :  { %12594 = vmatprep.subr.bf16.mxu0 %v15646_v6  ;;  %12623 = vmatprep.subr.bf16.mxu1 %v17175_v31 }
 0xbfd   :  { %12596 = vmatpush1.bf16.msra.mxu0 %v15653_v2  ;;  %12625 = vmatpush3.bf16.msra.mxu1 %v15655_v12 }
 0xbfe   :  { %12598 = vmatprep.subr.bf16.mxu0 %v15659_v42  ;;  %12626 = vmatprep.subr.bf16.mxu1 %v17175_v31 }
 0xc01   :  { %12600 = vmatpush1.bf16.msra.mxu0 %v15663_v49  ;;  %12628 = vmatpush3.bf16.msra.mxu1 %v17467_v26 }
 0xc02   :  { %12602 = vmatprep.subr.bf16.mxu0 %v17468_v33  ;;  %12629 = vmatprep.subr.bf16.mxu1 %v17175_v31 }
 0xc04   :  { %v5249_v28 = vpop.f32.mrb[38].mxu0  ;;  %v5320_v25 = vpop.f32.mrb[62].mxu1 }
 0xc05   :  { %v13531_v56 = vadd.f32 %v5249_v28, %v15869_v11  ;;  %v5251_v44 = vpop.f32.mrb[39].mxu0  ;;  %v10153_v51 = vpop.f32.mrb[63].mxu1  ;;  %12604 = vmatpush1.bf16.msra.mxu0 %v17470_v10  ;;  %12631 = vmatpush3.bf16.msra.mxu1 %v17471_v15  ;;  %v17520_v28 = vld [vmem:[#allocation68_spill] sm:$0xff] }
 0xc06   :  { %12606 = vmatprep.subr.bf16.mxu0 %v17508_v16  ;;  %12632 = vmatprep.subr.bf16.mxu1 %v17175_v31  ;;  %v13532_v29 = vadd.f32 %v5251_v44, %v17509_v27  ;;  %v17522_v44 = vld [vmem:[#allocation70_spill] sm:$0xff]  ;;  %v17523_v51 = vld [vmem:[#allocation71_spill] sm:$0xff] }
 0xc07   :  { %v8204_v61 = vmul.f32 -1.442695, %v13531_v56  ;;  %v17521_v56 = vld [vmem:[#allocation69_spill] sm:$0xff] }
 0xc08   :  { %v8205_v54 = vmul.f32 -1.442695, %v13532_v29  ;;  %v17524_v29 = vld [vmem:[#allocation72_spill] sm:$0xff] }
 0xc09   :  { %13793 = vpow2.f32 %v8204_v61  ;;  %12608 = vmatpush1.bf16.msra.mxu0 %v17510_v8  ;;  %12634 = vmatpush3.bf16.msra.mxu1 %v17511_v34 }
 0xc0a   :  { %12610 = vmatprep.subr.bf16.mxu0 %v17512_v17  ;;  %12635 = vmatprep.subr.bf16.mxu1 %v17175_v31  ;;  %13795 = vpow2.f32 %v8205_v54 }
 0xc0d   :  { %12612 = vmatpush1.bf16.msra.mxu0 %v17513_v21  ;;  %12637 = vmatpush3.bf16.msra.mxu1 %v17514_v13 }
 0xc0e   :  { %12614 = vmatprep.subr.bf16.mxu0 %v17515_v36  ;;  %12638 = vmatprep.subr.bf16.mxu1 %v17175_v31 }
 0xc11   :  { %12616 = vmatpush1.bf16.msra.mxu0 %v17516_v48  ;;  %12640 = vmatpush3.bf16.msra.mxu1 %v17517_v20 }
 0xc12   :  { %12642 = vmatprep.subr.bf16.mxu0 %v17518_v18  ;;  %12673 = vmatprep.subr.bf16.mxu1 %v17175_v31 }
 0xc13   :  { %v13794_v3 = vpop.eup %13793 }
 0xc14   :  { %v5332_v50 = vadd.f32 1.0, %v13794_v3  ;;  %5580 = vmatmul.mubr.f32.vlgmr.msra.gmra.mrb[42].mxu0 %v15990_v5  ;;  %10222 = vmatmul.mubr.f32.vlgmr.msra.gmra.mrb[66].mxu1 %v15990_v5  ;;  %v13796_v61 = vpop.eup %13795  ;;  %v17525_v3 = vld [vmem:[#allocation73_spill] sm:$0xff] }
 0xc15   :  { %12644 = vmatpush1.bf16.msra.mxu0 %v17519_v53  ;;  %12675 = vmatpush3.bf16.msra.mxu1 %v17520_v28  ;;  %v5333_v54 = vadd.f32 1.0, %v13796_v61 }
 0xc16   :  { %13797 = vrcp.f32 %v5332_v50  ;;  %12646 = vmatprep.subr.bf16.mxu0 %v17521_v56  ;;  %12676 = vmatprep.subr.bf16.mxu1 %v17175_v31  ;;  %v17526_v50 = vld [vmem:[#allocation74_spill] sm:$0xff]  ;;  %v5338_v56 = vadd.f32 %v5320_v25, %v15906_v35 }
 0xc17   :  { %5720 = vmatprep.mubr.f32.mxu0 %v17156_v47  ;;  %10256 = vmatprep.mubr.msk.f32.mxu1 %vm14064_vm0, %v17156_v47  ;;  %13799 = vrcp.f32 %v5333_v54  ;;  %v17528_v54 = vld [vmem:[#allocation56_spill] sm:$0xff] }
 0xc19   :  { %12648 = vmatpush1.bf16.msra.mxu0 %v17522_v44  ;;  %12678 = vmatpush3.bf16.msra.mxu1 %v17523_v51  ;;  %v5180_v51 = vadd.f32 %v15987_v57, %v15910_v55 }
 0xc1a   :  { %12650 = vmatprep.subr.bf16.mxu0 %v17524_v29  ;;  %12679 = vmatprep.subr.bf16.mxu1 %v17175_v31 }
 0xc1d   :  { %12652 = vmatpush1.bf16.msra.mxu0 %v17525_v3  ;;  %12681 = vmatpush3.bf16.msra.mxu1 %v17526_v50 }
 0xc1e   :  { %12654 = vmatprep.subr.bf16.mxu0 %v17490_v60  ;;  %12682 = vmatprep.subr.bf16.mxu1 %v17175_v31 }
 0xc20   :  { %v13798_v28 = vpop.eup %13797 }
 0xc21   :  { %v5339_v44 = vmul.f32 %v13798_v28, %v5338_v56  ;;  %12656 = vmatpush1.bf16.msra.mxu0 %v17491_v32  ;;  %12684 = vmatpush3.bf16.msra.mxu1 %v17492_v52  ;;  %v13800_v57 = vpop.eup %13799 }
 0xc22   :  { %12658 = vmatprep.subr.bf16.mxu0 %v17493_v63  ;;  %12685 = vmatprep.subr.bf16.mxu1 %v17175_v31  ;;  %v5342_v25 = vsub.f32 1.0, %v13800_v57 }
 0xc23   :  { %v5340_v61 = vadd.f32 %v5339_v44, %v5180_v51  ;;  %v5344_v44 = vmul.f32 %v13800_v57, %v15936_v19  ;;  %v17530_v57 = vld [vmem:[#allocation58_spill] sm:$0xff]  ;;  %v17535_v19 = vld [vmem:[#allocation37_spill] sm:$0xff] }
 0xc25   :  { %13801 = vtanh.f32 %v5340_v61  ;;  %12660 = vmatpush1.bf16.msra.mxu0 %v15758_v24  ;;  %12687 = vmatpush3.bf16.msra.mxu1 %v15760_v1  ;;  %v17529_v61 = vld [vmem:[#allocation57_spill] sm:$0xff] }
 0xc26   :  { %12662 = vmatprep.subr.bf16.mxu0 %v17494_v39  ;;  %12688 = vmatprep.subr.bf16.mxu1 %v17175_v31 }
 0xc29   :  { %12664 = vmatpush1.bf16.msra.mxu0 %v17495_v58  ;;  %12690 = vmatpush3.bf16.msra.mxu1 %v15770_v0 }
 0xc2a   :  { %12666 = vmatprep.subr.bf16.mxu0 %v15774_v59  ;;  %12691 = vmatprep.subr.bf16.mxu1 %v17175_v31  ;;  %v16129_v59 = vld [vmem:[#allocation6 + $0x58] sm:$0xff] }
 0xc2d   :  { %12668 = vmatpush1.bf16.msra.mxu0 %v15778_v14  ;;  %12693 = vmatpush3.bf16.msra.mxu1 %v15780_v62  ;;  %v16125_v14 = vld [vmem:[#allocation2 + $0x310] sm:$0xff] }
 0xc2e   :  { %12670 = vmatprep.subr.bf16.mxu0 %v15784_v43  ;;  %12694 = vmatprep.subr.bf16.mxu1 %v17175_v31 }
 0xc2f   :  { %v13802_v28 = vpop.eup %13801 }
 0xc30   :  { %v5343_v56 = vmul.f32 %v13802_v28, %v5342_v25  ;;  %v17531_v25 = vld [vmem:[#allocation63_spill] sm:$0xff]  ;;  %v17532_v28 = vld [vmem:[#allocation42_spill] sm:$0xff] }
 0xc31   :  { %12672 = vmatpush1.bf16.msra.mxu0 %v15788_v7  ;;  %12696 = vmatpush3.bf16.msra.mxu1 %v15790_v38 }
 0xc32   :  { %v16070_v51 = vadd.f32 %v5344_v44, %v5343_v56  ;;  %12698 = vmatprep.subr.bf16.mxu0 %v15460_v4  ;;  %12729 = vmatprep.subr.bf16.mxu1 %v17175_v31  ;;  %v17533_v56 = vld [vmem:[#allocation44_spill] sm:$0xff]  ;;  %v17534_v44 = vld [vmem:[#allocation41_spill] sm:$0xff] }
 0xc34   :  { %17527 = vst [vmem:[#allocation19_spill] sm:$0xff] %v16070_v51  ;;  %5721 = vmatmul.mubr.f32.vlgmr.msra.gmra.mrb[42].mxu0 %v16070_v51  ;;  %10257 = vmatmul.mubr.f32.vlgmr.msra.gmra.mrb[68].mxu1 %v16070_v51 }
 0xc35   :  { %12700 = vmatpush1.bf16.msra.mxu0 %v15470_v37  ;;  %12731 = vmatpush3.bf16.msra.mxu1 %v15472_v40  ;;  %v16122_v40 = vld [vmem:[#allocation6 + $0x48] sm:$0xff] }
 0xc36   :  { %12702 = vmatprep.subr.bf16.mxu0 %v15476_v30  ;;  %12732 = vmatprep.subr.bf16.mxu1 %v17175_v31 }
 0xc37   :  { %5889 = vmatprep.mubr.f32.mxu0 %v17156_v47  ;;  %10291 = vmatprep.mubr.msk.f32.mxu1 %vm14064_vm0, %v17156_v47 }
 0xc39   :  { %12704 = vmatpush1.bf16.msra.mxu0 %v15482_v46  ;;  %12734 = vmatpush3.bf16.msra.mxu1 %v17528_v54  ;;  %v17536_v54 = vld [vmem:[#allocation40_spill] sm:$0xff]  ;;  %v17538_v46 = vld [vmem:[#allocation65_spill] sm:$0xff] }
 0xc3a   :  { %12706 = vmatprep.subr.bf16.mxu0 %v17529_v61  ;;  %12735 = vmatprep.subr.bf16.mxu1 %v17175_v31  ;;  %v17537_v61 = vld [vmem:[#allocation39_spill] sm:$0xff] }
 0xc3d   :  { %12708 = vmatpush1.bf16.msra.mxu0 %v17530_v57  ;;  %12737 = vmatpush3.bf16.msra.mxu1 %v17531_v25  ;;  %v17539_v25 = vld [vmem:[#allocation66_spill] sm:$0xff] }
 0xc3e   :  { %12710 = vmatprep.subr.bf16.mxu0 %v17532_v28  ;;  %12738 = vmatprep.subr.bf16.mxu1 %v17175_v31  ;;  %v17540_v28 = vld [vmem:[#allocation67_spill] sm:$0xff]  ;;  %v17541_v57 = vld [vmem:[#allocation46_spill] sm:$0xff] }
 0xc41   :  { %12712 = vmatpush1.bf16.msra.mxu0 %v17533_v56  ;;  %12740 = vmatpush3.bf16.msra.mxu1 %v17534_v44  ;;  %v17542_v44 = vld [vmem:[#allocation12_spill] sm:$0xff] }
 0xc42   :  { %12714 = vmatprep.subr.bf16.mxu0 %v17535_v19  ;;  %12741 = vmatprep.subr.bf16.mxu1 %v17175_v31  ;;  %v17543_v19 = vld [vmem:[#allocation13_spill] sm:$0xff]  ;;  %v17544_v56 = vld [vmem:[#allocation28_spill] sm:$0xff] }
 0xc45   :  { %12716 = vmatpush1.bf16.msra.mxu0 %v17536_v54  ;;  %12743 = vmatpush3.bf16.msra.mxu1 %v17537_v61  ;;  %v17545_v61 = vld [vmem:[#allocation14_spill] sm:$0xff]  ;;  %v17547_v54 = vld [vmem:[#allocation29_spill] sm:$0xff] }
 0xc46   :  { %12718 = vmatprep.subr.bf16.mxu0 %v17538_v46  ;;  %12744 = vmatprep.subr.bf16.mxu1 %v17175_v31  ;;  %v17546_v46 = vld [vmem:[#allocation15_spill] sm:$0xff] }
 0xc49   :  { %12720 = vmatpush1.bf16.msra.mxu0 %v17539_v25  ;;  %12746 = vmatpush3.bf16.msra.mxu1 %v17540_v28  ;;  %v16111_v28 = vld [vmem:[#allocation2 + $0x300] sm:$0xff] }
 0xc4a   :  { %12722 = vmatprep.subr.bf16.mxu0 %v17541_v57  ;;  %12747 = vmatprep.subr.bf16.mxu1 %v17175_v31  ;;  %17548 = vst [vmem:[#allocation31_spill] sm:$0xff] %v16111_v28  ;;  %v17549_v57 = vld [vmem:[#allocation64_spill] sm:$0xff] }
 0xc4b   :  { %v5346_v25 = vmul.f32 %v16111_v28, %v17549_v57 }
 0xc4d   :  { %12724 = vmatpush1.bf16.msra.mxu0 %v17542_v44  ;;  %12749 = vmatpush3.bf16.msra.mxu1 %v17543_v19  ;;  %v16115_v44 = vld [vmem:[#allocation2 + $0x308] sm:$0xff]  ;;  %v16119_v19 = vld [vmem:[#allocation6 + $0x40] sm:$0xff] }
 0xc4e   :  { %12726 = vmatprep.subr.bf16.mxu0 %v17544_v56  ;;  %12750 = vmatprep.subr.bf16.mxu1 %v17175_v31  ;;  %17550 = vst [vmem:[#allocation20_spill] sm:$0xff] %v16115_v44  ;;  %v5347_v56 = vmul.f32 %v16115_v44, %v17549_v57  ;;  %17551 = vst [vmem:[#allocation48_spill] sm:$0xff] %v16119_v19 }
 0xc51   :  { %12728 = vmatpush1.bf16.msra.mxu0 %v17545_v61  ;;  %12752 = vmatpush3.bf16.msra.mxu1 %v17546_v46  ;;  %v5349_v61 = vadd.f32 %v16119_v19, %v5346_v25  ;;  %v5348_v25 = vmul.f32 %v16125_v14, %v17549_v57 }
 0xc52   :  { %12754 = vmatprep.subr.bf16.mxu0 %v17547_v54  ;;  %12785 = vmatprep.subr.bf16.mxu1 %v17175_v31  ;;  %v5350_v54 = vadd.f32 %v16122_v40, %v5347_v56 }
 0xcc7   :  { %v5418_v30 = vpop.f32.mrb[40].mxu0  ;;  %v5489_v46 = vpop.f32.mrb[64].mxu1 }
 0xcc8   :  { %v5493_v37 = vadd.f32 %v5418_v30, %v5349_v61  ;;  %v5420_v4 = vpop.f32.mrb[41].mxu0  ;;  %v10188_v38 = vpop.f32.mrb[65].mxu1  ;;  %v5507_v30 = vadd.f32 %v16129_v59, %v5489_v46 }
 0xcc9   :  { %v5494_v7 = vadd.f32 %v5420_v4, %v5350_v54  ;;  %v16132_v4 = vld [vmem:[#allocation6 + $0x50] sm:$0xff] }
 0xcca   :  { %v8206_v28 = vmul.f32 -1.442695, %v5493_v37  ;;  %v5351_v37 = vadd.f32 %v16132_v4, %v5348_v25 }
 0xccb   :  { %v8207_v51 = vmul.f32 -1.442695, %v5494_v7 }
 0xccc   :  { %13803 = vpow2.f32 %v8206_v28 }
 0xccd   :  { %13805 = vpow2.f32 %v8207_v51 }
 0xcd6   :  { %v13804_v43 = vpop.eup %13803 }
 0xcd7   :  { %v5501_v44 = vadd.f32 1.0, %v13804_v43  ;;  %v13806_v62 = vpop.eup %13805 }
 0xcd8   :  { %v5502_v19 = vadd.f32 1.0, %v13806_v62 }
 0xcd9   :  { %13807 = vrcp.f32 %v5501_v44 }
 0xcda   :  { %13809 = vrcp.f32 %v5502_v19 }
 0xce3   :  { %v13808_v38 = vpop.eup %13807 }
 0xce4   :  { %v5508_v7 = vmul.f32 %v13808_v38, %v5507_v30  ;;  %v13810_v61 = vpop.eup %13809 }
 0xce5   :  { %v5511_v28 = vsub.f32 1.0, %v13810_v61  ;;  %v5513_v56 = vmul.f32 %v13810_v61, %v15990_v5  ;;  %v17554_v61 = vld [vmem:[#allocation70_spill] sm:$0xff] }
 0xce6   :  { %v5509_v43 = vadd.f32 %v5508_v7, %v5351_v37 }
 0xce7   :  { %v16135_v51 = vpop.f32.mrb[66].mxu1 }
 0xce8   :  { %13811 = vtanh.f32 %v5509_v43  ;;  %v10223_v54 = vpop.f32.mrb[67].mxu1  ;;  %v17552_v43 = vld [vmem:[#allocation68_spill] sm:$0xff] }
 0xce9   :  { %v17553_v54 = vld [vmem:[#allocation69_spill] sm:$0xff] }
 0xcf2   :  { %v13812_v57 = vpop.eup %13811 }
 0xcf3   :  { %v5512_v62 = vmul.f32 %v13812_v57, %v5511_v28  ;;  %v17555_v28 = vld [vmem:[#allocation71_spill] sm:$0xff] }
 0xcf5   :  { %v16138_v44 = vadd.f32 %v5513_v56, %v5512_v62 }
 0xcf7   :  { %5890 = vmatmul.mubr.f32.vlgmr.msra.gmra.mrb[44].mxu0 %v16138_v44  ;;  %10292 = vmatmul.mubr.f32.vlgmr.msra.gmra.mrb[70].mxu1 %v16138_v44 }
 0xcf8   :  { %12756 = vmatpush1.bf16.msra.mxu0 %v15628_v41  ;;  %12787 = vmatpush3.bf16.msra.mxu1 %v15630_v22 }
 0xcf9   :  { %12758 = vmatprep.subr.bf16.mxu0 %v15634_v9  ;;  %12788 = vmatprep.subr.bf16.mxu1 %v17175_v31 }
 0xcfa   :  { %6052 = vmatprep.mubr.f32.mxu0 %v17156_v47  ;;  %10326 = vmatprep.mubr.msk.f32.mxu1 %vm14064_vm0, %v17156_v47 }
 0xcfc   :  { %12760 = vmatpush1.bf16.msra.mxu0 %v15640_v45  ;;  %12790 = vmatpush3.bf16.msra.mxu1 %v15642_v23 }
 0xcfd   :  { %12762 = vmatprep.subr.bf16.mxu0 %v15646_v6  ;;  %12791 = vmatprep.subr.bf16.mxu1 %v17175_v31 }
 0xd00   :  { %12764 = vmatpush1.bf16.msra.mxu0 %v15653_v2  ;;  %12793 = vmatpush3.bf16.msra.mxu1 %v15655_v12 }
 0xd01   :  { %12766 = vmatprep.subr.bf16.mxu0 %v15659_v42  ;;  %12794 = vmatprep.subr.bf16.mxu1 %v17175_v31 }
 0xd04   :  { %12768 = vmatpush1.bf16.msra.mxu0 %v15663_v49  ;;  %12796 = vmatpush3.bf16.msra.mxu1 %v17467_v26 }
 0xd05   :  { %12770 = vmatprep.subr.bf16.mxu0 %v17468_v33  ;;  %12797 = vmatprep.subr.bf16.mxu1 %v17175_v31 }
 0xd07   :  { %v5722_v46 = vpop.f32.mrb[42].mxu0  ;;  %v5793_v19 = vpop.f32.mrb[68].mxu1 }
 0xd08   :  { %v13533_v5 = vadd.f32 %v5722_v46, %v15869_v11  ;;  %v5724_v25 = vpop.f32.mrb[43].mxu0  ;;  %v10258_v30 = vpop.f32.mrb[69].mxu1  ;;  %12772 = vmatpush1.bf16.msra.mxu0 %v17470_v10  ;;  %12799 = vmatpush3.bf16.msra.mxu1 %v17471_v15  ;;  %v5811_v56 = vadd.f32 %v5793_v19, %v15906_v35  ;;  %v17556_v35 = vld [vmem:[#allocation78_spill] sm:$0xff]  ;;  %v17558_v19 = vld [vmem:[#allocation80_spill] sm:$0xff] }
 0xd09   :  { %12774 = vmatprep.subr.bf16.mxu0 %v17508_v16  ;;  %12800 = vmatprep.subr.bf16.mxu1 %v17175_v31  ;;  %v13534_v37 = vadd.f32 %v5724_v25, %v17509_v27 }
 0xd0a   :  { %v8208_v38 = vmul.f32 -1.442695, %v13533_v5  ;;  %v5653_v5 = vadd.f32 %v16135_v51, %v15910_v55  ;;  %v17557_v51 = vld [vmem:[#allocation79_spill] sm:$0xff] }
 0xd0b   :  { %v8209_v11 = vmul.f32 -1.442695, %v13534_v37 }
 0xd0c   :  { %13813 = vpow2.f32 %v8208_v38  ;;  %12776 = vmatpush1.bf16.msra.mxu0 %v17510_v8  ;;  %12802 = vmatpush3.bf16.msra.mxu1 %v17511_v34  ;;  %v17559_v38 = vld [vmem:[#allocation81_spill] sm:$0xff] }
 0xd0d   :  { %12778 = vmatprep.subr.bf16.mxu0 %v17512_v17  ;;  %12803 = vmatprep.subr.bf16.mxu1 %v17175_v31  ;;  %13815 = vpow2.f32 %v8209_v11 }
 0xd10   :  { %12780 = vmatpush1.bf16.msra.mxu0 %v17513_v21  ;;  %12805 = vmatpush3.bf16.msra.mxu1 %v17514_v13 }
 0xd11   :  { %12782 = vmatprep.subr.bf16.mxu0 %v17515_v36  ;;  %12806 = vmatprep.subr.bf16.mxu1 %v17175_v31 }
 0xd14   :  { %12784 = vmatpush1.bf16.msra.mxu0 %v17516_v48  ;;  %12808 = vmatpush3.bf16.msra.mxu1 %v17517_v20 }
 0xd15   :  { %12810 = vmatprep.subr.bf16.mxu0 %v17518_v18  ;;  %12841 = vmatprep.subr.bf16.mxu1 %v17175_v31 }
 0xd16   :  { %v13814_v27 = vpop.eup %13813 }
 0xd17   :  { %v5805_v7 = vadd.f32 1.0, %v13814_v27  ;;  %6053 = vmatmul.mubr.f32.vlgmr.msra.gmra.mrb[46].mxu0 %v16138_v44  ;;  %10327 = vmatmul.mubr.f32.vlgmr.msra.gmra.mrb[72].mxu1 %v16138_v44  ;;  %v13816_v57 = vpop.eup %13815 }
 0xd18   :  { %12812 = vmatpush1.bf16.msra.mxu0 %v17519_v53  ;;  %12843 = vmatpush3.bf16.msra.mxu1 %v17552_v43  ;;  %v5806_v62 = vadd.f32 1.0, %v13816_v57 }
 0xd19   :  { %13817 = vrcp.f32 %v5805_v7  ;;  %12814 = vmatprep.subr.bf16.mxu0 %v17553_v54  ;;  %12844 = vmatprep.subr.bf16.mxu1 %v17175_v31  ;;  %v17560_v7 = vld [vmem:[#allocation19_spill] sm:$0xff] }
 0xd1a   :  { %6193 = vmatprep.mubr.f32.mxu0 %v17156_v47  ;;  %10361 = vmatprep.mubr.msk.f32.mxu1 %vm14064_vm0, %v17156_v47  ;;  %13819 = vrcp.f32 %v5806_v62  ;;  %v17561_v62 = vld [vmem:[#allocation82_spill] sm:$0xff] }
 0xd1c   :  { %12816 = vmatpush1.bf16.msra.mxu0 %v17554_v61  ;;  %12846 = vmatpush3.bf16.msra.mxu1 %v17555_v28 }
 0xd1d   :  { %12818 = vmatprep.subr.bf16.mxu0 %v17524_v29  ;;  %12847 = vmatprep.subr.bf16.mxu1 %v17175_v31 }
 0xd20   :  { %12820 = vmatpush1.bf16.msra.mxu0 %v17525_v3  ;;  %12849 = vmatpush3.bf16.msra.mxu1 %v17526_v50 }
 0xd21   :  { %12822 = vmatprep.subr.bf16.mxu0 %v17490_v60  ;;  %12850 = vmatprep.subr.bf16.mxu1 %v17175_v31 }
 0xd23   :  { %v13818_v46 = vpop.eup %13817 }
 0xd24   :  { %v5812_v25 = vmul.f32 %v13818_v46, %v5811_v56  ;;  %12824 = vmatpush1.bf16.msra.mxu0 %v17491_v32  ;;  %12852 = vmatpush3.bf16.msra.mxu1 %v17492_v52  ;;  %v13820_v55 = vpop.eup %13819  ;;  %v17562_v56 = vld [vmem:[#allocation83_spill] sm:$0xff] }
 0xd25   :  { %12826 = vmatprep.subr.bf16.mxu0 %v17493_v63  ;;  %12853 = vmatprep.subr.bf16.mxu1 %v17175_v31  ;;  %v5815_v37 = vsub.f32 1.0, %v13820_v55  ;;  %v5817_v57 = vmul.f32 %v13820_v55, %v17560_v7  ;;  %v17568_v55 = vld [vmem:[#allocation55_spill] sm:$0xff] }
 0xd26   :  { %v5813_v30 = vadd.f32 %v5812_v25, %v5653_v5  ;;  %v17564_v5 = vld [vmem:[#allocation62_spill] sm:$0xff]  ;;  %v17565_v25 = vld [vmem:[#allocation43_spill] sm:$0xff] }
 0xd27   :  { %v17572_v7 = vld [vmem:[#allocation63_spill] sm:$0xff] }
 0xd28   :  { %13821 = vtanh.f32 %v5813_v30  ;;  %12828 = vmatpush1.bf16.msra.mxu0 %v15758_v24  ;;  %12855 = vmatpush3.bf16.msra.mxu1 %v15760_v1  ;;  %v17566_v30 = vld [vmem:[#allocation53_spill] sm:$0xff] }
 0xd29   :  { %12830 = vmatprep.subr.bf16.mxu0 %v17494_v39  ;;  %12856 = vmatprep.subr.bf16.mxu1 %v17175_v31 }
 0xd2c   :  { %12832 = vmatpush1.bf16.msra.mxu0 %v17495_v58  ;;  %12858 = vmatpush3.bf16.msra.mxu1 %v15770_v0 }
 0xd2d   :  { %12834 = vmatprep.subr.bf16.mxu0 %v17556_v35  ;;  %12859 = vmatprep.subr.bf16.mxu1 %v17175_v31 }
 0xd30   :  { %12836 = vmatpush1.bf16.msra.mxu0 %v17557_v51  ;;  %12861 = vmatpush3.bf16.msra.mxu1 %v17558_v19 }
 0xd31   :  { %12838 = vmatprep.subr.bf16.mxu0 %v17559_v38  ;;  %12862 = vmatprep.subr.bf16.mxu1 %v17175_v31 }
 0xd32   :  { %v13822_v11 = vpop.eup %13821 }
 0xd33   :  { %v5816_v27 = vmul.f32 %v13822_v11, %v5815_v37  ;;  %v17567_v37 = vld [vmem:[#allocation54_spill] sm:$0xff]  ;;  %v17569_v11 = vld [vmem:[#allocation56_spill] sm:$0xff] }
 0xd34   :  { %12840 = vmatpush1.bf16.msra.mxu0 %v17561_v62  ;;  %12864 = vmatpush3.bf16.msra.mxu1 %v17562_v56  ;;  %v17591_v56 = vld [vmem:[#allocation20_spill] sm:$0xff] }
 0xd35   :  { %v16218_v46 = vadd.f32 %v5817_v57, %v5816_v27  ;;  %12866 = vmatprep.subr.bf16.mxu0 %v17564_v5  ;;  %12897 = vmatprep.subr.bf16.mxu1 %v17175_v31  ;;  %v17570_v27 = vld [vmem:[#allocation57_spill] sm:$0xff]  ;;  %v17571_v57 = vld [vmem:[#allocation58_spill] sm:$0xff]  ;;  %v17592_v62 = vld [vmem:[#allocation48_spill] sm:$0xff] }
 0xd36   :  { %v17576_v5 = vld [vmem:[#allocation37_spill] sm:$0xff] }
 0xd37   :  { %17563 = vst [vmem:[#allocation75_spill] sm:$0xff] %v16218_v46  ;;  %6194 = vmatmul.mubr.f32.vlgmr.msra.gmra.mrb[46].mxu0 %v16218_v46  ;;  %10362 = vmatmul.mubr.f32.vlgmr.msra.gmra.mrb[74].mxu1 %v16218_v46 }
 0xd38   :  { %12868 = vmatpush1.bf16.msra.mxu0 %v17565_v25  ;;  %12899 = vmatpush3.bf16.msra.mxu1 %v17566_v30  ;;  %v17574_v30 = vld [vmem:[#allocation44_spill] sm:$0xff]  ;;  %v17575_v25 = vld [vmem:[#allocation41_spill] sm:$0xff] }
 0xd39   :  { %12870 = vmatprep.subr.bf16.mxu0 %v17567_v37  ;;  %12900 = vmatprep.subr.bf16.mxu1 %v17175_v31  ;;  %v17573_v37 = vld [vmem:[#allocation42_spill] sm:$0xff] }
 0xd3a   :  { %6362 = vmatprep.mubr.f32.mxu0 %v17156_v47  ;;  %10396 = vmatprep.mubr.msk.f32.mxu1 %vm14064_vm0, %v17156_v47 }
 0xd3c   :  { %12872 = vmatpush1.bf16.msra.mxu0 %v17568_v55  ;;  %12902 = vmatpush3.bf16.msra.mxu1 %v17569_v11  ;;  %v17577_v11 = vld [vmem:[#allocation40_spill] sm:$0xff]  ;;  %v17579_v55 = vld [vmem:[#allocation65_spill] sm:$0xff] }
 0xd3d   :  { %12874 = vmatprep.subr.bf16.mxu0 %v17570_v27  ;;  %12903 = vmatprep.subr.bf16.mxu1 %v17175_v31  ;;  %v17578_v27 = vld [vmem:[#allocation39_spill] sm:$0xff] }
 0xd40   :  { %12876 = vmatpush1.bf16.msra.mxu0 %v17571_v57  ;;  %12905 = vmatpush3.bf16.msra.mxu1 %v17572_v7  ;;  %v17580_v7 = vld [vmem:[#allocation66_spill] sm:$0xff] }
 0xd41   :  { %12878 = vmatprep.subr.bf16.mxu0 %v17573_v37  ;;  %12906 = vmatprep.subr.bf16.mxu1 %v17175_v31  ;;  %v17581_v37 = vld [vmem:[#allocation67_spill] sm:$0xff]  ;;  %v17582_v57 = vld [vmem:[#allocation46_spill] sm:$0xff] }
 0xd44   :  { %12880 = vmatpush1.bf16.msra.mxu0 %v17574_v30  ;;  %12908 = vmatpush3.bf16.msra.mxu1 %v17575_v25  ;;  %v17583_v25 = vld [vmem:[#allocation12_spill] sm:$0xff] }
 0xd45   :  { %12882 = vmatprep.subr.bf16.mxu0 %v17576_v5  ;;  %12909 = vmatprep.subr.bf16.mxu1 %v17175_v31  ;;  %v17584_v5 = vld [vmem:[#allocation13_spill] sm:$0xff]  ;;  %v17585_v30 = vld [vmem:[#allocation28_spill] sm:$0xff] }
 0xd48   :  { %12884 = vmatpush1.bf16.msra.mxu0 %v17577_v11  ;;  %12911 = vmatpush3.bf16.msra.mxu1 %v17578_v27  ;;  %v17586_v27 = vld [vmem:[#allocation14_spill] sm:$0xff]  ;;  %v17588_v11 = vld [vmem:[#allocation29_spill] sm:$0xff] }
 0xd49   :  { %12886 = vmatprep.subr.bf16.mxu0 %v17579_v55  ;;  %12912 = vmatprep.subr.bf16.mxu1 %v17175_v31  ;;  %v17587_v55 = vld [vmem:[#allocation15_spill] sm:$0xff] }
 0xd4c   :  { %12888 = vmatpush1.bf16.msra.mxu0 %v17580_v7  ;;  %12914 = vmatpush3.bf16.msra.mxu1 %v17581_v37  ;;  %v17589_v37 = vld [vmem:[#allocation45_spill] sm:$0xff] }
 0xd4d   :  { %12890 = vmatprep.subr.bf16.mxu0 %v17582_v57  ;;  %12915 = vmatprep.subr.bf16.mxu1 %v17175_v31  ;;  %v17590_v57 = vld [vmem:[#allocation31_spill] sm:$0xff] }
 0xd4e   :  { %v5819_v7 = vmul.f32 %v17590_v57, %v17589_v37 }
 0xd50   :  { %12892 = vmatpush1.bf16.msra.mxu0 %v17583_v25  ;;  %12917 = vmatpush3.bf16.msra.mxu1 %v17584_v5  ;;  %v5820_v25 = vmul.f32 %v17591_v56, %v17589_v37  ;;  %v5822_v5 = vadd.f32 %v17592_v62, %v5819_v7  ;;  %v5821_v56 = vmul.f32 %v16125_v14, %v17589_v37 }
 0xd51   :  { %12894 = vmatprep.subr.bf16.mxu0 %v17585_v30  ;;  %12918 = vmatprep.subr.bf16.mxu1 %v17175_v31 }
 0xd52   :  { %v5823_v38 = vadd.f32 %v16122_v40, %v5820_v25 }
 0xd54   :  { %12896 = vmatpush1.bf16.msra.mxu0 %v17586_v27  ;;  %12920 = vmatpush3.bf16.msra.mxu1 %v17587_v55 }
 0xd55   :  { %12922 = vmatprep.subr.bf16.mxu0 %v17588_v11  ;;  %12953 = vmatprep.subr.bf16.mxu1 %v17175_v31 }
 0xdca   :  { %v5891_v46 = vpop.f32.mrb[44].mxu0  ;;  %v5962_v30 = vpop.f32.mrb[70].mxu1 }
 0xdcb   :  { %v5966_v19 = vadd.f32 %v5891_v46, %v5822_v5  ;;  %v5893_v27 = vpop.f32.mrb[45].mxu0  ;;  %v10293_v51 = vpop.f32.mrb[71].mxu1  ;;  %v5980_v62 = vadd.f32 %v16129_v59, %v5962_v30  ;;  %v5824_v46 = vadd.f32 %v16132_v4, %v5821_v56 }
 0xdcc   :  { %v5967_v55 = vadd.f32 %v5893_v27, %v5823_v38 }
 0xdcd   :  { %v8210_v35 = vmul.f32 -1.442695, %v5966_v19 }
 0xdce   :  { %v8211_v11 = vmul.f32 -1.442695, %v5967_v55 }
 0xdcf   :  { %13823 = vpow2.f32 %v8210_v35 }
 0xdd0   :  { %13825 = vpow2.f32 %v8211_v11 }
 0xdd9   :  { %v13824_v0 = vpop.eup %13823 }
 0xdda   :  { %v5974_v58 = vadd.f32 1.0, %v13824_v0  ;;  %v13826_v57 = vpop.eup %13825 }
 0xddb   :  { %v5975_v7 = vadd.f32 1.0, %v13826_v57  ;;  %v16302_v57 = vld [vmem:[#allocation6 + $0x68] sm:$0xff] }
 0xddc   :  { %13827 = vrcp.f32 %v5974_v58 }
 0xddd   :  { %13829 = vrcp.f32 %v5975_v7 }
 0xde6   :  { %v13828_v39 = vpop.eup %13827 }
 0xde7   :  { %v5981_v5 = vmul.f32 %v13828_v39, %v5980_v62  ;;  %v13830_v38 = vpop.eup %13829  ;;  %v16295_v62 = vld [vmem:[#allocation6 + $0x60] sm:$0xff] }
 0xde8   :  { %v5984_v0 = vsub.f32 1.0, %v13830_v38  ;;  %v5986_v55 = vmul.f32 %v13830_v38, %v16138_v44 }
 0xde9   :  { %v5982_v51 = vadd.f32 %v5981_v5, %v5824_v46 }
 0xdea   :  { %v16269_v19 = vpop.f32.mrb[72].mxu1 }
 0xdeb   :  { %13831 = vtanh.f32 %v5982_v51  ;;  %v10328_v35 = vpop.f32.mrb[73].mxu1 }
 0xdf5   :  { %v13832_v58 = vpop.eup %13831 }
 0xdf6   :  { %v5985_v25 = vmul.f32 %v13832_v58, %v5984_v0  ;;  %v16334_v0 = vld [vmem:[#allocation6 + $0x78] sm:$0xff] }
 0xdf8   :  { %v16272_v37 = vadd.f32 %v5986_v55, %v5985_v25  ;;  %v16337_v55 = vld [vmem:[#allocation6 + $0x70] sm:$0xff] }
 0xdfa   :  { %6363 = vmatmul.mubr.f32.vlgmr.msra.gmra.mrb[48].mxu0 %v16272_v37  ;;  %10397 = vmatmul.mubr.f32.vlgmr.msra.gmra.mrb[76].mxu1 %v16272_v37 }
 0xdfb   :  { %12924 = vmatpush1.bf16.msra.mxu0 %v15628_v41  ;;  %12955 = vmatpush3.bf16.msra.mxu1 %v15630_v22 }
 0xdfc   :  { %12926 = vmatprep.subr.bf16.mxu0 %v15634_v9  ;;  %12956 = vmatprep.subr.bf16.mxu1 %v17175_v31 }
 0xdfd   :  { %6525 = vmatprep.mubr.f32.mxu0 %v17156_v47  ;;  %10431 = vmatprep.mubr.msk.f32.mxu1 %vm14064_vm0, %v17156_v47 }
 0xdff   :  { %12928 = vmatpush1.bf16.msra.mxu0 %v15640_v45  ;;  %12958 = vmatpush3.bf16.msra.mxu1 %v15642_v23 }
 0xe00   :  { %12930 = vmatprep.subr.bf16.mxu0 %v15646_v6  ;;  %12959 = vmatprep.subr.bf16.mxu1 %v17175_v31 }
 0xe03   :  { %12932 = vmatpush1.bf16.msra.mxu0 %v15653_v2  ;;  %12961 = vmatpush3.bf16.msra.mxu1 %v15655_v12 }
 0xe04   :  { %12934 = vmatprep.subr.bf16.mxu0 %v15659_v42  ;;  %12962 = vmatprep.subr.bf16.mxu1 %v17175_v31 }
 0xe07   :  { %12936 = vmatpush1.bf16.msra.mxu0 %v15663_v49  ;;  %12964 = vmatpush3.bf16.msra.mxu1 %v17467_v26 }
 0xe08   :  { %12938 = vmatprep.subr.bf16.mxu0 %v17468_v33  ;;  %12965 = vmatprep.subr.bf16.mxu1 %v17175_v31 }
 0xe0a   :  { %v6195_v39 = vpop.f32.mrb[46].mxu0  ;;  %v6266_v44 = vpop.f32.mrb[74].mxu1 }
 0xe0b   :  { %v13535_v56 = vadd.f32 %v16295_v62, %v6195_v39  ;;  %v6197_v30 = vpop.f32.mrb[47].mxu0  ;;  %v10363_v11 = vpop.f32.mrb[75].mxu1  ;;  %12940 = vmatpush1.bf16.msra.mxu0 %v17470_v10  ;;  %12967 = vmatpush3.bf16.msra.mxu1 %v17471_v15  ;;  %v6284_v58 = vadd.f32 %v16334_v0, %v6266_v44  ;;  %v6126_v39 = vadd.f32 %v16337_v55, %v16269_v19  ;;  %v17593_v44 = vld [vmem:[#allocation52_spill] sm:$0xff]  ;;  %v17594_v19 = vld [vmem:[#allocation59_spill] sm:$0xff] }
 0xe0c   :  { %12942 = vmatprep.subr.bf16.mxu0 %v17508_v16  ;;  %12968 = vmatprep.subr.bf16.mxu1 %v17175_v31  ;;  %v13536_v7 = vadd.f32 %v16302_v57, %v6197_v30  ;;  %v17595_v11 = vld [vmem:[#allocation38_spill] sm:$0xff] }
 0xe0d   :  { %v8212_v27 = vmul.f32 -1.442695, %v13535_v56 }
 0xe0e   :  { %v8213_v46 = vmul.f32 -1.442695, %v13536_v7 }
 0xe0f   :  { %13833 = vpow2.f32 %v8212_v27  ;;  %12944 = vmatpush1.bf16.msra.mxu0 %v17510_v8  ;;  %12970 = vmatpush3.bf16.msra.mxu1 %v17511_v34  ;;  %v17596_v27 = vld [vmem:[#allocation78_spill] sm:$0xff] }
 0xe10   :  { %12946 = vmatprep.subr.bf16.mxu0 %v17512_v17  ;;  %12971 = vmatprep.subr.bf16.mxu1 %v17175_v31  ;;  %13835 = vpow2.f32 %v8213_v46  ;;  %v17597_v46 = vld [vmem:[#allocation79_spill] sm:$0xff] }
 0xe13   :  { %12948 = vmatpush1.bf16.msra.mxu0 %v17513_v21  ;;  %12973 = vmatpush3.bf16.msra.mxu1 %v17514_v13 }
 0xe14   :  { %12950 = vmatprep.subr.bf16.mxu0 %v17515_v36  ;;  %12974 = vmatprep.subr.bf16.mxu1 %v17175_v31 }
 0xe17   :  { %12952 = vmatpush1.bf16.msra.mxu0 %v17516_v48  ;;  %12976 = vmatpush3.bf16.msra.mxu1 %v17517_v20 }
 0xe18   :  { %12978 = vmatprep.subr.bf16.mxu0 %v17518_v18  ;;  %13009 = vmatprep.subr.bf16.mxu1 %v17175_v31 }
 0xe19   :  { %v13834_v5 = vpop.eup %13833 }
 0xe1a   :  { %v6278_v51 = vadd.f32 1.0, %v13834_v5  ;;  %6526 = vmatmul.mubr.f32.vlgmr.msra.gmra.mrb[50].mxu0 %v16272_v37  ;;  %10432 = vmatmul.mubr.f32.vlgmr.msra.gmra.mrb[78].mxu1 %v16272_v37  ;;  %v13836_v35 = vpop.eup %13835  ;;  %v17598_v5 = vld [vmem:[#allocation80_spill] sm:$0xff] }
 0xe1b   :  { %12980 = vmatpush1.bf16.msra.mxu0 %v17519_v53  ;;  %13011 = vmatpush3.bf16.msra.mxu1 %v17552_v43  ;;  %v6279_v38 = vadd.f32 1.0, %v13836_v35 }
 0xe1c   :  { %13837 = vrcp.f32 %v6278_v51  ;;  %12982 = vmatprep.subr.bf16.mxu0 %v17553_v54  ;;  %13012 = vmatprep.subr.bf16.mxu1 %v17175_v31  ;;  %v17599_v51 = vld [vmem:[#allocation81_spill] sm:$0xff] }
 0xe1d   :  { %6666 = vmatprep.mubr.f32.mxu0 %v17156_v47  ;;  %10466 = vmatprep.mubr.msk.f32.mxu1 %vm14064_vm0, %v17156_v47  ;;  %13839 = vrcp.f32 %v6279_v38 }
 0xe1f   :  { %12984 = vmatpush1.bf16.msra.mxu0 %v17554_v61  ;;  %13014 = vmatpush3.bf16.msra.mxu1 %v17555_v28 }
 0xe20   :  { %12986 = vmatprep.subr.bf16.mxu0 %v17524_v29  ;;  %13015 = vmatprep.subr.bf16.mxu1 %v17175_v31 }
 0xe23   :  { %12988 = vmatpush1.bf16.msra.mxu0 %v17525_v3  ;;  %13017 = vmatpush3.bf16.msra.mxu1 %v17526_v50 }
 0xe24   :  { %12990 = vmatprep.subr.bf16.mxu0 %v17490_v60  ;;  %13018 = vmatprep.subr.bf16.mxu1 %v17175_v31 }
 0xe26   :  { %v13838_v25 = vpop.eup %13837 }
 0xe27   :  { %v6285_v56 = vmul.f32 %v13838_v25, %v6284_v58  ;;  %12992 = vmatpush1.bf16.msra.mxu0 %v17491_v32  ;;  %13020 = vmatpush3.bf16.msra.mxu1 %v17492_v52  ;;  %v13840_v7 = vpop.eup %13839  ;;  %v17600_v25 = vld [vmem:[#allocation75_spill] sm:$0xff] }
 0xe28   :  { %12994 = vmatprep.subr.bf16.mxu0 %v17493_v63  ;;  %13021 = vmatprep.subr.bf16.mxu1 %v17175_v31  ;;  %v6288_v35 = vsub.f32 1.0, %v13840_v7 }
 0xe29   :  { %v6286_v30 = vadd.f32 %v6285_v56, %v6126_v39  ;;  %v6290_v39 = vmul.f32 %v13840_v7, %v17600_v25  ;;  %v17601_v56 = vld [vmem:[#allocation82_spill] sm:$0xff]  ;;  %v17608_v7 = vld [vmem:[#allocation55_spill] sm:$0xff] }
 0xe2a   :  { %v17612_v25 = vld [vmem:[#allocation63_spill] sm:$0xff] }
 0xe2b   :  { %13841 = vtanh.f32 %v6286_v30  ;;  %12996 = vmatpush1.bf16.msra.mxu0 %v15758_v24  ;;  %13023 = vmatpush3.bf16.msra.mxu1 %v15760_v1  ;;  %v17602_v30 = vld [vmem:[#allocation83_spill] sm:$0xff] }
 0xe2c   :  { %12998 = vmatprep.subr.bf16.mxu0 %v17593_v44  ;;  %13024 = vmatprep.subr.bf16.mxu1 %v17175_v31 }
 0xe2f   :  { %13000 = vmatpush1.bf16.msra.mxu0 %v17594_v19  ;;  %13026 = vmatpush3.bf16.msra.mxu1 %v17595_v11  ;;  %v17604_v11 = vld [vmem:[#allocation62_spill] sm:$0xff] }
 0xe30   :  { %13002 = vmatprep.subr.bf16.mxu0 %v17596_v27  ;;  %13027 = vmatprep.subr.bf16.mxu1 %v17175_v31 }
 0xe33   :  { %13004 = vmatpush1.bf16.msra.mxu0 %v17597_v46  ;;  %13029 = vmatpush3.bf16.msra.mxu1 %v17598_v5  ;;  %v17606_v5 = vld [vmem:[#allocation53_spill] sm:$0xff] }
 0xe34   :  { %13006 = vmatprep.subr.bf16.mxu0 %v17599_v51  ;;  %13030 = vmatprep.subr.bf16.mxu1 %v17175_v31  ;;  %v17605_v51 = vld [vmem:[#allocation43_spill] sm:$0xff] }
 0xe35   :  { %v13842_v38 = vpop.eup %13841 }
 0xe36   :  { %v6289_v58 = vmul.f32 %v13842_v38, %v6288_v35  ;;  %v17607_v35 = vld [vmem:[#allocation54_spill] sm:$0xff]  ;;  %v17609_v38 = vld [vmem:[#allocation56_spill] sm:$0xff] }
 0xe37   :  { %13008 = vmatpush1.bf16.msra.mxu0 %v17601_v56  ;;  %13032 = vmatpush3.bf16.msra.mxu1 %v17602_v30  ;;  %v17631_v30 = vld [vmem:[#allocation20_spill] sm:$0xff] }
 0xe38   :  { %v16360_v27 = vadd.f32 %v6290_v39, %v6289_v58  ;;  %13034 = vmatprep.subr.bf16.mxu0 %v17604_v11  ;;  %13065 = vmatprep.subr.bf16.mxu1 %v17175_v31  ;;  %v17610_v58 = vld [vmem:[#allocation57_spill] sm:$0xff]  ;;  %v17611_v39 = vld [vmem:[#allocation58_spill] sm:$0xff]  ;;  %v17632_v56 = vld [vmem:[#allocation48_spill] sm:$0xff] }
 0xe39   :  { %v17616_v11 = vld [vmem:[#allocation37_spill] sm:$0xff] }
 0xe3a   :  { %17603 = vst [vmem:[#allocation60_spill] sm:$0xff] %v16360_v27  ;;  %6667 = vmatmul.mubr.f32.vlgmr.msra.gmra.mrb[50].mxu0 %v16360_v27  ;;  %10467 = vmatmul.mubr.f32.vlgmr.msra.gmra.mrb[80].mxu1 %v16360_v27 }
 0xe3b   :  { %13036 = vmatpush1.bf16.msra.mxu0 %v17605_v51  ;;  %13067 = vmatpush3.bf16.msra.mxu1 %v17606_v5  ;;  %v17614_v5 = vld [vmem:[#allocation44_spill] sm:$0xff]  ;;  %v17615_v51 = vld [vmem:[#allocation41_spill] sm:$0xff] }
 0xe3c   :  { %13038 = vmatprep.subr.bf16.mxu0 %v17607_v35  ;;  %13068 = vmatprep.subr.bf16.mxu1 %v17175_v31  ;;  %v17613_v35 = vld [vmem:[#allocation42_spill] sm:$0xff] }
 0xe3d   :  { %6835 = vmatprep.mubr.f32.mxu0 %v17156_v47  ;;  %10501 = vmatprep.mubr.msk.f32.mxu1 %vm14064_vm0, %v17156_v47 }
 0xe3f   :  { %13040 = vmatpush1.bf16.msra.mxu0 %v17608_v7  ;;  %13070 = vmatpush3.bf16.msra.mxu1 %v17609_v38  ;;  %v17617_v38 = vld [vmem:[#allocation40_spill] sm:$0xff]  ;;  %v17619_v7 = vld [vmem:[#allocation65_spill] sm:$0xff] }
 0xe40   :  { %13042 = vmatprep.subr.bf16.mxu0 %v17610_v58  ;;  %13071 = vmatprep.subr.bf16.mxu1 %v17175_v31  ;;  %v17618_v58 = vld [vmem:[#allocation39_spill] sm:$0xff] }
 0xe43   :  { %13044 = vmatpush1.bf16.msra.mxu0 %v17611_v39  ;;  %13073 = vmatpush3.bf16.msra.mxu1 %v17612_v25  ;;  %v17620_v25 = vld [vmem:[#allocation66_spill] sm:$0xff] }
 0xe44   :  { %13046 = vmatprep.subr.bf16.mxu0 %v17613_v35  ;;  %13074 = vmatprep.subr.bf16.mxu1 %v17175_v31  ;;  %v17621_v35 = vld [vmem:[#allocation67_spill] sm:$0xff]  ;;  %v17622_v39 = vld [vmem:[#allocation46_spill] sm:$0xff] }
 0xe47   :  { %13048 = vmatpush1.bf16.msra.mxu0 %v17614_v5  ;;  %13076 = vmatpush3.bf16.msra.mxu1 %v17615_v51  ;;  %v17623_v51 = vld [vmem:[#allocation12_spill] sm:$0xff] }
 0xe48   :  { %13050 = vmatprep.subr.bf16.mxu0 %v17616_v11  ;;  %13077 = vmatprep.subr.bf16.mxu1 %v17175_v31  ;;  %v17624_v11 = vld [vmem:[#allocation13_spill] sm:$0xff]  ;;  %v17625_v5 = vld [vmem:[#allocation28_spill] sm:$0xff] }
 0xe4b   :  { %13052 = vmatpush1.bf16.msra.mxu0 %v17617_v38  ;;  %13079 = vmatpush3.bf16.msra.mxu1 %v17618_v58  ;;  %v17626_v58 = vld [vmem:[#allocation14_spill] sm:$0xff]  ;;  %v17628_v38 = vld [vmem:[#allocation29_spill] sm:$0xff] }
 0xe4c   :  { %13054 = vmatprep.subr.bf16.mxu0 %v17619_v7  ;;  %13080 = vmatprep.subr.bf16.mxu1 %v17175_v31  ;;  %v17627_v7 = vld [vmem:[#allocation15_spill] sm:$0xff] }
 0xe4f   :  { %13056 = vmatpush1.bf16.msra.mxu0 %v17620_v25  ;;  %13082 = vmatpush3.bf16.msra.mxu1 %v17621_v35  ;;  %v17629_v35 = vld [vmem:[#allocation47_spill] sm:$0xff] }
 0xe50   :  { %13058 = vmatprep.subr.bf16.mxu0 %v17622_v39  ;;  %13083 = vmatprep.subr.bf16.mxu1 %v17175_v31  ;;  %v17630_v39 = vld [vmem:[#allocation31_spill] sm:$0xff] }
 0xe51   :  { %v6292_v25 = vmul.f32 %v17630_v39, %v17629_v35 }
 0xe53   :  { %13060 = vmatpush1.bf16.msra.mxu0 %v17623_v51  ;;  %13085 = vmatpush3.bf16.msra.mxu1 %v17624_v11  ;;  %v6293_v51 = vmul.f32 %v17631_v30, %v17629_v35  ;;  %v6295_v11 = vadd.f32 %v17632_v56, %v6292_v25  ;;  %v6294_v30 = vmul.f32 %v16125_v14, %v17629_v35 }
 0xe54   :  { %13062 = vmatprep.subr.bf16.mxu0 %v17625_v5  ;;  %13086 = vmatprep.subr.bf16.mxu1 %v17175_v31 }
 0xe55   :  { %v6296_v46 = vadd.f32 %v16122_v40, %v6293_v51  ;;  %v6297_v40 = vadd.f32 %v16132_v4, %v6294_v30 }
 0xe57   :  { %13064 = vmatpush1.bf16.msra.mxu0 %v17626_v58  ;;  %13088 = vmatpush3.bf16.msra.mxu1 %v17627_v7 }
 0xe58   :  { %13090 = vmatprep.subr.bf16.mxu0 %v17628_v38  ;;  %13121 = vmatprep.subr.bf16.mxu1 %v17175_v31 }
 0xecd   :  { %v6364_v27 = vpop.f32.mrb[48].mxu0  ;;  %v6435_v5 = vpop.f32.mrb[76].mxu1 }
 0xece   :  { %v6439_v19 = vadd.f32 %v6364_v27, %v6295_v11  ;;  %v6366_v58 = vpop.f32.mrb[49].mxu0  ;;  %v10398_v44 = vpop.f32.mrb[77].mxu1  ;;  %v6453_v56 = vadd.f32 %v16129_v59, %v6435_v5 }
 0xecf   :  { %v6440_v7 = vadd.f32 %v6366_v58, %v6296_v46 }
 0xed0   :  { %v8214_v1 = vmul.f32 -1.442695, %v6439_v19 }
 0xed1   :  { %v8215_v38 = vmul.f32 -1.442695, %v6440_v7 }
 0xed2   :  { %13843 = vpow2.f32 %v8214_v1 }
 0xed3   :  { %13845 = vpow2.f32 %v8215_v38 }
 0xedc   :  { %v13844_v24 = vpop.eup %13843 }
 0xedd   :  { %v6447_v63 = vadd.f32 1.0, %v13844_v24  ;;  %v13846_v39 = vpop.eup %13845 }
 0xede   :  { %v6448_v25 = vadd.f32 1.0, %v13846_v39 }
 0xedf   :  { %13847 = vrcp.f32 %v6447_v63 }
 0xee0   :  { %13849 = vrcp.f32 %v6448_v25 }
 0xee9   :  { %v13848_v52 = vpop.eup %13847 }
 0xeea   :  { %v6454_v11 = vmul.f32 %v13848_v52, %v6453_v56  ;;  %v13850_v27 = vpop.eup %13849 }
 0xeeb   :  { %v6457_v24 = vsub.f32 1.0, %v13850_v27  ;;  %v6459_v51 = vmul.f32 %v13850_v27, %v16272_v37  ;;  %v17634_v27 = vld [vmem:[#allocation36_spill] sm:$0xff] }
 0xeec   :  { %v6455_v44 = vadd.f32 %v6454_v11, %v6297_v40 }
 0xeed   :  { %v16411_v19 = vpop.f32.mrb[78].mxu1 }
 0xeee   :  { %13851 = vtanh.f32 %v6455_v44  ;;  %v10433_v1 = vpop.f32.mrb[79].mxu1  ;;  %v6599_v11 = vadd.f32 %v16337_v55, %v16411_v19  ;;  %v17638_v19 = vld [vmem:[#allocation59_spill] sm:$0xff] }
 0xeef   :  { %v17633_v1 = vld [vmem:[#allocation76_spill] sm:$0xff] }
 0xef8   :  { %v13852_v63 = vpop.eup %13851 }
 0xef9   :  { %v6458_v46 = vmul.f32 %v13852_v63, %v6457_v24  ;;  %v17635_v63 = vld [vmem:[#allocation50_spill] sm:$0xff] }
 0xefb   :  { %v16414_v14 = vadd.f32 %v6459_v51, %v6458_v46  ;;  %v17636_v46 = vld [vmem:[#allocation51_spill] sm:$0xff]  ;;  %v17637_v51 = vld [vmem:[#allocation52_spill] sm:$0xff] }
 0xefd   :  { %6836 = vmatmul.mubr.f32.vlgmr.msra.gmra.mrb[52].mxu0 %v16414_v14  ;;  %10502 = vmatmul.mubr.f32.vlgmr.msra.gmra.mrb[82].mxu1 %v16414_v14 }
 0xefe   :  { %13092 = vmatpush1.bf16.msra.mxu0 %v15628_v41  ;;  %13123 = vmatpush3.bf16.msra.mxu1 %v15630_v22 }
 0xeff   :  { %13094 = vmatprep.subr.bf16.mxu0 %v15634_v9  ;;  %13124 = vmatprep.subr.bf16.mxu1 %v17175_v31 }
 0xf00   :  { %6998 = vmatprep.mubr.f32.mxu0 %v17156_v47  ;;  %10536 = vmatprep.mubr.msk.f32.mxu1 %vm14064_vm0, %v17156_v47 }
 0xf02   :  { %13096 = vmatpush1.bf16.msra.mxu0 %v15640_v45  ;;  %13126 = vmatpush3.bf16.msra.mxu1 %v15642_v23 }
 0xf03   :  { %13098 = vmatprep.subr.bf16.mxu0 %v15646_v6  ;;  %13127 = vmatprep.subr.bf16.mxu1 %v17175_v31 }
 0xf06   :  { %13100 = vmatpush1.bf16.msra.mxu0 %v15653_v2  ;;  %13129 = vmatpush3.bf16.msra.mxu1 %v15655_v12 }
 0xf07   :  { %13102 = vmatprep.subr.bf16.mxu0 %v15659_v42  ;;  %13130 = vmatprep.subr.bf16.mxu1 %v17175_v31 }
 0xf0a   :  { %13104 = vmatpush1.bf16.msra.mxu0 %v15663_v49  ;;  %13132 = vmatpush3.bf16.msra.mxu1 %v17467_v26 }
 0xf0b   :  { %13106 = vmatprep.subr.bf16.mxu0 %v17468_v33  ;;  %13133 = vmatprep.subr.bf16.mxu1 %v17175_v31 }
 0xf0d   :  { %v6668_v59 = vpop.f32.mrb[50].mxu0  ;;  %v6739_v52 = vpop.f32.mrb[80].mxu1 }
 0xf0e   :  { %v13537_v4 = vadd.f32 %v16295_v62, %v6668_v59  ;;  %v6670_v37 = vpop.f32.mrb[51].mxu0  ;;  %v10468_v5 = vpop.f32.mrb[81].mxu1  ;;  %13108 = vmatpush1.bf16.msra.mxu0 %v17470_v10  ;;  %13135 = vmatpush3.bf16.msra.mxu1 %v17471_v15  ;;  %v6757_v56 = vadd.f32 %v16334_v0, %v6739_v52  ;;  %v17639_v59 = vld [vmem:[#allocation38_spill] sm:$0xff] }
 0xf0f   :  { %13110 = vmatprep.subr.bf16.mxu0 %v17508_v16  ;;  %13136 = vmatprep.subr.bf16.mxu1 %v17175_v31  ;;  %v13538_v7 = vadd.f32 %v16302_v57, %v6670_v37  ;;  %v17640_v52 = vld [vmem:[#allocation78_spill] sm:$0xff]  ;;  %v17641_v37 = vld [vmem:[#allocation79_spill] sm:$0xff]  ;;  %v17642_v5 = vld [vmem:[#allocation80_spill] sm:$0xff] }
 0xf10   :  { %v8216_v35 = vmul.f32 -1.442695, %v13537_v4 }
 0xf11   :  { %v8217_v38 = vmul.f32 -1.442695, %v13538_v7 }
 0xf12   :  { %13853 = vpow2.f32 %v8216_v35  ;;  %13112 = vmatpush1.bf16.msra.mxu0 %v17510_v8  ;;  %13138 = vmatpush3.bf16.msra.mxu1 %v17511_v34  ;;  %v17643_v35 = vld [vmem:[#allocation81_spill] sm:$0xff] }
 0xf13   :  { %13114 = vmatprep.subr.bf16.mxu0 %v17512_v17  ;;  %13139 = vmatprep.subr.bf16.mxu1 %v17175_v31  ;;  %13855 = vpow2.f32 %v8217_v38 }
 0xf16   :  { %13116 = vmatpush1.bf16.msra.mxu0 %v17513_v21  ;;  %13141 = vmatpush3.bf16.msra.mxu1 %v17514_v13 }
 0xf17   :  { %13118 = vmatprep.subr.bf16.mxu0 %v17515_v36  ;;  %13142 = vmatprep.subr.bf16.mxu1 %v17175_v31 }
 0xf1a   :  { %13120 = vmatpush1.bf16.msra.mxu0 %v17516_v48  ;;  %13144 = vmatpush3.bf16.msra.mxu1 %v17517_v20 }
 0xf1b   :  { %13146 = vmatprep.subr.bf16.mxu0 %v17518_v18  ;;  %13177 = vmatprep.subr.bf16.mxu1 %v17175_v31 }
 0xf1c   :  { %v13854_v58 = vpop.eup %13853 }
 0xf1d   :  { %v6751_v39 = vadd.f32 1.0, %v13854_v58  ;;  %6999 = vmatmul.mubr.f32.vlgmr.msra.gmra.mrb[54].mxu0 %v16414_v14  ;;  %10537 = vmatmul.mubr.f32.vlgmr.msra.gmra.mrb[84].mxu1 %v16414_v14  ;;  %v13856_v30 = vpop.eup %13855 }
 0xf1e   :  { %13148 = vmatpush1.bf16.msra.mxu0 %v17519_v53  ;;  %13179 = vmatpush3.bf16.msra.mxu1 %v17552_v43  ;;  %v6752_v25 = vadd.f32 1.0, %v13856_v30 }
 0xf1f   :  { %13857 = vrcp.f32 %v6751_v39  ;;  %13150 = vmatprep.subr.bf16.mxu0 %v17553_v54  ;;  %13180 = vmatprep.subr.bf16.mxu1 %v17175_v31  ;;  %v17644_v39 = vld [vmem:[#allocation60_spill] sm:$0xff] }
 0xf20   :  { %7139 = vmatprep.mubr.f32.mxu0 %v17156_v47  ;;  %10571 = vmatprep.mubr.msk.f32.mxu1 %vm14064_vm0, %v17156_v47  ;;  %13859 = vrcp.f32 %v6752_v25  ;;  %v17645_v25 = vld [vmem:[#allocation82_spill] sm:$0xff] }
 0xf22   :  { %13152 = vmatpush1.bf16.msra.mxu0 %v17554_v61  ;;  %13182 = vmatpush3.bf16.msra.mxu1 %v17555_v28 }
 0xf23   :  { %13154 = vmatprep.subr.bf16.mxu0 %v17524_v29  ;;  %13183 = vmatprep.subr.bf16.mxu1 %v17175_v31 }
 0xf26   :  { %13156 = vmatpush1.bf16.msra.mxu0 %v17525_v3  ;;  %13185 = vmatpush3.bf16.msra.mxu1 %v17526_v50 }
 0xf27   :  { %13158 = vmatprep.subr.bf16.mxu0 %v17490_v60  ;;  %13186 = vmatprep.subr.bf16.mxu1 %v17175_v31 }
 0xf29   :  { %v13858_v40 = vpop.eup %13857 }
 0xf2a   :  { %v6758_v44 = vmul.f32 %v13858_v40, %v6757_v56  ;;  %13160 = vmatpush1.bf16.msra.mxu0 %v17491_v32  ;;  %13188 = vmatpush3.bf16.msra.mxu1 %v17633_v1  ;;  %v13860_v4 = vpop.eup %13859  ;;  %v17646_v56 = vld [vmem:[#allocation83_spill] sm:$0xff] }
 0xf2b   :  { %13162 = vmatprep.subr.bf16.mxu0 %v17634_v27  ;;  %13189 = vmatprep.subr.bf16.mxu1 %v17175_v31  ;;  %v6761_v7 = vsub.f32 1.0, %v13860_v4  ;;  %v6763_v30 = vmul.f32 %v13860_v4, %v17644_v39  ;;  %v17652_v4 = vld [vmem:[#allocation55_spill] sm:$0xff]  ;;  %v17660_v39 = vld [vmem:[#allocation37_spill] sm:$0xff] }
 0xf2c   :  { %v6759_v24 = vadd.f32 %v6758_v44, %v6599_v11  ;;  %v17648_v11 = vld [vmem:[#allocation62_spill] sm:$0xff]  ;;  %v17649_v44 = vld [vmem:[#allocation43_spill] sm:$0xff] }
 0xf2e   :  { %13861 = vtanh.f32 %v6759_v24  ;;  %13164 = vmatpush1.bf16.msra.mxu0 %v17635_v63  ;;  %13191 = vmatpush3.bf16.msra.mxu1 %v17636_v46  ;;  %v17650_v24 = vld [vmem:[#allocation53_spill] sm:$0xff]  ;;  %v16553_v46 = vld [vmem:[#allocation6 + $0x58] sm:$0xff] }
 0xf2f   :  { %13166 = vmatprep.subr.bf16.mxu0 %v17637_v51  ;;  %13192 = vmatprep.subr.bf16.mxu1 %v17175_v31  ;;  %v16549_v51 = vld [vmem:[#allocation2 + $0x310] sm:$0xff] }
 0xf32   :  { %13168 = vmatpush1.bf16.msra.mxu0 %v17638_v19  ;;  %13194 = vmatpush3.bf16.msra.mxu1 %v17639_v59 }
 0xf33   :  { %13170 = vmatprep.subr.bf16.mxu0 %v17640_v52  ;;  %13195 = vmatprep.subr.bf16.mxu1 %v17175_v31 }
 0xf36   :  { %13172 = vmatpush1.bf16.msra.mxu0 %v17641_v37  ;;  %13197 = vmatpush3.bf16.msra.mxu1 %v17642_v5 }
 0xf37   :  { %13174 = vmatprep.subr.bf16.mxu0 %v17643_v35  ;;  %13198 = vmatprep.subr.bf16.mxu1 %v17175_v31 }
 0xf38   :  { %v13862_v38 = vpop.eup %13861 }
 0xf39   :  { %v6762_v58 = vmul.f32 %v13862_v38, %v6761_v7  ;;  %v17651_v7 = vld [vmem:[#allocation54_spill] sm:$0xff]  ;;  %v17653_v38 = vld [vmem:[#allocation56_spill] sm:$0xff] }
 0xf3a   :  { %13176 = vmatpush1.bf16.msra.mxu0 %v17645_v25  ;;  %13200 = vmatpush3.bf16.msra.mxu1 %v17646_v56  ;;  %v16546_v25 = vld [vmem:[#allocation6 + $0x48] sm:$0xff] }
 0xf3b   :  { %v16494_v40 = vadd.f32 %v6763_v30, %v6762_v58  ;;  %13202 = vmatprep.subr.bf16.mxu0 %v17648_v11  ;;  %13233 = vmatprep.subr.bf16.mxu1 %v17175_v31  ;;  %v17654_v58 = vld [vmem:[#allocation57_spill] sm:$0xff]  ;;  %v17655_v30 = vld [vmem:[#allocation58_spill] sm:$0xff]  ;;  %v17656_v11 = vld [vmem:[#allocation63_spill] sm:$0xff] }
 0xf3d   :  { %17647 = vst [vmem:[#allocation16_spill] sm:$0xff] %v16494_v40  ;;  %7140 = vmatmul.mubr.f32.vlgmr.msra.gmra.mrb[54].mxu0 %v16494_v40  ;;  %10572 = vmatmul.mubr.f32.vlgmr.msra.gmra.mrb[86].mxu1 %v16494_v40 }
 0xf3e   :  { %13204 = vmatpush1.bf16.msra.mxu0 %v17649_v44  ;;  %13235 = vmatpush3.bf16.msra.mxu1 %v17650_v24  ;;  %v17657_v44 = vld [vmem:[#allocation42_spill] sm:$0xff]  ;;  %v17658_v24 = vld [vmem:[#allocation44_spill] sm:$0xff] }
 0xf3f   :  { %13206 = vmatprep.subr.bf16.mxu0 %v17651_v7  ;;  %13236 = vmatprep.subr.bf16.mxu1 %v17175_v31  ;;  %v17659_v7 = vld [vmem:[#allocation41_spill] sm:$0xff] }
 0xf40   :  { %7308 = vmatprep.mubr.f32.mxu0 %v17156_v47  ;;  %10606 = vmatprep.mubr.msk.f32.mxu1 %vm14064_vm0, %v17156_v47 }
 0xf42   :  { %13208 = vmatpush1.bf16.msra.mxu0 %v17652_v4  ;;  %13238 = vmatpush3.bf16.msra.mxu1 %v17653_v38  ;;  %v17661_v4 = vld [vmem:[#allocation40_spill] sm:$0xff]  ;;  %v17662_v38 = vld [vmem:[#allocation39_spill] sm:$0xff] }
 0xf43   :  { %13210 = vmatprep.subr.bf16.mxu0 %v17654_v58  ;;  %13239 = vmatprep.subr.bf16.mxu1 %v17175_v31  ;;  %v17663_v58 = vld [vmem:[#allocation65_spill] sm:$0xff] }
 0xf46   :  { %13212 = vmatpush1.bf16.msra.mxu0 %v17655_v30  ;;  %13241 = vmatpush3.bf16.msra.mxu1 %v17656_v11  ;;  %v17664_v30 = vld [vmem:[#allocation66_spill] sm:$0xff]  ;;  %v17665_v11 = vld [vmem:[#allocation67_spill] sm:$0xff] }
 0xf47   :  { %13214 = vmatprep.subr.bf16.mxu0 %v17657_v44  ;;  %13242 = vmatprep.subr.bf16.mxu1 %v17175_v31  ;;  %v17666_v44 = vld [vmem:[#allocation46_spill] sm:$0xff] }
 0xf4a   :  { %13216 = vmatpush1.bf16.msra.mxu0 %v17658_v24  ;;  %13244 = vmatpush3.bf16.msra.mxu1 %v17659_v7  ;;  %v17667_v24 = vld [vmem:[#allocation12_spill] sm:$0xff] }
 0xf4b   :  { %13218 = vmatprep.subr.bf16.mxu0 %v17660_v39  ;;  %13245 = vmatprep.subr.bf16.mxu1 %v17175_v31  ;;  %v17668_v39 = vld [vmem:[#allocation13_spill] sm:$0xff]  ;;  %v17669_v7 = vld [vmem:[#allocation28_spill] sm:$0xff] }
 0xf4e   :  { %13220 = vmatpush1.bf16.msra.mxu0 %v17661_v4  ;;  %13247 = vmatpush3.bf16.msra.mxu1 %v17662_v38  ;;  %v17670_v4 = vld [vmem:[#allocation14_spill] sm:$0xff]  ;;  %v17671_v38 = vld [vmem:[#allocation15_spill] sm:$0xff] }
 0xf4f   :  { %13222 = vmatprep.subr.bf16.mxu0 %v17663_v58  ;;  %13248 = vmatprep.subr.bf16.mxu1 %v17175_v31  ;;  %v17672_v58 = vld [vmem:[#allocation29_spill] sm:$0xff] }
 0xf52   :  { %13224 = vmatpush1.bf16.msra.mxu0 %v17664_v30  ;;  %13250 = vmatpush3.bf16.msra.mxu1 %v17665_v11  ;;  %v16535_v30 = vld [vmem:[#allocation2 + $0x300] sm:$0xff]  ;;  %v17674_v11 = vld [vmem:[#allocation49_spill] sm:$0xff] }
 0xf53   :  { %13226 = vmatprep.subr.bf16.mxu0 %v17666_v44  ;;  %13251 = vmatprep.subr.bf16.mxu1 %v17175_v31  ;;  %17673 = vst [vmem:[#allocation17_spill] sm:$0xff] %v16535_v30  ;;  %v6765_v44 = vmul.f32 %v16535_v30, %v17674_v11 }
 0xf56   :  { %13228 = vmatpush1.bf16.msra.mxu0 %v17667_v24  ;;  %13253 = vmatpush3.bf16.msra.mxu1 %v17668_v39  ;;  %v16539_v24 = vld [vmem:[#allocation2 + $0x308] sm:$0xff] }
 0xf57   :  { %13230 = vmatprep.subr.bf16.mxu0 %v17669_v7  ;;  %13254 = vmatprep.subr.bf16.mxu1 %v17175_v31  ;;  %17675 = vst [vmem:[#allocation30_spill] sm:$0xff] %v16539_v24  ;;  %v6766_v39 = vmul.f32 %v16539_v24, %v17674_v11  ;;  %v16543_v7 = vld [vmem:[#allocation6 + $0x40] sm:$0xff] }
 0xf58   :  { %17676 = vst [vmem:[#allocation21_spill] sm:$0xff] %v16543_v7 }
 0xf5a   :  { %13232 = vmatpush1.bf16.msra.mxu0 %v17670_v4  ;;  %13256 = vmatpush3.bf16.msra.mxu1 %v17671_v38  ;;  %v6768_v4 = vadd.f32 %v16543_v7, %v6765_v44  ;;  %v6767_v44 = vmul.f32 %v16549_v51, %v17674_v11 }
 0xf5b   :  { %13258 = vmatprep.subr.bf16.mxu0 %v17672_v58  ;;  %13289 = vmatprep.subr.bf16.mxu1 %v17175_v31  ;;  %v6769_v58 = vadd.f32 %v16546_v25, %v6766_v39 }
 0xfd0   :  { %v6837_v56 = vpop.f32.mrb[52].mxu0  ;;  %v6908_v38 = vpop.f32.mrb[82].mxu1 }
 0xfd1   :  { %v6912_v40 = vadd.f32 %v6837_v56, %v6768_v4  ;;  %v6839_v35 = vpop.f32.mrb[53].mxu0  ;;  %v10503_v5 = vpop.f32.mrb[83].mxu1  ;;  %v6926_v56 = vadd.f32 %v16553_v46, %v6908_v38 }
 0xfd2   :  { %v6913_v37 = vadd.f32 %v6839_v35, %v6769_v58  ;;  %v16556_v35 = vld [vmem:[#allocation6 + $0x50] sm:$0xff] }
 0xfd3   :  { %v8218_v30 = vmul.f32 -1.442695, %v6912_v40 }
 0xfd4   :  { %v8219_v52 = vmul.f32 -1.442695, %v6913_v37  ;;  %v6770_v37 = vadd.f32 %v16556_v35, %v6767_v44 }
 0xfd5   :  { %13863 = vpow2.f32 %v8218_v30 }
 0xfd6   :  { %13865 = vpow2.f32 %v8219_v52 }
 0xfdf   :  { %v13864_v59 = vpop.eup %13863 }
 0xfe0   :  { %v6920_v24 = vadd.f32 1.0, %v13864_v59  ;;  %v13866_v19 = vpop.eup %13865 }
 0xfe1   :  { %v6921_v7 = vadd.f32 1.0, %v13866_v19 }
 0xfe2   :  { %13867 = vrcp.f32 %v6920_v24 }
 0xfe3   :  { %13869 = vrcp.f32 %v6921_v7 }
 0xfec   :  { %v13868_v5 = vpop.eup %13867 }
 0xfed   :  { %v6927_v52 = vmul.f32 %v13868_v5, %v6926_v56  ;;  %v13870_v30 = vpop.eup %13869 }
 0xfee   :  { %v6930_v24 = vsub.f32 1.0, %v13870_v30  ;;  %v6932_v39 = vmul.f32 %v13870_v30, %v16414_v14 }
 0xfef   :  { %v6928_v59 = vadd.f32 %v6927_v52, %v6770_v37 }
 0xff0   :  { %v16559_v40 = vpop.f32.mrb[84].mxu1 }
 0xff1   :  { %13871 = vtanh.f32 %v6928_v59  ;;  %v10538_v58 = vpop.f32.mrb[85].mxu1 }
 0xffb   :  { %v13872_v11 = vpop.eup %13871 }
 0xffc   :  { %v6931_v19 = vmul.f32 %v13872_v11, %v6930_v24  ;;  %v7072_v11 = vadd.f32 %v16337_v55, %v16559_v40  ;;  %v17679_v40 = vld [vmem:[#allocation59_spill] sm:$0xff] }
 0xffe   :  { %v16562_v4 = vadd.f32 %v6932_v39, %v6931_v19 }
0x1000   :  { %7309 = vmatmul.mubr.f32.vlgmr.msra.gmra.mrb[56].mxu0 %v16562_v4  ;;  %10607 = vmatmul.mubr.f32.vlgmr.msra.gmra.mrb[88].mxu1 %v16562_v4 }
0x1001   :  { %13260 = vmatpush1.bf16.msra.mxu0 %v15628_v41  ;;  %13291 = vmatpush3.bf16.msra.mxu1 %v15630_v22 }
0x1002   :  { %13262 = vmatprep.subr.bf16.mxu0 %v15634_v9  ;;  %13292 = vmatprep.subr.bf16.mxu1 %v17175_v31 }
0x1003   :  { %7471 = vmatprep.mubr.f32.mxu0 %v17156_v47  ;;  %10641 = vmatprep.mubr.msk.f32.mxu1 %vm14064_vm0, %v17156_v47 }
0x1005   :  { %13264 = vmatpush1.bf16.msra.mxu0 %v15640_v45  ;;  %13294 = vmatpush3.bf16.msra.mxu1 %v15642_v23 }
0x1006   :  { %13266 = vmatprep.subr.bf16.mxu0 %v15646_v6  ;;  %13295 = vmatprep.subr.bf16.mxu1 %v17175_v31 }
0x1009   :  { %13268 = vmatpush1.bf16.msra.mxu0 %v15653_v2  ;;  %13297 = vmatpush3.bf16.msra.mxu1 %v15655_v12 }
0x100a   :  { %13270 = vmatprep.subr.bf16.mxu0 %v15659_v42  ;;  %13298 = vmatprep.subr.bf16.mxu1 %v17175_v31 }
0x100d   :  { %13272 = vmatpush1.bf16.msra.mxu0 %v15663_v49  ;;  %13300 = vmatpush3.bf16.msra.mxu1 %v17467_v26 }
0x100e   :  { %13274 = vmatprep.subr.bf16.mxu0 %v17468_v33  ;;  %13301 = vmatprep.subr.bf16.mxu1 %v17175_v31 }
0x1010   :  { %v7141_v14 = vpop.f32.mrb[54].mxu0  ;;  %v7212_v7 = vpop.f32.mrb[86].mxu1 }
0x1011   :  { %v13539_v38 = vadd.f32 %v16295_v62, %v7141_v14  ;;  %v7143_v44 = vpop.f32.mrb[55].mxu0  ;;  %v10573_v56 = vpop.f32.mrb[87].mxu1  ;;  %13276 = vmatpush1.bf16.msra.mxu0 %v17470_v10  ;;  %13303 = vmatpush3.bf16.msra.mxu1 %v17471_v15  ;;  %v7230_v30 = vadd.f32 %v16334_v0, %v7212_v7  ;;  %v17677_v14 = vld [vmem:[#allocation51_spill] sm:$0xff]  ;;  %v17678_v7 = vld [vmem:[#allocation52_spill] sm:$0xff] }
0x1012   :  { %13278 = vmatprep.subr.bf16.mxu0 %v17508_v16  ;;  %13304 = vmatprep.subr.bf16.mxu1 %v17175_v31  ;;  %v13540_v37 = vadd.f32 %v16302_v57, %v7143_v44  ;;  %v17681_v44 = vld [vmem:[#allocation78_spill] sm:$0xff] }
0x1013   :  { %v8220_v5 = vmul.f32 -1.442695, %v13539_v38  ;;  %v17680_v38 = vld [vmem:[#allocation38_spill] sm:$0xff] }
0x1014   :  { %v8221_v62 = vmul.f32 -1.442695, %v13540_v37  ;;  %v17683_v37 = vld [vmem:[#allocation80_spill] sm:$0xff] }
0x1015   :  { %13873 = vpow2.f32 %v8220_v5  ;;  %13280 = vmatpush1.bf16.msra.mxu0 %v17510_v8  ;;  %13306 = vmatpush3.bf16.msra.mxu1 %v17511_v34  ;;  %v17682_v5 = vld [vmem:[#allocation79_spill] sm:$0xff] }
0x1016   :  { %13282 = vmatprep.subr.bf16.mxu0 %v17512_v17  ;;  %13307 = vmatprep.subr.bf16.mxu1 %v17175_v31  ;;  %13875 = vpow2.f32 %v8221_v62  ;;  %v17684_v62 = vld [vmem:[#allocation81_spill] sm:$0xff] }
0x1019   :  { %13284 = vmatpush1.bf16.msra.mxu0 %v17513_v21  ;;  %13309 = vmatpush3.bf16.msra.mxu1 %v17514_v13 }
0x101a   :  { %13286 = vmatprep.subr.bf16.mxu0 %v17515_v36  ;;  %13310 = vmatprep.subr.bf16.mxu1 %v17175_v31 }
0x101d   :  { %13288 = vmatpush1.bf16.msra.mxu0 %v17516_v48  ;;  %13312 = vmatpush3.bf16.msra.mxu1 %v17517_v20 }
0x101e   :  { %13314 = vmatprep.subr.bf16.mxu0 %v17518_v18  ;;  %13345 = vmatprep.subr.bf16.mxu1 %v17175_v31 }
0x101f   :  { %v13874_v57 = vpop.eup %13873 }
0x1020   :  { %v7224_v52 = vadd.f32 1.0, %v13874_v57  ;;  %7472 = vmatmul.mubr.f32.vlgmr.msra.gmra.mrb[58].mxu0 %v16562_v4  ;;  %10642 = vmatmul.mubr.f32.vlgmr.msra.gmra.mrb[90].mxu1 %v16562_v4  ;;  %v13876_v59 = vpop.eup %13875 }
0x1021   :  { %13316 = vmatpush1.bf16.msra.mxu0 %v17519_v53  ;;  %13347 = vmatpush3.bf16.msra.mxu1 %v17552_v43  ;;  %v7225_v58 = vadd.f32 1.0, %v13876_v59 }
0x1022   :  { %13877 = vrcp.f32 %v7224_v52  ;;  %13318 = vmatprep.subr.bf16.mxu0 %v17553_v54  ;;  %13348 = vmatprep.subr.bf16.mxu1 %v17175_v31 }
0x1023   :  { %7612 = vmatprep.mubr.f32.mxu0 %v17156_v47  ;;  %10676 = vmatprep.mubr.msk.f32.mxu1 %vm14064_vm0, %v17156_v47  ;;  %13879 = vrcp.f32 %v7225_v58  ;;  %v17685_v58 = vld [vmem:[#allocation16_spill] sm:$0xff] }
0x1025   :  { %13320 = vmatpush1.bf16.msra.mxu0 %v17554_v61  ;;  %13350 = vmatpush3.bf16.msra.mxu1 %v17555_v28 }
0x1026   :  { %13322 = vmatprep.subr.bf16.mxu0 %v17524_v29  ;;  %13351 = vmatprep.subr.bf16.mxu1 %v17175_v31 }
0x1029   :  { %13324 = vmatpush1.bf16.msra.mxu0 %v17525_v3  ;;  %13353 = vmatpush3.bf16.msra.mxu1 %v17526_v50 }
0x102a   :  { %13326 = vmatprep.subr.bf16.mxu0 %v17490_v60  ;;  %13354 = vmatprep.subr.bf16.mxu1 %v17175_v31 }
0x102c   :  { %v13878_v24 = vpop.eup %13877 }
0x102d   :  { %v7231_v19 = vmul.f32 %v13878_v24, %v7230_v30  ;;  %13328 = vmatpush1.bf16.msra.mxu0 %v17491_v32  ;;  %13356 = vmatpush3.bf16.msra.mxu1 %v17633_v1  ;;  %v13880_v56 = vpop.eup %13879  ;;  %v17686_v24 = vld [vmem:[#allocation82_spill] sm:$0xff] }
0x102e   :  { %13330 = vmatprep.subr.bf16.mxu0 %v17634_v27  ;;  %13357 = vmatprep.subr.bf16.mxu1 %v17175_v31  ;;  %v7234_v57 = vsub.f32 1.0, %v13880_v56  ;;  %v7236_v30 = vmul.f32 %v13880_v56, %v17685_v58 }
0x102f   :  { %v7232_v39 = vadd.f32 %v7231_v19, %v7072_v11  ;;  %v17687_v11 = vld [vmem:[#allocation83_spill] sm:$0xff] }
0x1031   :  { %13881 = vtanh.f32 %v7232_v39  ;;  %13332 = vmatpush1.bf16.msra.mxu0 %v17635_v63  ;;  %13359 = vmatpush3.bf16.msra.mxu1 %v17677_v14  ;;  %v17688_v39 = vld [vmem:[#allocation29_spill] sm:$0xff] }
0x1032   :  { %13334 = vmatprep.subr.bf16.mxu0 %v17678_v7  ;;  %13360 = vmatprep.subr.bf16.mxu1 %v17175_v31 }
0x1035   :  { %13336 = vmatpush1.bf16.msra.mxu0 %v17679_v40  ;;  %13362 = vmatpush3.bf16.msra.mxu1 %v17680_v38 }
0x1036   :  { %13338 = vmatprep.subr.bf16.mxu0 %v17681_v44  ;;  %13363 = vmatprep.subr.bf16.mxu1 %v17175_v31 }
0x1039   :  { %13340 = vmatpush1.bf16.msra.mxu0 %v17682_v5  ;;  %13365 = vmatpush3.bf16.msra.mxu1 %v17683_v37 }
0x103a   :  { %13342 = vmatprep.subr.bf16.mxu0 %v17684_v62  ;;  %13366 = vmatprep.subr.bf16.mxu1 %v17175_v31 }
0x103b   :  { %v13882_v52 = vpop.eup %13881 }
0x103c   :  { %v7235_v59 = vmul.f32 %v13882_v52, %v7234_v57 }
0x103d   :  { %13344 = vmatpush1.bf16.msra.mxu0 %v17686_v24  ;;  %13368 = vmatpush3.bf16.msra.mxu1 %v17687_v11 }
0x103e   :  { %v16642_v19 = vadd.f32 %v7236_v30, %v7235_v59  ;;  %13370 = vmatprep.subr.bf16.mxu0 %v17688_v39  ;;  %13401 = vmatprep.subr.bf16.mxu1 %v17175_v31 }
0x1040   :  { %7613 = vmatmul.mubr.f32.vlgmr.msra.gmra.mrb[58].mxu0 %v16642_v19  ;;  %10677 = vmatmul.mubr.f32.vlgmr.msra.gmra.mrb[92].mxu1 %v16642_v19 }
0x1041   :  { %13372 = vmatpush1.bf16.msra.mxu0 %v15628_v41  ;;  %13403 = vmatpush3.bf16.msra.mxu1 %v15630_v22  ;;  %v17689_v41 = vld [vmem:[#allocation61_spill] sm:$0xff] }
0x1042   :  { %13374 = vmatprep.subr.bf16.mxu0 %v15634_v9  ;;  %13404 = vmatprep.subr.bf16.mxu1 %v17175_v31  ;;  %v17690_v22 = vld [vmem:[#allocation17_spill] sm:$0xff] }
0x1043   :  { %7775 = vmatprep.mubr.f32.mxu0 %v17156_v47  ;;  %10711 = vmatprep.mubr.msk.f32.mxu1 %vm14064_vm0, %v17156_v47  ;;  %v7238_v9 = vmul.f32 %v17690_v22, %v17689_v41 }
0x1045   :  { %13376 = vmatpush1.bf16.msra.mxu0 %v15640_v45  ;;  %13406 = vmatpush3.bf16.msra.mxu1 %v15642_v23  ;;  %v17691_v45 = vld [vmem:[#allocation30_spill] sm:$0xff] }
0x1046   :  { %13378 = vmatprep.subr.bf16.mxu0 %v15646_v6  ;;  %13407 = vmatprep.subr.bf16.mxu1 %v17175_v31  ;;  %v7239_v23 = vmul.f32 %v17691_v45, %v17689_v41  ;;  %v17692_v6 = vld [vmem:[#allocation21_spill] sm:$0xff] }
0x1049   :  { %13380 = vmatpush1.bf16.msra.mxu0 %v15653_v2  ;;  %13409 = vmatpush3.bf16.msra.mxu1 %v15655_v12  ;;  %v7241_v2 = vadd.f32 %v17692_v6, %v7238_v9  ;;  %v8020_v6 = vld [vmem:[#allocation7 + $0x28] sm:$0xff] }
0x104a   :  { %13382 = vmatprep.subr.bf16.mxu0 %v15659_v42  ;;  %13410 = vmatprep.subr.bf16.mxu1 %v17175_v31 }
0x104d   :  { %13384 = vmatpush1.bf16.msra.mxu0 %v15663_v49  ;;  %13412 = vmatpush3.bf16.msra.mxu1 %v17467_v26  ;;  %v7242_v49 = vadd.f32 %v16546_v25, %v7239_v23 }
0x104e   :  { %13386 = vmatprep.subr.bf16.mxu0 %v17468_v33  ;;  %13413 = vmatprep.subr.bf16.mxu1 %v17175_v31 }
0x1051   :  { %13388 = vmatpush1.bf16.msra.mxu0 %v17470_v10  ;;  %13415 = vmatpush3.bf16.msra.mxu1 %v17471_v15 }
0x1052   :  { %13390 = vmatprep.subr.bf16.mxu0 %v17508_v16  ;;  %13416 = vmatprep.subr.bf16.mxu1 %v17175_v31 }
0x1055   :  { %13392 = vmatpush1.bf16.msra.mxu0 %v17510_v8  ;;  %13418 = vmatpush3.bf16.msra.mxu1 %v17511_v34 }
0x1056   :  { %13394 = vmatprep.subr.bf16.mxu0 %v17512_v17  ;;  %13419 = vmatprep.subr.bf16.mxu1 %v17175_v31 }
0x1059   :  { %13396 = vmatpush1.bf16.msra.mxu0 %v17513_v21  ;;  %13421 = vmatpush3.bf16.msra.mxu1 %v17514_v13  ;;  %v7240_v13 = vmul.f32 %v16549_v51, %v17689_v41 }
0x105a   :  { %13398 = vmatprep.subr.bf16.mxu0 %v17515_v36  ;;  %13422 = vmatprep.subr.bf16.mxu1 %v17175_v31 }
0x105d   :  { %13400 = vmatpush1.bf16.msra.mxu0 %v17516_v48  ;;  %13424 = vmatpush3.bf16.msra.mxu1 %v17517_v20 }
0x105e   :  { %13426 = vmatprep.subr.bf16.mxu0 %v17518_v18  ;;  %13457 = vmatprep.subr.bf16.mxu1 %v17175_v31  ;;  %v7243_v18 = vadd.f32 %v16556_v35, %v7240_v13  ;;  %v8029_v13 = vld [vmem:[#allocation7 + $0x70] sm:$0xff] }
0x10d3   :  { %v7310_v12 = vpop.f32.mrb[56].mxu0  ;;  %v7381_v42 = vpop.f32.mrb[88].mxu1 }
0x10d4   :  { %v7385_v26 = vadd.f32 %v7310_v12, %v7241_v2  ;;  %v7312_v33 = vpop.f32.mrb[57].mxu0  ;;  %v10608_v10 = vpop.f32.mrb[89].mxu1  ;;  %v7399_v48 = vadd.f32 %v16553_v46, %v7381_v42  ;;  %v8021_v12 = vld [vmem:[#allocation7 + $0x30] sm:$0xff]  ;;  %v8022_v42 = vld [vmem:[#allocation7 + $0x38] sm:$0xff] }
0x10d5   :  { %v7386_v15 = vadd.f32 %v7312_v33, %v7242_v49  ;;  %v13493_v49 = vpack.c.bf16 %v8022_v42, %v8021_v12  ;;  %v8024_v33 = vld [vmem:[#allocation7 + $0x48] sm:$0xff] }
0x10d6   :  { %v8222_v16 = vmul.f32 -1.442695, %v7385_v26  ;;  %v8023_v26 = vld [vmem:[#allocation7 + $0x40] sm:$0xff] }
0x10d7   :  { %v8223_v8 = vmul.f32 -1.442695, %v7386_v15  ;;  %v13497_v10 = vpack.c.bf16 %v8024_v33, %v8023_v26  ;;  %v8025_v15 = vld [vmem:[#allocation7 + $0x50] sm:$0xff] }
0x10d8   :  { %13883 = vpow2.f32 %v8222_v16  ;;  %v8026_v16 = vld [vmem:[#allocation7 + $0x58] sm:$0xff] }
0x10d9   :  { %13885 = vpow2.f32 %v8223_v8  ;;  %v13501_v8 = vpack.c.bf16 %v8026_v16, %v8025_v15 }
0x10e2   :  { %v13884_v34 = vpop.eup %13883 }
0x10e3   :  { %v7393_v17 = vadd.f32 1.0, %v13884_v34  ;;  %v13886_v21 = vpop.eup %13885  ;;  %v8027_v34 = vld [vmem:[#allocation7 + $0x60] sm:$0xff] }
0x10e4   :  { %v7394_v36 = vadd.f32 1.0, %v13886_v21 }
0x10e5   :  { %13887 = vrcp.f32 %v7393_v17  ;;  %v8028_v17 = vld [vmem:[#allocation7 + $0x68] sm:$0xff] }
0x10e6   :  { %13889 = vrcp.f32 %v7394_v36  ;;  %v13505_v21 = vpack.c.bf16 %v8028_v17, %v8027_v34  ;;  %v8030_v36 = vld [vmem:[#allocation7 + $0x78] sm:$0xff] }
0x10ef   :  { %v13888_v20 = vpop.eup %13887 }
0x10f0   :  { %v7400_v25 = vmul.f32 %v13888_v20, %v7399_v48  ;;  %v13890_v59 = vpop.eup %13889  ;;  %v13509_v48 = vpack.c.bf16 %v8030_v36, %v8029_v13  ;;  %v17694_v20 = vld [vmem:[#allocation19_spill] sm:$0xff] }
0x10f1   :  { %v7403_v30 = vsub.f32 1.0, %v13890_v59  ;;  %v7405_v9 = vmul.f32 %v13890_v59, %v16562_v4 }
0x10f2   :  { %v7401_v56 = vadd.f32 %v7400_v25, %v7243_v18  ;;  %v17695_v18 = vld [vmem:[#allocation75_spill] sm:$0xff]  ;;  %v17696_v25 = vld [vmem:[#allocation60_spill] sm:$0xff] }
0x10f3   :  { %v16693_v57 = vpop.f32.mrb[90].mxu1 }
0x10f4   :  { %13891 = vtanh.f32 %v7401_v56  ;;  %v10643_v52 = vpop.f32.mrb[91].mxu1 }
0x10fe   :  { %v13892_v39 = vpop.eup %13891 }
0x10ff   :  { %v7404_v22 = vmul.f32 %v13892_v39, %v7403_v30 }
0x1101   :  { %v7406_v51 = vadd.f32 %v7405_v9, %v7404_v22 }
0x1103   :  { %7776 = vmatmul.mubr.f32.vlgmr.msra.gmra.mrb[60].mxu0 %v7406_v51  ;;  %10712 = vmatmul.mubr.f32.vlgmr.msra.gmra.mrb[94].mxu1 %v7406_v51 }
0x1104   :  { %13428 = vmatpush1.bf16.msra.mxu0 %v17519_v53  ;;  %13459 = vmatpush3.bf16.msra.mxu1 %v17552_v43 }
0x1105   :  { %13430 = vmatprep.subr.bf16.mxu0 %v17553_v54  ;;  %13460 = vmatprep.subr.bf16.mxu1 %v17175_v31 }
0x1106   :  { %7916 = vmatprep.mubr.f32.mxu0 %v17156_v47  ;;  %10746 = vmatprep.mubr.msk.f32.mxu1 %vm14064_vm0, %v17156_v47 }
0x1108   :  { %13432 = vmatpush1.bf16.msra.mxu0 %v17554_v61  ;;  %13462 = vmatpush3.bf16.msra.mxu1 %v17555_v28  ;;  %v8015_v61 = vld [vmem:[#allocation7] sm:$0xff]  ;;  %v8016_v28 = vld [vmem:[#allocation7 + $0x8] sm:$0xff] }
0x1109   :  { %13434 = vmatprep.subr.bf16.mxu0 %v17524_v29  ;;  %13463 = vmatprep.subr.bf16.mxu1 %v17175_v31  ;;  %v16715_v29 = vld [vmem:[#allocation6 + $0x60] sm:$0xff] }
0x110c   :  { %13436 = vmatpush1.bf16.msra.mxu0 %v17525_v3  ;;  %13465 = vmatpush3.bf16.msra.mxu1 %v17526_v50 }
0x110d   :  { %13438 = vmatprep.subr.bf16.mxu0 %v17490_v60  ;;  %13466 = vmatprep.subr.bf16.mxu1 %v17175_v31  ;;  %v16722_v60 = vld [vmem:[#allocation6 + $0x68] sm:$0xff] }
0x1110   :  { %13440 = vmatpush1.bf16.msra.mxu0 %v17491_v32  ;;  %13468 = vmatpush3.bf16.msra.mxu1 %v17633_v1 }
0x1111   :  { %13442 = vmatprep.subr.bf16.mxu0 %v17634_v27  ;;  %13469 = vmatprep.subr.bf16.mxu1 %v17175_v31  ;;  %v13481_v27 = vpack.c.bf16 %v8016_v28, %v8015_v61 }
0x1113   :  { %v7614_v47 = vpop.f32.mrb[58].mxu0  ;;  %v7685_v53 = vpop.f32.mrb[92].mxu1 }
0x1114   :  { %v13541_v3 = vadd.f32 %v16715_v29, %v7614_v47  ;;  %v7616_v43 = vpop.f32.mrb[59].mxu0  ;;  %v10678_v50 = vpop.f32.mrb[93].mxu1  ;;  %13444 = vmatpush1.bf16.msra.mxu0 %v17635_v63  ;;  %13471 = vmatpush3.bf16.msra.mxu1 %v17677_v14  ;;  %v7703_v14 = vadd.f32 %v16334_v0, %v7685_v53  ;;  %v8019_v0 = vld [vmem:[#allocation7 + $0x20] sm:$0xff] }
0x1115   :  { %13446 = vmatprep.subr.bf16.mxu0 %v17678_v7  ;;  %13472 = vmatprep.subr.bf16.mxu1 %v17175_v31  ;;  %v13542_v54 = vadd.f32 %v16722_v60, %v7616_v43  ;;  %v13489_v2 = vpack.c.bf16 %v8020_v6, %v8019_v0  ;;  %v13955_v43 = vld [vmem:[#allocation6 + $0x78] sm:$0xff] }
0x1116   :  { %v8224_v32 = vmul.f32 -1.442695, %v13541_v3 }
0x1117   :  { %v8225_v1 = vmul.f32 -1.442695, %v13542_v54  ;;  %v13956_v54 = vld [vmem:[#allocation6 + $0x70] sm:$0xff] }
0x1118   :  { %13893 = vpow2.f32 %v8224_v32  ;;  %13448 = vmatpush1.bf16.msra.mxu0 %v17679_v40  ;;  %13474 = vmatpush3.bf16.msra.mxu1 %v17680_v38  ;;  %v7545_v40 = vadd.f32 %v16337_v55, %v16693_v57  ;;  %v17693_v55 = vld [vmem:[#allocation18_spill] sm:$0xff] }
0x1119   :  { %13450 = vmatprep.subr.bf16.mxu0 %v17681_v44  ;;  %13475 = vmatprep.subr.bf16.mxu1 %v17175_v31  ;;  %13895 = vpow2.f32 %v8225_v1 }
0x111c   :  { %13452 = vmatpush1.bf16.msra.mxu0 %v17682_v5  ;;  %13477 = vmatpush3.bf16.msra.mxu1 %v17683_v37 }
0x111d   :  { %13454 = vmatprep.subr.bf16.mxu0 %v17684_v62  ;;  %13478 = vmatprep.subr.bf16.mxu1 %v17175_v31  ;;  %v8017_v62 = vld [vmem:[#allocation7 + $0x10] sm:$0xff] }
0x1120   :  { %13456 = vmatpush1.bf16.msra.mxu0 %v17686_v24  ;;  %13480 = vmatpush3.bf16.msra.mxu1 %v17687_v11  ;;  %v8018_v24 = vld [vmem:[#allocation7 + $0x18] sm:$0xff] }
0x1121   :  { %13482 = vmatprep.subr.bf16.mxu0 %v13481_v27  ;;  %v13485_v23 = vpack.c.bf16 %v8018_v24, %v8017_v62 }
0x1122   :  { %v13894_v63 = vpop.eup %13893 }
0x1123   :  { %v7697_v46 = vadd.f32 1.0, %v13894_v63  ;;  %v13896_v35 = vpop.eup %13895 }
0x1124   :  { %v7698_v4 = vadd.f32 1.0, %v13896_v35 }
0x1125   :  { %13897 = vrcp.f32 %v7697_v46 }
0x1126   :  { %13899 = vrcp.f32 %v7698_v4 }
0x112f   :  { %v13898_v7 = vpop.eup %13897 }
0x1130   :  { %v7704_v38 = vmul.f32 %v13898_v7, %v7703_v14  ;;  %v13900_v44 = vpop.eup %13899 }
0x1131   :  { %v7707_v5 = vsub.f32 1.0, %v13900_v44  ;;  %v7709_v41 = vmul.f32 %v13900_v44, %v16642_v19 }
0x1132   :  { %v7705_v31 = vadd.f32 %v7704_v38, %v7545_v40 }
0x1134   :  { %13901 = vtanh.f32 %v7705_v31 }
0x113e   :  { %v13902_v37 = vpop.eup %13901 }
0x113f   :  { %v7708_v11 = vmul.f32 %v13902_v37, %v7707_v5 }
0x1141   :  { %v16739_v45 = vadd.f32 %v7709_v41, %v7708_v11 }
0x1143   :  { %7917 = vmatmul.mubr.f32.vlgmr.msra.gmra.mrb[60].mxu0 %v16739_v45  ;;  %10747 = vmatmul.mubr.f32.vlgmr.msra.gmra.mrb[96].mxu1 %v16739_v45 }
0x1144   :  { %13484 = vmatpush3.bf16.msra.mxu0 %v13481_v27  ;;  %10781 = vmatprep.mubr.f32.mxu0 %v17693_v55 }
0x1145   :  { %13486 = vmatprep.subr.bf16.mxu0 %v13485_v23 }
0x1148   :  { %13488 = vmatpush3.bf16.msra.mxu0 %v13485_v23 }
0x1149   :  { %13490 = vmatprep.subr.bf16.mxu0 %v13489_v2 }
0x114c   :  { %13492 = vmatpush3.bf16.msra.mxu0 %v13489_v2 }
0x114d   :  { %13494 = vmatprep.subr.bf16.mxu0 %v13493_v49 }
0x1150   :  { %13496 = vmatpush3.bf16.msra.mxu0 %v13493_v49 }
0x1151   :  { %13498 = vmatprep.subr.bf16.mxu0 %v13497_v10 }
0x1154   :  { %13500 = vmatpush3.bf16.msra.mxu0 %v13497_v10 }
0x1155   :  { %13502 = vmatprep.subr.bf16.mxu0 %v13501_v8 }
0x1158   :  { %13504 = vmatpush3.bf16.msra.mxu0 %v13501_v8 }
0x1159   :  { %13506 = vmatprep.subr.bf16.mxu0 %v13505_v21 }
0x115c   :  { %13508 = vmatpush3.bf16.msra.mxu0 %v13505_v21 }
0x115d   :  { %13510 = vmatprep.subr.bf16.mxu0 %v13509_v48 }
0x1160   :  { %13512 = vmatpush3.bf16.msra.mxu0 %v13509_v48 }
0x1163   :  { %10782 = vmatmul.mubr.f32.vlgmr.msra.gmra.mrb[62].mxu0 %v17694_v20 }
0x1164   :  { %10784 = vmatprep.mubr.f32.mxu0 %v17695_v18 }
0x1167   :  { %10785 = vmatmul.mubr.f32.gmra.mrb[64].mxu0 %v17696_v25 }
0x1168   :  { %10787 = vmatprep.mubr.f32.mxu0 %v17685_v58 }
0x116b   :  { %10788 = vmatmul.mubr.f32.gmra.mrb[66].mxu0 %v16642_v19 }
0x116c   :  { %10790 = vmatprep.mubr.f32.mxu0 %v16739_v45 }
0x11d6   :  { %v7848_v56 = vpop.f32.mrb[94].mxu1 }
0x11d7   :  { %v10713_v57 = vpop.f32.mrb[95].mxu1  ;;  %v7849_v61 = vadd.f32 %v13956_v54, %v7848_v56 }
0x1216   :  { %v7918_v52 = vpop.f32.mrb[60].mxu0  ;;  %v7989_v59 = vpop.f32.mrb[96].mxu1 }
0x1217   :  { %v13543_v30 = vadd.f32 %v16715_v29, %v7918_v52  ;;  %v7920_v39 = vpop.f32.mrb[61].mxu0  ;;  %v10748_v22 = vpop.f32.mrb[97].mxu1  ;;  %v8007_v50 = vadd.f32 %v13955_v43, %v7989_v59  ;;  %v8228_v29 = vld [vmem:[%s16785_s5] ss:$0 sm:$0xff] }
0x1218   :  { %v13544_v51 = vadd.f32 %v16722_v60, %v7920_v39 }
0x1219   :  { %v8226_v9 = vmul.f32 -1.442695, %v13543_v30 }
0x121a   :  { %v8227_v47 = vmul.f32 -1.442695, %v13544_v51 }
0x121b   :  { %13903 = vpow2.f32 %v8226_v9 }
0x121c   :  { %13905 = vpow2.f32 %v8227_v47 }
0x1225   :  { %v13904_v53 = vpop.eup %13903 }
0x1226   :  { %v8001_v58 = vadd.f32 1.0, %v13904_v53  ;;  %v13906_v19 = vpop.eup %13905 }
0x1227   :  { %v8002_v3 = vadd.f32 1.0, %v13906_v19 }
0x1228   :  { %13907 = vrcp.f32 %v8001_v58 }
0x1229   :  { %13909 = vrcp.f32 %v8002_v3 }
0x1232   :  { %v13908_v32 = vpop.eup %13907 }
0x1233   :  { %v8008_v28 = vmul.f32 %v13908_v32, %v8007_v50  ;;  %v13910_v40 = vpop.eup %13909 }
0x1234   :  { %v8011_v37 = vsub.f32 1.0, %v13910_v40  ;;  %v8013_v11 = vmul.f32 %v13910_v40, %v16739_v45 }
0x1235   :  { %v8009_v60 = vadd.f32 %v8008_v28, %v7849_v61 }
0x1236   :  { %v10783_v1 = vpop.f32.mrb[62].mxu0 }
0x1237   :  { %13911 = vtanh.f32 %v8009_v60  ;;  %v8110_v27 = vadd.f32 %v10783_v1, %v8228_v29  ;;  %v8104_v63 = vpop.f32.mrb[63].mxu0 }
0x1238   :  { %v8105_v46 = vadd.f32 %v8228_v29, %v8104_v63 }
0x1239   :  { %8144 = vst [vmem:[%s16786_s6 + $0x8] sm:$0xff] %v8110_v27 }
0x123a   :  { %8143 = vst [vmem:[%s16786_s6] sm:$0xff] %v8105_v46  ;;  %v10786_v35 = vpop.f32.mrb[64].mxu0 }
0x123b   :  { %v8120_v4 = vadd.f32 %v10786_v35, %v8228_v29  ;;  %v8114_v14 = vpop.f32.mrb[65].mxu0 }
0x123c   :  { %v8115_v7 = vadd.f32 %v8228_v29, %v8114_v14 }
0x123d   :  { %8146 = vst [vmem:[%s16786_s6 + $0x18] sm:$0xff] %v8120_v4 }
0x123e   :  { %8145 = vst [vmem:[%s16786_s6 + $0x10] sm:$0xff] %v8115_v7  ;;  %v10789_v38 = vpop.f32.mrb[66].mxu0 }
0x123f   :  { %v8130_v31 = vadd.f32 %v10789_v38, %v8228_v29  ;;  %v8124_v44 = vpop.f32.mrb[67].mxu0 }
0x1240   :  { %v8125_v5 = vadd.f32 %v8228_v29, %v8124_v44 }
0x1241   :  { %v13912_v62 = vpop.eup %13911  ;;  %8148 = vst [vmem:[%s16786_s6 + $0x28] sm:$0xff] %v8130_v31 }
0x1242   :  { %8147 = vst [vmem:[%s16786_s6 + $0x20] sm:$0xff] %v8125_v5  ;;  %v8012_v24 = vmul.f32 %v13912_v62, %v8011_v37 }
0x1244   :  { %v8014_v41 = vadd.f32 %v8013_v11, %v8012_v24 }
0x1246   :  { %10791 = vmatmul.mubr.f32.gmra.mrb[68].mxu0 %v8014_v41 }
0x1319   :  { %v10792_v23 = vpop.f32.mrb[68].mxu0 }
0x131a   :  { %v8140_v0 = vadd.f32 %v10792_v23, %v8228_v29  ;;  %v8134_v6 = vpop.f32.mrb[69].mxu0 }
0x131b   :  { %v8135_v55 = vadd.f32 %v8228_v29, %v8134_v6 }
0x131c   :  { %8150 = vst [vmem:[%s16786_s6 + $0x38] sm:$0xff] %v8140_v0 }
0x131d   :  { %8149 = vst [vmem:[%s16786_s6 + $0x30] sm:$0xff] %v8135_v55 }
0x131e   :  { %8161 = vsyncpa [#allocation3], 1 }
0x131f   :  { %8162 = vsyncpa [#allocation5], 1 }
0x1320   :  { %8163 = vsyncpa [#allocation8], 1 }

</bundles_post_ra>
